<compile_context>
chip_gen: v7x
topology: tpu7x:2x2x1
jax: 0.10.0
libtpu: 0.0.40
codegen_flags: <defaults>
</compile_context>

<pallas_src>
import jax
import jax.numpy as jnp
from jax import lax
from jax.experimental import pallas as pl
from jax.experimental.pallas import tpu as pltpu


# ----------------------------- in-kernel helpers -----------------------------

def _erf_approx(x):
    # Abramowitz & Stegun 7.1.26 rational approximation (max abs err ~1.5e-7).
    # TODO(synk): lax.erf has no guaranteed Mosaic lowering, so exact-GELU's erf
    # is approximated with basic VPU ops.  Full-precision divide (NOT the approx
    # EUP reciprocal) is required to stay inside the 1e-3 end-to-end tolerance.
    a1, a2, a3, a4, a5 = (0.254829592, -0.284496736, 1.421413741,
                          -1.453152027, 1.061405429)
    p = 0.3275911
    s = jnp.where(x >= 0.0, 1.0, -1.0)
    ax = jnp.abs(x)
    t = 1.0 / (1.0 + p * ax)
    poly = ((((a5 * t + a4) * t + a3) * t + a2) * t + a1) * t
    return s * (1.0 - poly * jnp.exp(-ax * ax))


def _gelu_exact(x):
    # PyTorch nn.GELU() default (erf-based) GELU.
    return 0.5 * x * (1.0 + _erf_approx(x * 0.7071067811865476))


# --------------------------------- kernel ------------------------------------

def _nova_kernel(xpad_ref,
                 w7_ref, b7_ref,
                 w1_ref, b1_ref, wr3_ref,
                 wp_ref, bp_ref,
                 o_ref, r1buf, out1buf):
    H, W, C = o_ref.shape
    HC = 8                       # row-chunk height -> 16-vreg accumulators
    NCH = H // HC
    RW = r1buf.shape[1]          # W + 16 (r1 stored at sublane offset 8)

    # ---- zero only the halo border of the r1 scratch (all full-tile stores) ----
    zrow = jnp.zeros((1, RW, C), jnp.float32)
    r1buf[0:1, :, :] = zrow
    r1buf[H + 1:H + 2, :, :] = zrow
    zband = jnp.zeros((H + 2, 8, C), jnp.float32)
    r1buf[:, 0:8, :] = zband
    r1buf[:, RW - 8:RW, :] = zband

    # ---- pass 1 (per row chunk): effective 7x7 dw conv -> 1x1 conv -> GELU ----
    def pass1(c, carry):
        r0 = pl.multiple_of(c * HC, HC)
        acc = None
        for dx in range(7):
            # One sublane-shifted slab per dx (28 vregs); the dy shifts are free
            # slices along the leading (layout-free) axis of the loaded value.
            slab = xpad_ref[pl.ds(r0, HC + 6), dx:dx + W, :]       # (HC+6, W, C)
            for dy in range(7):
                term = slab[dy:dy + HC] * w7_ref[dy * 7 + dx, :]
                acc = term if acc is None else acc + term
        out1 = acc + b7_ref[0, :]          # mix / denom / identity already folded
        out1buf[pl.ds(r0, HC), :, :] = out1

        r1 = jnp.dot(out1.reshape(HC * W, C), w1_ref[...],
                     preferred_element_type=jnp.float32) + b1_ref[0, :]
        r1 = _gelu_exact(r1).reshape(HC, W, C)
        # Tile-aligned store at sublane offset 8; halo columns 7 and 8+W stay zero.
        r1buf[pl.ds(r0 + 1, HC), 8:8 + W, :] = r1
        return carry

    lax.fori_loop(0, NCH, pass1, 0)

    # ---- pass 2 (per row chunk): residual 3x3 dw conv -> add -> projector 1x1 ----
    def pass2(c, carry):
        r0 = pl.multiple_of(c * HC, HC)
        res = None
        for dx in range(3):
            slab = r1buf[pl.ds(r0, HC + 2), 7 + dx:7 + dx + W, :]   # (HC+2, W, C)
            for dy in range(3):
                term = slab[dy:dy + HC] * wr3_ref[dy * 3 + dx, :]
                res = term if res is None else res + term
        out = out1buf[pl.ds(r0, HC), :, :] + res     # 3x3 bias folded into bp_ref
        proj = jnp.dot(out.reshape(HC * W, C), wp_ref[...],
                       preferred_element_type=jnp.float32) + bp_ref[0, :]
        o_ref[pl.ds(r0, HC), :, :] = proj.reshape(HC, W, C)
        return carry

    lax.fori_loop(0, NCH, pass2, 0)


# --------------------------------- wrapper -----------------------------------

def nova_op(x_nchw, params, *, interpret=False):
    B, C, H, W = x_nchw.shape
    assert H % 8 == 0 and W % 8 == 0, "kernel assumes H and W are multiples of 8"
    assert C % 128 == 0, "kernel assumes C is a multiple of 128 (lane-dense layout)"

    x = jnp.transpose(x_nchw, (0, 2, 3, 1)).astype(jnp.float32)     # NCHW -> NHWC
    WP = W + 8                                                      # W+6 halo, padded to a multiple of 8
    xpad = jnp.pad(x, ((0, 0), (3, 3), (3, WP - W - 3), (0, 0)))
    # TODO(synk): the halo pad and the NCHW<->NHWC transposes are extra XLA HBM
    # passes; an NHWC-native caller with in-kernel halo masking would remove them.

    # ---- fold 3x3/5x5/7x7 + scalars + 1/denom + identity into one 7x7 kernel ----
    w3 = params["weight3"][0].astype(jnp.float32)
    w5 = params["weight5"][0].astype(jnp.float32)
    w7 = params["weight7"][0].astype(jnp.float32)
    denom = w3 + w5 + w7 + 1e-6

    def dw2d(w):                       # (C, 1, k, k) -> (C, k, k)
        return w[:, 0].astype(jnp.float32)

    k3 = jnp.pad(dw2d(params["conv3_w"]), ((0, 0), (2, 2), (2, 2)))
    k5 = jnp.pad(dw2d(params["conv5_w"]), ((0, 0), (1, 1), (1, 1)))
    k7 = dw2d(params["conv7_w"])
    eff_w = (w3 * k3 + w5 * k5 + w7 * k7) / denom                   # (C, 7, 7)
    eff_w = eff_w.at[:, 3, 3].add(1.0)                              # + identity skip
    eff_b = (w3 * params["conv3_b"] + w5 * params["conv5_b"]
             + w7 * params["conv7_b"]) / denom                      # (C,)

    def dw_flat(w_ckk):                # (C, k, k) -> (k*k, C)
        Cc, k, _ = w_ckk.shape
        return jnp.transpose(w_ckk.reshape(Cc, k * k), (1, 0)).astype(jnp.float32)

    def b_row(b):                      # (C,) -> (1, C)
        return b.reshape(1, C).astype(jnp.float32)

    def pw(w):                         # (Cout, Cin, 1, 1) -> (Cin, Cout)
        return jnp.transpose(w[:, :, 0, 0], (1, 0)).astype(jnp.float32)

    wp_t = pw(params["proj_w"])
    # Fold the residual 3x3 bias through the projector: bp' = bp + brr @ Wp^T.
    bp_folded = (params["proj_b"].astype(jnp.float32)
                 + params["res2_b"].astype(jnp.float32) @ wp_t)

    operands = (
        xpad,
        dw_flat(eff_w), b_row(eff_b),                               # effective 7x7 dw
        pw(params["res1_w"]), b_row(params["res1_b"]),              # residual 1x1
        dw_flat(dw2d(params["res2_w"])),                            # residual 3x3 dw
        wp_t, b_row(bp_folded),                                     # projector 1x1
    )

    def full(shape):
        return pl.BlockSpec(shape, lambda b: (0,) * len(shape))

    in_specs = [
        pl.BlockSpec((None, H + 6, WP, C), lambda b: (b, 0, 0, 0)),  # padded x
        full((49, C)), full((1, C)),
        full((C, C)), full((1, C)),
        full((9, C)),
        full((C, C)), full((1, C)),
    ]

    out = pl.pallas_call(
        _nova_kernel,
        out_shape=jax.ShapeDtypeStruct((B, H, W, C), jnp.float32),
        grid=(B,),
        in_specs=in_specs,
        out_specs=pl.BlockSpec((None, H, W, C), lambda b: (b, 0, 0, 0)),
        scratch_shapes=[
            pltpu.VMEM((H + 2, W + 16, C), jnp.float32),   # r1 (padded, offset-8)
            pltpu.VMEM((H, W, C), jnp.float32),            # out1 (7x7 branch output)
        ],
        compiler_params=pltpu.CompilerParams(
            dimension_semantics=("parallel",),
            vmem_limit_bytes=32 * 1024 * 1024),
        interpret=interpret,
    )(*operands)
    return jnp.transpose(out, (0, 3, 1, 2))                          # NHWC -> NCHW


# ---------------------------- pure-JAX reference ------------------------------

def nova_ref(x, params):
    C = x.shape[1]
    P = jax.lax.Precision.HIGHEST

    def dwconv(h, w, b, pad):
        y = jax.lax.conv_general_dilated(
            h, w, (1, 1), [(pad, pad), (pad, pad)],
            dimension_numbers=("NCHW", "OIHW", "NCHW"),
            feature_group_count=C, precision=P)
        return y + b[None, :, None, None]

    def pwconv(h, w, b):
        y = jax.lax.conv_general_dilated(
            h, w, (1, 1), [(0, 0), (0, 0)],
            dimension_numbers=("NCHW", "OIHW", "NCHW"), precision=P)
        return y + b[None, :, None, None]

    out3 = dwconv(x, params["conv3_w"], params["conv3_b"], 1)
    out5 = dwconv(x, params["conv5_w"], params["conv5_b"], 2)
    out7 = dwconv(x, params["conv7_w"], params["conv7_b"], 3)
    w3, w5, w7 = params["weight3"], params["weight5"], params["weight7"]
    out = (w3 * out3 + w5 * out5 + w7 * out7) / (w3 + w5 + w7 + 1e-6)
    out = out + x
    r = pwconv(out, params["res1_w"], params["res1_b"])
    r = jax.nn.gelu(r, approximate=False)
    r = dwconv(r, params["res2_w"], params["res2_b"], 1)
    out = out + r
    return pwconv(out, params["proj_w"], params["proj_b"])


# ------------------------------- param init ----------------------------------

def init_params(key, C):
    ks = jax.random.split(key, 12)
    f = lambda k, shape: (0.1 * jax.random.normal(k, shape)).astype(jnp.float32)
    return {
        "conv3_w": f(ks[0], (C, 1, 3, 3)), "conv3_b": f(ks[1], (C,)),
        "conv5_w": f(ks[2], (C, 1, 5, 5)), "conv5_b": f(ks[3], (C,)),
        "conv7_w": f(ks[4], (C, 1, 7, 7)), "conv7_b": f(ks[5], (C,)),
        # nn.Parameter(torch.ones(1)) in the module; distinct values exercise the mix.
        "weight3": jnp.array([1.0], jnp.float32),
        "weight5": jnp.array([0.7], jnp.float32),
        "weight7": jnp.array([1.3], jnp.float32),
        "res1_w": f(ks[6], (C, C, 1, 1)), "res1_b": f(ks[7], (C,)),
        "res2_w": f(ks[8], (C, 1, 3, 3)), "res2_b": f(ks[9], (C,)),
        "proj_w": f(ks[10], (C, C, 1, 1)), "proj_b": f(ks[11], (C,)),
    }


if __name__ == "__main__":
    key = jax.random.PRNGKey(0)
    k_x, k_p = jax.random.split(key)
    # C=128 keeps the channel (lane) axis fully dense: unmasked vector stores and
    # 100% lane utilization for all elementwise work; the wrapper asserts this.
    B, C, H, W = 2, 128, 16, 16
    x = jax.random.normal(k_x, (B, C, H, W), jnp.float32)
    params = init_params(k_p, C)

    y = jax.block_until_ready(nova_op(x, params))

    y_ref = nova_ref(x, params)
    err = float(jnp.max(jnp.abs(y - y_ref)))
    assert y.shape == (B, C, H, W)
    assert err < 1e-3, f"max abs err {err}"
    print("KERNEL_OK")
</pallas_src>

<mosaic_0001>
module attributes {stable_mosaic.version = 11 : i64} {
  func.func @_nova_kernel(%arg0: i32, %arg1: memref<1x22x24x128xf32, #tpu.memory_space<vmem>>, %arg2: memref<49x128xf32, #tpu.memory_space<vmem>>, %arg3: memref<1x128xf32, #tpu.memory_space<vmem>>, %arg4: memref<128x128xf32, #tpu.memory_space<vmem>>, %arg5: memref<1x128xf32, #tpu.memory_space<vmem>>, %arg6: memref<9x128xf32, #tpu.memory_space<vmem>>, %arg7: memref<128x128xf32, #tpu.memory_space<vmem>>, %arg8: memref<1x128xf32, #tpu.memory_space<vmem>>, %arg9: memref<1x16x16x128xf32, #tpu.memory_space<vmem>>, %arg10: memref<18x32x128xf32, #tpu.memory_space<vmem>>, %arg11: memref<16x16x128xf32, #tpu.memory_space<vmem>>) attributes {dimension_semantics = [#tpu.dimension_semantics<parallel>], iteration_bounds = array<i64: 2>, scalar_prefetch = 0 : i64, scratch_operands = 2 : i64, tpu.core_type = #tpu.core_type<tc>, window_params = [{transform_indices = @transform_0, window_bounds = array<i64: 1, 22, 24, 128>}, {pipeline_mode = #tpu.pipeline_mode<synchronous>, transform_indices = @transform_1, window_bounds = array<i64: 49, 128>}, {pipeline_mode = #tpu.pipeline_mode<synchronous>, transform_indices = @transform_2, window_bounds = array<i64: 1, 128>}, {pipeline_mode = #tpu.pipeline_mode<synchronous>, transform_indices = @transform_3, window_bounds = array<i64: 128, 128>}, {pipeline_mode = #tpu.pipeline_mode<synchronous>, transform_indices = @transform_4, window_bounds = array<i64: 1, 128>}, {pipeline_mode = #tpu.pipeline_mode<synchronous>, transform_indices = @transform_5, window_bounds = array<i64: 9, 128>}, {pipeline_mode = #tpu.pipeline_mode<synchronous>, transform_indices = @transform_6, window_bounds = array<i64: 128, 128>}, {pipeline_mode = #tpu.pipeline_mode<synchronous>, transform_indices = @transform_7, window_bounds = array<i64: 1, 128>}, {transform_indices = @transform_8, window_bounds = array<i64: 1, 16, 16, 128>}]} {
    %cst = arith.constant 0.000000e+00 : f32
    %0 = vector.broadcast %cst : f32 to vector<1x32x128xf32>
    %c0 = arith.constant 0 : index
    %c0_0 = arith.constant 0 : index
    %c0_1 = arith.constant 0 : index
    %1 = vector.load %arg10[%c0, %c0_0, %c0_1] : memref<18x32x128xf32, #tpu.memory_space<vmem>>, vector<1x32x128xf32>
    tpu.vector_store %arg10[%c0, %c0_0, %c0_1], %0 {strides = array<i32>} : memref<18x32x128xf32, #tpu.memory_space<vmem>>, vector<1x32x128xf32>,
    %c17 = arith.constant 17 : index
    %c0_2 = arith.constant 0 : index
    %c0_3 = arith.constant 0 : index
    %2 = vector.load %arg10[%c17, %c0_2, %c0_3] : memref<18x32x128xf32, #tpu.memory_space<vmem>>, vector<1x32x128xf32>
    tpu.vector_store %arg10[%c17, %c0_2, %c0_3], %0 {strides = array<i32>} : memref<18x32x128xf32, #tpu.memory_space<vmem>>, vector<1x32x128xf32>,
    %cst_4 = arith.constant 0.000000e+00 : f32
    %3 = vector.broadcast %cst_4 : f32 to vector<18x8x128xf32>
    %c0_5 = arith.constant 0 : index
    %c0_6 = arith.constant 0 : index
    %c0_7 = arith.constant 0 : index
    %4 = vector.load %arg10[%c0_5, %c0_6, %c0_7] : memref<18x32x128xf32, #tpu.memory_space<vmem>>, vector<18x8x128xf32>
    tpu.vector_store %arg10[%c0_5, %c0_6, %c0_7], %3 {strides = array<i32>} : memref<18x32x128xf32, #tpu.memory_space<vmem>>, vector<18x8x128xf32>,
    %c0_8 = arith.constant 0 : index
    %c24 = arith.constant 24 : index
    %c0_9 = arith.constant 0 : index
    %5 = vector.load %arg10[%c0_8, %c24, %c0_9] : memref<18x32x128xf32, #tpu.memory_space<vmem>>, vector<18x8x128xf32>
    tpu.vector_store %arg10[%c0_8, %c24, %c0_9], %3 {strides = array<i32>} : memref<18x32x128xf32, #tpu.memory_space<vmem>>, vector<18x8x128xf32>,
    %c0_i32 = arith.constant 0 : i32
    %c2_i32 = arith.constant 2 : i32
    %6 = arith.addi %c0_i32, %c2_i32 : i32
    %c1_i32 = arith.constant 1 : i32
    scf.for %arg12 = %c0_i32 to %6 step %c1_i32  : i32 {
      %c8_i32 = arith.constant 8 : i32
      %8 = arith.muli %arg12, %c8_i32 : i32
      %9 = tpu.assume_multiple %8, 8 : i32
      %c0_15 = arith.constant 0 : index
      %10 = arith.index_cast %9 : i32 to index
      %c0_16 = arith.constant 0 : index
      %c0_17 = arith.constant 0 : index
      %11 = vector.load %arg1[%c0_15, %10, %c0_16, %c0_17] : memref<1x22x24x128xf32, #tpu.memory_space<vmem>>, vector<1x14x16x128xf32>
      %12 = vector.shape_cast %11 : vector<1x14x16x128xf32> to vector<14x16x128xf32>
      %13 = vector.extract_strided_slice %12 {offsets = [0, 0, 0], sizes = [8, 16, 128], strides = [1, 1, 1]} : vector<14x16x128xf32> to vector<8x16x128xf32>
      %c0_18 = arith.constant 0 : index
      %c0_19 = arith.constant 0 : index
      %14 = vector.load %arg2[%c0_18, %c0_19] : memref<49x128xf32, #tpu.memory_space<vmem>>, vector<1x128xf32>
      %15 = vector.shape_cast %14 : vector<1x128xf32> to vector<128xf32>
      %16 = vector.shape_cast %15 : vector<128xf32> to vector<1x1x128xf32>
      %17 = vector.broadcast %16 : vector<1x1x128xf32> to vector<8x16x128xf32>
      %18 = arith.mulf %13, %17 : vector<8x16x128xf32>
      %19 = vector.extract_strided_slice %12 {offsets = [1, 0, 0], sizes = [8, 16, 128], strides = [1, 1, 1]} : vector<14x16x128xf32> to vector<8x16x128xf32>
      %c7 = arith.constant 7 : index
      %c0_20 = arith.constant 0 : index
      %20 = vector.load %arg2[%c7, %c0_20] : memref<49x128xf32, #tpu.memory_space<vmem>>, vector<1x128xf32>
      %21 = vector.shape_cast %20 : vector<1x128xf32> to vector<128xf32>
      %22 = vector.shape_cast %21 : vector<128xf32> to vector<1x1x128xf32>
      %23 = vector.broadcast %22 : vector<1x1x128xf32> to vector<8x16x128xf32>
      %24 = arith.mulf %19, %23 : vector<8x16x128xf32>
      %25 = arith.addf %18, %24 : vector<8x16x128xf32>
      %26 = vector.extract_strided_slice %12 {offsets = [2, 0, 0], sizes = [8, 16, 128], strides = [1, 1, 1]} : vector<14x16x128xf32> to vector<8x16x128xf32>
      %c14 = arith.constant 14 : index
      %c0_21 = arith.constant 0 : index
      %27 = vector.load %arg2[%c14, %c0_21] : memref<49x128xf32, #tpu.memory_space<vmem>>, vector<1x128xf32>
      %28 = vector.shape_cast %27 : vector<1x128xf32> to vector<128xf32>
      %29 = vector.shape_cast %28 : vector<128xf32> to vector<1x1x128xf32>
      %30 = vector.broadcast %29 : vector<1x1x128xf32> to vector<8x16x128xf32>
      %31 = arith.mulf %26, %30 : vector<8x16x128xf32>
      %32 = arith.addf %25, %31 : vector<8x16x128xf32>
      %33 = vector.extract_strided_slice %12 {offsets = [3, 0, 0], sizes = [8, 16, 128], strides = [1, 1, 1]} : vector<14x16x128xf32> to vector<8x16x128xf32>
      %c21 = arith.constant 21 : index
      %c0_22 = arith.constant 0 : index
      %34 = vector.load %arg2[%c21, %c0_22] : memref<49x128xf32, #tpu.memory_space<vmem>>, vector<1x128xf32>
      %35 = vector.shape_cast %34 : vector<1x128xf32> to vector<128xf32>
      %36 = vector.shape_cast %35 : vector<128xf32> to vector<1x1x128xf32>
      %37 = vector.broadcast %36 : vector<1x1x128xf32> to vector<8x16x128xf32>
      %38 = arith.mulf %33, %37 : vector<8x16x128xf32>
      %39 = arith.addf %32, %38 : vector<8x16x128xf32>
      %40 = vector.extract_strided_slice %12 {offsets = [4, 0, 0], sizes = [8, 16, 128], strides = [1, 1, 1]} : vector<14x16x128xf32> to vector<8x16x128xf32>
      %c28 = arith.constant 28 : index
      %c0_23 = arith.constant 0 : index
      %41 = vector.load %arg2[%c28, %c0_23] : memref<49x128xf32, #tpu.memory_space<vmem>>, vector<1x128xf32>
      %42 = vector.shape_cast %41 : vector<1x128xf32> to vector<128xf32>
      %43 = vector.shape_cast %42 : vector<128xf32> to vector<1x1x128xf32>
      %44 = vector.broadcast %43 : vector<1x1x128xf32> to vector<8x16x128xf32>
      %45 = arith.mulf %40, %44 : vector<8x16x128xf32>
      %46 = arith.addf %39, %45 : vector<8x16x128xf32>
      %47 = vector.extract_strided_slice %12 {offsets = [5, 0, 0], sizes = [8, 16, 128], strides = [1, 1, 1]} : vector<14x16x128xf32> to vector<8x16x128xf32>
      %c35 = arith.constant 35 : index
      %c0_24 = arith.constant 0 : index
      %48 = vector.load %arg2[%c35, %c0_24] : memref<49x128xf32, #tpu.memory_space<vmem>>, vector<1x128xf32>
      %49 = vector.shape_cast %48 : vector<1x128xf32> to vector<128xf32>
      %50 = vector.shape_cast %49 : vector<128xf32> to vector<1x1x128xf32>
      %51 = vector.broadcast %50 : vector<1x1x128xf32> to vector<8x16x128xf32>
      %52 = arith.mulf %47, %51 : vector<8x16x128xf32>
      %53 = arith.addf %46, %52 : vector<8x16x128xf32>
      %54 = vector.extract_strided_slice %12 {offsets = [6, 0, 0], sizes = [8, 16, 128], strides = [1, 1, 1]} : vector<14x16x128xf32> to vector<8x16x128xf32>
      %c42 = arith.constant 42 : index
      %c0_25 = arith.constant 0 : index
      %55 = vector.load %arg2[%c42, %c0_25] : memref<49x128xf32, #tpu.memory_space<vmem>>, vector<1x128xf32>
      %56 = vector.shape_cast %55 : vector<1x128xf32> to vector<128xf32>
      %57 = vector.shape_cast %56 : vector<128xf32> to vector<1x1x128xf32>
      %58 = vector.broadcast %57 : vector<1x1x128xf32> to vector<8x16x128xf32>
      %59 = arith.mulf %54, %58 : vector<8x16x128xf32>
      %60 = arith.addf %53, %59 : vector<8x16x128xf32>
      %c0_26 = arith.constant 0 : index
      %61 = arith.index_cast %9 : i32 to index
      %c1 = arith.constant 1 : index
      %c0_27 = arith.constant 0 : index
      %62 = vector.load %arg1[%c0_26, %61, %c1, %c0_27] : memref<1x22x24x128xf32, #tpu.memory_space<vmem>>, vector<1x14x16x128xf32>
      %63 = vector.shape_cast %62 : vector<1x14x16x128xf32> to vector<14x16x128xf32>
      %64 = vector.extract_strided_slice %63 {offsets = [0, 0, 0], sizes = [8, 16, 128], strides = [1, 1, 1]} : vector<14x16x128xf32> to vector<8x16x128xf32>
      %c1_28 = arith.constant 1 : index
      %c0_29 = arith.constant 0 : index
      %65 = vector.load %arg2[%c1_28, %c0_29] : memref<49x128xf32, #tpu.memory_space<vmem>>, vector<1x128xf32>
      %66 = vector.shape_cast %65 : vector<1x128xf32> to vector<128xf32>
      %67 = vector.shape_cast %66 : vector<128xf32> to vector<1x1x128xf32>
      %68 = vector.broadcast %67 : vector<1x1x128xf32> to vector<8x16x128xf32>
      %69 = arith.mulf %64, %68 : vector<8x16x128xf32>
      %70 = arith.addf %60, %69 : vector<8x16x128xf32>
      %71 = vector.extract_strided_slice %63 {offsets = [1, 0, 0], sizes = [8, 16, 128], strides = [1, 1, 1]} : vector<14x16x128xf32> to vector<8x16x128xf32>
      %c8 = arith.constant 8 : index
      %c0_30 = arith.constant 0 : index
      %72 = vector.load %arg2[%c8, %c0_30] : memref<49x128xf32, #tpu.memory_space<vmem>>, vector<1x128xf32>
      %73 = vector.shape_cast %72 : vector<1x128xf32> to vector<128xf32>
      %74 = vector.shape_cast %73 : vector<128xf32> to vector<1x1x128xf32>
      %75 = vector.broadcast %74 : vector<1x1x128xf32> to vector<8x16x128xf32>
      %76 = arith.mulf %71, %75 : vector<8x16x128xf32>
      %77 = arith.addf %70, %76 : vector<8x16x128xf32>
      %78 = vector.extract_strided_slice %63 {offsets = [2, 0, 0], sizes = [8, 16, 128], strides = [1, 1, 1]} : vector<14x16x128xf32> to vector<8x16x128xf32>
      %c15 = arith.constant 15 : index
      %c0_31 = arith.constant 0 : index
      %79 = vector.load %arg2[%c15, %c0_31] : memref<49x128xf32, #tpu.memory_space<vmem>>, vector<1x128xf32>
      %80 = vector.shape_cast %79 : vector<1x128xf32> to vector<128xf32>
      %81 = vector.shape_cast %80 : vector<128xf32> to vector<1x1x128xf32>
      %82 = vector.broadcast %81 : vector<1x1x128xf32> to vector<8x16x128xf32>
      %83 = arith.mulf %78, %82 : vector<8x16x128xf32>
      %84 = arith.addf %77, %83 : vector<8x16x128xf32>
      %85 = vector.extract_strided_slice %63 {offsets = [3, 0, 0], sizes = [8, 16, 128], strides = [1, 1, 1]} : vector<14x16x128xf32> to vector<8x16x128xf32>
      %c22 = arith.constant 22 : index
      %c0_32 = arith.constant 0 : index
      %86 = vector.load %arg2[%c22, %c0_32] : memref<49x128xf32, #tpu.memory_space<vmem>>, vector<1x128xf32>
      %87 = vector.shape_cast %86 : vector<1x128xf32> to vector<128xf32>
      %88 = vector.shape_cast %87 : vector<128xf32> to vector<1x1x128xf32>
      %89 = vector.broadcast %88 : vector<1x1x128xf32> to vector<8x16x128xf32>
      %90 = arith.mulf %85, %89 : vector<8x16x128xf32>
      %91 = arith.addf %84, %90 : vector<8x16x128xf32>
      %92 = vector.extract_strided_slice %63 {offsets = [4, 0, 0], sizes = [8, 16, 128], strides = [1, 1, 1]} : vector<14x16x128xf32> to vector<8x16x128xf32>
      %c29 = arith.constant 29 : index
      %c0_33 = arith.constant 0 : index
      %93 = vector.load %arg2[%c29, %c0_33] : memref<49x128xf32, #tpu.memory_space<vmem>>, vector<1x128xf32>
      %94 = vector.shape_cast %93 : vector<1x128xf32> to vector<128xf32>
      %95 = vector.shape_cast %94 : vector<128xf32> to vector<1x1x128xf32>
      %96 = vector.broadcast %95 : vector<1x1x128xf32> to vector<8x16x128xf32>
      %97 = arith.mulf %92, %96 : vector<8x16x128xf32>
      %98 = arith.addf %91, %97 : vector<8x16x128xf32>
      %99 = vector.extract_strided_slice %63 {offsets = [5, 0, 0], sizes = [8, 16, 128], strides = [1, 1, 1]} : vector<14x16x128xf32> to vector<8x16x128xf32>
      %c36 = arith.constant 36 : index
      %c0_34 = arith.constant 0 : index
      %100 = vector.load %arg2[%c36, %c0_34] : memref<49x128xf32, #tpu.memory_space<vmem>>, vector<1x128xf32>
      %101 = vector.shape_cast %100 : vector<1x128xf32> to vector<128xf32>
      %102 = vector.shape_cast %101 : vector<128xf32> to vector<1x1x128xf32>
      %103 = vector.broadcast %102 : vector<1x1x128xf32> to vector<8x16x128xf32>
      %104 = arith.mulf %99, %103 : vector<8x16x128xf32>
      %105 = arith.addf %98, %104 : vector<8x16x128xf32>
      %106 = vector.extract_strided_slice %63 {offsets = [6, 0, 0], sizes = [8, 16, 128], strides = [1, 1, 1]} : vector<14x16x128xf32> to vector<8x16x128xf32>
      %c43 = arith.constant 43 : index
      %c0_35 = arith.constant 0 : index
      %107 = vector.load %arg2[%c43, %c0_35] : memref<49x128xf32, #tpu.memory_space<vmem>>, vector<1x128xf32>
      %108 = vector.shape_cast %107 : vector<1x128xf32> to vector<128xf32>
      %109 = vector.shape_cast %108 : vector<128xf32> to vector<1x1x128xf32>
      %110 = vector.broadcast %109 : vector<1x1x128xf32> to vector<8x16x128xf32>
      %111 = arith.mulf %106, %110 : vector<8x16x128xf32>
      %112 = arith.addf %105, %111 : vector<8x16x128xf32>
      %c0_36 = arith.constant 0 : index
      %113 = arith.index_cast %9 : i32 to index
      %c2 = arith.constant 2 : index
      %c0_37 = arith.constant 0 : index
      %114 = vector.load %arg1[%c0_36, %113, %c2, %c0_37] : memref<1x22x24x128xf32, #tpu.memory_space<vmem>>, vector<1x14x16x128xf32>
      %115 = vector.shape_cast %114 : vector<1x14x16x128xf32> to vector<14x16x128xf32>
      %116 = vector.extract_strided_slice %115 {offsets = [0, 0, 0], sizes = [8, 16, 128], strides = [1, 1, 1]} : vector<14x16x128xf32> to vector<8x16x128xf32>
      %c2_38 = arith.constant 2 : index
      %c0_39 = arith.constant 0 : index
      %117 = vector.load %arg2[%c2_38, %c0_39] : memref<49x128xf32, #tpu.memory_space<vmem>>, vector<1x128xf32>
      %118 = vector.shape_cast %117 : vector<1x128xf32> to vector<128xf32>
      %119 = vector.shape_cast %118 : vector<128xf32> to vector<1x1x128xf32>
      %120 = vector.broadcast %119 : vector<1x1x128xf32> to vector<8x16x128xf32>
      %121 = arith.mulf %116, %120 : vector<8x16x128xf32>
      %122 = arith.addf %112, %121 : vector<8x16x128xf32>
      %123 = vector.extract_strided_slice %115 {offsets = [1, 0, 0], sizes = [8, 16, 128], strides = [1, 1, 1]} : vector<14x16x128xf32> to vector<8x16x128xf32>
      %c9 = arith.constant 9 : index
      %c0_40 = arith.constant 0 : index
      %124 = vector.load %arg2[%c9, %c0_40] : memref<49x128xf32, #tpu.memory_space<vmem>>, vector<1x128xf32>
      %125 = vector.shape_cast %124 : vector<1x128xf32> to vector<128xf32>
      %126 = vector.shape_cast %125 : vector<128xf32> to vector<1x1x128xf32>
      %127 = vector.broadcast %126 : vector<1x1x128xf32> to vector<8x16x128xf32>
      %128 = arith.mulf %123, %127 : vector<8x16x128xf32>
      %129 = arith.addf %122, %128 : vector<8x16x128xf32>
      %130 = vector.extract_strided_slice %115 {offsets = [2, 0, 0], sizes = [8, 16, 128], strides = [1, 1, 1]} : vector<14x16x128xf32> to vector<8x16x128xf32>
      %c16 = arith.constant 16 : index
      %c0_41 = arith.constant 0 : index
      %131 = vector.load %arg2[%c16, %c0_41] : memref<49x128xf32, #tpu.memory_space<vmem>>, vector<1x128xf32>
      %132 = vector.shape_cast %131 : vector<1x128xf32> to vector<128xf32>
      %133 = vector.shape_cast %132 : vector<128xf32> to vector<1x1x128xf32>
      %134 = vector.broadcast %133 : vector<1x1x128xf32> to vector<8x16x128xf32>
      %135 = arith.mulf %130, %134 : vector<8x16x128xf32>
      %136 = arith.addf %129, %135 : vector<8x16x128xf32>
      %137 = vector.extract_strided_slice %115 {offsets = [3, 0, 0], sizes = [8, 16, 128], strides = [1, 1, 1]} : vector<14x16x128xf32> to vector<8x16x128xf32>
      %c23 = arith.constant 23 : index
      %c0_42 = arith.constant 0 : index
      %138 = vector.load %arg2[%c23, %c0_42] : memref<49x128xf32, #tpu.memory_space<vmem>>, vector<1x128xf32>
      %139 = vector.shape_cast %138 : vector<1x128xf32> to vector<128xf32>
      %140 = vector.shape_cast %139 : vector<128xf32> to vector<1x1x128xf32>
      %141 = vector.broadcast %140 : vector<1x1x128xf32> to vector<8x16x128xf32>
      %142 = arith.mulf %137, %141 : vector<8x16x128xf32>
      %143 = arith.addf %136, %142 : vector<8x16x128xf32>
      %144 = vector.extract_strided_slice %115 {offsets = [4, 0, 0], sizes = [8, 16, 128], strides = [1, 1, 1]} : vector<14x16x128xf32> to vector<8x16x128xf32>
      %c30 = arith.constant 30 : index
      %c0_43 = arith.constant 0 : index
      %145 = vector.load %arg2[%c30, %c0_43] : memref<49x128xf32, #tpu.memory_space<vmem>>, vector<1x128xf32>
      %146 = vector.shape_cast %145 : vector<1x128xf32> to vector<128xf32>
      %147 = vector.shape_cast %146 : vector<128xf32> to vector<1x1x128xf32>
      %148 = vector.broadcast %147 : vector<1x1x128xf32> to vector<8x16x128xf32>
      %149 = arith.mulf %144, %148 : vector<8x16x128xf32>
      %150 = arith.addf %143, %149 : vector<8x16x128xf32>
      %151 = vector.extract_strided_slice %115 {offsets = [5, 0, 0], sizes = [8, 16, 128], strides = [1, 1, 1]} : vector<14x16x128xf32> to vector<8x16x128xf32>
      %c37 = arith.constant 37 : index
      %c0_44 = arith.constant 0 : index
      %152 = vector.load %arg2[%c37, %c0_44] : memref<49x128xf32, #tpu.memory_space<vmem>>, vector<1x128xf32>
      %153 = vector.shape_cast %152 : vector<1x128xf32> to vector<128xf32>
      %154 = vector.shape_cast %153 : vector<128xf32> to vector<1x1x128xf32>
      %155 = vector.broadcast %154 : vector<1x1x128xf32> to vector<8x16x128xf32>
      %156 = arith.mulf %151, %155 : vector<8x16x128xf32>
      %157 = arith.addf %150, %156 : vector<8x16x128xf32>
      %158 = vector.extract_strided_slice %115 {offsets = [6, 0, 0], sizes = [8, 16, 128], strides = [1, 1, 1]} : vector<14x16x128xf32> to vector<8x16x128xf32>
      %c44 = arith.constant 44 : index
      %c0_45 = arith.constant 0 : index
      %159 = vector.load %arg2[%c44, %c0_45] : memref<49x128xf32, #tpu.memory_space<vmem>>, vector<1x128xf32>
      %160 = vector.shape_cast %159 : vector<1x128xf32> to vector<128xf32>
      %161 = vector.shape_cast %160 : vector<128xf32> to vector<1x1x128xf32>
      %162 = vector.broadcast %161 : vector<1x1x128xf32> to vector<8x16x128xf32>
      %163 = arith.mulf %158, %162 : vector<8x16x128xf32>
      %164 = arith.addf %157, %163 : vector<8x16x128xf32>
      %c0_46 = arith.constant 0 : index
      %165 = arith.index_cast %9 : i32 to index
      %c3 = arith.constant 3 : index
      %c0_47 = arith.constant 0 : index
      %166 = vector.load %arg1[%c0_46, %165, %c3, %c0_47] : memref<1x22x24x128xf32, #tpu.memory_space<vmem>>, vector<1x14x16x128xf32>
      %167 = vector.shape_cast %166 : vector<1x14x16x128xf32> to vector<14x16x128xf32>
      %168 = vector.extract_strided_slice %167 {offsets = [0, 0, 0], sizes = [8, 16, 128], strides = [1, 1, 1]} : vector<14x16x128xf32> to vector<8x16x128xf32>
      %c3_48 = arith.constant 3 : index
      %c0_49 = arith.constant 0 : index
      %169 = vector.load %arg2[%c3_48, %c0_49] : memref<49x128xf32, #tpu.memory_space<vmem>>, vector<1x128xf32>
      %170 = vector.shape_cast %169 : vector<1x128xf32> to vector<128xf32>
      %171 = vector.shape_cast %170 : vector<128xf32> to vector<1x1x128xf32>
      %172 = vector.broadcast %171 : vector<1x1x128xf32> to vector<8x16x128xf32>
      %173 = arith.mulf %168, %172 : vector<8x16x128xf32>
      %174 = arith.addf %164, %173 : vector<8x16x128xf32>
      %175 = vector.extract_strided_slice %167 {offsets = [1, 0, 0], sizes = [8, 16, 128], strides = [1, 1, 1]} : vector<14x16x128xf32> to vector<8x16x128xf32>
      %c10 = arith.constant 10 : index
      %c0_50 = arith.constant 0 : index
      %176 = vector.load %arg2[%c10, %c0_50] : memref<49x128xf32, #tpu.memory_space<vmem>>, vector<1x128xf32>
      %177 = vector.shape_cast %176 : vector<1x128xf32> to vector<128xf32>
      %178 = vector.shape_cast %177 : vector<128xf32> to vector<1x1x128xf32>
      %179 = vector.broadcast %178 : vector<1x1x128xf32> to vector<8x16x128xf32>
      %180 = arith.mulf %175, %179 : vector<8x16x128xf32>
      %181 = arith.addf %174, %180 : vector<8x16x128xf32>
      %182 = vector.extract_strided_slice %167 {offsets = [2, 0, 0], sizes = [8, 16, 128], strides = [1, 1, 1]} : vector<14x16x128xf32> to vector<8x16x128xf32>
      %c17_51 = arith.constant 17 : index
      %c0_52 = arith.constant 0 : index
      %183 = vector.load %arg2[%c17_51, %c0_52] : memref<49x128xf32, #tpu.memory_space<vmem>>, vector<1x128xf32>
      %184 = vector.shape_cast %183 : vector<1x128xf32> to vector<128xf32>
      %185 = vector.shape_cast %184 : vector<128xf32> to vector<1x1x128xf32>
      %186 = vector.broadcast %185 : vector<1x1x128xf32> to vector<8x16x128xf32>
      %187 = arith.mulf %182, %186 : vector<8x16x128xf32>
      %188 = arith.addf %181, %187 : vector<8x16x128xf32>
      %189 = vector.extract_strided_slice %167 {offsets = [3, 0, 0], sizes = [8, 16, 128], strides = [1, 1, 1]} : vector<14x16x128xf32> to vector<8x16x128xf32>
      %c24_53 = arith.constant 24 : index
      %c0_54 = arith.constant 0 : index
      %190 = vector.load %arg2[%c24_53, %c0_54] : memref<49x128xf32, #tpu.memory_space<vmem>>, vector<1x128xf32>
      %191 = vector.shape_cast %190 : vector<1x128xf32> to vector<128xf32>
      %192 = vector.shape_cast %191 : vector<128xf32> to vector<1x1x128xf32>
      %193 = vector.broadcast %192 : vector<1x1x128xf32> to vector<8x16x128xf32>
      %194 = arith.mulf %189, %193 : vector<8x16x128xf32>
      %195 = arith.addf %188, %194 : vector<8x16x128xf32>
      %196 = vector.extract_strided_slice %167 {offsets = [4, 0, 0], sizes = [8, 16, 128], strides = [1, 1, 1]} : vector<14x16x128xf32> to vector<8x16x128xf32>
      %c31 = arith.constant 31 : index
      %c0_55 = arith.constant 0 : index
      %197 = vector.load %arg2[%c31, %c0_55] : memref<49x128xf32, #tpu.memory_space<vmem>>, vector<1x128xf32>
      %198 = vector.shape_cast %197 : vector<1x128xf32> to vector<128xf32>
      %199 = vector.shape_cast %198 : vector<128xf32> to vector<1x1x128xf32>
      %200 = vector.broadcast %199 : vector<1x1x128xf32> to vector<8x16x128xf32>
      %201 = arith.mulf %196, %200 : vector<8x16x128xf32>
      %202 = arith.addf %195, %201 : vector<8x16x128xf32>
      %203 = vector.extract_strided_slice %167 {offsets = [5, 0, 0], sizes = [8, 16, 128], strides = [1, 1, 1]} : vector<14x16x128xf32> to vector<8x16x128xf32>
      %c38 = arith.constant 38 : index
      %c0_56 = arith.constant 0 : index
      %204 = vector.load %arg2[%c38, %c0_56] : memref<49x128xf32, #tpu.memory_space<vmem>>, vector<1x128xf32>
      %205 = vector.shape_cast %204 : vector<1x128xf32> to vector<128xf32>
      %206 = vector.shape_cast %205 : vector<128xf32> to vector<1x1x128xf32>
      %207 = vector.broadcast %206 : vector<1x1x128xf32> to vector<8x16x128xf32>
      %208 = arith.mulf %203, %207 : vector<8x16x128xf32>
      %209 = arith.addf %202, %208 : vector<8x16x128xf32>
      %210 = vector.extract_strided_slice %167 {offsets = [6, 0, 0], sizes = [8, 16, 128], strides = [1, 1, 1]} : vector<14x16x128xf32> to vector<8x16x128xf32>
      %c45 = arith.constant 45 : index
      %c0_57 = arith.constant 0 : index
      %211 = vector.load %arg2[%c45, %c0_57] : memref<49x128xf32, #tpu.memory_space<vmem>>, vector<1x128xf32>
      %212 = vector.shape_cast %211 : vector<1x128xf32> to vector<128xf32>
      %213 = vector.shape_cast %212 : vector<128xf32> to vector<1x1x128xf32>
      %214 = vector.broadcast %213 : vector<1x1x128xf32> to vector<8x16x128xf32>
      %215 = arith.mulf %210, %214 : vector<8x16x128xf32>
      %216 = arith.addf %209, %215 : vector<8x16x128xf32>
      %c0_58 = arith.constant 0 : index
      %217 = arith.index_cast %9 : i32 to index
      %c4 = arith.constant 4 : index
      %c0_59 = arith.constant 0 : index
      %218 = vector.load %arg1[%c0_58, %217, %c4, %c0_59] : memref<1x22x24x128xf32, #tpu.memory_space<vmem>>, vector<1x14x16x128xf32>
      %219 = vector.shape_cast %218 : vector<1x14x16x128xf32> to vector<14x16x128xf32>
      %220 = vector.extract_strided_slice %219 {offsets = [0, 0, 0], sizes = [8, 16, 128], strides = [1, 1, 1]} : vector<14x16x128xf32> to vector<8x16x128xf32>
      %c4_60 = arith.constant 4 : index
      %c0_61 = arith.constant 0 : index
      %221 = vector.load %arg2[%c4_60, %c0_61] : memref<49x128xf32, #tpu.memory_space<vmem>>, vector<1x128xf32>
      %222 = vector.shape_cast %221 : vector<1x128xf32> to vector<128xf32>
      %223 = vector.shape_cast %222 : vector<128xf32> to vector<1x1x128xf32>
      %224 = vector.broadcast %223 : vector<1x1x128xf32> to vector<8x16x128xf32>
      %225 = arith.mulf %220, %224 : vector<8x16x128xf32>
      %226 = arith.addf %216, %225 : vector<8x16x128xf32>
      %227 = vector.extract_strided_slice %219 {offsets = [1, 0, 0], sizes = [8, 16, 128], strides = [1, 1, 1]} : vector<14x16x128xf32> to vector<8x16x128xf32>
      %c11 = arith.constant 11 : index
      %c0_62 = arith.constant 0 : index
      %228 = vector.load %arg2[%c11, %c0_62] : memref<49x128xf32, #tpu.memory_space<vmem>>, vector<1x128xf32>
      %229 = vector.shape_cast %228 : vector<1x128xf32> to vector<128xf32>
      %230 = vector.shape_cast %229 : vector<128xf32> to vector<1x1x128xf32>
      %231 = vector.broadcast %230 : vector<1x1x128xf32> to vector<8x16x128xf32>
      %232 = arith.mulf %227, %231 : vector<8x16x128xf32>
      %233 = arith.addf %226, %232 : vector<8x16x128xf32>
      %234 = vector.extract_strided_slice %219 {offsets = [2, 0, 0], sizes = [8, 16, 128], strides = [1, 1, 1]} : vector<14x16x128xf32> to vector<8x16x128xf32>
      %c18 = arith.constant 18 : index
      %c0_63 = arith.constant 0 : index
      %235 = vector.load %arg2[%c18, %c0_63] : memref<49x128xf32, #tpu.memory_space<vmem>>, vector<1x128xf32>
      %236 = vector.shape_cast %235 : vector<1x128xf32> to vector<128xf32>
      %237 = vector.shape_cast %236 : vector<128xf32> to vector<1x1x128xf32>
      %238 = vector.broadcast %237 : vector<1x1x128xf32> to vector<8x16x128xf32>
      %239 = arith.mulf %234, %238 : vector<8x16x128xf32>
      %240 = arith.addf %233, %239 : vector<8x16x128xf32>
      %241 = vector.extract_strided_slice %219 {offsets = [3, 0, 0], sizes = [8, 16, 128], strides = [1, 1, 1]} : vector<14x16x128xf32> to vector<8x16x128xf32>
      %c25 = arith.constant 25 : index
      %c0_64 = arith.constant 0 : index
      %242 = vector.load %arg2[%c25, %c0_64] : memref<49x128xf32, #tpu.memory_space<vmem>>, vector<1x128xf32>
      %243 = vector.shape_cast %242 : vector<1x128xf32> to vector<128xf32>
      %244 = vector.shape_cast %243 : vector<128xf32> to vector<1x1x128xf32>
      %245 = vector.broadcast %244 : vector<1x1x128xf32> to vector<8x16x128xf32>
      %246 = arith.mulf %241, %245 : vector<8x16x128xf32>
      %247 = arith.addf %240, %246 : vector<8x16x128xf32>
      %248 = vector.extract_strided_slice %219 {offsets = [4, 0, 0], sizes = [8, 16, 128], strides = [1, 1, 1]} : vector<14x16x128xf32> to vector<8x16x128xf32>
      %c32 = arith.constant 32 : index
      %c0_65 = arith.constant 0 : index
      %249 = vector.load %arg2[%c32, %c0_65] : memref<49x128xf32, #tpu.memory_space<vmem>>, vector<1x128xf32>
      %250 = vector.shape_cast %249 : vector<1x128xf32> to vector<128xf32>
      %251 = vector.shape_cast %250 : vector<128xf32> to vector<1x1x128xf32>
      %252 = vector.broadcast %251 : vector<1x1x128xf32> to vector<8x16x128xf32>
      %253 = arith.mulf %248, %252 : vector<8x16x128xf32>
      %254 = arith.addf %247, %253 : vector<8x16x128xf32>
      %255 = vector.extract_strided_slice %219 {offsets = [5, 0, 0], sizes = [8, 16, 128], strides = [1, 1, 1]} : vector<14x16x128xf32> to vector<8x16x128xf32>
      %c39 = arith.constant 39 : index
      %c0_66 = arith.constant 0 : index
      %256 = vector.load %arg2[%c39, %c0_66] : memref<49x128xf32, #tpu.memory_space<vmem>>, vector<1x128xf32>
      %257 = vector.shape_cast %256 : vector<1x128xf32> to vector<128xf32>
      %258 = vector.shape_cast %257 : vector<128xf32> to vector<1x1x128xf32>
      %259 = vector.broadcast %258 : vector<1x1x128xf32> to vector<8x16x128xf32>
      %260 = arith.mulf %255, %259 : vector<8x16x128xf32>
      %261 = arith.addf %254, %260 : vector<8x16x128xf32>
      %262 = vector.extract_strided_slice %219 {offsets = [6, 0, 0], sizes = [8, 16, 128], strides = [1, 1, 1]} : vector<14x16x128xf32> to vector<8x16x128xf32>
      %c46 = arith.constant 46 : index
      %c0_67 = arith.constant 0 : index
      %263 = vector.load %arg2[%c46, %c0_67] : memref<49x128xf32, #tpu.memory_space<vmem>>, vector<1x128xf32>
      %264 = vector.shape_cast %263 : vector<1x128xf32> to vector<128xf32>
      %265 = vector.shape_cast %264 : vector<128xf32> to vector<1x1x128xf32>
      %266 = vector.broadcast %265 : vector<1x1x128xf32> to vector<8x16x128xf32>
      %267 = arith.mulf %262, %266 : vector<8x16x128xf32>
      %268 = arith.addf %261, %267 : vector<8x16x128xf32>
      %c0_68 = arith.constant 0 : index
      %269 = arith.index_cast %9 : i32 to index
      %c5 = arith.constant 5 : index
      %c0_69 = arith.constant 0 : index
      %270 = vector.load %arg1[%c0_68, %269, %c5, %c0_69] : memref<1x22x24x128xf32, #tpu.memory_space<vmem>>, vector<1x14x16x128xf32>
      %271 = vector.shape_cast %270 : vector<1x14x16x128xf32> to vector<14x16x128xf32>
      %272 = vector.extract_strided_slice %271 {offsets = [0, 0, 0], sizes = [8, 16, 128], strides = [1, 1, 1]} : vector<14x16x128xf32> to vector<8x16x128xf32>
      %c5_70 = arith.constant 5 : index
      %c0_71 = arith.constant 0 : index
      %273 = vector.load %arg2[%c5_70, %c0_71] : memref<49x128xf32, #tpu.memory_space<vmem>>, vector<1x128xf32>
      %274 = vector.shape_cast %273 : vector<1x128xf32> to vector<128xf32>
      %275 = vector.shape_cast %274 : vector<128xf32> to vector<1x1x128xf32>
      %276 = vector.broadcast %275 : vector<1x1x128xf32> to vector<8x16x128xf32>
      %277 = arith.mulf %272, %276 : vector<8x16x128xf32>
      %278 = arith.addf %268, %277 : vector<8x16x128xf32>
      %279 = vector.extract_strided_slice %271 {offsets = [1, 0, 0], sizes = [8, 16, 128], strides = [1, 1, 1]} : vector<14x16x128xf32> to vector<8x16x128xf32>
      %c12 = arith.constant 12 : index
      %c0_72 = arith.constant 0 : index
      %280 = vector.load %arg2[%c12, %c0_72] : memref<49x128xf32, #tpu.memory_space<vmem>>, vector<1x128xf32>
      %281 = vector.shape_cast %280 : vector<1x128xf32> to vector<128xf32>
      %282 = vector.shape_cast %281 : vector<128xf32> to vector<1x1x128xf32>
      %283 = vector.broadcast %282 : vector<1x1x128xf32> to vector<8x16x128xf32>
      %284 = arith.mulf %279, %283 : vector<8x16x128xf32>
      %285 = arith.addf %278, %284 : vector<8x16x128xf32>
      %286 = vector.extract_strided_slice %271 {offsets = [2, 0, 0], sizes = [8, 16, 128], strides = [1, 1, 1]} : vector<14x16x128xf32> to vector<8x16x128xf32>
      %c19 = arith.constant 19 : index
      %c0_73 = arith.constant 0 : index
      %287 = vector.load %arg2[%c19, %c0_73] : memref<49x128xf32, #tpu.memory_space<vmem>>, vector<1x128xf32>
      %288 = vector.shape_cast %287 : vector<1x128xf32> to vector<128xf32>
      %289 = vector.shape_cast %288 : vector<128xf32> to vector<1x1x128xf32>
      %290 = vector.broadcast %289 : vector<1x1x128xf32> to vector<8x16x128xf32>
      %291 = arith.mulf %286, %290 : vector<8x16x128xf32>
      %292 = arith.addf %285, %291 : vector<8x16x128xf32>
      %293 = vector.extract_strided_slice %271 {offsets = [3, 0, 0], sizes = [8, 16, 128], strides = [1, 1, 1]} : vector<14x16x128xf32> to vector<8x16x128xf32>
      %c26 = arith.constant 26 : index
      %c0_74 = arith.constant 0 : index
      %294 = vector.load %arg2[%c26, %c0_74] : memref<49x128xf32, #tpu.memory_space<vmem>>, vector<1x128xf32>
      %295 = vector.shape_cast %294 : vector<1x128xf32> to vector<128xf32>
      %296 = vector.shape_cast %295 : vector<128xf32> to vector<1x1x128xf32>
      %297 = vector.broadcast %296 : vector<1x1x128xf32> to vector<8x16x128xf32>
      %298 = arith.mulf %293, %297 : vector<8x16x128xf32>
      %299 = arith.addf %292, %298 : vector<8x16x128xf32>
      %300 = vector.extract_strided_slice %271 {offsets = [4, 0, 0], sizes = [8, 16, 128], strides = [1, 1, 1]} : vector<14x16x128xf32> to vector<8x16x128xf32>
      %c33 = arith.constant 33 : index
      %c0_75 = arith.constant 0 : index
      %301 = vector.load %arg2[%c33, %c0_75] : memref<49x128xf32, #tpu.memory_space<vmem>>, vector<1x128xf32>
      %302 = vector.shape_cast %301 : vector<1x128xf32> to vector<128xf32>
      %303 = vector.shape_cast %302 : vector<128xf32> to vector<1x1x128xf32>
      %304 = vector.broadcast %303 : vector<1x1x128xf32> to vector<8x16x128xf32>
      %305 = arith.mulf %300, %304 : vector<8x16x128xf32>
      %306 = arith.addf %299, %305 : vector<8x16x128xf32>
      %307 = vector.extract_strided_slice %271 {offsets = [5, 0, 0], sizes = [8, 16, 128], strides = [1, 1, 1]} : vector<14x16x128xf32> to vector<8x16x128xf32>
      %c40 = arith.constant 40 : index
      %c0_76 = arith.constant 0 : index
      %308 = vector.load %arg2[%c40, %c0_76] : memref<49x128xf32, #tpu.memory_space<vmem>>, vector<1x128xf32>
      %309 = vector.shape_cast %308 : vector<1x128xf32> to vector<128xf32>
      %310 = vector.shape_cast %309 : vector<128xf32> to vector<1x1x128xf32>
      %311 = vector.broadcast %310 : vector<1x1x128xf32> to vector<8x16x128xf32>
      %312 = arith.mulf %307, %311 : vector<8x16x128xf32>
      %313 = arith.addf %306, %312 : vector<8x16x128xf32>
      %314 = vector.extract_strided_slice %271 {offsets = [6, 0, 0], sizes = [8, 16, 128], strides = [1, 1, 1]} : vector<14x16x128xf32> to vector<8x16x128xf32>
      %c47 = arith.constant 47 : index
      %c0_77 = arith.constant 0 : index
      %315 = vector.load %arg2[%c47, %c0_77] : memref<49x128xf32, #tpu.memory_space<vmem>>, vector<1x128xf32>
      %316 = vector.shape_cast %315 : vector<1x128xf32> to vector<128xf32>
      %317 = vector.shape_cast %316 : vector<128xf32> to vector<1x1x128xf32>
      %318 = vector.broadcast %317 : vector<1x1x128xf32> to vector<8x16x128xf32>
      %319 = arith.mulf %314, %318 : vector<8x16x128xf32>
      %320 = arith.addf %313, %319 : vector<8x16x128xf32>
      %c0_78 = arith.constant 0 : index
      %321 = arith.index_cast %9 : i32 to index
      %c6 = arith.constant 6 : index
      %c0_79 = arith.constant 0 : index
      %322 = vector.load %arg1[%c0_78, %321, %c6, %c0_79] : memref<1x22x24x128xf32, #tpu.memory_space<vmem>>, vector<1x14x16x128xf32>
      %323 = vector.shape_cast %322 : vector<1x14x16x128xf32> to vector<14x16x128xf32>
      %324 = vector.extract_strided_slice %323 {offsets = [0, 0, 0], sizes = [8, 16, 128], strides = [1, 1, 1]} : vector<14x16x128xf32> to vector<8x16x128xf32>
      %c6_80 = arith.constant 6 : index
      %c0_81 = arith.constant 0 : index
      %325 = vector.load %arg2[%c6_80, %c0_81] : memref<49x128xf32, #tpu.memory_space<vmem>>, vector<1x128xf32>
      %326 = vector.shape_cast %325 : vector<1x128xf32> to vector<128xf32>
      %327 = vector.shape_cast %326 : vector<128xf32> to vector<1x1x128xf32>
      %328 = vector.broadcast %327 : vector<1x1x128xf32> to vector<8x16x128xf32>
      %329 = arith.mulf %324, %328 : vector<8x16x128xf32>
      %330 = arith.addf %320, %329 : vector<8x16x128xf32>
      %331 = vector.extract_strided_slice %323 {offsets = [1, 0, 0], sizes = [8, 16, 128], strides = [1, 1, 1]} : vector<14x16x128xf32> to vector<8x16x128xf32>
      %c13 = arith.constant 13 : index
      %c0_82 = arith.constant 0 : index
      %332 = vector.load %arg2[%c13, %c0_82] : memref<49x128xf32, #tpu.memory_space<vmem>>, vector<1x128xf32>
      %333 = vector.shape_cast %332 : vector<1x128xf32> to vector<128xf32>
      %334 = vector.shape_cast %333 : vector<128xf32> to vector<1x1x128xf32>
      %335 = vector.broadcast %334 : vector<1x1x128xf32> to vector<8x16x128xf32>
      %336 = arith.mulf %331, %335 : vector<8x16x128xf32>
      %337 = arith.addf %330, %336 : vector<8x16x128xf32>
      %338 = vector.extract_strided_slice %323 {offsets = [2, 0, 0], sizes = [8, 16, 128], strides = [1, 1, 1]} : vector<14x16x128xf32> to vector<8x16x128xf32>
      %c20 = arith.constant 20 : index
      %c0_83 = arith.constant 0 : index
      %339 = vector.load %arg2[%c20, %c0_83] : memref<49x128xf32, #tpu.memory_space<vmem>>, vector<1x128xf32>
      %340 = vector.shape_cast %339 : vector<1x128xf32> to vector<128xf32>
      %341 = vector.shape_cast %340 : vector<128xf32> to vector<1x1x128xf32>
      %342 = vector.broadcast %341 : vector<1x1x128xf32> to vector<8x16x128xf32>
      %343 = arith.mulf %338, %342 : vector<8x16x128xf32>
      %344 = arith.addf %337, %343 : vector<8x16x128xf32>
      %345 = vector.extract_strided_slice %323 {offsets = [3, 0, 0], sizes = [8, 16, 128], strides = [1, 1, 1]} : vector<14x16x128xf32> to vector<8x16x128xf32>
      %c27 = arith.constant 27 : index
      %c0_84 = arith.constant 0 : index
      %346 = vector.load %arg2[%c27, %c0_84] : memref<49x128xf32, #tpu.memory_space<vmem>>, vector<1x128xf32>
      %347 = vector.shape_cast %346 : vector<1x128xf32> to vector<128xf32>
      %348 = vector.shape_cast %347 : vector<128xf32> to vector<1x1x128xf32>
      %349 = vector.broadcast %348 : vector<1x1x128xf32> to vector<8x16x128xf32>
      %350 = arith.mulf %345, %349 : vector<8x16x128xf32>
      %351 = arith.addf %344, %350 : vector<8x16x128xf32>
      %352 = vector.extract_strided_slice %323 {offsets = [4, 0, 0], sizes = [8, 16, 128], strides = [1, 1, 1]} : vector<14x16x128xf32> to vector<8x16x128xf32>
      %c34 = arith.constant 34 : index
      %c0_85 = arith.constant 0 : index
      %353 = vector.load %arg2[%c34, %c0_85] : memref<49x128xf32, #tpu.memory_space<vmem>>, vector<1x128xf32>
      %354 = vector.shape_cast %353 : vector<1x128xf32> to vector<128xf32>
      %355 = vector.shape_cast %354 : vector<128xf32> to vector<1x1x128xf32>
      %356 = vector.broadcast %355 : vector<1x1x128xf32> to vector<8x16x128xf32>
      %357 = arith.mulf %352, %356 : vector<8x16x128xf32>
      %358 = arith.addf %351, %357 : vector<8x16x128xf32>
      %359 = vector.extract_strided_slice %323 {offsets = [5, 0, 0], sizes = [8, 16, 128], strides = [1, 1, 1]} : vector<14x16x128xf32> to vector<8x16x128xf32>
      %c41 = arith.constant 41 : index
      %c0_86 = arith.constant 0 : index
      %360 = vector.load %arg2[%c41, %c0_86] : memref<49x128xf32, #tpu.memory_space<vmem>>, vector<1x128xf32>
      %361 = vector.shape_cast %360 : vector<1x128xf32> to vector<128xf32>
      %362 = vector.shape_cast %361 : vector<128xf32> to vector<1x1x128xf32>
      %363 = vector.broadcast %362 : vector<1x1x128xf32> to vector<8x16x128xf32>
      %364 = arith.mulf %359, %363 : vector<8x16x128xf32>
      %365 = arith.addf %358, %364 : vector<8x16x128xf32>
      %366 = vector.extract_strided_slice %323 {offsets = [6, 0, 0], sizes = [8, 16, 128], strides = [1, 1, 1]} : vector<14x16x128xf32> to vector<8x16x128xf32>
      %c48 = arith.constant 48 : index
      %c0_87 = arith.constant 0 : index
      %367 = vector.load %arg2[%c48, %c0_87] : memref<49x128xf32, #tpu.memory_space<vmem>>, vector<1x128xf32>
      %368 = vector.shape_cast %367 : vector<1x128xf32> to vector<128xf32>
      %369 = vector.shape_cast %368 : vector<128xf32> to vector<1x1x128xf32>
      %370 = vector.broadcast %369 : vector<1x1x128xf32> to vector<8x16x128xf32>
      %371 = arith.mulf %366, %370 : vector<8x16x128xf32>
      %372 = arith.addf %365, %371 : vector<8x16x128xf32>
      %c0_88 = arith.constant 0 : index
      %c0_89 = arith.constant 0 : index
      %373 = vector.load %arg3[%c0_88, %c0_89] : memref<1x128xf32, #tpu.memory_space<vmem>>, vector<1x128xf32>
      %374 = vector.shape_cast %373 : vector<1x128xf32> to vector<128xf32>
      %375 = vector.shape_cast %374 : vector<128xf32> to vector<1x1x128xf32>
      %376 = vector.broadcast %375 : vector<1x1x128xf32> to vector<8x16x128xf32>
      %377 = arith.addf %372, %376 : vector<8x16x128xf32>
      %378 = arith.index_cast %9 : i32 to index
      %c0_90 = arith.constant 0 : index
      %c0_91 = arith.constant 0 : index
      %379 = vector.load %arg11[%378, %c0_90, %c0_91] : memref<16x16x128xf32, #tpu.memory_space<vmem>>, vector<8x16x128xf32>
      tpu.vector_store %arg11[%378, %c0_90, %c0_91], %377 {strides = array<i32>} : memref<16x16x128xf32, #tpu.memory_space<vmem>>, vector<8x16x128xf32>,
      %380 = vector.shape_cast %377 : vector<8x16x128xf32> to vector<128x128xf32>
      %c0_92 = arith.constant 0 : index
      %c0_93 = arith.constant 0 : index
      %381 = vector.load %arg4[%c0_92, %c0_93] : memref<128x128xf32, #tpu.memory_space<vmem>>, vector<128x128xf32>
      %cst_94 = arith.constant dense<0.000000e+00> : vector<128x128xf32>
      %382 = tpu.matmul %380, %381, %cst_94 {dimension_numbers = #tpu.dot_dimension_numbers<[1], [0], [0], [1], [0, 0, 1, 1], [], []>} : vector<128x128xf32>, vector<128x128xf32>, vector<128x128xf32> -> vector<128x128xf32>
      %c0_95 = arith.constant 0 : index
      %c0_96 = arith.constant 0 : index
      %383 = vector.load %arg5[%c0_95, %c0_96] : memref<1x128xf32, #tpu.memory_space<vmem>>, vector<1x128xf32>
      %384 = vector.shape_cast %383 : vector<1x128xf32> to vector<128xf32>
      %385 = vector.shape_cast %384 : vector<128xf32> to vector<1x128xf32>
      %386 = vector.broadcast %385 : vector<1x128xf32> to vector<128x128xf32>
      %387 = arith.addf %382, %386 : vector<128x128xf32>
      %cst_97 = arith.constant 5.000000e-01 : f32
      %388 = vector.broadcast %cst_97 : f32 to vector<128x128xf32>
      %389 = arith.mulf %388, %387 : vector<128x128xf32>
      %cst_98 = arith.constant 0.707106769 : f32
      %390 = vector.broadcast %cst_98 : f32 to vector<128x128xf32>
      %391 = arith.mulf %387, %390 : vector<128x128xf32>
      %cst_99 = arith.constant 0.000000e+00 : f32
      %392 = vector.broadcast %cst_99 : f32 to vector<128x128xf32>
      %393 = arith.cmpf oge, %391, %392 : vector<128x128xf32>
      %cst_100 = arith.constant 1.000000e+00 : f32
      %cst_101 = arith.constant -1.000000e+00 : f32
      %394 = vector.broadcast %cst_100 : f32 to vector<128x128xf32>
      %395 = vector.broadcast %cst_101 : f32 to vector<128x128xf32>
      %396 = arith.select %393, %394, %395 : vector<128x128xi1>, vector<128x128xf32>
      %397 = math.absf %391 : vector<128x128xf32>
      %cst_102 = arith.constant 0.327591091 : f32
      %398 = vector.broadcast %cst_102 : f32 to vector<128x128xf32>
      %399 = arith.mulf %398, %397 : vector<128x128xf32>
      %cst_103 = arith.constant 1.000000e+00 : f32
      %400 = vector.broadcast %cst_103 : f32 to vector<128x128xf32>
      %401 = arith.addf %400, %399 : vector<128x128xf32>
      %cst_104 = arith.constant 1.000000e+00 : f32
      %402 = vector.broadcast %cst_104 : f32 to vector<128x128xf32>
      %403 = arith.divf %402, %401 : vector<128x128xf32>
      %cst_105 = arith.constant 1.06140542 : f32
      %404 = vector.broadcast %cst_105 : f32 to vector<128x128xf32>
      %405 = arith.mulf %404, %403 : vector<128x128xf32>
      %cst_106 = arith.constant -1.45315206 : f32
      %406 = vector.broadcast %cst_106 : f32 to vector<128x128xf32>
      %407 = arith.addf %405, %406 : vector<128x128xf32>
      %408 = arith.mulf %407, %403 : vector<128x128xf32>
      %cst_107 = arith.constant 1.42141378 : f32
      %409 = vector.broadcast %cst_107 : f32 to vector<128x128xf32>
      %410 = arith.addf %408, %409 : vector<128x128xf32>
      %411 = arith.mulf %410, %403 : vector<128x128xf32>
      %cst_108 = arith.constant -0.284496725 : f32
      %412 = vector.broadcast %cst_108 : f32 to vector<128x128xf32>
      %413 = arith.addf %411, %412 : vector<128x128xf32>
      %414 = arith.mulf %413, %403 : vector<128x128xf32>
      %cst_109 = arith.constant 0.254829586 : f32
      %415 = vector.broadcast %cst_109 : f32 to vector<128x128xf32>
      %416 = arith.addf %414, %415 : vector<128x128xf32>
      %417 = arith.mulf %416, %403 : vector<128x128xf32>
      %cst_110 = arith.constant 0.000000e+00 : f32
      %418 = vector.broadcast %cst_110 : f32 to vector<128x128xf32>
      %419 = arith.subf %418, %397 : vector<128x128xf32>
      %420 = arith.mulf %419, %397 : vector<128x128xf32>
      %421 = math.exp %420 : vector<128x128xf32>
      %422 = arith.mulf %417, %421 : vector<128x128xf32>
      %cst_111 = arith.constant 1.000000e+00 : f32
      %423 = vector.broadcast %cst_111 : f32 to vector<128x128xf32>
      %424 = arith.subf %423, %422 : vector<128x128xf32>
      %425 = arith.mulf %396, %424 : vector<128x128xf32>
      %cst_112 = arith.constant 1.000000e+00 : f32
      %426 = vector.broadcast %cst_112 : f32 to vector<128x128xf32>
      %427 = arith.addf %426, %425 : vector<128x128xf32>
      %428 = arith.mulf %389, %427 : vector<128x128xf32>
      %429 = vector.shape_cast %428 : vector<128x128xf32> to vector<8x16x128xf32>
      %c1_i32_113 = arith.constant 1 : i32
      %430 = arith.addi %9, %c1_i32_113 : i32
      %431 = arith.index_cast %430 : i32 to index
      %c8_114 = arith.constant 8 : index
      %c0_115 = arith.constant 0 : index
      %432 = vector.load %arg10[%431, %c8_114, %c0_115] : memref<18x32x128xf32, #tpu.memory_space<vmem>>, vector<8x16x128xf32>
      tpu.vector_store %arg10[%431, %c8_114, %c0_115], %429 {strides = array<i32>} : memref<18x32x128xf32, #tpu.memory_space<vmem>>, vector<8x16x128xf32>,
    }
    %c2_i32_10 = arith.constant 2 : i32
    %c0_i32_11 = arith.constant 0 : i32
    %c2_i32_12 = arith.constant 2 : i32
    %7 = arith.addi %c0_i32_11, %c2_i32_12 : i32
    %c1_i32_13 = arith.constant 1 : i32
    scf.for %arg12 = %c0_i32_11 to %7 step %c1_i32_13  : i32 {
      %c8_i32 = arith.constant 8 : i32
      %8 = arith.muli %arg12, %c8_i32 : i32
      %9 = tpu.assume_multiple %8, 8 : i32
      %10 = arith.index_cast %9 : i32 to index
      %c7 = arith.constant 7 : index
      %c0_15 = arith.constant 0 : index
      %11 = vector.load %arg10[%10, %c7, %c0_15] : memref<18x32x128xf32, #tpu.memory_space<vmem>>, vector<10x16x128xf32>
      %12 = vector.extract_strided_slice %11 {offsets = [0, 0, 0], sizes = [8, 16, 128], strides = [1, 1, 1]} : vector<10x16x128xf32> to vector<8x16x128xf32>
      %c0_16 = arith.constant 0 : index
      %c0_17 = arith.constant 0 : index
      %13 = vector.load %arg6[%c0_16, %c0_17] : memref<9x128xf32, #tpu.memory_space<vmem>>, vector<1x128xf32>
      %14 = vector.shape_cast %13 : vector<1x128xf32> to vector<128xf32>
      %15 = vector.shape_cast %14 : vector<128xf32> to vector<1x1x128xf32>
      %16 = vector.broadcast %15 : vector<1x1x128xf32> to vector<8x16x128xf32>
      %17 = arith.mulf %12, %16 : vector<8x16x128xf32>
      %18 = vector.extract_strided_slice %11 {offsets = [1, 0, 0], sizes = [8, 16, 128], strides = [1, 1, 1]} : vector<10x16x128xf32> to vector<8x16x128xf32>
      %c3 = arith.constant 3 : index
      %c0_18 = arith.constant 0 : index
      %19 = vector.load %arg6[%c3, %c0_18] : memref<9x128xf32, #tpu.memory_space<vmem>>, vector<1x128xf32>
      %20 = vector.shape_cast %19 : vector<1x128xf32> to vector<128xf32>
      %21 = vector.shape_cast %20 : vector<128xf32> to vector<1x1x128xf32>
      %22 = vector.broadcast %21 : vector<1x1x128xf32> to vector<8x16x128xf32>
      %23 = arith.mulf %18, %22 : vector<8x16x128xf32>
      %24 = arith.addf %17, %23 : vector<8x16x128xf32>
      %25 = vector.extract_strided_slice %11 {offsets = [2, 0, 0], sizes = [8, 16, 128], strides = [1, 1, 1]} : vector<10x16x128xf32> to vector<8x16x128xf32>
      %c6 = arith.constant 6 : index
      %c0_19 = arith.constant 0 : index
      %26 = vector.load %arg6[%c6, %c0_19] : memref<9x128xf32, #tpu.memory_space<vmem>>, vector<1x128xf32>
      %27 = vector.shape_cast %26 : vector<1x128xf32> to vector<128xf32>
      %28 = vector.shape_cast %27 : vector<128xf32> to vector<1x1x128xf32>
      %29 = vector.broadcast %28 : vector<1x1x128xf32> to vector<8x16x128xf32>
      %30 = arith.mulf %25, %29 : vector<8x16x128xf32>
      %31 = arith.addf %24, %30 : vector<8x16x128xf32>
      %32 = arith.index_cast %9 : i32 to index
      %c8 = arith.constant 8 : index
      %c0_20 = arith.constant 0 : index
      %33 = vector.load %arg10[%32, %c8, %c0_20] : memref<18x32x128xf32, #tpu.memory_space<vmem>>, vector<10x16x128xf32>
      %34 = vector.extract_strided_slice %33 {offsets = [0, 0, 0], sizes = [8, 16, 128], strides = [1, 1, 1]} : vector<10x16x128xf32> to vector<8x16x128xf32>
      %c1 = arith.constant 1 : index
      %c0_21 = arith.constant 0 : index
      %35 = vector.load %arg6[%c1, %c0_21] : memref<9x128xf32, #tpu.memory_space<vmem>>, vector<1x128xf32>
      %36 = vector.shape_cast %35 : vector<1x128xf32> to vector<128xf32>
      %37 = vector.shape_cast %36 : vector<128xf32> to vector<1x1x128xf32>
      %38 = vector.broadcast %37 : vector<1x1x128xf32> to vector<8x16x128xf32>
      %39 = arith.mulf %34, %38 : vector<8x16x128xf32>
      %40 = arith.addf %31, %39 : vector<8x16x128xf32>
      %41 = vector.extract_strided_slice %33 {offsets = [1, 0, 0], sizes = [8, 16, 128], strides = [1, 1, 1]} : vector<10x16x128xf32> to vector<8x16x128xf32>
      %c4 = arith.constant 4 : index
      %c0_22 = arith.constant 0 : index
      %42 = vector.load %arg6[%c4, %c0_22] : memref<9x128xf32, #tpu.memory_space<vmem>>, vector<1x128xf32>
      %43 = vector.shape_cast %42 : vector<1x128xf32> to vector<128xf32>
      %44 = vector.shape_cast %43 : vector<128xf32> to vector<1x1x128xf32>
      %45 = vector.broadcast %44 : vector<1x1x128xf32> to vector<8x16x128xf32>
      %46 = arith.mulf %41, %45 : vector<8x16x128xf32>
      %47 = arith.addf %40, %46 : vector<8x16x128xf32>
      %48 = vector.extract_strided_slice %33 {offsets = [2, 0, 0], sizes = [8, 16, 128], strides = [1, 1, 1]} : vector<10x16x128xf32> to vector<8x16x128xf32>
      %c7_23 = arith.constant 7 : index
      %c0_24 = arith.constant 0 : index
      %49 = vector.load %arg6[%c7_23, %c0_24] : memref<9x128xf32, #tpu.memory_space<vmem>>, vector<1x128xf32>
      %50 = vector.shape_cast %49 : vector<1x128xf32> to vector<128xf32>
      %51 = vector.shape_cast %50 : vector<128xf32> to vector<1x1x128xf32>
      %52 = vector.broadcast %51 : vector<1x1x128xf32> to vector<8x16x128xf32>
      %53 = arith.mulf %48, %52 : vector<8x16x128xf32>
      %54 = arith.addf %47, %53 : vector<8x16x128xf32>
      %55 = arith.index_cast %9 : i32 to index
      %c9 = arith.constant 9 : index
      %c0_25 = arith.constant 0 : index
      %56 = vector.load %arg10[%55, %c9, %c0_25] : memref<18x32x128xf32, #tpu.memory_space<vmem>>, vector<10x16x128xf32>
      %57 = vector.extract_strided_slice %56 {offsets = [0, 0, 0], sizes = [8, 16, 128], strides = [1, 1, 1]} : vector<10x16x128xf32> to vector<8x16x128xf32>
      %c2 = arith.constant 2 : index
      %c0_26 = arith.constant 0 : index
      %58 = vector.load %arg6[%c2, %c0_26] : memref<9x128xf32, #tpu.memory_space<vmem>>, vector<1x128xf32>
      %59 = vector.shape_cast %58 : vector<1x128xf32> to vector<128xf32>
      %60 = vector.shape_cast %59 : vector<128xf32> to vector<1x1x128xf32>
      %61 = vector.broadcast %60 : vector<1x1x128xf32> to vector<8x16x128xf32>
      %62 = arith.mulf %57, %61 : vector<8x16x128xf32>
      %63 = arith.addf %54, %62 : vector<8x16x128xf32>
      %64 = vector.extract_strided_slice %56 {offsets = [1, 0, 0], sizes = [8, 16, 128], strides = [1, 1, 1]} : vector<10x16x128xf32> to vector<8x16x128xf32>
      %c5 = arith.constant 5 : index
      %c0_27 = arith.constant 0 : index
      %65 = vector.load %arg6[%c5, %c0_27] : memref<9x128xf32, #tpu.memory_space<vmem>>, vector<1x128xf32>
      %66 = vector.shape_cast %65 : vector<1x128xf32> to vector<128xf32>
      %67 = vector.shape_cast %66 : vector<128xf32> to vector<1x1x128xf32>
      %68 = vector.broadcast %67 : vector<1x1x128xf32> to vector<8x16x128xf32>
      %69 = arith.mulf %64, %68 : vector<8x16x128xf32>
      %70 = arith.addf %63, %69 : vector<8x16x128xf32>
      %71 = vector.extract_strided_slice %56 {offsets = [2, 0, 0], sizes = [8, 16, 128], strides = [1, 1, 1]} : vector<10x16x128xf32> to vector<8x16x128xf32>
      %c8_28 = arith.constant 8 : index
      %c0_29 = arith.constant 0 : index
      %72 = vector.load %arg6[%c8_28, %c0_29] : memref<9x128xf32, #tpu.memory_space<vmem>>, vector<1x128xf32>
      %73 = vector.shape_cast %72 : vector<1x128xf32> to vector<128xf32>
      %74 = vector.shape_cast %73 : vector<128xf32> to vector<1x1x128xf32>
      %75 = vector.broadcast %74 : vector<1x1x128xf32> to vector<8x16x128xf32>
      %76 = arith.mulf %71, %75 : vector<8x16x128xf32>
      %77 = arith.addf %70, %76 : vector<8x16x128xf32>
      %78 = arith.index_cast %9 : i32 to index
      %c0_30 = arith.constant 0 : index
      %c0_31 = arith.constant 0 : index
      %79 = vector.load %arg11[%78, %c0_30, %c0_31] : memref<16x16x128xf32, #tpu.memory_space<vmem>>, vector<8x16x128xf32>
      %80 = arith.addf %79, %77 : vector<8x16x128xf32>
      %81 = vector.shape_cast %80 : vector<8x16x128xf32> to vector<128x128xf32>
      %c0_32 = arith.constant 0 : index
      %c0_33 = arith.constant 0 : index
      %82 = vector.load %arg7[%c0_32, %c0_33] : memref<128x128xf32, #tpu.memory_space<vmem>>, vector<128x128xf32>
      %cst_34 = arith.constant dense<0.000000e+00> : vector<128x128xf32>
      %83 = tpu.matmul %81, %82, %cst_34 {dimension_numbers = #tpu.dot_dimension_numbers<[1], [0], [0], [1], [0, 0, 1, 1], [], []>} : vector<128x128xf32>, vector<128x128xf32>, vector<128x128xf32> -> vector<128x128xf32>
      %c0_35 = arith.constant 0 : index
      %c0_36 = arith.constant 0 : index
      %84 = vector.load %arg8[%c0_35, %c0_36] : memref<1x128xf32, #tpu.memory_space<vmem>>, vector<1x128xf32>
      %85 = vector.shape_cast %84 : vector<1x128xf32> to vector<128xf32>
      %86 = vector.shape_cast %85 : vector<128xf32> to vector<1x128xf32>
      %87 = vector.broadcast %86 : vector<1x128xf32> to vector<128x128xf32>
      %88 = arith.addf %83, %87 : vector<128x128xf32>
      %89 = vector.shape_cast %88 : vector<128x128xf32> to vector<8x16x128xf32>
      %c0_37 = arith.constant 0 : index
      %90 = arith.index_cast %9 : i32 to index
      %c0_38 = arith.constant 0 : index
      %c0_39 = arith.constant 0 : index
      %91 = vector.load %arg9[%c0_37, %90, %c0_38, %c0_39] : memref<1x16x16x128xf32, #tpu.memory_space<vmem>>, vector<1x8x16x128xf32>
      %92 = vector.shape_cast %91 : vector<1x8x16x128xf32> to vector<8x16x128xf32>
      %93 = vector.shape_cast %89 : vector<8x16x128xf32> to vector<1x8x16x128xf32>
      tpu.vector_store %arg9[%c0_37, %90, %c0_38, %c0_39], %93 {strides = array<i32>} : memref<1x16x16x128xf32, #tpu.memory_space<vmem>>, vector<1x8x16x128xf32>,
    }
    %c2_i32_14 = arith.constant 2 : i32
    return
  }
  func.func @transform_0(%arg0: i32) -> (i32, i32, i32, i32) {
    %c0_i32 = arith.constant 0 : i32
    %c0_i32_0 = arith.constant 0 : i32
    %c0_i32_1 = arith.constant 0 : i32
    %c0_i32_2 = arith.constant 0 : i32
    return %arg0, %c0_i32, %c0_i32_0, %c0_i32_1 : i32, i32, i32, i32
  }
  func.func @transform_1(%arg0: i32) -> (i32, i32) {
    %c0_i32 = arith.constant 0 : i32
    %c0_i32_0 = arith.constant 0 : i32
    %c0_i32_1 = arith.constant 0 : i32
    return %c0_i32, %c0_i32_0 : i32, i32
  }
  func.func @transform_2(%arg0: i32) -> (i32, i32) {
    %c0_i32 = arith.constant 0 : i32
    %c0_i32_0 = arith.constant 0 : i32
    %c0_i32_1 = arith.constant 0 : i32
    return %c0_i32, %c0_i32_0 : i32, i32
  }
  func.func @transform_3(%arg0: i32) -> (i32, i32) {
    %c0_i32 = arith.constant 0 : i32
    %c0_i32_0 = arith.constant 0 : i32
    %c0_i32_1 = arith.constant 0 : i32
    return %c0_i32, %c0_i32_0 : i32, i32
  }
  func.func @transform_4(%arg0: i32) -> (i32, i32) {
    %c0_i32 = arith.constant 0 : i32
    %c0_i32_0 = arith.constant 0 : i32
    %c0_i32_1 = arith.constant 0 : i32
    return %c0_i32, %c0_i32_0 : i32, i32
  }
  func.func @transform_5(%arg0: i32) -> (i32, i32) {
    %c0_i32 = arith.constant 0 : i32
    %c0_i32_0 = arith.constant 0 : i32
    %c0_i32_1 = arith.constant 0 : i32
    return %c0_i32, %c0_i32_0 : i32, i32
  }
  func.func @transform_6(%arg0: i32) -> (i32, i32) {
    %c0_i32 = arith.constant 0 : i32
    %c0_i32_0 = arith.constant 0 : i32
    %c0_i32_1 = arith.constant 0 : i32
    return %c0_i32, %c0_i32_0 : i32, i32
  }
  func.func @transform_7(%arg0: i32) -> (i32, i32) {
    %c0_i32 = arith.constant 0 : i32
    %c0_i32_0 = arith.constant 0 : i32
    %c0_i32_1 = arith.constant 0 : i32
    return %c0_i32, %c0_i32_0 : i32, i32
  }
  func.func @transform_8(%arg0: i32) -> (i32, i32, i32, i32) {
    %c0_i32 = arith.constant 0 : i32
    %c0_i32_0 = arith.constant 0 : i32
    %c0_i32_1 = arith.constant 0 : i32
    %c0_i32_2 = arith.constant 0 : i32
    return %arg0, %c0_i32, %c0_i32_0, %c0_i32_1 : i32, i32, i32, i32
  }
}

</mosaic_0001>

<bundles_post_ra>
// kernel: tpu_custom_call.1
= control target key start
LH: loop header
LB: loop body
LE: loop exit
PB: predicated region body
PF: predicated region fallthrough
CT: control target
= control target key end

     0   :  { %13 = vsyncpa [#allocation5], 0  ;;  %s9647_s0 = inlined_call_operand.hbm [shape: f32[2,22,24,128], index: 0, kind: input, shape index: {}]   ;;  %s9648_s1 = inlined_call_operand.hbm [shape: f32[49,128], index: 1, kind: input, shape index: {}]   ;;  %s9649_s2 = inlined_call_operand.vmem [shape: f32[1,128], index: 2, kind: input, shape index: {}]   ;;  %s9650_s3 = inlined_call_operand.hbm [shape: f32[128,128], index: 3, kind: input, shape index: {}]   ;;  %s9651_s4 = inlined_call_operand.vmem [shape: f32[1,128], index: 4, kind: input, shape index: {}]   ;;  %s9652_s5 = inlined_call_operand.vmem [shape: f32[9,128], index: 5, kind: input, shape index: {}]   ;;  %s9653_s6 = inlined_call_operand.hbm [shape: f32[128,128], index: 6, kind: input, shape index: {}]   ;;  %s9654_s7 = inlined_call_operand.vmem [shape: f32[1,128], index: 7, kind: input, shape index: {}]   ;;  %s9655_s8 = inlined_call_operand.hbm [shape: f32[2,16,16,128], index: 8, kind: output, shape index: {}]  }
   0x1   :  { %15 = vsyncpa [#allocation5 + $0x1], 0 }
   0x2   :  { %16 = vsyncpa [#allocation8], 0 }
   0x3   :  { %17 = vsyncpa [#allocation11], 0 }
   0x4   :  { %18 = vsyncpa [#allocation6], 0 }
   0x5   :  { %20 = vsyncpa [#allocation6 + $0x1], 0  ;;  %s4931_s27 = smov 0   ;;  %s4933_s28 = smov 0  }
   0x6   :  { %s4935_s29 = smov 0   ;;  %s4937_s30 = smov 0  }
   0x7 LB: > { %10228 = sst [smem:[#allocation17_spill]] %s4853_s27  ;;  %s4952_s9 = sadd.s32 4294967295, %s4865_s30   ;;  %s4865_s30 = sphi %s4937_s30, %s11377_s30   ;;  %s4861_s29 = sphi %s4935_s29, %s11376_s29   ;;  %s4857_s28 = sphi %s4933_s28, %s11375_s28   ;;  %s4853_s27 = sphi %s4931_s27, %s11374_s27  }
   0x8   : > { %s3820_s10 = sadd.s32 4294967294, %s4865_s30   ;;  %p46_p0 = scmp.ne.s32.totalorder %s4857_s28, %s4853_s27 }
   0x9   : > { %p9656_p1 = scmp.eq.s32.totalorder %s4952_s9, 0  ;;  %p223_p3 = scmp.eq.s32.totalorder %s3820_s10, 1 }
   0xa   : > { %p3821_p5 = scmp.ge.s32.totalorder %s4865_s30, 1  ;;  %p230_p7 = scmp.lt.s32.totalorder %s4865_s30, 3 }
   0xb   : > { %p4961_p4 = por %p9656_p1, %p46_p0  ;;  %p4966_p6 = por %p223_p3, %p46_p0 }
   0xc   : > { %p4971_p8 = pnand %p3821_p5, %p230_p7  ;;  %s4875_s14 = smov [#allocation7]  }
   0xd   : > { %s10229_s11 = scalar_select %p4961_p4, 1, 0 }
   0xe   : > { %s10230_s12 = scalar_select %p4966_p6, 1, 0 }
   0xf   : > { %s10232_s13 = scalar_select %p4971_p8, 1, 0 }
  0x10   : > { %10231 = sst [smem:[#allocation18_spill]] %s10230_s12  ;;  %s242_s15 = sshll.u32 %s4875_s14, 4  ;;  %s4975_s15 = int_to_ptr.vmem [resolvable:$true] %s242_s15 }
  0x11   : > { %p4218_p9 = pneg %p4971_p8  ;;  %s4876_s17 = smov [#allocation9]  }
  0x12   : > { %s258_s18 = sshll.u32 %s4876_s17, 4  ;;  %s4877_s19 = smov [#allocation10]   ;;  %s4986_s18 = int_to_ptr.vmem [resolvable:$true] %s258_s18 }
  0x13   : > { %p4982_p11 = pnand %p4218_p9, %p9656_p1  ;;  %s4988_s20 = sshll.u32 %s4877_s19, 4  ;;  %s278_s20 = int_to_ptr.vmem [resolvable:$true] %s4988_s20 }
  0x14   : > { %s4669_s23 = scalar_lea.hbm %s9648_s1, 896 }
  0x15   : > { %p4670_p12 = scmp.ne.s32.totalorder %s9648_s1, %s4669_s23  ;;  %p4998_p13 = pneg %p4982_p11 }
  0x16   : > { %p4676_p5 = scmp.lt.u32.totalorder %s4669_s23, %s9648_s1 }
  0x17   : > { %p4672_p0 = pnand %p4998_p13, %p4670_p12 }
  0x19   : > { %p4673_p3 = pneg %p4672_p0 }
  0x1b   : > { %p4678_p7 = pnand %p4676_p5, %p4673_p3 }
  0x1d   : > { %4681 = shalt.err (!%p4678_p7)
}
  0x1e   : > { %s4682_s17 = scalar_lea.vmem %s4975_s15, 896  ;;  %p4690_p2 = scmp.lt.s32.totalorder %s4975_s15, %s4975_s15 }
  0x1f   : > { %p4683_p9 = scmp.ne.s32.totalorder %s4975_s15, %s4682_s17  ;;  %p4691_p6 = scmp.lt.s32.totalorder %s4682_s17, %s4682_s17 }
  0x21   : > { %p4685_p10 = pnand %p4683_p9, %p4998_p13  ;;  %p4692_p12 = por %p4691_p6, %p4690_p2 }
  0x23   : > { %p4686_p1 = pneg %p4685_p10 }
  0x25   : > { %p4693_p0 = pnand %p4692_p12, %p4686_p1 }
  0x27   : > { %4696 = shalt.err (!%p4693_p0)
}
  0x28   : > { %s9661_s19 = smov 128   ;;  %s9662_s21 = smov 8  }
  0x29   : > { %4221 = dma.hbm_to_vmem [thread:$0]  (!%p4982_p11), %s9648_s1, 896, %s4975_s15, [#allocation8], %s9661_s19, %s9661_s19, %s9662_s21  }
  0x2a   : > { %s4697_s10 = scalar_lea.hbm %s9650_s3, 2048 }
  0x2b   : > { %p4698_p1 = scmp.ne.s32.totalorder %s9650_s3, %s4697_s10  ;;  %p4704_p10 = scmp.lt.u32.totalorder %s4697_s10, %s9650_s3 }
  0x2d   : > { %p4700_p2 = pnand %p4698_p1, %p4998_p13 }
  0x2f   : > { %p4701_p6 = pneg %p4700_p2 }
  0x31   : > { %p4706_p3 = pnand %p4704_p10, %p4701_p6 }
  0x33   : > { %4709 = shalt.err (!%p4706_p3)
}
  0x34   : > { %s4710_s15 = scalar_lea.vmem %s4986_s18, 2048  ;;  %p4718_p12 = scmp.lt.s32.totalorder %s4986_s18, %s4986_s18 }
  0x35   : > { %p4711_p5 = scmp.ne.s32.totalorder %s4986_s18, %s4710_s15  ;;  %p4719_p0 = scmp.lt.s32.totalorder %s4710_s15, %s4710_s15 }
  0x37   : > { %p4713_p7 = pnand %p4711_p5, %p4998_p13  ;;  %p4720_p1 = por %p4719_p0, %p4718_p12 }
  0x39   : > { %p4714_p9 = pneg %p4713_p7 }
  0x3b   : > { %p4721_p2 = pnand %p4720_p1, %p4714_p9 }
  0x3d   : > { %4724 = shalt.err (!%p4721_p2)
}
  0x3e   : > { %4224 = dma.hbm_to_vmem [thread:$0]  (!%p4982_p11), %s9650_s3, 2048, %s4986_s18, [#allocation8], %s9661_s19, %s9661_s19, %s9662_s21  }
  0x3f   : > { %s4725_s24 = scalar_lea.hbm %s9653_s6, 2048 }
  0x40   : > { %p4726_p6 = scmp.ne.s32.totalorder %s9653_s6, %s4725_s24  ;;  %p4732_p5 = scmp.lt.u32.totalorder %s4725_s24, %s9653_s6 }
  0x42   : > { %p4728_p10 = pnand %p4726_p6, %p4998_p13 }
  0x44   : > { %p4729_p3 = pneg %p4728_p10 }
  0x46   : > { %p4734_p7 = pnand %p4732_p5, %p4729_p3 }
  0x48   : > { %4737 = shalt.err (!%p4734_p7)
}
  0x49   : > { %s4738_s15 = scalar_lea.vmem %s278_s20, 2048  ;;  %p4746_p1 = scmp.lt.s32.totalorder %s278_s20, %s278_s20 }
  0x4a   : > { %p4739_p9 = scmp.ne.s32.totalorder %s278_s20, %s4738_s15  ;;  %p4747_p2 = scmp.lt.s32.totalorder %s4738_s15, %s4738_s15 }
  0x4c   : > { %p4741_p12 = pnand %p4739_p9, %p4998_p13  ;;  %p4748_p4 = por %p4747_p2, %p4746_p1 }
  0x4e   : > { %p4742_p0 = pneg %p4741_p12 }
  0x50   : > { %p4749_p8 = pnand %p4748_p4, %p4742_p0 }
  0x52   : > { %4752 = shalt.err (!%p4749_p8)
}
  0x53   : > { %4227 = dma.hbm_to_vmem [thread:$0]  (!%p4982_p11), %s9653_s6, 2048, %s278_s20, [#allocation11], %s9661_s19, %s9661_s19, %s9662_s21  }
  0x54   : > { %s5071_s26 = sadd.s32 1, %s4865_s30   ;;  %s33_s12 = sadd.s32 1, %s4861_s29 }
  0x55   : > { %s30_s16 = ssub.s32 %s4865_s30, %s5071_s26  ;;  %p40_p8 = scmp.ne.s32.totalorder %s4861_s29, %s4857_s28 }
  0x56   : > { %p31_p4 = scmp.eq.s32.totalorder %s30_s16, 0  ;;  %p41_p13 = scmp.eq.s32.totalorder %s4865_s30, 0 }
  0x57   : > { %p4239_p6 = scmp.lt.s32.totalorder %s4865_s30, 2  ;;  %p10235_p3 = scmp.eq.s32.totalorder %s4952_s9, 1 }
  0x58   : > { %s5081_s22 = scalar_select %p31_p4, %s4861_s29, %s33_s12  }
  0x59   : > { %p42_p10 = por %p41_p13, %p40_p8  ;;  %p5085_p5 = por %p10235_p3, %p40_p8 }
  0x5a   : > { %s294_s24 = sand.u32 1, %s4861_s29   ;;  %s4200_s25 = smul.u32 8448, %s4865_s30 }
  0x5b   : > { %s4199_s20 = smul.u32 528, %s294_s24  ;;  %p5091_p11 = pnand %p4239_p6, %p42_p10 }
  0x5c   : > { %s5098_s15 = scalar_lea.hbm %s9647_s0, %s4200_s25  ;;  %s5102_s16 = scalar_lea.sflag [#allocation5], %s294_s24 }
  0x5d   : > { %s298_s18 = scalar_lea.vmem [#allocation4], %s4199_s20  ;;  %s4753_s12 = scalar_lea.hbm %s5098_s15, 8448 }
  0x5e   : > { %s305_s27 = sshll.u32 %s298_s18, 4  ;;  %p4754_p7 = scmp.ne.s32.totalorder %s5098_s15, %s4753_s12  ;;  %s5100_s27 = int_to_ptr.vmem [resolvable:$true] %s305_s27 }
  0x5f   : > { %p4755_p9 = pneg %p5091_p11  ;;  %s4758_s17 = scalar_lea.hbm %s9647_s0, 16896 }
  0x60   : > { %p4759_p1 = scmp.lt.u32.totalorder %s5098_s15, %s9647_s0  ;;  %p4760_p2 = scmp.lt.u32.totalorder %s4758_s17, %s4753_s12 }
  0x61   : > { %p4756_p12 = pnand %p4755_p9, %p4754_p7  ;;  %p4762_p8 = scmp.lt.u32.totalorder %s4753_s12, %s5098_s15 }
  0x62   : > { %p4761_p4 = por %p4760_p2, %p4759_p1 }
  0x63   : > { %p4757_p0 = pneg %p4756_p12 }
  0x64   : > { %p4763_p13 = por %p4762_p8, %p4761_p4 }
  0x66   : > { %p4764_p6 = pnand %p4763_p13, %p4757_p0 }
  0x68   : > { %4767 = shalt.err (!%p4764_p6)
}
  0x69   : > { %s4768_s24 = scalar_lea.vmem %s5100_s27, 8448  ;;  %s4880_s20 = smov [#allocation4]  }
  0x6a   : > { %p4769_p10 = scmp.ne.s32.totalorder %s5100_s27, %s4768_s24  ;;  %s4773_s18 = sshll.u32 %s4880_s20, 4  ;;  %s4774_s18 = int_to_ptr.vmem [resolvable:$false] %s4773_s18 }
  0x6b   : > { %s4775_s19 = scalar_lea.vmem %s4774_s18, 16896  ;;  %p4776_p12 = scmp.lt.s32.totalorder %s5100_s27, %s4774_s18 }
  0x6c   : > { %p4771_p3 = pnand %p4769_p10, %p4755_p9  ;;  %p4777_p1 = scmp.lt.s32.totalorder %s4775_s19, %s4768_s24 }
  0x6e   : > { %p4772_p7 = pneg %p4771_p3  ;;  %p4778_p2 = por %p4777_p1, %p4776_p12 }
  0x70   : > { %p4779_p4 = pnand %p4778_p2, %p4772_p7 }
  0x72   : > { %4782 = shalt.err (!%p4779_p4)
}
  0x73   : > { %s10238_s21 = smov 8   ;;  %s10239_s12 = smov 128  }
  0x74   : > { %4231 = dma.hbm_to_vmem [thread:$0]  (!%p5091_p11), %s5098_s15, 8448, %s5100_s27, %s5102_s16, %s10239_s12, %s10239_s12, %s10238_s21  }
  0x75   : > { %p10240_p9 = scmp.ne.s32.totalorder %s10232_s13, 0 }
  0x76   : > { %s5136_s25 = sand.u32 (!%p10240_p9), 1, %s4857_s28   ;;  %p10241_p0 = scmp.ne.s32.totalorder (!%p10240_p9), %s10229_s11, 0 }
  0x77   : > { %317 = sbr.rel (%p10240_p9) target bundleno = 1273 (0x4f9), region = 52  ;;  %s320_s17 = scalar_lea.sflag (!%p10240_p9), [#allocation5], %s5136_s25 }
  0x78   : > { %s4201_s14 = smul.u32 (!%p10240_p9), 528, %s5136_s25 }
  0x7a   : > { %s5140_s24 = scalar_lea.vmem (!%p10240_p9), [#allocation4], %s4201_s14 }
  0x7e   : > { %4836 = dma.done.wait (%p10241_p0), %s320_s17, 8448  }
  0x7f   : > { %4838 = vsyncadd (%p10241_p0), %s320_s17, 4294958848  ;;  %p10242_p11 = scmp.eq.s32.totalorder %s4952_s9, 0 }
  0x81   : > { %4840 = dma.done.wait (%p10242_p11), [#allocation8], 2944   ;;  %p10243_p8 = pmov %p10242_p11 }
  0x83   : > { %4842 = vsyncadd (%p10243_p8), [#allocation8], 4294964352  ;;  %p10244_p13 = pmov %p10243_p8 }
  0x84   : > { %p10245_p6 = pmov %p10243_p8 }
  0x85   : > { %4844 = dma.done.wait (%p10244_p13), [#allocation11], 2048  }
  0x86   : > { %4846 = vsyncadd (%p10245_p6), [#allocation11], 4294965248  ;;  %s3831_s13 = sshll.u32 %s5136_s25, 8  ;;  %v4881_v0 = vmov 0.0   ;;  %s5159_s10 = smov 0  }
  0x87   : > { %369 = vst [vmem:[#allocation2 + $0x8] sm:$0xff] %v4881_v0  ;;  %370 = vst [vmem:[#allocation2 + $0x10] sm:$0xff] %v4881_v0  ;;  %s5157_s11 = scalar_lea.vmem [#allocation12], %s3831_s13 }
  0x88   : > { %374 = vst [vmem:[#allocation2 + $0x228] sm:$0xff] %v4881_v0  ;;  %375 = vst [vmem:[#allocation2 + $0x230] sm:$0xff] %v4881_v0 }
  0x89   : > { %377 = vst [vmem:[#allocation2] sm:$0xff] %v4881_v0  ;;  %378 = vst [vmem:[#allocation2 + $0x20] sm:$0xff] %v4881_v0 }
  0x8a   : > { %379 = vst [vmem:[#allocation2 + $0x40] sm:$0xff] %v4881_v0  ;;  %380 = vst [vmem:[#allocation2 + $0x60] sm:$0xff] %v4881_v0 }
  0x8b   : > { %381 = vst [vmem:[#allocation2 + $0x80] sm:$0xff] %v4881_v0  ;;  %382 = vst [vmem:[#allocation2 + $0xa0] sm:$0xff] %v4881_v0 }
  0x8c   : > { %383 = vst [vmem:[#allocation2 + $0xc0] sm:$0xff] %v4881_v0  ;;  %384 = vst [vmem:[#allocation2 + $0xe0] sm:$0xff] %v4881_v0 }
  0x8d   : > { %385 = vst [vmem:[#allocation2 + $0x100] sm:$0xff] %v4881_v0  ;;  %386 = vst [vmem:[#allocation2 + $0x120] sm:$0xff] %v4881_v0 }
  0x8e   : > { %387 = vst [vmem:[#allocation2 + $0x140] sm:$0xff] %v4881_v0  ;;  %388 = vst [vmem:[#allocation2 + $0x160] sm:$0xff] %v4881_v0 }
  0x8f   : > { %389 = vst [vmem:[#allocation2 + $0x180] sm:$0xff] %v4881_v0  ;;  %390 = vst [vmem:[#allocation2 + $0x1a0] sm:$0xff] %v4881_v0 }
  0x90   : > { %391 = vst [vmem:[#allocation2 + $0x1c0] sm:$0xff] %v4881_v0  ;;  %392 = vst [vmem:[#allocation2 + $0x1e0] sm:$0xff] %v4881_v0 }
  0x91   : > { %393 = vst [vmem:[#allocation2 + $0x200] sm:$0xff] %v4881_v0  ;;  %396 = vst [vmem:[#allocation2 + $0x38] sm:$0xff] %v4881_v0 }
  0x92   : > { %397 = vst [vmem:[#allocation2 + $0x58] sm:$0xff] %v4881_v0  ;;  %398 = vst [vmem:[#allocation2 + $0x78] sm:$0xff] %v4881_v0 }
  0x93   : > { %399 = vst [vmem:[#allocation2 + $0x98] sm:$0xff] %v4881_v0  ;;  %400 = vst [vmem:[#allocation2 + $0xb8] sm:$0xff] %v4881_v0 }
  0x94   : > { %401 = vst [vmem:[#allocation2 + $0xd8] sm:$0xff] %v4881_v0  ;;  %402 = vst [vmem:[#allocation2 + $0xf8] sm:$0xff] %v4881_v0 }
  0x95   : > { %403 = vst [vmem:[#allocation2 + $0x118] sm:$0xff] %v4881_v0  ;;  %404 = vst [vmem:[#allocation2 + $0x138] sm:$0xff] %v4881_v0 }
  0x96   : > { %405 = vst [vmem:[#allocation2 + $0x158] sm:$0xff] %v4881_v0  ;;  %406 = vst [vmem:[#allocation2 + $0x178] sm:$0xff] %v4881_v0 }
  0x97   : > { %407 = vst [vmem:[#allocation2 + $0x198] sm:$0xff] %v4881_v0  ;;  %408 = vst [vmem:[#allocation2 + $0x1b8] sm:$0xff] %v4881_v0 }
  0x98   : > { %409 = vst [vmem:[#allocation2 + $0x1d8] sm:$0xff] %v4881_v0  ;;  %410 = vst [vmem:[#allocation2 + $0x1f8] sm:$0xff] %v4881_v0 }
  0x99   : > { %411 = vst [vmem:[#allocation2 + $0x218] sm:$0xff] %v4881_v0  ;;  %394 = vst [vmem:[#allocation2 + $0x220] sm:$0xff] %v4881_v0 }
  0x9a   : > { %395 = vst [vmem:[#allocation2 + $0x18] sm:$0xff] %v4881_v0  ;;  %412 = vst [vmem:[#allocation2 + $0x238] sm:$0xff] %v4881_v0 }
  0x9b LB: >> { %v2456_v1 = vld [vmem:[#allocation9] sm:$0xff]  ;;  %v2457_v2 = vld [vmem:[#allocation9 + $0x8] sm:$0xff]  ;;  %v2458_v3 = vld [vmem:[#allocation9 + $0x10] sm:$0xff]  ;;  %s3833_s15 = smul.u32 192, %s4869_s10  ;;  %s3922_s16 = sshll.u32 %s4869_s10, 7  ;;  %s4869_s10 = sphi %s5159_s10, %s418_s10  }
  0x9c   : >> { %v4103_v4 = vpack.c.bf16 %v2457_v2, %v2456_v1  ;;  %v2459_v5 = vld [vmem:[#allocation9 + $0x18] sm:$0xff]  ;;  %v2460_v7 = vld [vmem:[#allocation9 + $0x20] sm:$0xff]  ;;  %v2461_v8 = vld [vmem:[#allocation9 + $0x28] sm:$0xff]  ;;  %s6239_s19 = scalar_lea.vmem [#allocation3], %s3922_s16  ;;  %s3923_s16 = sshll.u32 %s4869_s10, 8 }
  0x9d   : >> { %v4107_v6 = vpack.c.bf16 %v2459_v5, %v2458_v3  ;;  %s5166_s27 = scalar_lea.vmem %s5140_s24, %s3833_s15 [#allocation4]  ;;  %v4111_v9 = vpack.c.bf16 %v2461_v8, %v2460_v7  ;;  %v2462_v10 = vld [vmem:[#allocation9 + $0x30] sm:$0xff]  ;;  %v2463_v12 = vld [vmem:[#allocation9 + $0x38] sm:$0xff]  ;;  %v5178_v16 = vld [vmem:[#allocation7] ss:$0 sm:$0xff]  ;;  %s8878_s20 = scalar_lea.vmem [#allocation2], %s3923_s16 }
  0x9e   : >> { %4104 = vmatprep.subr.bf16.mxu0 %v4103_v4  ;;  %4167 = vmatprep.subr.bf16.mxu1 %v4103_v4  ;;  %v422_v11 = vld [vmem:[%s5166_s27] sm:$0xff]  ;;  %v5170_v13 = vld [vmem:[%s5166_s27 + $0x18] sm:$0xff]  ;;  %v5173_v14 = vld [vmem:[%s5166_s27 + $0x30] sm:$0xff]  ;;  %v4115_v21 = vpack.c.bf16 %v2463_v12, %v2462_v10  ;;  %s418_s10 = sadd.s32 1, %s4869_s10  }
  0x9f   : >> { %4106 = vmatpush3.bf16.msra.mxu0 %v4103_v4  ;;  %4175 = vmatpush3.bf16.msra.mxu1 %v4103_v4  ;;  %v5176_v15 = vld [vmem:[%s5166_s27 + $0x48] sm:$0xff]  ;;  %v455_v17 = vmul.f32 %v5178_v16, %v422_v11  ;;  %v5181_v18 = vld [vmem:[#allocation7 + $0x7] ss:$0 sm:$0xff]  ;;  %v5185_v20 = vld [vmem:[#allocation7 + $0x15] ss:$0 sm:$0xff]  ;;  %p415_p10 = scmp.ge.s32.totalorder %s418_s10, 2  }
  0xa0   : >> { %4108 = vmatprep.subr.bf16.mxu0 %v4107_v6  ;;  %4168 = vmatprep.subr.bf16.mxu1 %v4107_v6  ;;  %v5183_v19 = vld [vmem:[#allocation7 + $0xe] ss:$0 sm:$0xff]  ;;  %v476_v22 = vmul.f32 %v5181_v18, %v5170_v13  ;;  %v2464_v24 = vld [vmem:[#allocation9 + $0x40] sm:$0xff]  ;;  %v2465_v25 = vld [vmem:[#allocation9 + $0x48] sm:$0xff]  ;;  %v550_v28 = vmul.f32 %v5185_v20, %v5176_v15 }
  0xa1   : >> { %v513_v23 = vmul.f32 %v5183_v19, %v5173_v14  ;;  %v5191_v26 = vld [vmem:[#allocation7 + $0x1c] ss:$0 sm:$0xff]  ;;  %v5196_v29 = vld [vmem:[%s5166_s27 + $0x60] sm:$0xff]  ;;  %v4119_v31 = vpack.c.bf16 %v2465_v25, %v2464_v24  ;;  %v2466_v32 = vld [vmem:[#allocation9 + $0x50] sm:$0xff]  ;;  %v5269_v25 = vmul.f32 %v5181_v18, %v5173_v14 }
  0xa2   : >> { %v492_v27 = vadd.f32 %v476_v22, %v455_v17  ;;  %v5198_v30 = vld [vmem:[#allocation7 + $0x23] ss:$0 sm:$0xff]  ;;  %v587_v34 = vmul.f32 %v5191_v26, %v5196_v29  ;;  %v2467_v35 = vld [vmem:[#allocation9 + $0x58] sm:$0xff]  ;;  %v5203_v36 = vld [vmem:[%s5166_s27 + $0x78] sm:$0xff]  ;;  %v463_v0 = vmul.f32 %v5178_v16, %v5196_v29 }
  0xa3   : >> { %4110 = vmatpush3.bf16.msra.mxu0 %v4107_v6  ;;  %4176 = vmatpush3.bf16.msra.mxu1 %v4107_v6  ;;  %v5205_v37 = vld [vmem:[#allocation7 + $0x2a] ss:$0 sm:$0xff]  ;;  %v624_v39 = vmul.f32 %v5198_v30, %v5203_v36  ;;  %v5210_v40 = vld [vmem:[%s5166_s27 + $0x90] sm:$0xff]  ;;  %v693_v41 = vld [vmem:[%s5166_s27 + $0x1] sm:$0xff]  ;;  %v4123_v43 = vpack.c.bf16 %v2467_v35, %v2466_v32  ;;  %v484_v1 = vmul.f32 %v5181_v18, %v5203_v36 }
  0xa4   : >> { %4112 = vmatprep.subr.bf16.mxu0 %v4111_v9  ;;  %4169 = vmatprep.subr.bf16.mxu1 %v4111_v9  ;;  %v529_v33 = vadd.f32 %v513_v23, %v492_v27  ;;  %v5213_v42 = vld [vmem:[#allocation7 + $0x1] ss:$0 sm:$0xff]  ;;  %v2468_v44 = vld [vmem:[#allocation9 + $0x60] sm:$0xff]  ;;  %v661_v46 = vmul.f32 %v5205_v37, %v5210_v40  ;;  %v5218_v49 = vld [vmem:[#allocation7 + $0x8] ss:$0 sm:$0xff]  ;;  %v521_v17 = vmul.f32 %v5183_v19, %v5210_v40 }
  0xa5   : >> { %v2469_v47 = vld [vmem:[#allocation9 + $0x68] sm:$0xff]  ;;  %v726_v51 = vmul.f32 %v5213_v42, %v693_v41  ;;  %v5222_v52 = vld [vmem:[%s5166_s27 + $0x31] sm:$0xff]  ;;  %v5224_v53 = vld [vmem:[#allocation7 + $0xf] ss:$0 sm:$0xff]  ;;  %v500_v12 = vadd.f32 %v484_v1, %v463_v0  ;;  %v5292_v14 = vmul.f32 %v5191_v26, %v5203_v36 }
  0xa6   : >> { %v566_v38 = vadd.f32 %v550_v28, %v529_v33  ;;  %v695_v48 = vld [vmem:[%s5166_s27 + $0x19] sm:$0xff]  ;;  %10246 = vst [vmem:[#allocation19_spill] sm:$0xff] %v5224_v53  ;;  %v4127_v54 = vpack.c.bf16 %v2469_v47, %v2468_v44  ;;  %v2470_v55 = vld [vmem:[#allocation9 + $0x70] sm:$0xff]  ;;  %v2471_v58 = vld [vmem:[#allocation9 + $0x78] sm:$0xff]  ;;  %v800_v62 = vmul.f32 %v5224_v53, %v5222_v52  ;;  %v5284_v33 = vmul.f32 %v5183_v19, %v5176_v15 }
  0xa7   : >> { %4114 = vmatpush3.bf16.msra.mxu0 %v4111_v9  ;;  %4177 = vmatpush3.bf16.msra.mxu1 %v4111_v9  ;;  %v763_v57 = vmul.f32 %v5218_v49, %v695_v48  ;;  %v5228_v59 = vld [vmem:[%s5166_s27 + $0x49] sm:$0xff]  ;;  %v5230_v60 = vld [vmem:[#allocation7 + $0x16] ss:$0 sm:$0xff]  ;;  %v5234_v63 = vld [vmem:[#allocation7 + $0x1d] ss:$0 sm:$0xff]  ;;  %v4131_v2 = vpack.c.bf16 %v2471_v58, %v2470_v55  ;;  %v5251_v9 = vmul.f32 %v5178_v16, %v5170_v13 }
  0xa8   : >> { %4116 = vmatprep.subr.bf16.mxu0 %v4115_v21  ;;  %4170 = vmatprep.subr.bf16.mxu1 %v4115_v21  ;;  %v603_v45 = vadd.f32 %v587_v34, %v566_v38  ;;  %10247 = vst [vmem:[#allocation20_spill] sm:$0xff] %v5228_v59  ;;  %v837_v4 = vmul.f32 %v5230_v60, %v5228_v59  ;;  %v5243_v5 = vld [vmem:[%s5166_s27 + $0x61] sm:$0xff]  ;;  %v5254_v10 = vld [vmem:[%s5166_s27 + $0x79] sm:$0xff]  ;;  %v5256_v11 = vld [vmem:[#allocation7 + $0x2b] ss:$0 sm:$0xff] }
  0xa9   : >> { %10248 = vst [vmem:[#allocation21_spill] sm:$0xff] %v5243_v5  ;;  %v5245_v6 = vld [vmem:[#allocation7 + $0x24] ss:$0 sm:$0xff]  ;;  %v874_v8 = vmul.f32 %v5234_v63, %v5243_v5  ;;  %10249 = vst [vmem:[#allocation22_spill] sm:$0xff] %v5254_v10  ;;  %v982_v24 = vld [vmem:[%s5166_s27 + $0x1a] sm:$0xff]  ;;  %v5272_v27 = vmul.f32 %v5213_v42, %v695_v48  ;;  %v5288_v34 = vmul.f32 %v5185_v20, %v5196_v29 }
  0xaa   : >> { %v640_v50 = vadd.f32 %v624_v39, %v603_v45  ;;  %v911_v23 = vmul.f32 %v5245_v6, %v5254_v10  ;;  %v980_v13 = vld [vmem:[%s5166_s27 + $0x2] sm:$0xff]  ;;  %v5275_v28 = vld [vmem:[%s5166_s27 + $0x32] sm:$0xff]  ;;  %10256 = vst [vmem:[#allocation29_spill] sm:$0xff] %v5292_v14  ;;  %v5296_v35 = vmul.f32 %v5213_v42, %v5222_v52  ;;  %v5300_v38 = vmul.f32 %v5213_v42, %v5228_v59  ;;  %v990_v29 = vld [vmem:[%s5166_s27 + $0x7a] sm:$0xff] }
  0xab   : >> { %4118 = vmatpush3.bf16.msra.mxu0 %v4115_v21  ;;  %4178 = vmatpush3.bf16.msra.mxu1 %v4115_v21  ;;  %v5261_v21 = vld [vmem:[%s5166_s27 + $0x91] sm:$0xff]  ;;  %10251 = vst [vmem:[#allocation24_spill] sm:$0xff] %v5272_v27  ;;  %10252 = vst [vmem:[#allocation25_spill] sm:$0xff] %v5275_v28  ;;  %v5280_v32 = vld [vmem:[#allocation7 + $0x2] ss:$0 sm:$0xff]  ;;  %v5318_v48 = vadd.f32 %v521_v17, %v500_v12 }
  0xac   : >> { %4120 = vmatprep.subr.bf16.mxu0 %v4119_v31  ;;  %4171 = vmatprep.subr.bf16.mxu1 %v4119_v31  ;;  %v677_v56 = vadd.f32 %v661_v46, %v640_v50  ;;  %10250 = vst [vmem:[#allocation23_spill] sm:$0xff] %v5261_v21  ;;  %10254 = vst [vmem:[#allocation27_spill] sm:$0xff] %v5280_v32  ;;  %v948_v15 = vmul.f32 %v5256_v11, %v5261_v21  ;;  %v988_v41 = vld [vmem:[%s5166_s27 + $0x62] sm:$0xff]  ;;  %v5308_v36 = vld [vmem:[#allocation7 + $0x10] ss:$0 sm:$0xff] }
  0xad   : >> { %10255 = vst [vmem:[#allocation28_spill] sm:$0xff] %v5288_v34  ;;  %10257 = vst [vmem:[#allocation30_spill] sm:$0xff] %v5296_v35  ;;  %v5310_v44 = vld [vmem:[#allocation7 + $0x17] ss:$0 sm:$0xff]  ;;  %v5312_v45 = vld [vmem:[#allocation7 + $0x1e] ss:$0 sm:$0xff]  ;;  %v5322_v50 = vmul.f32 %v5213_v42, %v5243_v5  ;;  %v5339_v0 = vmul.f32 %v5224_v53, %v5261_v21  ;;  %v5343_v1 = vmul.f32 %v5280_v32, %v5275_v28 }
  0xae   : >> { %v742_v61 = vadd.f32 %v726_v51, %v677_v56  ;;  %10258 = vst [vmem:[#allocation31_spill] sm:$0xff] %v5300_v38  ;;  %10260 = vst [vmem:[#allocation33_spill] sm:$0xff] %v5308_v36  ;;  %v5314_v46 = vld [vmem:[#allocation7 + $0x25] ss:$0 sm:$0xff]  ;;  %v5316_v47 = vld [vmem:[#allocation7 + $0x2c] ss:$0 sm:$0xff]  ;;  %v5326_v51 = vmul.f32 %v5218_v49, %v5254_v10  ;;  %v1013_v56 = vmul.f32 %v5280_v32, %v980_v13 }
  0xaf   : >> { %4122 = vmatpush3.bf16.msra.mxu0 %v4119_v31  ;;  %4179 = vmatpush3.bf16.msra.mxu1 %v4119_v31  ;;  %v5278_v31 = vld [vmem:[%s5166_s27 + $0x4a] sm:$0xff]  ;;  %10261 = vst [vmem:[#allocation34_spill] sm:$0xff] %v5316_v47  ;;  %v992_v55 = vld [vmem:[%s5166_s27 + $0x92] sm:$0xff]  ;;  %10264 = vst [vmem:[#allocation37_spill] sm:$0xff] %v5343_v1  ;;  %v5362_v13 = vmul.f32 %v5314_v46, %v990_v29  ;;  %v5380_v35 = vmul.f32 %v5280_v32, %v988_v41 }
  0xb0   : >> { %4124 = vmatprep.subr.bf16.mxu0 %v4123_v43  ;;  %4172 = vmatprep.subr.bf16.mxu1 %v4123_v43  ;;  %v779_v3 = vadd.f32 %v763_v57, %v742_v61  ;;  %10253 = vst [vmem:[#allocation26_spill] sm:$0xff] %v5278_v31  ;;  %v5331_v57 = vmul.f32 %v5280_v32, %v982_v24  ;;  %v1267_v58 = vld [vmem:[%s5166_s27 + $0x3] sm:$0xff]  ;;  %v1269_v61 = vld [vmem:[%s5166_s27 + $0x1b] sm:$0xff]  ;;  %v1279_v21 = vld [vmem:[%s5166_s27 + $0x93] sm:$0xff] }
  0xb1   : >> { %v5354_v12 = vld [vmem:[#allocation7 + $0xa] ss:$0 sm:$0xff]  ;;  %v5371_v38 = vmul.f32 %v5316_v47, %v992_v55  ;;  %v5396_v59 = vld [vmem:[#allocation7 + $0x2d] ss:$0 sm:$0xff]  ;;  %v1556_v14 = vld [vmem:[%s5166_s27 + $0x1c] sm:$0xff] }
  0xb2   : >> { %v816_v7 = vadd.f32 %v800_v62, %v779_v3  ;;  %10262 = vst [vmem:[#allocation35_spill] sm:$0xff] %v5331_v57  ;;  %v5335_v62 = vld [vmem:[#allocation7 + $0x3] ss:$0 sm:$0xff]  ;;  %10266 = vst [vmem:[#allocation39_spill] sm:$0xff] %v5354_v12  ;;  %v5421_v34 = vld [vmem:[#allocation7 + $0x4] ss:$0 sm:$0xff] }
  0xb3   : >> { %4126 = vmatpush3.bf16.msra.mxu0 %v4123_v43  ;;  %4180 = vmatpush3.bf16.msra.mxu1 %v4123_v43  ;;  %v5306_v43 = vld [vmem:[#allocation7 + $0x9] ss:$0 sm:$0xff]  ;;  %10263 = vst [vmem:[#allocation36_spill] sm:$0xff] %v5335_v62  ;;  %v5388_v10 = vmul.f32 %v5335_v62, %v1269_v61  ;;  %10275 = vst [vmem:[#allocation48_spill] sm:$0xff] %v5396_v59 }
  0xb4   : >> { %4128 = vmatprep.subr.bf16.mxu0 %v4127_v54  ;;  %4173 = vmatprep.subr.bf16.mxu1 %v4127_v54  ;;  %v853_v22 = vadd.f32 %v837_v4, %v816_v7  ;;  %10259 = vst [vmem:[#allocation32_spill] sm:$0xff] %v5306_v43  ;;  %v1050_v3 = vmul.f32 %v5306_v43, %v982_v24  ;;  %v1271_v7 = vld [vmem:[%s5166_s27 + $0x33] sm:$0xff]  ;;  %v5364_v24 = vld [vmem:[#allocation7 + $0x11] ss:$0 sm:$0xff]  ;;  %v1275_v1 = vld [vmem:[%s5166_s27 + $0x63] sm:$0xff] }
  0xb5   : >> { %v1087_v4 = vmul.f32 %v5308_v36, %v5275_v28  ;;  %10267 = vst [vmem:[#allocation40_spill] sm:$0xff] %v5364_v24  ;;  %v1277_v28 = vld [vmem:[%s5166_s27 + $0x7b] sm:$0xff]  ;;  %10272 = vst [vmem:[#allocation45_spill] sm:$0xff] %v5388_v10  ;;  %v5412_v10 = vld [vmem:[%s5166_s27 + $0xa8] sm:$0xff]  ;;  %v5442_v53 = vmul.f32 %v5335_v62, %v1275_v1 }
  0xb6   : >> { %v890_v39 = vadd.f32 %v874_v8, %v853_v22  ;;  %v1273_v8 = vld [vmem:[%s5166_s27 + $0x4b] sm:$0xff]  ;;  %v1124_v22 = vmul.f32 %v5310_v44, %v5278_v31  ;;  %10276 = vst [vmem:[#allocation49_spill] sm:$0xff] %v5412_v10  ;;  %10278 = vst [vmem:[#allocation51_spill] sm:$0xff] %v5421_v34 }
  0xb7   : >> { %4130 = vmatpush3.bf16.msra.mxu0 %v4127_v54  ;;  %4181 = vmatpush3.bf16.msra.mxu1 %v4127_v54  ;;  %v5394_v5 = vmul.f32 %v5335_v62, %v1273_v8  ;;  %10281 = vst [vmem:[#allocation54_spill] sm:$0xff] %v5442_v53  ;;  %v5513_v53 = vld [vmem:[#allocation7 + $0xc] ss:$0 sm:$0xff] }
  0xb8   : >> { %4132 = vmatprep.subr.bf16.mxu0 %v4131_v2  ;;  %4174 = vmatprep.subr.bf16.mxu1 %v4131_v2  ;;  %v927_v54 = vadd.f32 %v911_v23, %v890_v39  ;;  %v5359_v23 = vmul.f32 %v5312_v45, %v988_v41  ;;  %v5366_v39 = vld [vmem:[#allocation7 + $0x18] ss:$0 sm:$0xff]  ;;  %v5399_v41 = vmul.f32 %v5354_v12, %v1269_v61 }
  0xb9   : >> { %10268 = vst [vmem:[#allocation41_spill] sm:$0xff] %v5366_v39  ;;  %10274 = vst [vmem:[#allocation47_spill] sm:$0xff] %v5394_v5  ;;  %v5415_v5 = vld [vmem:[%s5166_s27 + $0xc0] sm:$0xff] }
  0xba   : >> { %v964_v17 = vadd.f32 %v948_v15, %v927_v54  ;;  %v5375_v15 = vmul.f32 %v5335_v62, %v1267_v58  ;;  %v5377_v54 = vld [vmem:[#allocation7 + $0x26] ss:$0 sm:$0xff]  ;;  %v5391_v58 = vmul.f32 %v5335_v62, %v1271_v7  ;;  %10277 = vst [vmem:[#allocation50_spill] sm:$0xff] %v5415_v5  ;;  %10300 = vst [vmem:[#allocation73_spill] sm:$0xff] %v5513_v53 }
  0xbb   : >> { %4134 = vmatpush3.bf16.msra.mxu0 %v4131_v2  ;;  %4182 = vmatpush3.bf16.msra.mxu1 %v4131_v2  ;;  %v5347_v2 = vmul.f32 %v5280_v32, %v5278_v31  ;;  %10270 = vst [vmem:[#allocation43_spill] sm:$0xff] %v5377_v54  ;;  %v5383_v31 = vmul.f32 %v5306_v43, %v990_v29  ;;  %v1562_v62 = vld [vmem:[%s5166_s27 + $0x64] sm:$0xff] }
  0xbc   : >> { %v1029_v57 = vadd.f32 %v1013_v56, %v964_v17  ;;  %10273 = vst [vmem:[#allocation46_spill] sm:$0xff] %v5391_v58  ;;  %v5402_v29 = vmul.f32 %v5364_v24, %v1271_v7  ;;  %v5405_v56 = vmul.f32 %v5366_v39, %v1273_v8  ;;  %v1554_v58 = vld [vmem:[%s5166_s27 + $0x4] sm:$0xff]  ;;  %v5418_v61 = vmul.f32 %v5377_v54, %v1277_v28  ;;  %v5424_v7 = vld [vmem:[%s5166_s27 + $0xd8] sm:$0xff] }
  0xbd   : >> { %10265 = vst [vmem:[#allocation38_spill] sm:$0xff] %v5347_v2  ;;  %v5368_v2 = vld [vmem:[#allocation7 + $0x1f] ss:$0 sm:$0xff]  ;;  %10271 = vst [vmem:[#allocation44_spill] sm:$0xff] %v5383_v31  ;;  %v558_v8 = vmul.f32 %v5185_v20, %v5412_v10  ;;  %v595_v43 = vmul.f32 %v5191_v26, %v5415_v5  ;;  %v5431_v32 = vmul.f32 %v5396_v59, %v1279_v21  ;;  %v5447_v5 = vld [vmem:[#allocation7 + $0xb] ss:$0 sm:$0xff] }
  0xbe   : >> { %10269 = vst [vmem:[#allocation42_spill] sm:$0xff] %v5368_v2  ;;  %v5408_v17 = vmul.f32 %v5368_v2, %v1275_v1  ;;  %v1066_v27 = vadd.f32 %v1050_v3, %v1029_v57  ;;  %10279 = vst [vmem:[#allocation52_spill] sm:$0xff] %v5424_v7  ;;  %v1558_v2 = vld [vmem:[%s5166_s27 + $0x34] sm:$0xff]  ;;  %v1560_v57 = vld [vmem:[%s5166_s27 + $0x4c] sm:$0xff]  ;;  %v5439_v54 = vmul.f32 %v5308_v36, %v992_v55 }
  0xbf   : >> { %v5436_v3 = vld [vmem:[%s5166_s27 + $0xf0] sm:$0xff]  ;;  %v5445_v31 = vmul.f32 %v5354_v12, %v1277_v28  ;;  %10283 = vst [vmem:[#allocation56_spill] sm:$0xff] %v5447_v5  ;;  %v5451_v39 = vld [vmem:[#allocation7 + $0x19] ss:$0 sm:$0xff]  ;;  %v574_v47 = vadd.f32 %v558_v8, %v5318_v48  ;;  %v632_v55 = vmul.f32 %v5198_v30, %v5424_v7  ;;  %v5457_v1 = vmul.f32 %v5364_v24, %v1279_v21  ;;  %v5468_v12 = vld [vmem:[#allocation7 + $0x27] ss:$0 sm:$0xff] }
  0xc0   : >> { %10280 = vst [vmem:[#allocation53_spill] sm:$0xff] %v5436_v3  ;;  %v1103_v10 = vadd.f32 %v1087_v4, %v1066_v27  ;;  %v5449_v59 = vld [vmem:[#allocation7 + $0x12] ss:$0 sm:$0xff]  ;;  %10285 = vst [vmem:[#allocation58_spill] sm:$0xff] %v5451_v39  ;;  %v5461_v28 = vmul.f32 %v5421_v34, %v1554_v58  ;;  %v5464_v27 = vmul.f32 %v5421_v34, %v1556_v14  ;;  %v5466_v4 = vld [vmem:[#allocation7 + $0x20] ss:$0 sm:$0xff] }
  0xc1   : >> { %10282 = vst [vmem:[#allocation55_spill] sm:$0xff] %v5445_v31  ;;  %10284 = vst [vmem:[#allocation57_spill] sm:$0xff] %v5449_v59  ;;  %v494_v48 = vadd.f32 %v5269_v25, %v5251_v9  ;;  %v5474_v21 = vmul.f32 %v5198_v30, %v5210_v40  ;;  %v1564_v58 = vld [vmem:[%s5166_s27 + $0x7c] sm:$0xff]  ;;  %v1566_v7 = vld [vmem:[%s5166_s27 + $0x94] sm:$0xff]  ;;  %v669_v36 = vmul.f32 %v5205_v37, %v5436_v3 }
  0xc2   : >> { %10286 = vst [vmem:[#allocation59_spill] sm:$0xff] %v5457_v1  ;;  %10287 = vst [vmem:[#allocation60_spill] sm:$0xff] %v5464_v27  ;;  %v1140_v8 = vadd.f32 %v1124_v22, %v1103_v10  ;;  %v5479_v27 = vmul.f32 %v5421_v34, %v1558_v2  ;;  %v5481_v24 = vld [vmem:[#allocation7 + $0x2e] ss:$0 sm:$0xff]  ;;  %v611_v1 = vadd.f32 %v595_v43, %v574_v47  ;;  %v1841_v22 = vld [vmem:[%s5166_s27 + $0x5] sm:$0xff] }
  0xc3   : >> { %10288 = vst [vmem:[#allocation61_spill] sm:$0xff] %v5466_v4  ;;  %10289 = vst [vmem:[#allocation62_spill] sm:$0xff] %v5468_v12  ;;  %v5486_v9 = vmul.f32 %v5421_v34, %v1560_v57  ;;  %v5489_v40 = vmul.f32 %v5447_v5, %v1556_v14  ;;  %v5492_v10 = vmul.f32 %v5449_v59, %v1558_v2  ;;  %v1847_v14 = vld [vmem:[%s5166_s27 + $0x4d] sm:$0xff]  ;;  %v5508_v31 = vld [vmem:[#allocation7 + $0x5] ss:$0 sm:$0xff] }
  0xc4   : >> { %10290 = vst [vmem:[#allocation63_spill] sm:$0xff] %v5474_v21  ;;  %10291 = vst [vmem:[#allocation64_spill] sm:$0xff] %v5479_v27  ;;  %v5495_v25 = vmul.f32 %v5451_v39, %v1560_v57  ;;  %v1843_v27 = vld [vmem:[%s5166_s27 + $0x1d] sm:$0xff]  ;;  %v1177_v43 = vadd.f32 %v5359_v23, %v1140_v8  ;;  %v5501_v47 = vmul.f32 %v5466_v4, %v1562_v62  ;;  %v5517_v23 = vld [vmem:[#allocation7 + $0x1a] ss:$0 sm:$0xff] }
  0xc5   : >> { %10292 = vst [vmem:[#allocation65_spill] sm:$0xff] %v5481_v24  ;;  %10293 = vst [vmem:[#allocation66_spill] sm:$0xff] %v5486_v9  ;;  %v5504_v21 = vmul.f32 %v5468_v12, %v1564_v58  ;;  %v1845_v9 = vld [vmem:[%s5166_s27 + $0x35] sm:$0xff]  ;;  %v648_v2 = vadd.f32 %v632_v55, %v611_v1  ;;  %v5511_v57 = vmul.f32 %v5481_v24, %v1566_v7  ;;  %v5532_v24 = vld [vmem:[#allocation7 + $0x28] ss:$0 sm:$0xff] }
  0xc6   : >> { %10294 = vst [vmem:[#allocation67_spill] sm:$0xff] %v5492_v10  ;;  %10295 = vst [vmem:[#allocation68_spill] sm:$0xff] %v5495_v25  ;;  %v5515_v25 = vld [vmem:[#allocation7 + $0x13] ss:$0 sm:$0xff]  ;;  %v5520_v8 = vmul.f32 %v5421_v34, %v1562_v62  ;;  %v5526_v55 = vmul.f32 %v5449_v59, %v1566_v7  ;;  %v1214_v1 = vadd.f32 %v5362_v13, %v1177_v43  ;;  %v5535_v12 = vld [vmem:[%s5166_s27 + $0xa9] sm:$0xff] }
  0xc7   : >> { %10296 = vst [vmem:[#allocation69_spill] sm:$0xff] %v5501_v47  ;;  %10297 = vst [vmem:[#allocation70_spill] sm:$0xff] %v5504_v21  ;;  %v5523_v21 = vmul.f32 %v5447_v5, %v1564_v58  ;;  %v5530_v47 = vld [vmem:[#allocation7 + $0x21] ss:$0 sm:$0xff]  ;;  %v685_v10 = vadd.f32 %v669_v36, %v648_v2  ;;  %v5538_v62 = vadd.f32 %v5284_v33, %v494_v48  ;;  %v423_v33 = vld [vmem:[%s5166_s27 + $0x8] sm:$0xff] }
  0xc8   : >> { %10298 = vst [vmem:[#allocation71_spill] sm:$0xff] %v5508_v31  ;;  %10299 = vst [vmem:[#allocation72_spill] sm:$0xff] %v5511_v57  ;;  %v1849_v57 = vld [vmem:[%s5166_s27 + $0x65] sm:$0xff]  ;;  %v5542_v7 = vmul.f32 %v5218_v49, %v5222_v52  ;;  %v1851_v58 = vld [vmem:[%s5166_s27 + $0x7d] sm:$0xff]  ;;  %v5546_v13 = vmul.f32 %v5508_v31, %v1841_v22  ;;  %v5549_v43 = vmul.f32 %v5508_v31, %v1843_v27 }
  0xc9   : >> { %10301 = vst [vmem:[#allocation74_spill] sm:$0xff] %v5515_v25  ;;  %10302 = vst [vmem:[#allocation75_spill] sm:$0xff] %v5517_v23  ;;  %v5552_v36 = vmul.f32 %v5508_v31, %v1845_v9  ;;  %v5555_v2 = vmul.f32 %v5508_v31, %v1847_v14  ;;  %v5559_v48 = vld [vmem:[%s5166_s27 + $0x20] sm:$0xff]  ;;  %v1251_v52 = vadd.f32 %v5371_v38, %v1214_v1  ;;  %v5590_v1 = vld [vmem:[%s5166_s27 + $0x50] sm:$0xff] }
  0xca   : >> { %10303 = vst [vmem:[#allocation76_spill] sm:$0xff] %v5520_v8  ;;  %10304 = vst [vmem:[#allocation77_spill] sm:$0xff] %v5523_v21  ;;  %v5563_v22 = vmul.f32 %v5513_v53, %v1843_v27  ;;  %v5579_v21 = vmul.f32 %v5517_v23, %v1847_v14  ;;  %v5582_v38 = vmul.f32 %v5530_v47, %v1849_v57  ;;  %v5594_v8 = vld [vmem:[#allocation7 + $0x6] ss:$0 sm:$0xff]  ;;  %v5597_v14 = vld [vmem:[%s5166_s27 + $0xd9] sm:$0xff] }
  0xcb   : >> { %10305 = vst [vmem:[#allocation78_spill] sm:$0xff] %v5526_v55  ;;  %10306 = vst [vmem:[#allocation79_spill] sm:$0xff] %v5530_v47  ;;  %v750_v55 = vadd.f32 %v5322_v50, %v685_v10  ;;  %v5585_v27 = vmul.f32 %v5532_v24, %v1851_v58  ;;  %v1316_v50 = vadd.f32 %v5375_v15, %v1251_v52  ;;  %v2128_v10 = vld [vmem:[%s5166_s27 + $0x6] sm:$0xff] }
  0xcc   : >> { %10307 = vst [vmem:[#allocation80_spill] sm:$0xff] %v5532_v24  ;;  %10308 = vst [vmem:[#allocation81_spill] sm:$0xff] %v5535_v12  ;;  %v456_v5 = vmul.f32 %v5178_v16, %v423_v33  ;;  %v477_v34 = vmul.f32 %v5181_v18, %v5559_v48  ;;  %v5609_v15 = vmul.f32 %v5508_v31, %v1849_v57  ;;  %v2132_v33 = vld [vmem:[%s5166_s27 + $0x36] sm:$0xff] }
  0xcd   : >> { %10309 = vst [vmem:[#allocation82_spill] sm:$0xff] %v5538_v62  ;;  %10310 = vst [vmem:[#allocation83_spill] sm:$0xff] %v5542_v7  ;;  %v5566_v7 = vmul.f32 %v5515_v25, %v1845_v9  ;;  %v1853_v62 = vld [vmem:[%s5166_s27 + $0x95] sm:$0xff]  ;;  %v845_v9 = vmul.f32 %v5230_v60, %v5535_v12  ;;  %v787_v59 = vadd.f32 %v5326_v51, %v750_v55  ;;  %v2130_v55 = vld [vmem:[%s5166_s27 + $0x1e] sm:$0xff] }
  0xce   : >> { %10311 = vst [vmem:[#allocation84_spill] sm:$0xff] %v5549_v43  ;;  %10312 = vst [vmem:[#allocation85_spill] sm:$0xff] %v5552_v36  ;;  %v5568_v43 = vld [vmem:[#allocation7 + $0x2f] ss:$0 sm:$0xff]  ;;  %v5571_v36 = vld [vmem:[%s5166_s27 + $0xc1] sm:$0xff]  ;;  %v1353_v51 = vadd.f32 %v5399_v41, %v1316_v50  ;;  %v5624_v57 = vmul.f32 %v5594_v8, %v2128_v10  ;;  %v919_v41 = vmul.f32 %v5245_v6, %v5597_v14 }
  0xcf   : >> { %10313 = vst [vmem:[#allocation86_spill] sm:$0xff] %v5555_v2  ;;  %10314 = vst [vmem:[#allocation87_spill] sm:$0xff] %v5559_v48  ;;  %v5575_v2 = vld [vmem:[%s5166_s27 + $0x38] sm:$0xff]  ;;  %v5604_v12 = vmul.f32 %v5568_v43, %v1853_v62  ;;  %v824_v48 = vadd.f32 %v5339_v0, %v787_v59  ;;  %v5631_v50 = vmul.f32 %v5513_v53, %v1851_v58  ;;  %v5640_v0 = vld [vmem:[#allocation7 + $0x14] ss:$0 sm:$0xff] }
  0xd0   : >> { %10315 = vst [vmem:[#allocation88_spill] sm:$0xff] %v5568_v43  ;;  %10316 = vst [vmem:[#allocation89_spill] sm:$0xff] %v5571_v36  ;;  %v514_v52 = vmul.f32 %v5183_v19, %v5575_v2  ;;  %v5634_v59 = vmul.f32 %v5515_v25, %v1853_v62  ;;  %v5642_v10 = vld [vmem:[#allocation7 + $0x1b] ss:$0 sm:$0xff]  ;;  %v5650_v62 = vmul.f32 %v5594_v8, %v2130_v55 }
  0xd1   : >> { %10317 = vst [vmem:[#allocation90_spill] sm:$0xff] %v5575_v2  ;;  %10318 = vst [vmem:[#allocation91_spill] sm:$0xff] %v5579_v21  ;;  %v493_v21 = vadd.f32 %v477_v34, %v456_v5  ;;  %v5637_v5 = vld [vmem:[%s5166_s27 + $0x68] sm:$0xff]  ;;  %v1390_v34 = vadd.f32 %v5402_v29, %v1353_v51  ;;  %v861_v2 = vadd.f32 %v845_v9, %v824_v48  ;;  %v2138_v9 = vld [vmem:[%s5166_s27 + $0x7e] sm:$0xff] }
  0xd2   : >> { %10319 = vst [vmem:[#allocation92_spill] sm:$0xff] %v5582_v38  ;;  %10320 = vst [vmem:[#allocation93_spill] sm:$0xff] %v5585_v27  ;;  %v882_v27 = vmul.f32 %v5234_v63, %v5571_v36  ;;  %v5617_v38 = vld [vmem:[%s5166_s27 + $0xf1] sm:$0xff]  ;;  %v551_v36 = vmul.f32 %v5185_v20, %v5590_v1  ;;  %v588_v58 = vmul.f32 %v5191_v26, %v5637_v5 }
  0xd3   : >> { %10321 = vst [vmem:[#allocation94_spill] sm:$0xff] %v5590_v1  ;;  %10322 = vst [vmem:[#allocation95_spill] sm:$0xff] %v5594_v8  ;;  %v5644_v1 = vld [vmem:[#allocation7 + $0x22] ss:$0 sm:$0xff]  ;;  %v956_v51 = vmul.f32 %v5256_v11, %v5617_v38  ;;  %v1427_v48 = vadd.f32 %v5405_v56, %v1390_v34  ;;  %v5675_v31 = vmul.f32 %v5640_v0, %v2132_v33 }
  0xd4   : >> { %10323 = vst [vmem:[#allocation96_spill] sm:$0xff] %v5597_v14  ;;  %10324 = vst [vmem:[#allocation97_spill] sm:$0xff] %v5604_v12  ;;  %v2134_v12 = vld [vmem:[%s5166_s27 + $0x4e] sm:$0xff]  ;;  %v530_v14 = vadd.f32 %v514_v52, %v493_v21  ;;  %v5661_v21 = vld [vmem:[%s5166_s27 + $0x80] sm:$0xff] }
  0xd5   : >> { %10325 = vst [vmem:[#allocation98_spill] sm:$0xff] %v5609_v15  ;;  %10326 = vst [vmem:[#allocation99_spill] sm:$0xff] %v5617_v38  ;;  %v5626_v15 = vld [vmem:[#allocation7 + $0xd] ss:$0 sm:$0xff]  ;;  %v5656_v29 = vmul.f32 %v5594_v8, %v2134_v12  ;;  %v5665_v52 = vld [vmem:[#allocation7 + $0x29] ss:$0 sm:$0xff]  ;;  %v5678_v56 = vmul.f32 %v5642_v10, %v2134_v12 }
  0xd6   : >> { %10327 = vst [vmem:[#allocation100_spill] sm:$0xff] %v5624_v57  ;;  %10328 = vst [vmem:[#allocation101_spill] sm:$0xff] %v5626_v15  ;;  %v567_v25 = vadd.f32 %v551_v36, %v530_v14  ;;  %v5672_v53 = vmul.f32 %v5626_v15, %v2130_v55  ;;  %v5684_v57 = vld [vmem:[%s5166_s27 + $0x98] sm:$0xff]  ;;  %v694_v36 = vld [vmem:[%s5166_s27 + $0x9] sm:$0xff] }
  0xd7   : >> { %10329 = vst [vmem:[#allocation102_spill] sm:$0xff] %v5631_v50  ;;  %10330 = vst [vmem:[#allocation103_spill] sm:$0xff] %v5634_v59  ;;  %v2136_v50 = vld [vmem:[%s5166_s27 + $0x66] sm:$0xff]  ;;  %v5653_v59 = vmul.f32 %v5594_v8, %v2132_v33 }
  0xd8   : >> { %10331 = vst [vmem:[#allocation104_spill] sm:$0xff] %v5637_v5  ;;  %10332 = vst [vmem:[#allocation105_spill] sm:$0xff] %v5650_v62  ;;  %v5667_v62 = vld [vmem:[#allocation7 + $0x30] ss:$0 sm:$0xff]  ;;  %v5681_v34 = vmul.f32 %v5644_v1, %v2136_v50  ;;  %v5695_v33 = vld [vmem:[%s5166_s27 + $0xc2] sm:$0xff]  ;;  %v604_v12 = vadd.f32 %v588_v58, %v567_v25 }
  0xd9   : >> { %10333 = vst [vmem:[#allocation106_spill] sm:$0xff] %v5653_v59  ;;  %10334 = vst [vmem:[#allocation107_spill] sm:$0xff] %v5656_v29  ;;  %v898_v59 = vadd.f32 %v882_v27, %v861_v2  ;;  %v625_v29 = vmul.f32 %v5198_v30, %v5661_v21  ;;  %v1464_v2 = vadd.f32 %v5408_v17, %v1427_v48  ;;  %v5689_v27 = vld [vmem:[%s5166_s27 + $0x96] sm:$0xff]  ;;  %v5692_v55 = vld [vmem:[%s5166_s27 + $0xaa] sm:$0xff] }
  0xda   : >> { %10335 = vst [vmem:[#allocation108_spill] sm:$0xff] %v5661_v21  ;;  %10336 = vst [vmem:[#allocation109_spill] sm:$0xff] %v5672_v53  ;;  %v5707_v17 = vmul.f32 %v5594_v8, %v2136_v50  ;;  %v5717_v48 = vld [vmem:[%s5166_s27 + $0xda] sm:$0xff]  ;;  %v5723_v53 = vld [vmem:[%s5166_s27 + $0xab] sm:$0xff]  ;;  %v727_v50 = vmul.f32 %v5213_v42, %v694_v36 }
  0xdb   : >> { %10337 = vst [vmem:[#allocation110_spill] sm:$0xff] %v5675_v31  ;;  %10338 = vst [vmem:[#allocation111_spill] sm:$0xff] %v5678_v56  ;;  %v935_v14 = vadd.f32 %v919_v41, %v898_v59  ;;  %v662_v56 = vmul.f32 %v5205_v37, %v5684_v57  ;;  %v5704_v31 = vmul.f32 %v5667_v62, %v5689_v27  ;;  %v5713_v59 = vld [vmem:[%s5166_s27 + $0x21] sm:$0xff] }
  0xdc   : >> { %10339 = vst [vmem:[#allocation112_spill] sm:$0xff] %v5681_v34  ;;  %10340 = vst [vmem:[#allocation113_spill] sm:$0xff] %v5684_v57  ;;  %v5700_v34 = vmul.f32 %v5665_v52, %v2138_v9  ;;  %v5710_v41 = vmul.f32 %v5626_v15, %v2138_v9  ;;  %v1501_v25 = vadd.f32 %v5418_v61, %v1464_v2  ;;  %v5739_v2 = vld [vmem:[%s5166_s27 + $0x39] sm:$0xff] }
  0xdd   : >> { %10341 = vst [vmem:[#allocation114_spill] sm:$0xff] %v5692_v55  ;;  %10342 = vst [vmem:[#allocation115_spill] sm:$0xff] %v5695_v33  ;;  %v972_v58 = vadd.f32 %v956_v51, %v935_v14  ;;  %v5728_v9 = vmul.f32 %v5185_v20, %v5436_v3  ;;  %v1132_v61 = vmul.f32 %v5310_v44, %v5692_v55  ;;  %v5744_v14 = vld [vmem:[%s5166_s27 + $0xc3] sm:$0xff]  ;;  %v5767_v3 = vld [vmem:[%s5166_s27 + $0x51] sm:$0xff] }
  0xde   : >> { %10343 = vst [vmem:[#allocation116_spill] sm:$0xff] %v5700_v34  ;;  %10344 = vst [vmem:[#allocation117_spill] sm:$0xff] %v5704_v31  ;;  %v5720_v34 = vld [vmem:[%s5166_s27 + $0xf2] sm:$0xff]  ;;  %v641_v31 = vadd.f32 %v625_v29, %v604_v12  ;;  %v1169_v51 = vmul.f32 %v5312_v45, %v5695_v33  ;;  %v1538_v29 = vadd.f32 %v5431_v32, %v1501_v25  ;;  %v5747_v12 = vld [vmem:[%s5166_s27 + $0xdb] sm:$0xff] }
  0xdf   : >> { %10345 = vst [vmem:[#allocation118_spill] sm:$0xff] %v5707_v17  ;;  %10346 = vst [vmem:[#allocation119_spill] sm:$0xff] %v5710_v41  ;;  %v5732_v41 = vmul.f32 %v5230_v60, %v5617_v38  ;;  %v1037_v36 = vadd.f32 %v5380_v35, %v972_v58  ;;  %v764_v38 = vmul.f32 %v5218_v49, %v5713_v59  ;;  %v10358_v25 = vld [vmem:[#allocation34_spill] sm:$0xff]  ;;  %v10359_v58 = vld [vmem:[#allocation41_spill] sm:$0xff] }
  0xe0   : >> { %10347 = vst [vmem:[#allocation120_spill] sm:$0xff] %v5713_v59  ;;  %10348 = vst [vmem:[#allocation121_spill] sm:$0xff] %v5717_v48  ;;  %v5756_v33 = vmul.f32 %v5310_v44, %v5720_v34  ;;  %v1206_v32 = vmul.f32 %v5314_v46, %v5717_v48  ;;  %v1243_v35 = vmul.f32 %v10358_v25, %v5720_v34  ;;  %v5772_v17 = vld [vmem:[%s5166_s27 + $0xac] sm:$0xff]  ;;  %v5778_v15 = vld [vmem:[%s5166_s27 + $0xdc] sm:$0xff] }
  0xe1   : >> { %10349 = vst [vmem:[#allocation122_spill] sm:$0xff] %v5720_v34  ;;  %10350 = vst [vmem:[#allocation123_spill] sm:$0xff] %v5723_v53  ;;  %v5764_v55 = vmul.f32 %v10359_v58, %v5723_v53  ;;  %v10365_v34 = vld [vmem:[#allocation19_spill] sm:$0xff]  ;;  %v10367_v25 = vld [vmem:[#allocation42_spill] sm:$0xff] }
  0xe2   : >> { %10351 = vst [vmem:[#allocation124_spill] sm:$0xff] %v5728_v9  ;;  %10352 = vst [vmem:[#allocation125_spill] sm:$0xff] %v5732_v41  ;;  %v5750_v41 = vld [vmem:[%s5166_s27 + $0xf3] sm:$0xff]  ;;  %v678_v9 = vadd.f32 %v662_v56, %v641_v31  ;;  %v1603_v31 = vadd.f32 %v5461_v28, %v1538_v29  ;;  %v10361_v56 = vld [vmem:[#allocation44_spill] sm:$0xff]  ;;  %v801_v8 = vmul.f32 %v10365_v34, %v5739_v2 }
  0xe3   : >> { %10353 = vst [vmem:[#allocation126_spill] sm:$0xff] %v5739_v2  ;;  %10354 = vst [vmem:[#allocation127_spill] sm:$0xff] %v5744_v14  ;;  %v1074_v59 = vadd.f32 %v10361_v56, %v1037_v36  ;;  %v5784_v53 = vmul.f32 %v10359_v58, %v5750_v41  ;;  %v5788_v28 = vmul.f32 %v10367_v25, %v5744_v14  ;;  %v10368_v29 = vld [vmem:[#allocation43_spill] sm:$0xff]  ;;  %v10369_v56 = vld [vmem:[#allocation48_spill] sm:$0xff] }
  0xe4   : >> { %10355 = vst [vmem:[#allocation128_spill] sm:$0xff] %v5747_v12  ;;  %10356 = vst [vmem:[#allocation129_spill] sm:$0xff] %v5750_v41  ;;  %v743_v48 = vadd.f32 %v727_v50, %v678_v9  ;;  %v5792_v36 = vmul.f32 %v10368_v29, %v5747_v12  ;;  %v5796_v50 = vmul.f32 %v10369_v56, %v5750_v41 }
  0xe5   : >> { %10357 = vst [vmem:[#allocation130_spill] sm:$0xff] %v5756_v33  ;;  %10360 = vst [vmem:[#allocation131_spill] sm:$0xff] %v5767_v3  ;;  %v5775_v33 = vld [vmem:[%s5166_s27 + $0xc4] sm:$0xff]  ;;  %v1640_v9 = vadd.f32 %v5489_v40, %v1603_v31  ;;  %v1111_v2 = vadd.f32 %v5439_v54, %v1074_v59  ;;  %v838_v14 = vmul.f32 %v5230_v60, %v5767_v3  ;;  %v10374_v54 = vld [vmem:[#allocation62_spill] sm:$0xff] }
  0xe6   : >> { %10362 = vst [vmem:[#allocation44_spill] sm:$0xff] %v5772_v17  ;;  %10363 = vst [vmem:[#allocation132_spill] sm:$0xff] %v5775_v33  ;;  %v780_v58 = vadd.f32 %v764_v38, %v743_v48  ;;  %v5807_v12 = vmul.f32 %v5451_v39, %v5772_v17  ;;  %v5815_v40 = vmul.f32 %v5466_v4, %v5775_v33  ;;  %v5822_v38 = vld [vmem:[%s5166_s27 + $0x69] sm:$0xff]  ;;  %v10377_v48 = vld [vmem:[#allocation67_spill] sm:$0xff] }
  0xe7   : >> { %10364 = vst [vmem:[#allocation133_spill] sm:$0xff] %v5778_v15  ;;  %10366 = vst [vmem:[#allocation19_spill] sm:$0xff] %v5784_v53  ;;  %v5801_v53 = vld [vmem:[%s5166_s27 + $0xf4] sm:$0xff]  ;;  %v5819_v59 = vmul.f32 %v10374_v54, %v5778_v15  ;;  %v1677_v31 = vadd.f32 %v10377_v48, %v1640_v9  ;;  %v1148_v3 = vadd.f32 %v1132_v61, %v1111_v2  ;;  %v10381_v15 = vld [vmem:[#allocation65_spill] sm:$0xff] }
  0xe8   : >> { %10370 = vst [vmem:[#allocation134_spill] sm:$0xff] %v5801_v53  ;;  %10371 = vst [vmem:[#allocation135_spill] sm:$0xff] %v5807_v12  ;;  %v5811_v41 = vmul.f32 %v5451_v39, %v5801_v53  ;;  %v5826_v17 = vld [vmem:[%s5166_s27 + $0xad] sm:$0xff]  ;;  %v5829_v12 = vld [vmem:[%s5166_s27 + $0x81] sm:$0xff]  ;;  %v875_v33 = vmul.f32 %v5234_v63, %v5822_v38  ;;  %v464_v2 = vmul.f32 %v5178_v16, %v5637_v5 }
  0xe9   : >> { %10373 = vst [vmem:[#allocation137_spill] sm:$0xff] %v5815_v40  ;;  %10375 = vst [vmem:[#allocation138_spill] sm:$0xff] %v5819_v59  ;;  %v5834_v40 = vld [vmem:[%s5166_s27 + $0xb0] sm:$0xff]  ;;  %v5838_v59 = vmul.f32 %v10381_v15, %v5801_v53  ;;  %v5841_v54 = vld [vmem:[%s5166_s27 + $0xc5] sm:$0xff]  ;;  %v912_v61 = vmul.f32 %v5245_v6, %v5829_v12  ;;  %v1185_v48 = vadd.f32 %v1169_v51, %v1148_v3 }
  0xea   : >> { %10372 = vst [vmem:[#allocation136_spill] sm:$0xff] %v5811_v41  ;;  %10376 = vst [vmem:[#allocation139_spill] sm:$0xff] %v5822_v38  ;;  %v817_v41 = vadd.f32 %v801_v8, %v780_v58  ;;  %v485_v8 = vmul.f32 %v5181_v18, %v5661_v21  ;;  %v10384_v58 = vld [vmem:[#allocation68_spill] sm:$0xff]  ;;  %v5854_v39 = vld [vmem:[%s5166_s27 + $0xf5] sm:$0xff]  ;;  %v522_v15 = vmul.f32 %v5183_v19, %v5684_v57 }
  0xeb   : >> { %10378 = vst [vmem:[#allocation67_spill] sm:$0xff] %v5826_v17  ;;  %10379 = vst [vmem:[#allocation140_spill] sm:$0xff] %v5829_v12  ;;  %v1714_v9 = vadd.f32 %v10384_v58, %v1677_v31  ;;  %v5851_v4 = vld [vmem:[%s5166_s27 + $0xdd] sm:$0xff]  ;;  %v5863_v16 = vmul.f32 %v5517_v23, %v5826_v17  ;;  %v5867_v18 = vmul.f32 %v5517_v23, %v5854_v39  ;;  %v981_v51 = vld [vmem:[%s5166_s27 + $0xa] sm:$0xff] }
  0xec   : >> { %10380 = vst [vmem:[#allocation141_spill] sm:$0xff] %v5834_v40  ;;  %10382 = vst [vmem:[#allocation142_spill] sm:$0xff] %v5838_v59  ;;  %v854_v53 = vadd.f32 %v838_v14, %v817_v41  ;;  %v5857_v59 = vld [vmem:[%s5166_s27 + $0xc8] sm:$0xff]  ;;  %v5870_v3 = vld [vmem:[%s5166_s27 + $0x99] sm:$0xff]  ;;  %v501_v31 = vadd.f32 %v485_v8, %v464_v2  ;;  %v559_v41 = vmul.f32 %v5185_v20, %v5834_v40 }
  0xed   : >> { %10383 = vst [vmem:[#allocation143_spill] sm:$0xff] %v5841_v54  ;;  %10385 = vst [vmem:[#allocation68_spill] sm:$0xff] %v5851_v4  ;;  %v10390_v14 = vld [vmem:[#allocation69_spill] sm:$0xff]  ;;  %v1222_v19 = vadd.f32 %v1206_v32, %v1185_v48  ;;  %v949_v17 = vmul.f32 %v5256_v11, %v5870_v3  ;;  %v5879_v21 = vld [vmem:[%s5166_s27 + $0xe0] sm:$0xff]  ;;  %v5887_v2 = vmul.f32 %v5532_v24, %v5851_v4 }
  0xee   : >> { %10386 = vst [vmem:[#allocation144_spill] sm:$0xff] %v5854_v39  ;;  %10387 = vst [vmem:[#allocation145_spill] sm:$0xff] %v5857_v59  ;;  %v1751_v58 = vadd.f32 %v10390_v14, %v1714_v9  ;;  %v891_v57 = vadd.f32 %v875_v33, %v854_v53  ;;  %v5890_v20 = vld [vmem:[%s5166_s27 + $0x22] sm:$0xff]  ;;  %v538_v8 = vadd.f32 %v522_v15, %v501_v31  ;;  %v10395_v33 = vld [vmem:[#allocation70_spill] sm:$0xff] }
  0xef   : >> { %10388 = vst [vmem:[#allocation146_spill] sm:$0xff] %v5867_v18  ;;  %10389 = vst [vmem:[#allocation147_spill] sm:$0xff] %v5870_v3  ;;  %v5883_v18 = vmul.f32 %v5530_v47, %v5841_v54  ;;  %v596_v53 = vmul.f32 %v5191_v26, %v5857_v59  ;;  %v1259_v9 = vadd.f32 %v1243_v35, %v1222_v19  ;;  %v5896_v48 = vld [vmem:[%s5166_s27 + $0xae] sm:$0xff]  ;;  %v10397_v54 = vld [vmem:[#allocation27_spill] sm:$0xff] }
  0xf0   : >> { %10391 = vst [vmem:[#allocation69_spill] sm:$0xff] %v5879_v21  ;;  %10393 = vst [vmem:[#allocation149_spill] sm:$0xff] %v5887_v2  ;;  %v1788_v32 = vadd.f32 %v10395_v33, %v1751_v58  ;;  %v928_v14 = vadd.f32 %v912_v61, %v891_v57  ;;  %v1014_v40 = vmul.f32 %v10397_v54, %v981_v51  ;;  %v5900_v4 = vld [vmem:[%s5166_s27 + $0xf8] sm:$0xff]  ;;  %v10402_v57 = vld [vmem:[#allocation72_spill] sm:$0xff] }
  0xf1   : >> { %10392 = vst [vmem:[#allocation148_spill] sm:$0xff] %v5883_v18  ;;  %10394 = vst [vmem:[#allocation150_spill] sm:$0xff] %v5890_v20  ;;  %v5904_v5 = vmul.f32 %v5568_v43, %v5854_v39  ;;  %v5908_v15 = vmul.f32 %v5640_v0, %v5689_v27  ;;  %v5911_v26 = vld [vmem:[%s5166_s27 + $0x3a] sm:$0xff]  ;;  %v575_v31 = vadd.f32 %v559_v41, %v538_v8  ;;  %v10403_v51 = vld [vmem:[#allocation54_spill] sm:$0xff] }
  0xf2   : >> { %10396 = vst [vmem:[#allocation70_spill] sm:$0xff] %v5896_v48  ;;  %10398 = vst [vmem:[#allocation27_spill] sm:$0xff] %v5900_v4  ;;  %v633_v35 = vmul.f32 %v5198_v30, %v5879_v21  ;;  %v1825_v61 = vadd.f32 %v10402_v57, %v1788_v32  ;;  %v1324_v58 = vadd.f32 %v10403_v51, %v1259_v9  ;;  %v5918_v19 = vld [vmem:[%s5166_s27 + $0xc6] sm:$0xff]  ;;  %v5921_v33 = vld [vmem:[%s5166_s27 + $0xde] sm:$0xff] }
  0xf3   : >> { %10399 = vst [vmem:[#allocation151_spill] sm:$0xff] %v5904_v5  ;;  %10400 = vst [vmem:[#allocation152_spill] sm:$0xff] %v5908_v15  ;;  %v5924_v39 = vld [vmem:[%s5166_s27 + $0xf6] sm:$0xff]  ;;  %v965_v59 = vadd.f32 %v949_v17, %v928_v14  ;;  %v10407_v27 = vld [vmem:[#allocation32_spill] sm:$0xff]  ;;  %v5930_v41 = vmul.f32 %v5642_v10, %v5896_v48  ;;  %v612_v32 = vadd.f32 %v596_v53, %v575_v31 }
  0xf4   : >> { %10401 = vst [vmem:[#allocation153_spill] sm:$0xff] %v5911_v26  ;;  %10404 = vst [vmem:[#allocation72_spill] sm:$0xff] %v5918_v19  ;;  %v1051_v15 = vmul.f32 %v10407_v27, %v5890_v20  ;;  %v5934_v30 = vmul.f32 %v5642_v10, %v5924_v39  ;;  %v5937_v8 = vld [vmem:[%s5166_s27 + $0x52] sm:$0xff]  ;;  %v670_v9 = vmul.f32 %v5205_v37, %v5900_v4  ;;  %v10412_v21 = vld [vmem:[#allocation33_spill] sm:$0xff] }
  0xf5   : >> { %10405 = vst [vmem:[#allocation54_spill] sm:$0xff] %v5921_v33  ;;  %10406 = vst [vmem:[#allocation154_spill] sm:$0xff] %v5924_v39  ;;  %v1890_v17 = vadd.f32 %v5546_v13, %v1825_v61  ;;  %v10411_v14 = vld [vmem:[#allocation55_spill] sm:$0xff]  ;;  %v1030_v51 = vadd.f32 %v1014_v40, %v965_v59  ;;  %v1088_v20 = vmul.f32 %v10412_v21, %v5911_v26  ;;  %v5958_v59 = vld [vmem:[%s5166_s27 + $0x6a] sm:$0xff] }
  0xf6   : >> { %10408 = vst [vmem:[#allocation32_spill] sm:$0xff] %v5930_v41  ;;  %10409 = vst [vmem:[#allocation155_spill] sm:$0xff] %v5934_v30  ;;  %v1361_v57 = vadd.f32 %v10411_v14, %v1324_v58  ;;  %v5947_v30 = vmul.f32 %v5644_v1, %v5918_v19  ;;  %v5951_v53 = vmul.f32 %v5665_v52, %v5921_v33  ;;  %v10415_v58 = vld [vmem:[#allocation59_spill] sm:$0xff]  ;;  %v1268_v4 = vld [vmem:[%s5166_s27 + $0xb] sm:$0xff] }
  0xf7   : >> { %10410 = vst [vmem:[#allocation156_spill] sm:$0xff] %v5937_v8  ;;  %v649_v31 = vadd.f32 %v633_v35, %v612_v32  ;;  %v735_v13 = vmul.f32 %v5213_v42, %v5822_v38  ;;  %v1927_v61 = vadd.f32 %v5563_v22, %v1890_v17  ;;  %10416 = vst [vmem:[#allocation59_spill] sm:$0xff] %v5958_v59  ;;  %v5968_v32 = vld [vmem:[%s5166_s27 + $0x82] sm:$0xff]  ;;  %v5971_v42 = vld [vmem:[%s5166_s27 + $0x9a] sm:$0xff] }
  0xf8   : >> { %10413 = vst [vmem:[#allocation55_spill] sm:$0xff] %v5947_v30  ;;  %10414 = vst [vmem:[#allocation33_spill] sm:$0xff] %v5951_v53  ;;  %v1398_v40 = vadd.f32 %v10415_v58, %v1361_v57  ;;  %v1067_v14 = vadd.f32 %v1051_v15, %v1030_v51  ;;  %v1125_v19 = vmul.f32 %v5310_v44, %v5937_v8  ;;  %v5976_v17 = vld [vmem:[%s5166_s27 + $0x23] sm:$0xff]  ;;  %v5985_v8 = vld [vmem:[%s5166_s27 + $0x3b] sm:$0xff] }
  0xf9   : >> { %v5965_v35 = vmul.f32 %v5667_v62, %v5924_v39  ;;  %10418 = vst [vmem:[#allocation158_spill] sm:$0xff] %v5968_v32  ;;  %10419 = vst [vmem:[#allocation159_spill] sm:$0xff] %v5971_v42  ;;  %v1162_v22 = vmul.f32 %v5312_v45, %v5958_v59  ;;  %v686_v57 = vadd.f32 %v670_v9, %v649_v31  ;;  %v5988_v26 = vld [vmem:[%s5166_s27 + $0x53] sm:$0xff]  ;;  %v6001_v38 = vld [vmem:[%s5166_s27 + $0x6b] sm:$0xff] }
  0xfa   : >> { %10420 = vst [vmem:[#allocation160_spill] sm:$0xff] %v5976_v17  ;;  %v772_v15 = vmul.f32 %v5218_v49, %v5829_v12  ;;  %v1964_v51 = vadd.f32 %v5566_v7, %v1927_v61  ;;  %v1435_v58 = vadd.f32 %v5764_v55, %v1398_v40  ;;  %v1104_v39 = vadd.f32 %v1088_v20, %v1067_v14  ;;  %v5991_v9 = vld [vmem:[%s5166_s27 + $0xb1] sm:$0xff]  ;;  %v10425_v7 = vld [vmem:[#allocation36_spill] sm:$0xff]  ;;  %v6006_v30 = vld [vmem:[%s5166_s27 + $0xc9] sm:$0xff] }
  0xfb   : >> { %10417 = vst [vmem:[#allocation157_spill] sm:$0xff] %v5965_v35  ;;  %v1199_v33 = vmul.f32 %v5314_v46, %v5968_v32  ;;  %10421 = vst [vmem:[#allocation161_spill] sm:$0xff] %v5985_v8  ;;  %v10424_v49 = vld [vmem:[#allocation34_spill] sm:$0xff]  ;;  %v1301_v61 = vmul.f32 %v10425_v7, %v1268_v4  ;;  %v751_v12 = vadd.f32 %v735_v13, %v686_v57  ;;  %v10426_v20 = vld [vmem:[#allocation91_spill] sm:$0xff] }
  0xfc   : >> { %10422 = vst [vmem:[#allocation162_spill] sm:$0xff] %v5988_v26  ;;  %10423 = vst [vmem:[#allocation163_spill] sm:$0xff] %v5991_v9  ;;  %v1236_v31 = vmul.f32 %v10424_v49, %v5971_v42  ;;  %v809_v55 = vmul.f32 %v10365_v34, %v5870_v3  ;;  %v2001_v40 = vadd.f32 %v10426_v20, %v1964_v51  ;;  %v10428_v35 = vld [vmem:[#allocation39_spill] sm:$0xff]  ;;  %v6009_v4 = vld [vmem:[%s5166_s27 + $0x83] sm:$0xff] }
  0xfd   : >> { %v1472_v14 = vadd.f32 %v5788_v28, %v1435_v58  ;;  %v1141_v48 = vadd.f32 %v1125_v19, %v1104_v39  ;;  %10427 = vst [vmem:[#allocation34_spill] sm:$0xff] %v6001_v38  ;;  %v1338_v53 = vmul.f32 %v10428_v35, %v5976_v17  ;;  %10429 = vst [vmem:[#allocation36_spill] sm:$0xff] %v6006_v30  ;;  %v6012_v13 = vld [vmem:[%s5166_s27 + $0x9b] sm:$0xff]  ;;  %v10433_v28 = vld [vmem:[#allocation41_spill] sm:$0xff] }
  0xfe   : >> { %10430 = vst [vmem:[#allocation91_spill] sm:$0xff] %v6009_v4  ;;  %10431 = vst [vmem:[#allocation39_spill] sm:$0xff] %v6012_v13  ;;  %v10432_v57 = vld [vmem:[#allocation40_spill] sm:$0xff]  ;;  %v6018_v39 = vmul.f32 %v10433_v28, %v5988_v26  ;;  %v1555_v19 = vld [vmem:[%s5166_s27 + $0xc] sm:$0xff]  ;;  %v788_v58 = vadd.f32 %v772_v15, %v751_v12  ;;  %v846_v20 = vmul.f32 %v5230_v60, %v5991_v9 }
  0xff   : >> { %v1375_v51 = vmul.f32 %v10432_v57, %v5985_v8  ;;  %v10434_v17 = vld [vmem:[#allocation92_spill] sm:$0xff]  ;;  %v1509_v41 = vadd.f32 %v5792_v36, %v1472_v14  ;;  %v1178_v5 = vadd.f32 %v1162_v22, %v1141_v48  ;;  %v6027_v2 = vmul.f32 %v10367_v25, %v6001_v38  ;;  %v6047_v36 = vld [vmem:[%s5166_s27 + $0x54] sm:$0xff]  ;;  %v10439_v15 = vld [vmem:[#allocation93_spill] sm:$0xff] }
 0x100   : >> { %v2038_v3 = vadd.f32 %v10434_v17, %v2001_v40  ;;  %v6030_v8 = vld [vmem:[%s5166_s27 + $0x24] sm:$0xff]  ;;  %v6033_v18 = vld [vmem:[%s5166_s27 + $0x3c] sm:$0xff]  ;;  %v6040_v12 = vmul.f32 %v10368_v29, %v6009_v4  ;;  %v6044_v17 = vmul.f32 %v10369_v56, %v6012_v13  ;;  %10438 = vst [vmem:[#allocation166_spill] sm:$0xff] %v6047_v36  ;;  %v825_v48 = vadd.f32 %v809_v55, %v788_v58 }
 0x101   : >> { %10435 = vst [vmem:[#allocation92_spill] sm:$0xff] %v6030_v8  ;;  %10436 = vst [vmem:[#allocation164_spill] sm:$0xff] %v6033_v18  ;;  %v6036_v26 = vld [vmem:[%s5166_s27 + $0xe1] sm:$0xff]  ;;  %v883_v22 = vmul.f32 %v5234_v63, %v6006_v30  ;;  %v1546_v14 = vadd.f32 %v5796_v50, %v1509_v41  ;;  %v1215_v9 = vadd.f32 %v1199_v33, %v1178_v5  ;;  %v10440_v29 = vld [vmem:[#allocation51_spill] sm:$0xff] }
 0x102   : >> { %10437 = vst [vmem:[#allocation165_spill] sm:$0xff] %v6036_v26  ;;  %v2075_v40 = vadd.f32 %v10439_v15, %v2038_v3  ;;  %v6054_v25 = vmul.f32 %v10440_v29, %v1555_v19  ;;  %v6057_v56 = vld [vmem:[%s5166_s27 + $0xf9] sm:$0xff]  ;;  %v10443_v55 = vld [vmem:[#allocation57_spill] sm:$0xff]  ;;  %v862_v30 = vadd.f32 %v846_v20, %v825_v48  ;;  %v920_v3 = vmul.f32 %v5245_v6, %v6036_v26 }
 0x103   : >> { %10441 = vst [vmem:[#allocation93_spill] sm:$0xff] %v6057_v56  ;;  %v10442_v28 = vld [vmem:[#allocation56_spill] sm:$0xff]  ;;  %v6065_v58 = vmul.f32 %v10443_v55, %v6033_v18  ;;  %v10444_v50 = vld [vmem:[#allocation97_spill] sm:$0xff]  ;;  %v1252_v19 = vadd.f32 %v1236_v31, %v1215_v9 }
 0x104   : >> { %v6061_v57 = vmul.f32 %v10442_v28, %v6030_v8  ;;  %v2112_v5 = vadd.f32 %v10444_v50, %v2075_v40  ;;  %v10445_v33 = vld [vmem:[#allocation76_spill] sm:$0xff]  ;;  %v6072_v15 = vld [vmem:[%s5166_s27 + $0x6c] sm:$0xff]  ;;  %v899_v31 = vadd.f32 %v883_v22, %v862_v30  ;;  %v957_v50 = vmul.f32 %v5256_v11, %v6057_v56 }
 0x105   : >> { %v1611_v41 = vadd.f32 %v10445_v33, %v1546_v14  ;;  %10446 = vst [vmem:[#allocation97_spill] sm:$0xff] %v6072_v15  ;;  %v6075_v29 = vld [vmem:[%s5166_s27 + $0x84] sm:$0xff]  ;;  %v10448_v8 = vld [vmem:[#allocation58_spill] sm:$0xff]  ;;  %v6083_v55 = vld [vmem:[%s5166_s27 + $0x9c] sm:$0xff]  ;;  %v1022_v30 = vmul.f32 %v10397_v54, %v5958_v59 }
 0x106   : >> { %10447 = vst [vmem:[#allocation76_spill] sm:$0xff] %v6075_v29  ;;  %v6079_v28 = vmul.f32 %v10448_v8, %v6047_v36  ;;  %v1842_v18 = vld [vmem:[%s5166_s27 + $0xd] sm:$0xff]  ;;  %10450 = vst [vmem:[#allocation168_spill] sm:$0xff] %v6083_v55  ;;  %v6094_v9 = vld [vmem:[%s5166_s27 + $0x25] sm:$0xff] }
 0x107   : >> { %v10451_v20 = vld [vmem:[#allocation61_spill] sm:$0xff]  ;;  %v10452_v40 = vld [vmem:[#allocation62_spill] sm:$0xff]  ;;  %10454 = vst [vmem:[#allocation170_spill] sm:$0xff] %v6094_v9  ;;  %v10455_v33 = vld [vmem:[#allocation100_spill] sm:$0xff] }
 0x108   : >> { %10449 = vst [vmem:[#allocation167_spill] sm:$0xff] %v6079_v28  ;;  %v6087_v48 = vmul.f32 %v10451_v20, %v6072_v15  ;;  %v6091_v14 = vmul.f32 %v10452_v40, %v6075_v29  ;;  %v2177_v36 = vadd.f32 %v10455_v33, %v2112_v5  ;;  %v10456_v26 = vld [vmem:[#allocation77_spill] sm:$0xff]  ;;  %v1317_v28 = vadd.f32 %v1301_v61, %v1252_v19  ;;  %v6105_v15 = vld [vmem:[%s5166_s27 + $0x3d] sm:$0xff]  ;;  %v10461_v22 = vld [vmem:[#allocation82_spill] sm:$0xff] }
 0x109   : >> { %v1648_v8 = vadd.f32 %v10456_v26, %v1611_v41  ;;  %v10457_v13 = vld [vmem:[#allocation65_spill] sm:$0xff]  ;;  %10459 = vst [vmem:[#allocation77_spill] sm:$0xff] %v6105_v15  ;;  %v10460_v40 = vld [vmem:[#allocation71_spill] sm:$0xff]  ;;  %v936_v29 = vadd.f32 %v920_v3, %v899_v31  ;;  %v10462_v56 = vld [vmem:[#allocation28_spill] sm:$0xff]  ;;  %v1059_v31 = vmul.f32 %v10407_v27, %v5968_v32 }
 0x10a   : >> { %10453 = vst [vmem:[#allocation169_spill] sm:$0xff] %v6091_v14  ;;  %v6102_v20 = vmul.f32 %v10457_v13, %v6083_v55  ;;  %v6108_v14 = vmul.f32 %v10460_v40, %v1842_v18  ;;  %v568_v5 = vadd.f32 %v10462_v56, %v10461_v22  ;;  %v10463_v26 = vld [vmem:[#allocation109_spill] sm:$0xff]  ;;  %v10464_v41 = vld [vmem:[#allocation78_spill] sm:$0xff]  ;;  %v1354_v33 = vadd.f32 %v1338_v53, %v1317_v28  ;;  %v10470_v53 = vld [vmem:[#allocation135_spill] sm:$0xff] }
 0x10b   : >> { %v2214_v61 = vadd.f32 %v10463_v26, %v2177_v36  ;;  %v1685_v19 = vadd.f32 %v10464_v41, %v1648_v8  ;;  %v6117_v13 = vld [vmem:[%s5166_s27 + $0x55] sm:$0xff]  ;;  %v973_v3 = vadd.f32 %v957_v50, %v936_v29  ;;  %v10467_v54 = vld [vmem:[#allocation29_spill] sm:$0xff] }
 0x10c   : >> { %10458 = vst [vmem:[#allocation100_spill] sm:$0xff] %v6102_v20  ;;  %10465 = vst [vmem:[#allocation82_spill] sm:$0xff] %v6117_v13  ;;  %v10466_v20 = vld [vmem:[#allocation73_spill] sm:$0xff]  ;;  %v605_v59 = vadd.f32 %v10467_v54, %v568_v5  ;;  %v10469_v36 = vld [vmem:[#allocation110_spill] sm:$0xff]  ;;  %v1391_v22 = vadd.f32 %v1375_v51, %v1354_v33  ;;  %v6142_v5 = vmul.f32 %v5517_v23, %v6117_v13 }
 0x10d   : >> { %v6121_v18 = vmul.f32 %v10466_v20, %v6094_v9  ;;  %v10468_v40 = vld [vmem:[#allocation49_spill] sm:$0xff]  ;;  %v2251_v8 = vadd.f32 %v10469_v36, %v2214_v61  ;;  %v1722_v28 = vadd.f32 %v10470_v53, %v1685_v19  ;;  %v10471_v26 = vld [vmem:[#allocation74_spill] sm:$0xff]  ;;  %v1096_v61 = vmul.f32 %v10412_v21, %v5971_v42  ;;  %v10474_v54 = vld [vmem:[#allocation63_spill] sm:$0xff] }
 0x10e   : >> { %v663_v56 = vmul.f32 %v5205_v37, %v10468_v40  ;;  %v6132_v29 = vmul.f32 %v10471_v26, %v6105_v15  ;;  %v6135_v50 = vld [vmem:[%s5166_s27 + $0xb2] sm:$0xff]  ;;  %v1038_v37 = vadd.f32 %v1022_v30, %v973_v3  ;;  %v642_v19 = vadd.f32 %v10474_v54, %v605_v59  ;;  %v10476_v36 = vld [vmem:[#allocation137_spill] sm:$0xff]  ;;  %v6161_v3 = vld [vmem:[%s5166_s27 + $0x9d] sm:$0xff] }
 0x10f   : >> { %10472 = vst [vmem:[#allocation28_spill] sm:$0xff] %v6135_v50  ;;  %v6138_v41 = vld [vmem:[%s5166_s27 + $0x6d] sm:$0xff]  ;;  %v10475_v51 = vld [vmem:[#allocation111_spill] sm:$0xff]  ;;  %v1759_v53 = vadd.f32 %v10476_v36, %v1722_v28  ;;  %v1428_v15 = vadd.f32 %v6018_v39, %v1391_v22  ;;  %v6151_v9 = vld [vmem:[%s5166_s27 + $0x85] sm:$0xff]  ;;  %v1133_v39 = vmul.f32 %v5310_v44, %v6135_v50 }
 0x110   : >> { %10473 = vst [vmem:[#allocation109_spill] sm:$0xff] %v6138_v41  ;;  %v2288_v33 = vadd.f32 %v10475_v51, %v2251_v8  ;;  %10477 = vst [vmem:[#allocation78_spill] sm:$0xff] %v6151_v9  ;;  %v6155_v13 = vmul.f32 %v5530_v47, %v6138_v41  ;;  %v6158_v30 = vld [vmem:[%s5166_s27 + $0xca] sm:$0xff]  ;;  %v6165_v59 = vmul.f32 %v5532_v24, %v6151_v9  ;;  %v10480_v54 = vld [vmem:[#allocation112_spill] sm:$0xff] }
 0x111   : >> { %10478 = vst [vmem:[#allocation73_spill] sm:$0xff] %v6158_v30  ;;  %10479 = vst [vmem:[#allocation29_spill] sm:$0xff] %v6161_v3  ;;  %v2129_v8 = vld [vmem:[%s5166_s27 + $0xe] sm:$0xff]  ;;  %v1075_v28 = vadd.f32 %v1059_v31, %v1038_v37  ;;  %v679_v22 = vadd.f32 %v663_v56, %v642_v19  ;;  %v1465_v32 = vadd.f32 %v6027_v2, %v1428_v15  ;;  %v6178_v24 = vld [vmem:[%s5166_s27 + $0xe2] sm:$0xff] }
 0x112   : >> { %v2325_v51 = vadd.f32 %v10480_v54, %v2288_v33  ;;  %v10481_v36 = vld [vmem:[#allocation138_spill] sm:$0xff]  ;;  %v6175_v47 = vmul.f32 %v5568_v43, %v6161_v3  ;;  %10483 = vst [vmem:[#allocation110_spill] sm:$0xff] %v6178_v24  ;;  %v6181_v23 = vld [vmem:[%s5166_s27 + $0x26] sm:$0xff]  ;;  %v1170_v56 = vmul.f32 %v5312_v45, %v6158_v30  ;;  %v10489_v43 = vld [vmem:[#allocation95_spill] sm:$0xff] }
 0x113   : >> { %v1796_v42 = vadd.f32 %v10481_v36, %v1759_v53  ;;  %10484 = vst [vmem:[#allocation135_spill] sm:$0xff] %v6181_v23  ;;  %v1112_v31 = vadd.f32 %v1096_v61, %v1075_v28  ;;  %v10485_v37 = vld [vmem:[#allocation24_spill] sm:$0xff]  ;;  %v10488_v2 = vld [vmem:[#allocation142_spill] sm:$0xff]  ;;  %v1502_v50 = vadd.f32 %v6040_v12, %v1465_v32  ;;  %v10494_v32 = vld [vmem:[#allocation21_spill] sm:$0xff] }
 0x114   : >> { %10482 = vst [vmem:[#allocation49_spill] sm:$0xff] %v6175_v47  ;;  %v744_v19 = vadd.f32 %v10485_v37, %v679_v22  ;;  %v10486_v33 = vld [vmem:[#allocation20_spill] sm:$0xff]  ;;  %v6193_v47 = vmul.f32 %v10489_v43, %v2129_v8  ;;  %v1207_v22 = vmul.f32 %v5314_v46, %v6178_v24  ;;  %v839_v12 = vmul.f32 %v5230_v60, %v10494_v32  ;;  %v10495_v8 = vld [vmem:[#allocation117_spill] sm:$0xff]  ;;  %v10516_v24 = vld [vmem:[#allocation42_spill] sm:$0xff] }
 0x115   : >> { %v802_v53 = vmul.f32 %v10365_v34, %v10486_v33  ;;  %v10487_v54 = vld [vmem:[#allocation116_spill] sm:$0xff]  ;;  %v1833_v15 = vadd.f32 %v10488_v2, %v1796_v42  ;;  %v1149_v34 = vadd.f32 %v1133_v39, %v1112_v31  ;;  %v10496_v33 = vld [vmem:[#allocation98_spill] sm:$0xff]  ;;  %v1539_v2 = vadd.f32 %v6044_v17, %v1502_v50  ;;  %v10497_v30 = vld [vmem:[#allocation101_spill] sm:$0xff] }
 0x116   : >> { %v2362_v36 = vadd.f32 %v10487_v54, %v2325_v51  ;;  %v6196_v61 = vld [vmem:[%s5166_s27 + $0xfa] sm:$0xff]  ;;  %v6216_v43 = vmul.f32 %v10497_v30, %v6181_v23 }
 0x117   : >> { %10490 = vst [vmem:[#allocation74_spill] sm:$0xff] %v6196_v61  ;;  %v6201_v45 = vld [vmem:[%s9649_s2] ss:$0 sm:$0xff]  ;;  %v10493_v51 = vld [vmem:[#allocation83_spill] sm:$0xff]  ;;  %v1898_v54 = vadd.f32 %v10496_v33, %v1833_v15  ;;  %v1186_v31 = vadd.f32 %v1170_v56, %v1149_v34  ;;  %v1244_v46 = vmul.f32 %v10424_v49, %v6196_v61  ;;  %v10500_v15 = vld [vmem:[#allocation102_spill] sm:$0xff]  ;;  %v1604_v17 = vadd.f32 %v6054_v25, %v1539_v2 }
 0x118   : >> { %10491 = vst [vmem:[#allocation63_spill] sm:$0xff] %v6201_v45  ;;  %v6204_v28 = vld [vmem:[%s5166_s27 + $0x3e] sm:$0xff]  ;;  %v781_v42 = vadd.f32 %v10493_v51, %v744_v19  ;;  %v2399_v37 = vadd.f32 %v10495_v8, %v2362_v36  ;;  %v6219_v39 = vld [vmem:[%s5166_s27 + $0x56] sm:$0xff]  ;;  %v6233_v56 = vld [vmem:[%s5166_s27 + $0x6e] sm:$0xff] }
 0x119   : >> { %10492 = vst [vmem:[#allocation111_spill] sm:$0xff] %v6204_v28  ;;  %10498 = vst [vmem:[#allocation137_spill] sm:$0xff] %v6219_v39  ;;  %v10499_v51 = vld [vmem:[#allocation22_spill] sm:$0xff]  ;;  %v1935_v32 = vadd.f32 %v10500_v15, %v1898_v54  ;;  %v6230_v50 = vmul.f32 %v5640_v0, %v6204_v28  ;;  %v1223_v49 = vadd.f32 %v1207_v22, %v1186_v31  ;;  %v10502_v34 = vld [vmem:[#allocation23_spill] sm:$0xff] }
 0x11a   : >> { %v818_v19 = vadd.f32 %v802_v53, %v781_v42  ;;  %v876_v60 = vmul.f32 %v5234_v63, %v10499_v51  ;;  %v2422_v36 = vadd.f32 %v6201_v45, %v2399_v37  ;;  %10501 = vst [vmem:[#allocation112_spill] sm:$0xff] %v6233_v56  ;;  %v1309_v63 = vmul.f32 %v10425_v7, %v6001_v38  ;;  %v10503_v25 = vld [vmem:[#allocation103_spill] sm:$0xff]  ;;  %v6245_v33 = vld [vmem:[%s5166_s27 + $0x86] sm:$0xff]  ;;  %v6374_v38 = vld [vmem:[#allocation7 + $0x25] ss:$0 sm:$0xff] }
 0x11b   : >> { %v913_v42 = vmul.f32 %v5245_v6, %v10502_v34  ;;  %v1972_v8 = vadd.f32 %v10503_v25, %v1935_v32  ;;  %v1641_v37 = vadd.f32 %v6061_v57, %v1604_v17  ;;  %10504 = vst [vmem:[#allocation138_spill] sm:$0xff] %v6245_v33  ;;  %v6249_v22 = vmul.f32 %v5642_v10, %v6219_v39  ;;  %v6256_v6 = vld [vmem:[%s5166_s27 + $0xb3] sm:$0xff]  ;;  %v6262_v2 = vld [vmem:[%s5166_s27 + $0xcb] sm:$0xff]  ;;  %v6265_v31 = vld [vmem:[%s5166_s27 + $0xe3] sm:$0xff] }
 0x11c   : >> { %v855_v53 = vadd.f32 %v839_v12, %v818_v19  ;;  %2440 = vst [vmem:[%s6239_s19] sm:$0xff] %v2422_v36  ;;  %4023 = vmatprep.mubr.f32.mxu0 %v2422_v36  ;;  %v6253_v7 = vmul.f32 %v5644_v1, %v6233_v56  ;;  %10505 = vst [vmem:[#allocation24_spill] sm:$0xff] %v6256_v6  ;;  %v6259_v12 = vld [vmem:[%s5166_s27 + $0x9e] sm:$0xff]  ;;  %v1260_v54 = vadd.f32 %v1244_v46, %v1223_v49  ;;  %v10509_v51 = vld [vmem:[#allocation81_spill] sm:$0xff] }
 0x11d   : >> { %10506 = vst [vmem:[#allocation20_spill] sm:$0xff] %v6259_v12  ;;  %10507 = vst [vmem:[#allocation116_spill] sm:$0xff] %v6262_v2  ;;  %v1346_v57 = vmul.f32 %v10428_v35, %v6009_v4  ;;  %v950_v36 = vmul.f32 %v5256_v11, %v10509_v51  ;;  %v2009_v15 = vadd.f32 %v5863_v16, %v1972_v8  ;;  %v6282_v49 = vld [vmem:[%s5166_s27 + $0xfb] sm:$0xff]  ;;  %v10513_v11 = vld [vmem:[#allocation41_spill] sm:$0xff] }
 0x11e   : >> { %10508 = vst [vmem:[#allocation142_spill] sm:$0xff] %v6265_v31  ;;  %v892_v19 = vadd.f32 %v876_v60, %v855_v53  ;;  %v1678_v32 = vadd.f32 %v6065_v58, %v1641_v37  ;;  %v6275_v17 = vmul.f32 %v5665_v52, %v6245_v33  ;;  %v6279_v46 = vmul.f32 %v5667_v62, %v6259_v12  ;;  %v10511_v35 = vld [vmem:[#allocation39_spill] sm:$0xff]  ;;  %v10512_v60 = vld [vmem:[#allocation40_spill] sm:$0xff] }
 0x11f   : >> { %10510 = vst [vmem:[#allocation83_spill] sm:$0xff] %v6282_v49  ;;  %v1325_v34 = vadd.f32 %v1309_v63, %v1260_v54  ;;  %v1383_v53 = vmul.f32 %v10512_v60, %v10511_v35  ;;  %v1420_v25 = vmul.f32 %v10513_v11, %v6256_v6  ;;  %v10514_v8 = vld [vmem:[#allocation148_spill] sm:$0xff]  ;;  %v10515_v37 = vld [vmem:[#allocation167_spill] sm:$0xff]  ;;  %v1457_v39 = vmul.f32 %v10516_v24, %v6262_v2  ;;  %v10519_v35 = vld [vmem:[#allocation25_spill] sm:$0xff] }
 0x120   : >> { %v929_v16 = vadd.f32 %v913_v42, %v892_v19  ;;  %v2046_v58 = vadd.f32 %v10514_v8, %v2009_v15  ;;  %v1715_v61 = vadd.f32 %v10515_v37, %v1678_v32  ;;  %v10517_v28 = vld [vmem:[#allocation43_spill] sm:$0xff]  ;;  %v10518_v63 = vld [vmem:[#allocation48_spill] sm:$0xff]  ;;  %v1052_v42 = vmul.f32 %v10407_v27, %v10519_v35  ;;  %v10520_v19 = vld [vmem:[#allocation149_spill] sm:$0xff]  ;;  %10548 = vst [vmem:[#allocation148_spill] sm:$0xff] %v6374_v38 }
 0x121   : >> { %v1494_v23 = vmul.f32 %v10517_v28, %v6265_v31  ;;  %v1362_v4 = vadd.f32 %v1346_v57, %v1325_v34  ;;  %v1531_v54 = vmul.f32 %v10518_v63, %v6282_v49  ;;  %v10521_v11 = vld [vmem:[#allocation97_spill] sm:$0xff]  ;;  %v10522_v8 = vld [vmem:[#allocation51_spill] sm:$0xff]  ;;  %v10523_v37 = vld [vmem:[#allocation76_spill] sm:$0xff] }
 0x122   : >> { %v966_v60 = vadd.f32 %v950_v36, %v929_v16  ;;  %v2083_v15 = vadd.f32 %v10520_v19, %v2046_v58  ;;  %v1752_v32 = vadd.f32 %v6087_v48, %v1715_v61  ;;  %v1596_v24 = vmul.f32 %v10522_v8, %v10521_v11  ;;  %v10524_v2 = vld [vmem:[#allocation56_spill] sm:$0xff]  ;;  %v10525_v34 = vld [vmem:[#allocation35_spill] sm:$0xff]  ;;  %v10526_v63 = vld [vmem:[#allocation26_spill] sm:$0xff] }
 0x123   : >> { %v6304_v28 = vmul.f32 %v10524_v2, %v10523_v37  ;;  %v1399_v57 = vadd.f32 %v1383_v53, %v1362_v4  ;;  %v1089_v36 = vmul.f32 %v10412_v21, %v10526_v63  ;;  %v6309_v16 = vld [vmem:[#allocation7] ss:$0 sm:$0xff]  ;;  %v6312_v27 = vld [vmem:[%s5166_s27 + $0x78] sm:$0xff]  ;;  %v10529_v58 = vld [vmem:[#allocation169_spill] sm:$0xff] }
 0x124   : >> { %v1031_v31 = vadd.f32 %v10525_v34, %v966_v60  ;;  %10527 = vst [vmem:[#allocation21_spill] sm:$0xff] %v6312_v27  ;;  %v465_v48 = vmul.f32 %v6312_v27, %v6309_v16  ;;  %v10528_v61 = vld [vmem:[#allocation151_spill] sm:$0xff]  ;;  %v1789_v2 = vadd.f32 %v10529_v58, %v1752_v32  ;;  %v6321_v4 = vld [vmem:[#allocation7 + $0x7] ss:$0 sm:$0xff]  ;;  %v6324_v53 = vld [vmem:[%s5166_s27 + $0x90] sm:$0xff] }
 0x125   : >> { %v2120_v35 = vadd.f32 %v10528_v61, %v2083_v15  ;;  %v6319_v19 = vld [vmem:[%s5166_s27 + $0xb4] sm:$0xff]  ;;  %10531 = vst [vmem:[#allocation98_spill] sm:$0xff] %v6324_v53  ;;  %v486_v21 = vmul.f32 %v6324_v53, %v6321_v4  ;;  %v6328_v60 = vld [vmem:[#allocation7 + $0xe] ss:$0 sm:$0xff]  ;;  %v1436_v34 = vadd.f32 %v1420_v25, %v1399_v57  ;;  %v6337_v61 = vld [vmem:[%s5166_s27 + $0x62] sm:$0xff] }
 0x126   : >> { %10530 = vst [vmem:[#allocation117_spill] sm:$0xff] %v6319_v19  ;;  %10532 = vst [vmem:[#allocation101_spill] sm:$0xff] %v6328_v60  ;;  %v523_v8 = vmul.f32 %v6328_v60, %v10468_v40  ;;  %v10533_v15 = vld [vmem:[#allocation57_spill] sm:$0xff]  ;;  %v1068_v32 = vadd.f32 %v1052_v42, %v1031_v31  ;;  %v1126_v58 = vmul.f32 %v6337_v61, %v5310_v44  ;;  %v10535_v49 = vld [vmem:[#allocation118_spill] sm:$0xff] }
 0x127   : >> { %v6334_v63 = vmul.f32 %v10533_v15, %v6083_v55  ;;  %10534 = vst [vmem:[#allocation22_spill] sm:$0xff] %v6337_v61  ;;  %v2185_v53 = vadd.f32 %v10535_v49, %v2120_v35  ;;  %v10536_v27 = vld [vmem:[#allocation100_spill] sm:$0xff]  ;;  %v6344_v11 = vld [vmem:[%s5166_s27 + $0xcc] sm:$0xff]  ;;  %v502_v6 = vadd.f32 %v486_v21, %v465_v48  ;;  %v6346_v40 = vld [vmem:[#allocation7 + $0x15] ss:$0 sm:$0xff]  ;;  %v1473_v15 = vadd.f32 %v1457_v39, %v1436_v34 }
 0x128   : >> { %v1826_v37 = vadd.f32 %v10536_v27, %v1789_v2  ;;  %10537 = vst [vmem:[#allocation102_spill] sm:$0xff] %v6344_v11  ;;  %10538 = vst [vmem:[#allocation23_spill] sm:$0xff] %v6346_v40  ;;  %v10539_v25 = vld [vmem:[#allocation50_spill] sm:$0xff]  ;;  %v1105_v55 = vadd.f32 %v1089_v36, %v1068_v32  ;;  %v6355_v44 = vld [vmem:[%s5166_s27 + $0x7a] sm:$0xff] }
 0x129   : >> { %v560_v57 = vmul.f32 %v6346_v40, %v10539_v25  ;;  %v10540_v31 = vld [vmem:[#allocation58_spill] sm:$0xff]  ;;  %10541 = vst [vmem:[#allocation103_spill] sm:$0xff] %v6355_v44  ;;  %v6357_v49 = vld [vmem:[#allocation7 + $0x1e] ss:$0 sm:$0xff]  ;;  %v6364_v39 = vld [vmem:[%s5166_s27 + $0xe4] sm:$0xff]  ;;  %v539_v21 = vadd.f32 %v523_v8, %v502_v6  ;;  %v1510_v32 = vadd.f32 %v1494_v23, %v1473_v15 }
 0x12a   : >> { %v6352_v42 = vmul.f32 %v10540_v31, %v6319_v19  ;;  %10542 = vst [vmem:[#allocation81_spill] sm:$0xff] %v6357_v49  ;;  %v1163_v27 = vmul.f32 %v6357_v49, %v6355_v44  ;;  %v10543_v48 = vld [vmem:[#allocation119_spill] sm:$0xff]  ;;  %v1891_v2 = vadd.f32 %v6108_v14, %v1826_v37  ;;  %10544 = vst [vmem:[#allocation40_spill] sm:$0xff] %v6364_v39  ;;  %v10546_v25 = vld [vmem:[#allocation52_spill] sm:$0xff] }
 0x12b   : >> { %v2222_v35 = vadd.f32 %v10543_v48, %v2185_v53  ;;  %v6366_v34 = vld [vmem:[#allocation7 + $0x1c] ss:$0 sm:$0xff]  ;;  %v10547_v31 = vld [vmem:[#allocation61_spill] sm:$0xff]  ;;  %v1142_v19 = vadd.f32 %v1126_v58, %v1105_v55  ;;  %v6377_v49 = vld [vmem:[%s5166_s27 + $0x92] sm:$0xff]  ;;  %v576_v23 = vadd.f32 %v560_v57, %v539_v21  ;;  %v1547_v58 = vadd.f32 %v1531_v54, %v1510_v32 }
 0x12c   : >> { %10545 = vst [vmem:[#allocation41_spill] sm:$0xff] %v6366_v34  ;;  %v597_v36 = vmul.f32 %v6366_v34, %v10546_v25  ;;  %v6372_v61 = vmul.f32 %v10547_v31, %v6344_v11  ;;  %10549 = vst [vmem:[#allocation167_spill] sm:$0xff] %v6377_v49  ;;  %v1200_v14 = vmul.f32 %v6377_v49, %v6374_v38  ;;  %v6382_v37 = vld [vmem:[%s5166_s27 + $0x108] sm:$0xff]  ;;  %v10551_v6 = vld [vmem:[#allocation152_spill] sm:$0xff] }
 0x12d   : >> { %10550 = vst [vmem:[#allocation42_spill] sm:$0xff] %v6382_v37  ;;  %v2259_v53 = vadd.f32 %v10551_v6, %v2222_v35  ;;  %v1928_v8 = vadd.f32 %v6121_v18, %v1891_v2  ;;  %v6387_v48 = vld [vmem:[%s5166_s27 + $0xfc] sm:$0xff]  ;;  %v10554_v25 = vld [vmem:[#allocation53_spill] sm:$0xff]  ;;  %v10555_v31 = vld [vmem:[#allocation62_spill] sm:$0xff]  ;;  %v1179_v38 = vadd.f32 %v1163_v27, %v1142_v19  ;;  %v1612_v32 = vadd.f32 %v1596_v24, %v1547_v58 }
 0x12e   : >> { %10552 = vst [vmem:[#allocation43_spill] sm:$0xff] %v6387_v48  ;;  %v6389_v15 = vld [vmem:[#allocation7 + $0x23] ss:$0 sm:$0xff]  ;;  %v6395_v11 = vmul.f32 %v10555_v31, %v6364_v39  ;;  %v6397_v34 = vld [vmem:[#allocation7 + $0x2c] ss:$0 sm:$0xff]  ;;  %v10557_v35 = vld [vmem:[#allocation114_spill] sm:$0xff]  ;;  %v613_v21 = vadd.f32 %v597_v36, %v576_v23 }
 0x12f   : >> { %10553 = vst [vmem:[#allocation48_spill] sm:$0xff] %v6389_v15  ;;  %v634_v55 = vmul.f32 %v6389_v15, %v10554_v25  ;;  %10556 = vst [vmem:[#allocation25_spill] sm:$0xff] %v6397_v34  ;;  %v1237_v18 = vmul.f32 %v6397_v34, %v10557_v35  ;;  %v10558_v2 = vld [vmem:[#allocation32_spill] sm:$0xff]  ;;  %v1965_v57 = vadd.f32 %v6132_v29, %v1928_v8  ;;  %v6403_v40 = vld [vmem:[#allocation7 + $0x2a] ss:$0 sm:$0xff] }
 0x130   : >> { %v2296_v6 = vadd.f32 %v10558_v2, %v2259_v53  ;;  %10559 = vst [vmem:[#allocation149_spill] sm:$0xff] %v6403_v40  ;;  %v671_v54 = vmul.f32 %v6403_v40, %v6382_v37  ;;  %v10560_v19 = vld [vmem:[#allocation65_spill] sm:$0xff]  ;;  %v10561_v25 = vld [vmem:[#allocation71_spill] sm:$0xff]  ;;  %v1216_v53 = vadd.f32 %v1200_v14, %v1179_v38  ;;  %v6417_v23 = vld [vmem:[#allocation7 + $0x1] ss:$0 sm:$0xff]  ;;  %v1649_v58 = vadd.f32 %v6304_v28, %v1612_v32 }
 0x131   : >> { %v6409_v27 = vmul.f32 %v10560_v19, %v6387_v48  ;;  %v6413_v31 = vmul.f32 %v10561_v25, %v6138_v41  ;;  %v10562_v2 = vld [vmem:[#allocation55_spill] sm:$0xff]  ;;  %v2002_v36 = vadd.f32 %v6142_v5, %v1965_v57  ;;  %v650_v8 = vadd.f32 %v634_v55, %v613_v21  ;;  %10563 = vst [vmem:[#allocation51_spill] sm:$0xff] %v6417_v23  ;;  %v10566_v55 = vld [vmem:[#allocation33_spill] sm:$0xff]  ;;  %v6518_v41 = vld [vmem:[#allocation7 + $0x26] ss:$0 sm:$0xff] }
 0x132   : >> { %v2333_v29 = vadd.f32 %v10562_v2, %v2296_v6  ;;  %v6420_v37 = vld [vmem:[%s5166_s27 + $0x79] sm:$0xff]  ;;  %v6427_v19 = vmul.f32 %v10466_v20, %v6151_v9  ;;  %v1253_v38 = vadd.f32 %v1237_v18, %v1216_v53  ;;  %v6430_v6 = vld [vmem:[#allocation7 + $0xa] ss:$0 sm:$0xff]  ;;  %v6438_v28 = vld [vmem:[#allocation7 + $0x8] ss:$0 sm:$0xff]  ;;  %v1686_v18 = vadd.f32 %v6334_v63, %v1649_v58  ;;  %10591 = vst [vmem:[#allocation32_spill] sm:$0xff] %v6518_v41 }
 0x133   : >> { %10564 = vst [vmem:[#allocation56_spill] sm:$0xff] %v6420_v37  ;;  %v736_v24 = vmul.f32 %v6420_v37, %v6417_v23  ;;  %v4382_v14 = vld [vmem:[%s5166_s27 + $0x33] sm:$0xff]  ;;  %10565 = vst [vmem:[#allocation35_spill] sm:$0xff] %v6430_v6  ;;  %v2039_v21 = vadd.f32 %v6155_v13, %v2002_v36  ;;  %v687_v2 = vadd.f32 %v671_v54, %v650_v8  ;;  %v6452_v36 = vld [vmem:[%s5166_s27 + $0x4b] sm:$0xff] }
 0x134   : >> { %v1339_v5 = vmul.f32 %v6430_v6, %v4382_v14  ;;  %v2370_v57 = vadd.f32 %v10566_v55, %v2333_v29  ;;  %v6436_v25 = vld [vmem:[%s5166_s27 + $0xb5] sm:$0xff]  ;;  %10568 = vst [vmem:[#allocation151_spill] sm:$0xff] %v6438_v28  ;;  %v6448_v53 = vmul.f32 %v10471_v26, %v6161_v3  ;;  %v10570_v29 = vld [vmem:[#allocation45_spill] sm:$0xff]  ;;  %10571 = vst [vmem:[#allocation57_spill] sm:$0xff] %v6452_v36 }
 0x135   : >> { %10567 = vst [vmem:[#allocation26_spill] sm:$0xff] %v6436_v25  ;;  %v6441_v32 = vld [vmem:[%s5166_s27 + $0x91] sm:$0xff]  ;;  %v1318_v13 = vadd.f32 %v10570_v29, %v1253_v38  ;;  %v10573_v14 = vld [vmem:[#allocation157_spill] sm:$0xff]  ;;  %v2076_v48 = vadd.f32 %v6165_v59, %v2039_v21  ;;  %v752_v58 = vadd.f32 %v736_v24, %v687_v2  ;;  %v1723_v29 = vadd.f32 %v6352_v42, %v1686_v18  ;;  %v6485_v18 = vld [vmem:[%s5166_s27 + $0xfd] sm:$0xff] }
 0x136   : >> { %10569 = vst [vmem:[#allocation169_spill] sm:$0xff] %v6441_v32  ;;  %v773_v20 = vmul.f32 %v6441_v32, %v6438_v28  ;;  %v6454_v54 = vld [vmem:[#allocation7 + $0x11] ss:$0 sm:$0xff]  ;;  %v2407_v55 = vadd.f32 %v10573_v14, %v2370_v57  ;;  %v6463_v26 = vld [vmem:[#allocation7 + $0xf] ss:$0 sm:$0xff]  ;;  %v6469_v39 = vld [vmem:[%s5166_s27 + $0xe5] sm:$0xff] }
 0x137   : >> { %10572 = vst [vmem:[#allocation118_spill] sm:$0xff] %v6454_v54  ;;  %v1376_v8 = vmul.f32 %v6454_v54, %v6452_v36  ;;  %v6461_v63 = vld [vmem:[%s5166_s27 + $0xcd] sm:$0xff]  ;;  %10575 = vst [vmem:[#allocation50_spill] sm:$0xff] %v6463_v26  ;;  %v810_v38 = vmul.f32 %v6463_v26, %v10509_v51  ;;  %v10577_v32 = vld [vmem:[#allocation75_spill] sm:$0xff]  ;;  %v1355_v57 = vadd.f32 %v1339_v5, %v1318_v13 }
 0x138   : >> { %10574 = vst [vmem:[#allocation100_spill] sm:$0xff] %v6461_v63  ;;  %10576 = vst [vmem:[#allocation58_spill] sm:$0xff] %v6469_v39  ;;  %v6473_v36 = vmul.f32 %v10577_v32, %v6436_v25  ;;  %v6475_v59 = vld [vmem:[#allocation7 + $0x18] ss:$0 sm:$0xff]  ;;  %v6478_v21 = vld [vmem:[%s5166_s27 + $0x63] sm:$0xff]  ;;  %v2430_v51 = vadd.f32 %v6201_v45, %v2407_v55  ;;  %v789_v14 = vadd.f32 %v773_v20, %v752_v58 }
 0x139   : >> { %10578 = vst [vmem:[#allocation119_spill] sm:$0xff] %v6475_v59  ;;  %10579 = vst [vmem:[#allocation52_spill] sm:$0xff] %v6478_v21  ;;  %v1413_v24 = vmul.f32 %v6478_v21, %v6475_v59  ;;  %v10580_v2 = vld [vmem:[#allocation49_spill] sm:$0xff]  ;;  %v6487_v37 = vld [vmem:[#allocation7 + $0x16] ss:$0 sm:$0xff]  ;;  %v1760_v13 = vadd.f32 %v6372_v61, %v1723_v29  ;;  %v1392_v21 = vadd.f32 %v1376_v8, %v1355_v57 }
 0x13a   : >> { %v2113_v42 = vadd.f32 %v10580_v2, %v2076_v48  ;;  %10581 = vst [vmem:[#allocation61_spill] sm:$0xff] %v6485_v18  ;;  %10582 = vst [vmem:[#allocation152_spill] sm:$0xff] %v6487_v37  ;;  %v10583_v32 = vld [vmem:[#allocation89_spill] sm:$0xff]  ;;  %v10584_v25 = vld [vmem:[#allocation79_spill] sm:$0xff]  ;;  %4035 = vmatprep.mubr.f32.mxu1 %v2430_v51  ;;  %v826_v58 = vadd.f32 %v810_v38, %v789_v14 }
 0x13b   : >> { %v847_v5 = vmul.f32 %v6487_v37, %v10583_v32  ;;  %v6494_v3 = vmul.f32 %v10584_v25, %v6461_v63  ;;  %v6496_v9 = vld [vmem:[#allocation7 + $0x1f] ss:$0 sm:$0xff]  ;;  %2448 = vst [vmem:[%s6239_s19 + $0x40] sm:$0xff] %v2430_v51  ;;  %v10587_v55 = vld [vmem:[#allocation80_spill] sm:$0xff]  ;;  %v6509_v8 = vld [vmem:[#allocation7 + $0x1d] ss:$0 sm:$0xff]  ;;  %v1797_v2 = vadd.f32 %v6395_v11, %v1760_v13  ;;  %v1429_v51 = vadd.f32 %v1413_v24, %v1392_v21 }
 0x13c   : >> { %10585 = vst [vmem:[#allocation53_spill] sm:$0xff] %v6496_v9  ;;  %v6499_v48 = vld [vmem:[%s5166_s27 + $0x7b] sm:$0xff]  ;;  %v2178_v61 = vadd.f32 %v6193_v47, %v2113_v42  ;;  %v6507_v25 = vmul.f32 %v10587_v55, %v6469_v39  ;;  %10588 = vst [vmem:[#allocation114_spill] sm:$0xff] %v6509_v8  ;;  %v6521_v47 = vld [vmem:[%s5166_s27 + $0x93] sm:$0xff] }
 0x13d   : >> { %10586 = vst [vmem:[#allocation62_spill] sm:$0xff] %v6499_v48  ;;  %v1450_v20 = vmul.f32 %v6499_v48, %v6496_v9  ;;  %v10589_v29 = vld [vmem:[#allocation96_spill] sm:$0xff]  ;;  %10592 = vst [vmem:[#allocation65_spill] sm:$0xff] %v6521_v47  ;;  %v1487_v38 = vmul.f32 %v6521_v47, %v6518_v41  ;;  %v6526_v42 = vld [vmem:[%s5166_s27 + $0x109] sm:$0xff]  ;;  %v863_v21 = vadd.f32 %v847_v5, %v826_v58 }
 0x13e   : >> { %v884_v57 = vmul.f32 %v6509_v8, %v10589_v29  ;;  %v10590_v32 = vld [vmem:[#allocation88_spill] sm:$0xff]  ;;  %10593 = vst [vmem:[#allocation71_spill] sm:$0xff] %v6526_v42  ;;  %v2215_v14 = vadd.f32 %v6216_v43, %v2178_v61  ;;  %v6530_v55 = vld [vmem:[%s5166_s27 + $0xb6] sm:$0xff]  ;;  %v6533_v11 = vld [vmem:[%s5166_s27 + $0xce] sm:$0xff]  ;;  %v1834_v39 = vadd.f32 %v6409_v27, %v1797_v2  ;;  %v6549_v43 = vmul.f32 %v10497_v30, %v6245_v33 }
 0x13f   : >> { %v6516_v63 = vmul.f32 %v10590_v32, %v6485_v18  ;;  %10594 = vst [vmem:[#allocation55_spill] sm:$0xff] %v6530_v55  ;;  %10595 = vst [vmem:[#allocation33_spill] sm:$0xff] %v6533_v11  ;;  %v10596_v13 = vld [vmem:[#allocation95_spill] sm:$0xff]  ;;  %v6539_v24 = vld [vmem:[#allocation7 + $0x24] ss:$0 sm:$0xff]  ;;  %v1466_v61 = vadd.f32 %v1450_v20, %v1429_v51  ;;  %v6570_v51 = vmul.f32 %v5642_v10, %v6530_v55 }
 0x140   : >> { %v6537_v29 = vmul.f32 %v10596_v13, %v6233_v56  ;;  %v10597_v32 = vld [vmem:[#allocation99_spill] sm:$0xff]  ;;  %v6545_v41 = vld [vmem:[%s5166_s27 + $0xe6] sm:$0xff]  ;;  %v2252_v5 = vadd.f32 %v6230_v50, %v2215_v14  ;;  %v900_v27 = vadd.f32 %v884_v57, %v863_v21  ;;  %v1899_v20 = vadd.f32 %v6413_v31, %v1834_v39 }
 0x141   : >> { %v921_v18 = vmul.f32 %v6539_v24, %v10597_v32  ;;  %10598 = vst [vmem:[#allocation45_spill] sm:$0xff] %v6545_v41  ;;  %v6551_v8 = vld [vmem:[#allocation7 + $0x2d] ss:$0 sm:$0xff]  ;;  %v10600_v9 = vld [vmem:[#allocation123_spill] sm:$0xff]  ;;  %v6561_v32 = vmul.f32 %v5640_v0, %v6259_v12  ;;  %v6563_v2 = vld [vmem:[#allocation7 + $0x2b] ss:$0 sm:$0xff]  ;;  %v6574_v50 = vmul.f32 %v5644_v1, %v6533_v11  ;;  %v1503_v0 = vadd.f32 %v1487_v38, %v1466_v61 }
 0x142   : >> { %10599 = vst [vmem:[#allocation157_spill] sm:$0xff] %v6551_v8  ;;  %v1524_v13 = vmul.f32 %v6551_v8, %v10600_v9  ;;  %v6557_v58 = vld [vmem:[%s5166_s27 + $0xfe] sm:$0xff]  ;;  %10602 = vst [vmem:[#allocation49_spill] sm:$0xff] %v6563_v2  ;;  %v958_v30 = vmul.f32 %v6563_v2, %v6526_v42  ;;  %v2289_v14 = vadd.f32 %v6249_v22, %v2252_v5  ;;  %v4401_v38 = vld [vmem:[%s5166_s27 + $0x34] sm:$0xff] }
 0x143   : >> { %10601 = vst [vmem:[#allocation75_spill] sm:$0xff] %v6557_v58  ;;  %v6579_v57 = vmul.f32 %v5665_v52, %v6545_v41  ;;  %v937_v21 = vadd.f32 %v921_v18, %v900_v27  ;;  %v6581_v42 = vld [vmem:[#allocation7 + $0x2] ss:$0 sm:$0xff]  ;;  %v1936_v10 = vadd.f32 %v6427_v19, %v1899_v20  ;;  %v6588_v1 = vmul.f32 %v5667_v62, %v6557_v58  ;;  %v6591_v22 = vld [vmem:[#allocation7 + $0xb] ss:$0 sm:$0xff]  ;;  %v6596_v61 = vld [vmem:[%s5166_s27 + $0x4c] sm:$0xff] }
 0x144   : >> { %10603 = vst [vmem:[#allocation89_spill] sm:$0xff] %v6581_v42  ;;  %v1023_v39 = vmul.f32 %v6581_v42, %v6355_v44  ;;  %v1540_v31 = vadd.f32 %v1524_v13, %v1503_v0  ;;  %v1626_v52 = vmul.f32 %v6591_v22, %v4401_v38  ;;  %v2326_v18 = vadd.f32 %v6253_v7, %v2289_v14  ;;  %v6598_v5 = vld [vmem:[#allocation7 + $0x12] ss:$0 sm:$0xff]  ;;  %v6602_v20 = vld [vmem:[#allocation7 + $0x9] ss:$0 sm:$0xff]  ;;  %v10607_v0 = vld [vmem:[#allocation60_spill] sm:$0xff] }
 0x145   : >> { %10604 = vst [vmem:[#allocation79_spill] sm:$0xff] %v6596_v61  ;;  %10605 = vst [vmem:[#allocation80_spill] sm:$0xff] %v6598_v5  ;;  %v1663_v19 = vmul.f32 %v6598_v5, %v6596_v61  ;;  %v974_v27 = vadd.f32 %v958_v30, %v937_v21  ;;  %v1060_v62 = vmul.f32 %v6602_v20, %v6377_v49  ;;  %v6608_v38 = vld [vmem:[#allocation7 + $0x19] ss:$0 sm:$0xff]  ;;  %v6611_v7 = vld [vmem:[%s5166_s27 + $0x64] sm:$0xff] }
 0x146   : >> { %10606 = vst [vmem:[#allocation96_spill] sm:$0xff] %v6602_v20  ;;  %v1973_v13 = vadd.f32 %v6448_v53, %v1936_v10  ;;  %v1605_v58 = vadd.f32 %v10607_v0, %v1540_v31  ;;  %10608 = vst [vmem:[#allocation88_spill] sm:$0xff] %v6608_v38  ;;  %v1700_v14 = vmul.f32 %v6611_v7, %v6608_v38  ;;  %v6615_v41 = vld [vmem:[#allocation7 + $0x10] ss:$0 sm:$0xff]  ;;  %v10611_v11 = vld [vmem:[#allocation87_spill] sm:$0xff] }
 0x147   : >> { %10609 = vst [vmem:[#allocation95_spill] sm:$0xff] %v6611_v7  ;;  %10610 = vst [vmem:[#allocation99_spill] sm:$0xff] %v6615_v41  ;;  %v1097_v30 = vmul.f32 %v6615_v41, %v10557_v35  ;;  %v2363_v21 = vadd.f32 %v6275_v17, %v2326_v18  ;;  %v1039_v61 = vadd.f32 %v1023_v39, %v974_v27  ;;  %v10612_v10 = vld [vmem:[#allocation90_spill] sm:$0xff]  ;;  %v10614_v7 = vld [vmem:[#allocation115_spill] sm:$0xff] }
 0x148   : >> { %v458_v53 = vmul.f32 %v6309_v16, %v10611_v11  ;;  %v479_v31 = vmul.f32 %v6321_v4, %v10612_v10  ;;  %v2010_v0 = vadd.f32 %v6473_v36, %v1973_v13  ;;  %v1642_v49 = vadd.f32 %v1626_v52, %v1605_v58  ;;  %v6625_v44 = vld [vmem:[#allocation7 + $0x17] ss:$0 sm:$0xff]  ;;  %v10616_v11 = vld [vmem:[#allocation104_spill] sm:$0xff]  ;;  %v10617_v27 = vld [vmem:[#allocation23_spill] sm:$0xff] }
 0x149   : >> { %10613 = vst [vmem:[#allocation123_spill] sm:$0xff] %v6625_v44  ;;  %v1134_v55 = vmul.f32 %v6625_v44, %v10614_v7  ;;  %v10615_v12 = vld [vmem:[#allocation94_spill] sm:$0xff]  ;;  %v2400_v17 = vadd.f32 %v6279_v46, %v2363_v21  ;;  %v1076_v39 = vadd.f32 %v1060_v62, %v1039_v61  ;;  %v553_v33 = vmul.f32 %v10617_v27, %v10616_v11  ;;  %v6635_v58 = vld [vmem:[#allocation7 + $0x20] ss:$0 sm:$0xff]  ;;  %v10620_v13 = vld [vmem:[#allocation121_spill] sm:$0xff] }
 0x14a   : >> { %v516_v35 = vmul.f32 %v6328_v60, %v10615_v12  ;;  %v495_v18 = vadd.f32 %v479_v31, %v458_v53  ;;  %v2047_v10 = vadd.f32 %v6494_v3, %v2010_v0  ;;  %v1679_v36 = vadd.f32 %v1663_v19, %v1642_v49  ;;  %10618 = vst [vmem:[#allocation60_spill] sm:$0xff] %v6635_v58  ;;  %v6638_v52 = vld [vmem:[%s5166_s27 + $0x7c] sm:$0xff]  ;;  %v10621_v46 = vld [vmem:[#allocation81_spill] sm:$0xff]  ;;  %v6648_v0 = vld [vmem:[#allocation7 + $0x27] ss:$0 sm:$0xff] }
 0x14b   : >> { %10619 = vst [vmem:[#allocation87_spill] sm:$0xff] %v6638_v52  ;;  %v1737_v12 = vmul.f32 %v6638_v52, %v6635_v58  ;;  %v1171_v61 = vmul.f32 %v10621_v46, %v10620_v13  ;;  %v2423_v62 = vadd.f32 %v6201_v45, %v2400_v17  ;;  %v1113_v7 = vadd.f32 %v1097_v30, %v1076_v39  ;;  %v10622_v53 = vld [vmem:[#allocation108_spill] sm:$0xff]  ;;  %v10623_v31 = vld [vmem:[#allocation41_spill] sm:$0xff]  ;;  %v6651_v11 = vld [vmem:[%s5166_s27 + $0x94] sm:$0xff] }
 0x14c   : >> { %v532_v21 = vadd.f32 %v516_v35, %v495_v18  ;;  %v590_v3 = vmul.f32 %v10623_v31, %v10622_v53  ;;  %v2084_v49 = vadd.f32 %v6507_v25, %v2047_v10  ;;  %v1716_v19 = vadd.f32 %v1700_v14, %v1679_v36  ;;  %10624 = vst [vmem:[#allocation90_spill] sm:$0xff] %v6648_v0  ;;  %v6655_v13 = vld [vmem:[#allocation7 + $0x2e] ss:$0 sm:$0xff]  ;;  %v10627_v17 = vld [vmem:[#allocation44_spill] sm:$0xff]  ;;  %v10629_v39 = vld [vmem:[#allocation122_spill] sm:$0xff] }
 0x14d   : >> { %10625 = vst [vmem:[#allocation115_spill] sm:$0xff] %v6651_v11  ;;  %v1774_v56 = vmul.f32 %v6651_v11, %v6648_v0  ;;  %10626 = vst [vmem:[#allocation94_spill] sm:$0xff] %v6655_v13  ;;  %v1811_v30 = vmul.f32 %v6655_v13, %v10627_v17  ;;  %v6660_v35 = vld [vmem:[%s5166_s27 + $0x10a] sm:$0xff]  ;;  %4024 = vmatmul.mubr.f32.vlgmr.msra.gmra.mrb[0].mxu0 %v2423_v62  ;;  %v1150_v25 = vadd.f32 %v1134_v55, %v1113_v7  ;;  %v10630_v14 = vld [vmem:[#allocation148_spill] sm:$0xff] }
 0x14e   : >> { %10628 = vst [vmem:[#allocation104_spill] sm:$0xff] %v6660_v35  ;;  %2441 = vst [vmem:[%s6239_s19 + $0x8] sm:$0xff] %v2423_v62  ;;  %v1208_v18 = vmul.f32 %v10630_v14, %v10629_v39  ;;  %v569_v10 = vadd.f32 %v553_v33, %v532_v21  ;;  %v10631_v36 = vld [vmem:[#allocation113_spill] sm:$0xff]  ;;  %v2121_v46 = vadd.f32 %v6516_v63, %v2084_v49  ;;  %v4415_v31 = vld [vmem:[%s5166_s27 + $0x35] sm:$0xff] }
 0x14f   : >> { %v627_v53 = vmul.f32 %v6389_v15, %v10631_v36  ;;  %v1753_v44 = vadd.f32 %v1737_v12, %v1716_v19  ;;  %v6669_v41 = vld [vmem:[#allocation7 + $0xc] ss:$0 sm:$0xff]  ;;  %v6673_v60 = vld [vmem:[%s5166_s27 + $0x4d] sm:$0xff]  ;;  %v1187_v62 = vadd.f32 %v1171_v61, %v1150_v25  ;;  %v1245_v7 = vmul.f32 %v6397_v34, %v6660_v35  ;;  %v6694_v61 = vld [vmem:[%s5166_s27 + $0x7d] sm:$0xff] }
 0x150   : >> { %10632 = vst [vmem:[#allocation121_spill] sm:$0xff] %v6669_v41  ;;  %v1913_v27 = vmul.f32 %v6669_v41, %v4415_v31  ;;  %10633 = vst [vmem:[#allocation108_spill] sm:$0xff] %v6673_v60  ;;  %v6675_v55 = vld [vmem:[#allocation7 + $0x13] ss:$0 sm:$0xff]  ;;  %v606_v21 = vadd.f32 %v590_v3, %v569_v10  ;;  %v10635_v63 = vld [vmem:[#allocation141_spill] sm:$0xff]  ;;  %v2186_v49 = vadd.f32 %v6537_v29, %v2121_v46 }
 0x151   : >> { %10634 = vst [vmem:[#allocation44_spill] sm:$0xff] %v6675_v55  ;;  %v1950_v33 = vmul.f32 %v6675_v55, %v6673_v60  ;;  %v664_v12 = vmul.f32 %v6403_v40, %v10635_v63  ;;  %v1790_v19 = vadd.f32 %v1774_v56, %v1753_v44  ;;  %v6684_v31 = vld [vmem:[#allocation7 + $0x1a] ss:$0 sm:$0xff]  ;;  %v6687_v39 = vld [vmem:[%s5166_s27 + $0x65] sm:$0xff]  ;;  %v6691_v60 = vld [vmem:[#allocation7 + $0x21] ss:$0 sm:$0xff]  ;;  %v1224_v25 = vadd.f32 %v1208_v18, %v1187_v62 }
 0x152   : >> { %10636 = vst [vmem:[#allocation122_spill] sm:$0xff] %v6684_v31  ;;  %10637 = vst [vmem:[#allocation113_spill] sm:$0xff] %v6687_v39  ;;  %v1987_v36 = vmul.f32 %v6687_v39, %v6684_v31  ;;  %v6698_v3 = vmul.f32 %v6694_v61, %v6691_v60  ;;  %v6700_v10 = vld [vmem:[#allocation7 + $0x3] ss:$0 sm:$0xff]  ;;  %v643_v44 = vadd.f32 %v627_v53, %v606_v21  ;;  %v6707_v34 = vld [vmem:[#allocation7 + $0x28] ss:$0 sm:$0xff] }
 0x153   : >> { %10638 = vst [vmem:[#allocation141_spill] sm:$0xff] %v6691_v60  ;;  %10639 = vst [vmem:[#allocation171_spill] sm:$0xff] %v6694_v61  ;;  %v1310_v56 = vmul.f32 %v6700_v10, %v6499_v48  ;;  %v10641_v29 = vld [vmem:[#allocation120_spill] sm:$0xff]  ;;  %v2223_v35 = vadd.f32 %v6549_v43, %v2186_v49  ;;  %v1827_v39 = vadd.f32 %v1811_v30, %v1790_v19  ;;  %v6710_v14 = vld [vmem:[%s5166_s27 + $0x95] sm:$0xff] }
 0x154   : >> { %10640 = vst [vmem:[#allocation172_spill] sm:$0xff] %v6700_v10  ;;  %v729_v46 = vmul.f32 %v6417_v23, %v10641_v29  ;;  %10642 = vst [vmem:[#allocation120_spill] sm:$0xff] %v6707_v34  ;;  %v2061_v18 = vmul.f32 %v6710_v14, %v6707_v34  ;;  %v6714_v62 = vld [vmem:[#allocation7 + $0x2f] ss:$0 sm:$0xff]  ;;  %v10645_v40 = vld [vmem:[#allocation67_spill] sm:$0xff]  ;;  %v1261_v53 = vadd.f32 %v1245_v7, %v1224_v25 }
 0x155   : >> { %10643 = vst [vmem:[#allocation173_spill] sm:$0xff] %v6710_v14  ;;  %10644 = vst [vmem:[#allocation174_spill] sm:$0xff] %v6714_v62  ;;  %v6718_v48 = vmul.f32 %v6714_v62, %v10645_v40  ;;  %v1347_v21 = vmul.f32 %v6521_v47, %v6430_v6  ;;  %v680_v43 = vadd.f32 %v664_v12, %v643_v44  ;;  %v10646_v49 = vld [vmem:[#allocation126_spill] sm:$0xff]  ;;  %v10647_v29 = vld [vmem:[#allocation84_spill] sm:$0xff] }
 0x156   : >> { %v766_v30 = vmul.f32 %v6438_v28, %v10646_v49  ;;  %v2260_v19 = vadd.f32 %v6561_v32, %v2223_v35  ;;  %v1892_v10 = vadd.f32 %v10647_v29, %v1827_v39  ;;  %v4427_v23 = vld [vmem:[%s5166_s27 + $0x36] sm:$0xff]  ;;  %v6727_v15 = vld [vmem:[#allocation7 + $0xd] ss:$0 sm:$0xff]  ;;  %v6733_v7 = vld [vmem:[%s5166_s27 + $0x4e] sm:$0xff]  ;;  %v1326_v44 = vadd.f32 %v1310_v56, %v1261_v53 }
 0x157   : >> { %10648 = vst [vmem:[#allocation67_spill] sm:$0xff] %v6727_v15  ;;  %v6730_v62 = vmul.f32 %v6727_v15, %v4427_v23  ;;  %10649 = vst [vmem:[#allocation126_spill] sm:$0xff] %v6733_v7  ;;  %v6735_v25 = vld [vmem:[#allocation7 + $0x14] ss:$0 sm:$0xff]  ;;  %v1384_v32 = vmul.f32 %v6454_v54, %v10600_v9  ;;  %v745_v35 = vadd.f32 %v729_v46, %v680_v43  ;;  %v10651_v39 = vld [vmem:[#allocation131_spill] sm:$0xff] }
 0x158   : >> { %10650 = vst [vmem:[#allocation84_spill] sm:$0xff] %v6735_v25  ;;  %v6739_v12 = vmul.f32 %v6735_v25, %v6733_v7  ;;  %v803_v49 = vmul.f32 %v6463_v26, %v10651_v39  ;;  %v2297_v23 = vadd.f32 %v6570_v51, %v2260_v19  ;;  %v1929_v29 = vadd.f32 %v1913_v27, %v1892_v10  ;;  %v6746_v47 = vld [vmem:[#allocation7 + $0x1b] ss:$0 sm:$0xff]  ;;  %v6749_v6 = vld [vmem:[%s5166_s27 + $0x66] sm:$0xff]  ;;  %v6755_v56 = vld [vmem:[#allocation7 + $0x22] ss:$0 sm:$0xff] }
 0x159   : >> { %10652 = vst [vmem:[#allocation131_spill] sm:$0xff] %v6746_v47  ;;  %10653 = vst [vmem:[#allocation175_spill] sm:$0xff] %v6749_v6  ;;  %v6753_v7 = vmul.f32 %v6749_v6, %v6746_v47  ;;  %v6758_v53 = vld [vmem:[%s5166_s27 + $0x7e] sm:$0xff]  ;;  %v6765_v46 = vld [vmem:[%s5166_s27 + $0x10b] sm:$0xff]  ;;  %v1363_v51 = vadd.f32 %v1347_v21, %v1326_v44  ;;  %v782_v43 = vadd.f32 %v766_v30, %v745_v35 }
 0x15a   : >> { %10654 = vst [vmem:[#allocation176_spill] sm:$0xff] %v6755_v56  ;;  %10655 = vst [vmem:[#allocation177_spill] sm:$0xff] %v6758_v53  ;;  %v6762_v9 = vmul.f32 %v6758_v53, %v6755_v56  ;;  %v10658_v27 = vld [vmem:[#allocation127_spill] sm:$0xff]  ;;  %v2334_v6 = vadd.f32 %v6574_v50, %v2297_v23  ;;  %v1966_v54 = vadd.f32 %v1950_v33, %v1929_v29  ;;  %v6772_v26 = vld [vmem:[#allocation7 + $0x29] ss:$0 sm:$0xff] }
 0x15b   : >> { %10657 = vst [vmem:[#allocation179_spill] sm:$0xff] %v6765_v46  ;;  %v1421_v10 = vmul.f32 %v6475_v59, %v10658_v27  ;;  %v10659_v19 = vld [vmem:[#allocation139_spill] sm:$0xff]  ;;  %10660 = vst [vmem:[#allocation127_spill] sm:$0xff] %v6772_v26  ;;  %v6781_v47 = vld [vmem:[#allocation7 + $0x30] ss:$0 sm:$0xff]  ;;  %v1400_v30 = vadd.f32 %v1384_v32, %v1363_v51  ;;  %v819_v33 = vadd.f32 %v803_v49, %v782_v43 }
 0x15c   : >> { %10656 = vst [vmem:[#allocation178_spill] sm:$0xff] %v6762_v9  ;;  %v840_v39 = vmul.f32 %v6487_v37, %v10659_v19  ;;  %v6775_v28 = vld [vmem:[%s5166_s27 + $0x96] sm:$0xff]  ;;  %10663 = vst [vmem:[#allocation181_spill] sm:$0xff] %v6781_v47  ;;  %v10666_v35 = vld [vmem:[#allocation128_spill] sm:$0xff]  ;;  %v2371_v37 = vadd.f32 %v6579_v57, %v2334_v6  ;;  %v2003_v59 = vadd.f32 %v1987_v36, %v1966_v54 }
 0x15d   : >> { %10661 = vst [vmem:[#allocation139_spill] sm:$0xff] %v6775_v28  ;;  %v6779_v56 = vmul.f32 %v6775_v28, %v6772_v26  ;;  %v10664_v21 = vld [vmem:[#allocation70_spill] sm:$0xff]  ;;  %v10667_v27 = vld [vmem:[#allocation53_spill] sm:$0xff]  ;;  %v10668_v23 = vld [vmem:[#allocation140_spill] sm:$0xff]  ;;  %v1532_v9 = vmul.f32 %v6551_v8, %v6765_v46  ;;  %v1671_v57 = vmul.f32 %v6598_v5, %v10627_v17 }
 0x15e   : >> { %v6785_v44 = vmul.f32 %v6781_v47, %v10664_v21  ;;  %v1458_v50 = vmul.f32 %v10667_v27, %v10666_v35  ;;  %v10669_v29 = vld [vmem:[#allocation114_spill] sm:$0xff]  ;;  %v10670_v26 = vld [vmem:[#allocation129_spill] sm:$0xff]  ;;  %v1437_v47 = vadd.f32 %v1421_v10, %v1400_v30  ;;  %v856_v51 = vadd.f32 %v840_v39, %v819_v33  ;;  %v10673_v49 = vld [vmem:[#allocation147_spill] sm:$0xff] }
 0x15f   : >> { %10662 = vst [vmem:[#allocation180_spill] sm:$0xff] %v6779_v56  ;;  %v877_v19 = vmul.f32 %v10669_v29, %v10668_v23  ;;  %v10671_v56 = vld [vmem:[#allocation32_spill] sm:$0xff]  ;;  %v914_v43 = vmul.f32 %v6539_v24, %v10673_v49  ;;  %v2408_v35 = vadd.f32 %v6588_v1, %v2371_v37  ;;  %v2040_v6 = vadd.f32 %v6698_v3, %v2003_v59  ;;  %v6805_v54 = vld [vmem:[%s5166_s27 + $0x10c] sm:$0xff]  ;;  %v10676_v33 = vld [vmem:[#allocation163_spill] sm:$0xff] }
 0x160   : >> { %10665 = vst [vmem:[#allocation70_spill] sm:$0xff] %v6785_v44  ;;  %v1495_v25 = vmul.f32 %v10671_v56, %v10670_v26  ;;  %v6796_v44 = vld [vmem:[#allocation7 + $0x4] ss:$0 sm:$0xff]  ;;  %10674 = vst [vmem:[#allocation53_spill] sm:$0xff] %v6805_v54  ;;  %v1634_v26 = vmul.f32 %v6651_v11, %v6591_v22  ;;  %v1474_v36 = vadd.f32 %v1458_v50, %v1437_v47  ;;  %v10677_v3 = vld [vmem:[#allocation133_spill] sm:$0xff] }
 0x161   : >> { %10672 = vst [vmem:[#allocation128_spill] sm:$0xff] %v6796_v44  ;;  %v1597_v32 = vmul.f32 %v6796_v44, %v6638_v52  ;;  %v10675_v10 = vld [vmem:[#allocation132_spill] sm:$0xff]  ;;  %v893_v30 = vadd.f32 %v877_v19, %v856_v51  ;;  %v951_v37 = vmul.f32 %v6563_v2, %v10676_v33  ;;  %v2431_v59 = vadd.f32 %v6201_v45, %v2408_v35  ;;  %v10678_v49 = vld [vmem:[#allocation134_spill] sm:$0xff]  ;;  %v10686_v11 = vld [vmem:[#allocation145_spill] sm:$0xff] }
 0x162   : >> { %v1708_v39 = vmul.f32 %v6608_v38, %v10675_v10  ;;  %v2077_v1 = vadd.f32 %v2061_v18, %v2040_v6  ;;  %v1745_v23 = vmul.f32 %v6635_v58, %v10677_v3  ;;  %v6820_v46 = vmul.f32 %v6648_v0, %v10678_v49  ;;  %v10679_v19 = vld [vmem:[#allocation150_spill] sm:$0xff]  ;;  %v6830_v35 = vld [vmem:[#allocation7 + $0x5] ss:$0 sm:$0xff]  ;;  %v10684_v3 = vld [vmem:[#allocation101_spill] sm:$0xff] }
 0x163   : >> { %v1511_v47 = vadd.f32 %v1495_v25, %v1474_v36  ;;  %v6824_v17 = vmul.f32 %v6655_v13, %v6805_v54  ;;  %v930_v50 = vadd.f32 %v914_v43, %v893_v30  ;;  %v1016_v51 = vmul.f32 %v6581_v42, %v10679_v19  ;;  %2449 = vst [vmem:[%s6239_s19 + $0x48] sm:$0xff] %v2431_v59  ;;  %v6837_v10 = vld [vmem:[%s5166_s27 + $0x80] sm:$0xff]  ;;  %v6842_v43 = vld [vmem:[%s5166_s27 + $0x98] sm:$0xff]  ;;  %v10685_v19 = vld [vmem:[#allocation105_spill] sm:$0xff] }
 0x164   : >> { %4036 = vmatmul.mubr.f32.vlgmr.msra.gmra.mrb[0].mxu1 %v2431_v59  ;;  %v2114_v18 = vadd.f32 %v6718_v48, %v2077_v1  ;;  %10680 = vst [vmem:[#allocation140_spill] sm:$0xff] %v6830_v35  ;;  %v6834_v6 = vmul.f32 %v6830_v35, %v6694_v61  ;;  %10681 = vst [vmem:[#allocation114_spill] sm:$0xff] %v6837_v10  ;;  %v466_v25 = vmul.f32 %v6837_v10, %v6309_v16  ;;  %v10683_v48 = vld [vmem:[#allocation153_spill] sm:$0xff]  ;;  %v10687_v52 = vld [vmem:[#allocation23_spill] sm:$0xff] }
 0x165   : >> { %10682 = vst [vmem:[#allocation129_spill] sm:$0xff] %v6842_v43  ;;  %v487_v36 = vmul.f32 %v6842_v43, %v6321_v4  ;;  %v1548_v30 = vadd.f32 %v1532_v9, %v1511_v47  ;;  %v967_v59 = vadd.f32 %v951_v37, %v930_v50  ;;  %v1053_v1 = vmul.f32 %v6602_v20, %v10683_v48  ;;  %v10688_v47 = vld [vmem:[#allocation156_spill] sm:$0xff]  ;;  %v10689_v50 = vld [vmem:[#allocation99_spill] sm:$0xff]  ;;  %v6865_v48 = vld [vmem:[%s5166_s27 + $0x10d] sm:$0xff] }
 0x166   : >> { %v524_v49 = vmul.f32 %v10684_v3, %v10635_v63  ;;  %v2179_v54 = vadd.f32 %v10685_v19, %v2114_v18  ;;  %v6853_v61 = vmul.f32 %v6710_v14, %v6669_v41  ;;  %v561_v42 = vmul.f32 %v10687_v52, %v10686_v11  ;;  %10690 = vst [vmem:[#allocation32_spill] sm:$0xff] %v6865_v48  ;;  %v10691_v19 = vld [vmem:[#allocation143_spill] sm:$0xff]  ;;  %v10693_v11 = vld [vmem:[#allocation41_spill] sm:$0xff]  ;;  %v10694_v20 = vld [vmem:[#allocation68_spill] sm:$0xff] }
 0x167   : >> { %v503_v10 = vadd.f32 %v487_v36, %v466_v25  ;;  %v1613_v43 = vadd.f32 %v1597_v32, %v1548_v30  ;;  %v6859_v9 = vmul.f32 %v6675_v55, %v10645_v40  ;;  %v1032_v37 = vadd.f32 %v1016_v51, %v967_v59  ;;  %v10692_v36 = vld [vmem:[#allocation69_spill] sm:$0xff]  ;;  %v10695_v59 = vld [vmem:[#allocation59_spill] sm:$0xff]  ;;  %v10698_v52 = vld [vmem:[#allocation144_spill] sm:$0xff] }
 0x168   : >> { %v1090_v63 = vmul.f32 %v10689_v50, %v10688_v47  ;;  %v2216_v18 = vadd.f32 %v6730_v62, %v2179_v54  ;;  %v6869_v14 = vmul.f32 %v6684_v31, %v10691_v19  ;;  %v598_v32 = vmul.f32 %v10693_v11, %v10692_v36  ;;  %v10696_v47 = vld [vmem:[#allocation123_spill] sm:$0xff]  ;;  %v6880_v62 = vld [vmem:[%s5166_s27 + $0x110] sm:$0xff]  ;;  %v10700_v36 = vld [vmem:[#allocation48_spill] sm:$0xff] }
 0x169   : >> { %v540_v25 = vadd.f32 %v524_v49, %v503_v10  ;;  %v1650_v30 = vadd.f32 %v1634_v26, %v1613_v43  ;;  %v6875_v40 = vmul.f32 %v6691_v60, %v10694_v20  ;;  %v1069_v51 = vadd.f32 %v1053_v1, %v1032_v37  ;;  %10697 = vst [vmem:[#allocation147_spill] sm:$0xff] %v6880_v62  ;;  %v10699_v49 = vld [vmem:[#allocation27_spill] sm:$0xff]  ;;  %v10701_v20 = vld [vmem:[#allocation174_spill] sm:$0xff] }
 0x16a   : >> { %v1127_v50 = vmul.f32 %v10696_v47, %v10695_v59  ;;  %v2253_v54 = vadd.f32 %v6739_v12, %v2216_v18  ;;  %v6885_v19 = vmul.f32 %v6707_v34, %v10698_v52  ;;  %v635_v26 = vmul.f32 %v10700_v36, %v10699_v49  ;;  %v10702_v59 = vld [vmem:[#allocation158_spill] sm:$0xff]  ;;  %v10703_v47 = vld [vmem:[#allocation81_spill] sm:$0xff]  ;;  %v6896_v18 = vld [vmem:[#allocation7 + $0x6] ss:$0 sm:$0xff] }
 0x16b   : >> { %v577_v10 = vadd.f32 %v561_v42, %v540_v25  ;;  %v1687_v43 = vadd.f32 %v1671_v57, %v1650_v30  ;;  %v6891_v1 = vmul.f32 %v10701_v20, %v6865_v48  ;;  %v1106_v37 = vadd.f32 %v1090_v63, %v1069_v51  ;;  %10704 = vst [vmem:[#allocation132_spill] sm:$0xff] %v6896_v18  ;;  %v10706_v57 = vld [vmem:[#allocation149_spill] sm:$0xff]  ;;  %v10708_v49 = vld [vmem:[#allocation159_spill] sm:$0xff] }
 0x16c   : >> { %v1164_v11 = vmul.f32 %v10703_v47, %v10702_v59  ;;  %v2290_v12 = vadd.f32 %v6753_v7, %v2253_v54  ;;  %v6900_v42 = vmul.f32 %v6896_v18, %v6758_v53  ;;  %v672_v25 = vmul.f32 %v10706_v57, %v6880_v62  ;;  %v10709_v59 = vld [vmem:[#allocation148_spill] sm:$0xff]  ;;  %v10710_v54 = vld [vmem:[#allocation178_spill] sm:$0xff]  ;;  %v10714_v62 = vld [vmem:[#allocation51_spill] sm:$0xff] }
 0x16d   : >> { %v614_v52 = vadd.f32 %v598_v32, %v577_v10  ;;  %v1724_v30 = vadd.f32 %v1708_v39, %v1687_v43  ;;  %v6906_v63 = vmul.f32 %v6775_v28, %v6727_v15  ;;  %v1143_v51 = vadd.f32 %v1127_v50, %v1106_v37  ;;  %v10711_v47 = vld [vmem:[#allocation84_spill] sm:$0xff]  ;;  %v6921_v28 = vld [vmem:[%s5166_s27 + $0x10e] sm:$0xff]  ;;  %v10717_v50 = vld [vmem:[#allocation131_spill] sm:$0xff] }
 0x16e   : >> { %10705 = vst [vmem:[#allocation163_spill] sm:$0xff] %v6900_v42  ;;  %v1201_v7 = vmul.f32 %v10709_v59, %v10708_v49  ;;  %v2327_v48 = vadd.f32 %v10710_v54, %v2290_v12  ;;  %v6913_v53 = vmul.f32 %v10711_v47, %v10664_v21  ;;  %v6916_v10 = vld [vmem:[%s5166_s27 + $0x81] sm:$0xff]  ;;  %10715 = vst [vmem:[#allocation153_spill] sm:$0xff] %v6921_v28  ;;  %v6935_v42 = vld [vmem:[%s5166_s27 + $0x99] sm:$0xff] }
 0x16f   : >> { %10707 = vst [vmem:[#allocation133_spill] sm:$0xff] %v6906_v63  ;;  %v651_v32 = vadd.f32 %v635_v26, %v614_v52  ;;  %10713 = vst [vmem:[#allocation150_spill] sm:$0xff] %v6916_v10  ;;  %v737_v39 = vmul.f32 %v6916_v10, %v10714_v62  ;;  %v1761_v43 = vadd.f32 %v1745_v23, %v1724_v30  ;;  %v10716_v63 = vld [vmem:[#allocation72_spill] sm:$0xff]  ;;  %v10720_v12 = vld [vmem:[#allocation25_spill] sm:$0xff] }
 0x170   : >> { %10712 = vst [vmem:[#allocation134_spill] sm:$0xff] %v6913_v53  ;;  %v6925_v37 = vmul.f32 %v10717_v50, %v10716_v63  ;;  %v1180_v49 = vadd.f32 %v1164_v11, %v1143_v51  ;;  %v10719_v59 = vld [vmem:[#allocation28_spill] sm:$0xff]  ;;  %v10722_v53 = vld [vmem:[#allocation54_spill] sm:$0xff]  ;;  %10725 = vst [vmem:[#allocation145_spill] sm:$0xff] %v6935_v42 }
 0x171   : >> { %v1238_v54 = vmul.f32 %v10720_v12, %v10719_v59  ;;  %v10721_v57 = vld [vmem:[#allocation180_spill] sm:$0xff]  ;;  %v688_v47 = vadd.f32 %v672_v25, %v651_v32  ;;  %v10726_v23 = vld [vmem:[#allocation151_spill] sm:$0xff]  ;;  %v1798_v10 = vadd.f32 %v6820_v46, %v1761_v43  ;;  %v10727_v63 = vld [vmem:[#allocation154_spill] sm:$0xff] }
 0x172   : >> { %10718 = vst [vmem:[#allocation101_spill] sm:$0xff] %v6925_v37  ;;  %v2364_v21 = vadd.f32 %v10721_v57, %v2327_v48  ;;  %v10723_v26 = vld [vmem:[#allocation176_spill] sm:$0xff]  ;;  %v774_v30 = vmul.f32 %v6935_v42, %v10726_v23  ;;  %v10728_v62 = vld [vmem:[#allocation127_spill] sm:$0xff]  ;;  %v1217_v51 = vadd.f32 %v1201_v7, %v1180_v49  ;;  %v10732_v57 = vld [vmem:[#allocation70_spill] sm:$0xff] }
 0x173   : >> { %v6932_v52 = vmul.f32 %v10723_v26, %v10722_v53  ;;  %v6942_v11 = vmul.f32 %v10728_v62, %v10727_v63  ;;  %v10730_v37 = vld [vmem:[#allocation160_spill] sm:$0xff]  ;;  %v10733_v53 = vld [vmem:[#allocation181_spill] sm:$0xff]  ;;  %v753_v32 = vadd.f32 %v737_v39, %v688_v47  ;;  %v10735_v42 = vld [vmem:[#allocation50_spill] sm:$0xff]  ;;  %v1835_v46 = vadd.f32 %v6824_v17, %v1798_v10 }
 0x174   : >> { %v10731_v12 = vld [vmem:[#allocation172_spill] sm:$0xff]  ;;  %v2401_v50 = vadd.f32 %v10732_v57, %v2364_v21  ;;  %v6949_v25 = vmul.f32 %v10733_v53, %v6921_v28  ;;  %v1254_v43 = vadd.f32 %v1238_v54, %v1217_v51  ;;  %v10736_v63 = vld [vmem:[#allocation161_spill] sm:$0xff]  ;;  %v10738_v49 = vld [vmem:[#allocation162_spill] sm:$0xff] }
 0x175   : >> { %10724 = vst [vmem:[#allocation105_spill] sm:$0xff] %v6932_v52  ;;  %10729 = vst [vmem:[#allocation156_spill] sm:$0xff] %v6942_v11  ;;  %v1303_v48 = vmul.f32 %v10731_v12, %v10730_v37  ;;  %v811_v52 = vmul.f32 %v10735_v42, %v10676_v33  ;;  %v10737_v11 = vld [vmem:[#allocation35_spill] sm:$0xff]  ;;  %v10739_v23 = vld [vmem:[#allocation118_spill] sm:$0xff]  ;;  %v790_v28 = vadd.f32 %v774_v30, %v753_v32 }
 0x176   : >> { %10734 = vst [vmem:[#allocation143_spill] sm:$0xff] %v6949_v25  ;;  %v1340_v7 = vmul.f32 %v10737_v11, %v10736_v63  ;;  %v1377_v37 = vmul.f32 %v10739_v23, %v10738_v49  ;;  %v2424_v21 = vadd.f32 %v6201_v45, %v2401_v50  ;;  %v10740_v57 = vld [vmem:[#allocation34_spill] sm:$0xff]  ;;  %v10741_v12 = vld [vmem:[#allocation119_spill] sm:$0xff]  ;;  %v10742_v25 = vld [vmem:[#allocation36_spill] sm:$0xff]  ;;  %v1900_v33 = vadd.f32 %v6834_v6, %v1835_v46 }
 0x177   : >> { %v1414_v62 = vmul.f32 %v10741_v12, %v10740_v57  ;;  %v10743_v47 = vld [vmem:[#allocation152_spill] sm:$0xff]  ;;  %v1319_v17 = vadd.f32 %v1303_v48, %v1254_v43  ;;  %v10744_v10 = vld [vmem:[#allocation91_spill] sm:$0xff]  ;;  %v827_v32 = vadd.f32 %v811_v52, %v790_v28  ;;  %v10748_v45 = vld [vmem:[#allocation165_spill] sm:$0xff] }
 0x178   : >> { %v848_v39 = vmul.f32 %v10743_v47, %v10742_v25  ;;  %v1451_v54 = vmul.f32 %v10667_v27, %v10744_v10  ;;  %v10745_v51 = vld [vmem:[#allocation39_spill] sm:$0xff]  ;;  %2442 = vst [vmem:[%s6239_s19 + $0x10] sm:$0xff] %v2424_v21  ;;  %4026 = vmatprep.mubr.f32.mxu0 %v2424_v21  ;;  %v10746_v50 = vld [vmem:[#allocation24_spill] sm:$0xff]  ;;  %v885_v25 = vmul.f32 %v10669_v29, %v10748_v45  ;;  %v10750_v10 = vld [vmem:[#allocation166_spill] sm:$0xff] }
 0x179   : >> { %v1488_v63 = vmul.f32 %v10671_v56, %v10745_v51  ;;  %v1525_v49 = vmul.f32 %v6551_v8, %v10746_v50  ;;  %v10747_v57 = vld [vmem:[#allocation92_spill] sm:$0xff]  ;;  %v1937_v6 = vadd.f32 %v6853_v61, %v1900_v33  ;;  %v1356_v48 = vadd.f32 %v1340_v7, %v1319_v17  ;;  %v6985_v51 = vld [vmem:[%s5166_s27 + $0x111] sm:$0xff]  ;;  %v10752_v8 = vld [vmem:[#allocation97_spill] sm:$0xff] }
 0x17a   : >> { %v1590_v30 = vmul.f32 %v6796_v44, %v10747_v57  ;;  %v10749_v46 = vld [vmem:[#allocation164_spill] sm:$0xff]  ;;  %v6982_v21 = vmul.f32 %v6598_v5, %v10750_v10  ;;  %10751 = vst [vmem:[#allocation69_spill] sm:$0xff] %v6985_v51  ;;  %v6989_v28 = vmul.f32 %v6608_v38, %v10752_v8  ;;  %v864_v61 = vadd.f32 %v848_v39, %v827_v32  ;;  %v10754_v7 = vld [vmem:[#allocation93_spill] sm:$0xff]  ;;  %v10757_v38 = vld [vmem:[#allocation170_spill] sm:$0xff] }
 0x17b   : >> { %v6978_v43 = vmul.f32 %v6591_v22, %v10749_v46  ;;  %v10753_v52 = vld [vmem:[#allocation76_spill] sm:$0xff]  ;;  %v922_v33 = vmul.f32 %v6539_v24, %v10754_v7  ;;  %v1974_v17 = vadd.f32 %v6859_v9, %v1937_v6  ;;  %v1393_v57 = vadd.f32 %v1377_v37, %v1356_v48  ;;  %v10756_v5 = vld [vmem:[#allocation117_spill] sm:$0xff]  ;;  %v4445_v7 = vld [vmem:[%s5166_s27 + $0x30] sm:$0xff] }
 0x17c   : >> { %v6993_v45 = vmul.f32 %v6635_v58, %v10753_v52  ;;  %v10755_v46 = vld [vmem:[#allocation168_spill] sm:$0xff]  ;;  %v7004_v8 = vmul.f32 %v6655_v13, %v10756_v5  ;;  %v7008_v52 = vmul.f32 %v6830_v35, %v10757_v38  ;;  %v10758_v39 = vld [vmem:[#allocation77_spill] sm:$0xff]  ;;  %v901_v9 = vadd.f32 %v885_v25, %v864_v61  ;;  %v10761_v35 = vld [vmem:[#allocation82_spill] sm:$0xff] }
 0x17d   : >> { %v7000_v10 = vmul.f32 %v6648_v0, %v10755_v46  ;;  %v7012_v32 = vmul.f32 %v6669_v41, %v10758_v39  ;;  %v959_v37 = vmul.f32 %v6563_v2, %v6985_v51  ;;  %v2011_v6 = vadd.f32 %v6869_v14, %v1974_v17  ;;  %v7020_v13 = vld [vmem:[%s5166_s27 + $0x48] sm:$0xff]  ;;  %v10766_v0 = vld [vmem:[#allocation23_spill] sm:$0xff] }
 0x17e   : >> { %v1430_v48 = vadd.f32 %v1414_v62, %v1393_v57  ;;  %v459_v46 = vmul.f32 %v4445_v7, %v6309_v16  ;;  %10760 = vst [vmem:[#allocation59_spill] sm:$0xff] %v7020_v13  ;;  %v480_v38 = vmul.f32 %v7020_v13, %v6321_v4  ;;  %v7026_v39 = vmul.f32 %v6675_v55, %v10761_v35  ;;  %v7029_v61 = vld [vmem:[%s5166_s27 + $0x82] sm:$0xff]  ;;  %v7050_v55 = vld [vmem:[%s5166_s27 + $0x9a] sm:$0xff] }
 0x17f   : >> { %10759 = vst [vmem:[#allocation68_spill] sm:$0xff] %v7012_v32  ;;  %v938_v25 = vadd.f32 %v922_v33, %v901_v9  ;;  %10762 = vst [vmem:[#allocation144_spill] sm:$0xff] %v7029_v61  ;;  %v10763_v51 = vld [vmem:[#allocation89_spill] sm:$0xff]  ;;  %v7034_v62 = vld [vmem:[%s5166_s27 + $0x60] sm:$0xff]  ;;  %v2048_v57 = vadd.f32 %v6875_v40, %v2011_v6 }
 0x180   : >> { %v1024_v14 = vmul.f32 %v7029_v61, %v10763_v51  ;;  %10764 = vst [vmem:[#allocation27_spill] sm:$0xff] %v7034_v62  ;;  %v517_v17 = vmul.f32 %v7034_v62, %v10684_v3  ;;  %v1467_v7 = vadd.f32 %v1451_v54, %v1430_v48  ;;  %v496_v41 = vadd.f32 %v480_v38, %v459_v46  ;;  %v10765_v13 = vld [vmem:[#allocation21_spill] sm:$0xff]  ;;  %v10769_v9 = vld [vmem:[#allocation78_spill] sm:$0xff]  ;;  %v10772_v62 = vld [vmem:[#allocation96_spill] sm:$0xff] }
 0x181   : >> { %v554_v32 = vmul.f32 %v10766_v0, %v10765_v13  ;;  %v10767_v35 = vld [vmem:[#allocation109_spill] sm:$0xff]  ;;  %v7047_v61 = vmul.f32 %v6691_v60, %v10769_v9  ;;  %v975_v51 = vadd.f32 %v959_v37, %v938_v25  ;;  %10771 = vst [vmem:[#allocation159_spill] sm:$0xff] %v7050_v55  ;;  %v1061_v40 = vmul.f32 %v7050_v55, %v10772_v62  ;;  %v10773_v13 = vld [vmem:[#allocation98_spill] sm:$0xff]  ;;  %v10779_v9 = vld [vmem:[#allocation99_spill] sm:$0xff] }
 0x182   : >> { %v7043_v33 = vmul.f32 %v6684_v31, %v10767_v35  ;;  %v2085_v54 = vadd.f32 %v6885_v19, %v2048_v57  ;;  %v1504_v6 = vadd.f32 %v1488_v63, %v1467_v7  ;;  %v533_v48 = vadd.f32 %v517_v17, %v496_v41  ;;  %v10774_v46 = vld [vmem:[#allocation41_spill] sm:$0xff]  ;;  %v10781_v7 = vld [vmem:[#allocation135_spill] sm:$0xff] }
 0x183   : >> { %10770 = vst [vmem:[#allocation158_spill] sm:$0xff] %v7047_v61  ;;  %v591_v38 = vmul.f32 %v10774_v46, %v10773_v13  ;;  %v10775_v35 = vld [vmem:[#allocation29_spill] sm:$0xff]  ;;  %v1040_v25 = vadd.f32 %v1024_v14, %v975_v51  ;;  %v1098_v55 = vmul.f32 %v10779_v9, %v10719_v59  ;;  %v10793_v61 = vld [vmem:[#allocation112_spill] sm:$0xff] }
 0x184   : >> { %10768 = vst [vmem:[#allocation48_spill] sm:$0xff] %v7043_v33  ;;  %v7059_v31 = vmul.f32 %v6707_v34, %v10775_v35  ;;  %v10777_v33 = vld [vmem:[#allocation26_spill] sm:$0xff]  ;;  %v2122_v19 = vadd.f32 %v6891_v1, %v2085_v54  ;;  %v1541_v63 = vadd.f32 %v1525_v49, %v1504_v6  ;;  %v570_v41 = vadd.f32 %v554_v32, %v533_v48  ;;  %v7069_v17 = vld [vmem:[%s5166_s27 + $0xa8] sm:$0xff]  ;;  %v10787_v49 = vld [vmem:[#allocation163_spill] sm:$0xff] }
 0x185   : >> { %v7063_v37 = vmul.f32 %v10701_v20, %v10777_v33  ;;  %10780 = vst [vmem:[#allocation28_spill] sm:$0xff] %v7069_v17  ;;  %v628_v57 = vmul.f32 %v7069_v17, %v10700_v36  ;;  %v7075_v35 = vmul.f32 %v6896_v18, %v10781_v7  ;;  %v1077_v14 = vadd.f32 %v1061_v40, %v1040_v25  ;;  %v10785_v59 = vld [vmem:[#allocation73_spill] sm:$0xff]  ;;  %v7085_v48 = vld [vmem:[%s5166_s27 + $0xc0] sm:$0xff] }
 0x186   : >> { %10776 = vst [vmem:[#allocation178_spill] sm:$0xff] %v7059_v31  ;;  %v10783_v31 = vld [vmem:[#allocation111_spill] sm:$0xff]  ;;  %v2187_v32 = vadd.f32 %v10787_v49, %v2122_v19  ;;  %v1606_v54 = vadd.f32 %v1590_v30, %v1541_v63  ;;  %v607_v6 = vadd.f32 %v591_v38, %v570_v41  ;;  %10788 = vst [vmem:[#allocation154_spill] sm:$0xff] %v7085_v48  ;;  %v10789_v20 = vld [vmem:[#allocation149_spill] sm:$0xff] }
 0x187   : >> { %10778 = vst [vmem:[#allocation72_spill] sm:$0xff] %v7063_v37  ;;  %10782 = vst [vmem:[#allocation180_spill] sm:$0xff] %v7075_v35  ;;  %v7079_v51 = vmul.f32 %v6727_v15, %v10783_v31  ;;  %v10786_v37 = vld [vmem:[#allocation123_spill] sm:$0xff]  ;;  %v665_v34 = vmul.f32 %v7085_v48, %v10789_v20  ;;  %v10790_v7 = vld [vmem:[#allocation137_spill] sm:$0xff]  ;;  %v1114_v25 = vadd.f32 %v1098_v55, %v1077_v14 }
 0x188   : >> { %v1135_v1 = vmul.f32 %v10786_v37, %v10785_v59  ;;  %v10791_v35 = vld [vmem:[#allocation84_spill] sm:$0xff]  ;;  %v10794_v31 = vld [vmem:[#allocation131_spill] sm:$0xff]  ;;  %v10796_v59 = vld [vmem:[#allocation110_spill] sm:$0xff]  ;;  %v1643_v63 = vadd.f32 %v6978_v43, %v1606_v54 }
 0x189   : >> { %10784 = vst [vmem:[#allocation54_spill] sm:$0xff] %v7079_v51  ;;  %v7091_v18 = vmul.f32 %v10791_v35, %v10790_v7  ;;  %v7095_v40 = vmul.f32 %v10794_v31, %v10793_v61  ;;  %v10797_v51 = vld [vmem:[#allocation81_spill] sm:$0xff]  ;;  %v10799_v41 = vld [vmem:[#allocation138_spill] sm:$0xff]  ;;  %v10802_v35 = vld [vmem:[#allocation20_spill] sm:$0xff] }
 0x18a   : >> { %v1172_v19 = vmul.f32 %v10797_v51, %v10796_v59  ;;  %v10798_v30 = vld [vmem:[#allocation133_spill] sm:$0xff]  ;;  %v7103_v49 = vmul.f32 %v10723_v26, %v10799_v41  ;;  %v7106_v7 = vld [vmem:[%s5166_s27 + $0x112] sm:$0xff]  ;;  %v10808_v43 = vld [vmem:[#allocation148_spill] sm:$0xff]  ;;  %v1680_v26 = vadd.f32 %v6982_v21, %v1643_v63 }
 0x18b   : >> { %10792 = vst [vmem:[#allocation160_spill] sm:$0xff] %v7091_v18  ;;  %10795 = vst [vmem:[#allocation70_spill] sm:$0xff] %v7095_v40  ;;  %v2224_v38 = vadd.f32 %v10798_v30, %v2187_v32  ;;  %v644_v18 = vadd.f32 %v628_v57, %v607_v6  ;;  %v10803_v61 = vld [vmem:[#allocation127_spill] sm:$0xff]  ;;  %v1151_v32 = vadd.f32 %v1135_v1, %v1114_v25  ;;  %v10807_v59 = vld [vmem:[#allocation74_spill] sm:$0xff] }
 0x18c   : >> { %10800 = vst [vmem:[#allocation50_spill] sm:$0xff] %v7103_v49  ;;  %10801 = vst [vmem:[#allocation161_spill] sm:$0xff] %v7106_v7  ;;  %v7110_v40 = vmul.f32 %v10803_v61, %v10802_v35  ;;  %v10805_v55 = vld [vmem:[#allocation55_spill] sm:$0xff]  ;;  %v1209_v54 = vmul.f32 %v10808_v43, %v10807_v59  ;;  %v10809_v30 = vld [vmem:[#allocation134_spill] sm:$0xff] }
 0x18d   : >> { %v7114_v14 = vmul.f32 %v10733_v53, %v10805_v55  ;;  %v2261_v49 = vadd.f32 %v10809_v30, %v2224_v38  ;;  %v681_v31 = vadd.f32 %v665_v34, %v644_v18  ;;  %v4452_v57 = vld [vmem:[%s5166_s27 + $0x49] sm:$0xff]  ;;  %v10810_v6 = vld [vmem:[#allocation151_spill] sm:$0xff]  ;;  %v1188_v61 = vadd.f32 %v1172_v19, %v1151_v32  ;;  %v7141_v32 = vld [vmem:[%s5166_s27 + $0x61] sm:$0xff] }
 0x18e   : >> { %10804 = vst [vmem:[#allocation162_spill] sm:$0xff] %v7110_v40  ;;  %v767_v15 = vmul.f32 %v4452_v57, %v10810_v6  ;;  %v10811_v40 = vld [vmem:[#allocation25_spill] sm:$0xff]  ;;  %v7130_v25 = vld [vmem:[%s5166_s27 + $0x9b] sm:$0xff]  ;;  %v1717_v34 = vadd.f32 %v6989_v28, %v1680_v26  ;;  %v7137_v18 = vld [vmem:[%s5166_s27 + $0x113] sm:$0xff]  ;;  %v804_v30 = vmul.f32 %v7141_v32, %v10735_v42 }
 0x18f   : >> { %10806 = vst [vmem:[#allocation118_spill] sm:$0xff] %v7114_v14  ;;  %v1246_v35 = vmul.f32 %v10811_v40, %v7106_v7  ;;  %v7125_v53 = vld [vmem:[%s5166_s27 + $0x83] sm:$0xff]  ;;  %10814 = vst [vmem:[#allocation36_spill] sm:$0xff] %v7130_v25  ;;  %v1348_v38 = vmul.f32 %v7130_v25, %v10737_v11  ;;  %v10817_v19 = vld [vmem:[#allocation30_spill] sm:$0xff]  ;;  %v1225_v57 = vadd.f32 %v1209_v54, %v1188_v61 }
 0x190   : >> { %10812 = vst [vmem:[#allocation34_spill] sm:$0xff] %v7125_v53  ;;  %v10813_v14 = vld [vmem:[#allocation172_spill] sm:$0xff]  ;;  %v10815_v59 = vld [vmem:[#allocation101_spill] sm:$0xff]  ;;  %10816 = vst [vmem:[#allocation152_spill] sm:$0xff] %v7137_v18  ;;  %v746_v63 = vadd.f32 %v10817_v19, %v681_v31  ;;  %v1385_v7 = vmul.f32 %v10739_v23, %v10746_v50  ;;  %v1754_v31 = vadd.f32 %v6993_v45, %v1717_v34 }
 0x191   : >> { %v1311_v1 = vmul.f32 %v7125_v53, %v10813_v14  ;;  %v2298_v21 = vadd.f32 %v10815_v59, %v2261_v49  ;;  %10818 = vst [vmem:[#allocation91_spill] sm:$0xff] %v7141_v32  ;;  %v10819_v53 = vld [vmem:[#allocation116_spill] sm:$0xff]  ;;  %v10820_v49 = vld [vmem:[#allocation142_spill] sm:$0xff]  ;;  %v10821_v28 = vld [vmem:[#allocation105_spill] sm:$0xff]  ;;  %v1262_v32 = vadd.f32 %v1246_v35, %v1225_v57 }
 0x192   : >> { %v1422_v25 = vmul.f32 %v10741_v12, %v10819_v53  ;;  %v1459_v26 = vmul.f32 %v10667_v27, %v10820_v49  ;;  %v783_v19 = vadd.f32 %v767_v15, %v746_v63  ;;  %v10822_v14 = vld [vmem:[#allocation56_spill] sm:$0xff]  ;;  %v10823_v61 = vld [vmem:[#allocation83_spill] sm:$0xff]  ;;  %v10824_v50 = vld [vmem:[#allocation157_spill] sm:$0xff]  ;;  %v1791_v35 = vadd.f32 %v7000_v10, %v1754_v31 }
 0x193   : >> { %v2335_v59 = vadd.f32 %v10821_v28, %v2298_v21  ;;  %v841_v11 = vmul.f32 %v10743_v47, %v10822_v14  ;;  %v1496_v54 = vmul.f32 %v10671_v56, %v10823_v61  ;;  %v7159_v53 = vmul.f32 %v10824_v50, %v7137_v18  ;;  %v7162_v12 = vld [vmem:[%s5166_s27 + $0x84] sm:$0xff]  ;;  %v7173_v49 = vld [vmem:[%s5166_s27 + $0x9c] sm:$0xff] }
 0x194   : >> { %10825 = vst [vmem:[#allocation39_spill] sm:$0xff] %v7162_v12  ;;  %v7166_v21 = vmul.f32 %v7162_v12, %v6796_v44  ;;  %v10826_v45 = vld [vmem:[#allocation156_spill] sm:$0xff]  ;;  %v820_v14 = vadd.f32 %v804_v30, %v783_v19  ;;  %v10827_v34 = vld [vmem:[#allocation169_spill] sm:$0xff]  ;;  %v1327_v57 = vadd.f32 %v1311_v1, %v1262_v32  ;;  %10828 = vst [vmem:[#allocation24_spill] sm:$0xff] %v7173_v49 }
 0x195   : >> { %v2372_v15 = vadd.f32 %v10826_v45, %v2335_v59  ;;  %v878_v63 = vmul.f32 %v10669_v29, %v10827_v34  ;;  %v7177_v28 = vmul.f32 %v7173_v49, %v6591_v22  ;;  %v10829_v61 = vld [vmem:[#allocation80_spill] sm:$0xff]  ;;  %v10830_v12 = vld [vmem:[#allocation102_spill] sm:$0xff]  ;;  %v10832_v10 = vld [vmem:[#allocation143_spill] sm:$0xff]  ;;  %v1828_v31 = vadd.f32 %v7004_v8, %v1791_v35 }
 0x196   : >> { %v7181_v18 = vmul.f32 %v10829_v61, %v10756_v5  ;;  %v10831_v59 = vld [vmem:[#allocation88_spill] sm:$0xff]  ;;  %v857_v19 = vadd.f32 %v841_v11, %v820_v14  ;;  %v7190_v1 = vld [vmem:[%s5166_s27 + $0xa9] sm:$0xff]  ;;  %v1364_v49 = vadd.f32 %v1348_v38, %v1327_v57  ;;  %v7195_v44 = vld [vmem:[%s5166_s27 + $0x114] sm:$0xff]  ;;  %v488_v11 = vmul.f32 %v7069_v17, %v6321_v4 }
 0x197   : >> { %v7185_v45 = vmul.f32 %v10831_v59, %v10830_v12  ;;  %v2409_v30 = vadd.f32 %v10832_v10, %v2372_v15  ;;  %10833 = vst [vmem:[#allocation92_spill] sm:$0xff] %v7190_v1  ;;  %v915_v32 = vmul.f32 %v7190_v1, %v6539_v24  ;;  %10834 = vst [vmem:[#allocation165_spill] sm:$0xff] %v7195_v44  ;;  %v7198_v5 = vld [vmem:[%s5166_s27 + $0xc1] sm:$0xff]  ;;  %v10836_v8 = vld [vmem:[#allocation63_spill] sm:$0xff] }
 0x198   : >> { %10835 = vst [vmem:[#allocation164_spill] sm:$0xff] %v7198_v5  ;;  %v952_v12 = vmul.f32 %v7198_v5, %v6563_v2  ;;  %v467_v15 = vmul.f32 %v10773_v13, %v6309_v16  ;;  %v1893_v14 = vadd.f32 %v7008_v52, %v1828_v31  ;;  %v894_v10 = vadd.f32 %v878_v63, %v857_v19  ;;  %v10837_v59 = vld [vmem:[#allocation40_spill] sm:$0xff]  ;;  %v7215_v16 = vld [vmem:[%s5166_s27 + $0xd8] sm:$0xff] }
 0x199   : >> { %v2432_v35 = vadd.f32 %v10836_v8, %v2409_v30  ;;  %v525_v38 = vmul.f32 %v7085_v48, %v10684_v3  ;;  %v1401_v57 = vadd.f32 %v1385_v7, %v1364_v49  ;;  %v7212_v2 = vmul.f32 %v6635_v58, %v10837_v59  ;;  %10838 = vst [vmem:[#allocation166_spill] sm:$0xff] %v7215_v16  ;;  %v10839_v52 = vld [vmem:[#allocation68_spill] sm:$0xff]  ;;  %v10840_v63 = vld [vmem:[#allocation43_spill] sm:$0xff]  ;;  %v10841_v3 = vld [vmem:[#allocation90_spill] sm:$0xff] }
 0x19a   : >> { %v504_v61 = vadd.f32 %v488_v11, %v467_v15  ;;  %v562_v4 = vmul.f32 %v7215_v16, %v10766_v0  ;;  %v1930_v13 = vadd.f32 %v10839_v52, %v1893_v14  ;;  %v7223_v7 = vmul.f32 %v10841_v3, %v10840_v63  ;;  %v10842_v49 = vld [vmem:[#allocation94_spill] sm:$0xff]  ;;  %v7230_v19 = vld [vmem:[%s5166_s27 + $0x85] sm:$0xff]  ;;  %v7240_v52 = vld [vmem:[%s5166_s27 + $0x9d] sm:$0xff] }
 0x19b   : >> { %2450 = vst [vmem:[%s6239_s19 + $0x50] sm:$0xff] %v2432_v35  ;;  %4038 = vmatprep.mubr.f32.mxu1 %v2432_v35  ;;  %v7227_v59 = vmul.f32 %v10842_v49, %v7195_v44  ;;  %v931_v30 = vadd.f32 %v915_v32, %v894_v10  ;;  %v1438_v31 = vadd.f32 %v1422_v25, %v1401_v57  ;;  %10843 = vst [vmem:[#allocation97_spill] sm:$0xff] %v7230_v19  ;;  %v10844_v15 = vld [vmem:[#allocation140_spill] sm:$0xff]  ;;  %v4462_v8 = vld [vmem:[%s5166_s27 + $0xf0] sm:$0xff] }
 0x19c   : >> { %v7234_v0 = vmul.f32 %v7230_v19, %v10844_v15  ;;  %v541_v11 = vadd.f32 %v525_v38, %v504_v61  ;;  %v599_v35 = vmul.f32 %v4462_v8, %v10774_v46  ;;  %v1967_v14 = vadd.f32 %v7026_v39, %v1930_v13  ;;  %10845 = vst [vmem:[#allocation76_spill] sm:$0xff] %v7240_v52  ;;  %v10846_v63 = vld [vmem:[#allocation121_spill] sm:$0xff]  ;;  %v7249_v57 = vld [vmem:[%s5166_s27 + $0x120] sm:$0xff]  ;;  %v10849_v8 = vld [vmem:[#allocation42_spill] sm:$0xff] }
 0x19d   : >> { %v7244_v44 = vmul.f32 %v7240_v52, %v10846_v63  ;;  %v968_v25 = vadd.f32 %v952_v12, %v931_v30  ;;  %v4464_v32 = vld [vmem:[%s5166_s27 + $0x4a] sm:$0xff]  ;;  %10847 = vst [vmem:[#allocation93_spill] sm:$0xff] %v7249_v57  ;;  %v1475_v16 = vadd.f32 %v1459_v26, %v1438_v31  ;;  %v10848_v61 = vld [vmem:[#allocation44_spill] sm:$0xff]  ;;  %v636_v39 = vmul.f32 %v10700_v36, %v10849_v8  ;;  %v7259_v17 = vld [vmem:[%s5166_s27 + $0x115] sm:$0xff] }
 0x19e   : >> { %v1054_v10 = vmul.f32 %v4464_v32, %v10772_v62  ;;  %v7253_v38 = vmul.f32 %v10848_v61, %v10777_v33  ;;  %v578_v46 = vadd.f32 %v562_v4, %v541_v11  ;;  %v10850_v13 = vld [vmem:[#allocation48_spill] sm:$0xff]  ;;  %10851 = vst [vmem:[#allocation168_spill] sm:$0xff] %v7259_v17  ;;  %v10853_v12 = vld [vmem:[#allocation122_spill] sm:$0xff]  ;;  %v10854_v32 = vld [vmem:[#allocation37_spill] sm:$0xff]  ;;  %v673_v36 = vmul.f32 %v10789_v20, %v7249_v57 }
 0x19f   : >> { %v2004_v48 = vadd.f32 %v10850_v13, %v1967_v14  ;;  %v10852_v52 = vld [vmem:[#allocation100_spill] sm:$0xff]  ;;  %v1033_v19 = vadd.f32 %v10854_v32, %v968_v25  ;;  %v10855_v15 = vld [vmem:[#allocation22_spill] sm:$0xff]  ;;  %v1512_v31 = vadd.f32 %v1496_v54, %v1475_v16  ;;  %v10858_v13 = vld [vmem:[#allocation61_spill] sm:$0xff] }
 0x1a0   : >> { %v7263_v30 = vmul.f32 %v10853_v12, %v10852_v52  ;;  %v1091_v26 = vmul.f32 %v10779_v9, %v10855_v15  ;;  %v10856_v33 = vld [vmem:[#allocation58_spill] sm:$0xff]  ;;  %v615_v11 = vadd.f32 %v599_v35, %v578_v46  ;;  %v10859_v61 = vld [vmem:[#allocation120_spill] sm:$0xff]  ;;  %v10860_v25 = vld [vmem:[#allocation103_spill] sm:$0xff] }
 0x1a1   : >> { %v7270_v4 = vmul.f32 %v6691_v60, %v10856_v33  ;;  %v10857_v14 = vld [vmem:[#allocation158_spill] sm:$0xff]  ;;  %v7277_v52 = vmul.f32 %v10859_v61, %v10858_v13  ;;  %v1070_v12 = vadd.f32 %v1054_v10, %v1033_v19  ;;  %v1128_v32 = vmul.f32 %v10786_v37, %v10860_v25  ;;  %v10862_v46 = vld [vmem:[#allocation51_spill] sm:$0xff] }
 0x1a2   : >> { %v2041_v8 = vadd.f32 %v10857_v14, %v2004_v48  ;;  %v1549_v54 = vadd.f32 %v7159_v53, %v1512_v31  ;;  %v10861_v16 = vld [vmem:[#allocation174_spill] sm:$0xff]  ;;  %v652_v35 = vadd.f32 %v636_v39, %v615_v11  ;;  %v738_v20 = vmul.f32 %v10827_v34, %v10862_v46  ;;  %v10864_v14 = vld [vmem:[#allocation132_spill] sm:$0xff]  ;;  %v10865_v13 = vld [vmem:[#allocation167_spill] sm:$0xff] }
 0x1a3   : >> { %v7284_v15 = vmul.f32 %v10861_v16, %v7259_v17  ;;  %v10863_v48 = vld [vmem:[#allocation178_spill] sm:$0xff]  ;;  %v7291_v19 = vmul.f32 %v10864_v14, %v10799_v41  ;;  %v1107_v10 = vadd.f32 %v1091_v26, %v1070_v12  ;;  %v1165_v25 = vmul.f32 %v10865_v13, %v10797_v51  ;;  %v10866_v31 = vld [vmem:[#allocation20_spill] sm:$0xff]  ;;  %v10867_v17 = vld [vmem:[#allocation67_spill] sm:$0xff] }
 0x1a4   : >> { %v2078_v33 = vadd.f32 %v10863_v48, %v2041_v8  ;;  %v1614_v53 = vadd.f32 %v7166_v21, %v1549_v54  ;;  %v7298_v57 = vmul.f32 %v10867_v17, %v10866_v31  ;;  %v689_v39 = vadd.f32 %v673_v36, %v652_v35  ;;  %v10868_v11 = vld [vmem:[#allocation72_spill] sm:$0xff]  ;;  %v7308_v51 = vld [vmem:[%s5166_s27 + $0xaa] sm:$0xff]  ;;  %v7314_v54 = vld [vmem:[%s5166_s27 + $0x116] sm:$0xff] }
 0x1a5   : >> { %v775_v34 = vmul.f32 %v7190_v1, %v10810_v6  ;;  %v10869_v41 = vld [vmem:[#allocation84_spill] sm:$0xff]  ;;  %v1144_v12 = vadd.f32 %v1128_v32, %v1107_v10  ;;  %10870 = vst [vmem:[#allocation117_spill] sm:$0xff] %v7308_v51  ;;  %v1202_v21 = vmul.f32 %v7308_v51, %v10808_v43  ;;  %10871 = vst [vmem:[#allocation170_spill] sm:$0xff] %v7314_v54  ;;  %v10872_v36 = vld [vmem:[#allocation33_spill] sm:$0xff] }
 0x1a6   : >> { %v2115_v8 = vadd.f32 %v10868_v11, %v2078_v33  ;;  %v7305_v46 = vmul.f32 %v10869_v41, %v10805_v55  ;;  %v1651_v26 = vadd.f32 %v7177_v28, %v1614_v53  ;;  %v10873_v35 = vld [vmem:[#allocation131_spill] sm:$0xff]  ;;  %v754_v48 = vadd.f32 %v738_v20, %v689_v39  ;;  %v10875_v33 = vld [vmem:[#allocation180_spill] sm:$0xff]  ;;  %v10876_v10 = vld [vmem:[#allocation45_spill] sm:$0xff] }
 0x1a7   : >> { %v7318_v6 = vmul.f32 %v10873_v35, %v10872_v36  ;;  %v812_v55 = vmul.f32 %v7198_v5, %v10735_v42  ;;  %v10877_v31 = vld [vmem:[#allocation176_spill] sm:$0xff]  ;;  %v1181_v43 = vadd.f32 %v1165_v25, %v1144_v12  ;;  %v10880_v36 = vld [vmem:[#allocation75_spill] sm:$0xff]  ;;  %v10885_v12 = vld [vmem:[#allocation181_spill] sm:$0xff] }
 0x1a8   : >> { %v2180_v32 = vadd.f32 %v10875_v33, %v2115_v8  ;;  %v7325_v11 = vmul.f32 %v10877_v31, %v10876_v10  ;;  %v7328_v1 = vld [vmem:[%s5166_s27 + $0xc2] sm:$0xff]  ;;  %v1688_v53 = vadd.f32 %v7181_v18, %v1651_v26  ;;  %v10881_v20 = vld [vmem:[#allocation127_spill] sm:$0xff]  ;;  %v791_v42 = vadd.f32 %v775_v34, %v754_v48  ;;  %v10884_v10 = vld [vmem:[#allocation54_spill] sm:$0xff] }
 0x1a9   : >> { %10874 = vst [vmem:[#allocation77_spill] sm:$0xff] %v7318_v6  ;;  %10879 = vst [vmem:[#allocation21_spill] sm:$0xff] %v7328_v1  ;;  %v1239_v28 = vmul.f32 %v7328_v1, %v10811_v40  ;;  %v7335_v39 = vmul.f32 %v10881_v20, %v10880_v36  ;;  %v7338_v8 = vld [vmem:[%s5166_s27 + $0xd9] sm:$0xff]  ;;  %v7345_v5 = vmul.f32 %v10885_v12, %v7314_v54  ;;  %v10888_v26 = vld [vmem:[#allocation57_spill] sm:$0xff] }
 0x1aa   : >> { %10878 = vst [vmem:[#allocation82_spill] sm:$0xff] %v7325_v11  ;;  %10883 = vst [vmem:[#allocation109_spill] sm:$0xff] %v7338_v8  ;;  %v849_v33 = vmul.f32 %v7338_v8, %v10743_v47  ;;  %v2217_v25 = vadd.f32 %v10884_v10, %v2180_v32  ;;  %v1218_v40 = vadd.f32 %v1202_v21, %v1181_v43  ;;  %v10887_v18 = vld [vmem:[#allocation35_spill] sm:$0xff]  ;;  %v10889_v34 = vld [vmem:[#allocation52_spill] sm:$0xff] }
 0x1ab   : >> { %10882 = vst [vmem:[#allocation23_spill] sm:$0xff] %v7335_v39  ;;  %10886 = vst [vmem:[#allocation78_spill] sm:$0xff] %v7345_v5  ;;  %v1341_v14 = vmul.f32 %v10888_v26, %v10887_v18  ;;  %v1725_v36 = vadd.f32 %v7185_v45, %v1688_v53  ;;  %v1378_v48 = vmul.f32 %v10889_v34, %v10739_v23  ;;  %v4468_v11 = vld [vmem:[%s5166_s27 + $0xf1] sm:$0xff]  ;;  %v10890_v8 = vld [vmem:[#allocation160_spill] sm:$0xff] }
 0x1ac   : >> { %v828_v39 = vadd.f32 %v812_v55, %v791_v42  ;;  %v886_v47 = vmul.f32 %v4468_v11, %v10669_v29  ;;  %v2254_v32 = vadd.f32 %v10890_v8, %v2217_v25  ;;  %v1255_v10 = vadd.f32 %v1239_v28, %v1218_v40  ;;  %v10891_v6 = vld [vmem:[#allocation119_spill] sm:$0xff]  ;;  %v10892_v54 = vld [vmem:[#allocation62_spill] sm:$0xff]  ;;  %v10893_v21 = vld [vmem:[#allocation65_spill] sm:$0xff] }
 0x1ad   : >> { %v1415_v5 = vmul.f32 %v10892_v54, %v10891_v6  ;;  %v1452_v43 = vmul.f32 %v10893_v21, %v10667_v27  ;;  %v7360_v18 = vld [vmem:[%s5166_s27 + $0x121] sm:$0xff]  ;;  %v1762_v45 = vadd.f32 %v7212_v2, %v1725_v36  ;;  %v7364_v53 = vld [vmem:[%s5166_s27 + $0xab] sm:$0xff]  ;;  %v10896_v29 = vld [vmem:[#allocation71_spill] sm:$0xff] }
 0x1ae   : >> { %10894 = vst [vmem:[#allocation96_spill] sm:$0xff] %v7360_v18  ;;  %10895 = vst [vmem:[#allocation98_spill] sm:$0xff] %v7364_v53  ;;  %v1489_v23 = vmul.f32 %v7364_v53, %v10671_v56  ;;  %v865_v55 = vadd.f32 %v849_v33, %v828_v39  ;;  %v923_v11 = vmul.f32 %v6539_v24, %v10896_v29  ;;  %v10897_v28 = vld [vmem:[#allocation70_spill] sm:$0xff]  ;;  %v7373_v8 = vld [vmem:[%s5166_s27 + $0xc3] sm:$0xff] }
 0x1af   : >> { %v2291_v42 = vadd.f32 %v10897_v28, %v2254_v32  ;;  %v10898_v54 = vld [vmem:[#allocation46_spill] sm:$0xff]  ;;  %10899 = vst [vmem:[#allocation41_spill] sm:$0xff] %v7373_v8  ;;  %v7377_v27 = vmul.f32 %v7373_v8, %v10824_v50  ;;  %v10900_v2 = vld [vmem:[#allocation79_spill] sm:$0xff]  ;;  %v1799_v56 = vadd.f32 %v7223_v7, %v1762_v45  ;;  %v10901_v39 = vld [vmem:[#allocation80_spill] sm:$0xff] }
 0x1b0   : >> { %v1320_v6 = vadd.f32 %v10898_v54, %v1255_v10  ;;  %v7381_v25 = vmul.f32 %v10900_v2, %v6591_v22  ;;  %v10902_v33 = vld [vmem:[#allocation95_spill] sm:$0xff]  ;;  %v902_v40 = vadd.f32 %v886_v47, %v865_v55  ;;  %v10903_v26 = vld [vmem:[#allocation49_spill] sm:$0xff]  ;;  %v10904_v34 = vld [vmem:[#allocation50_spill] sm:$0xff] }
 0x1b1   : >> { %v7386_v24 = vmul.f32 %v10902_v33, %v10901_v39  ;;  %v960_v36 = vmul.f32 %v10903_v26, %v7360_v18  ;;  %v2328_v32 = vadd.f32 %v10904_v34, %v2291_v42  ;;  %v10905_v29 = vld [vmem:[#allocation88_spill] sm:$0xff]  ;;  %v10906_v28 = vld [vmem:[#allocation87_spill] sm:$0xff]  ;;  %v1836_v45 = vadd.f32 %v7227_v59, %v1799_v56  ;;  %v7401_v33 = vld [vmem:[%s5166_s27 + $0xac] sm:$0xff] }
 0x1b2   : >> { %v1357_v10 = vadd.f32 %v1341_v14, %v1320_v6  ;;  %v7393_v54 = vmul.f32 %v10906_v28, %v10905_v29  ;;  %v10907_v2 = vld [vmem:[#allocation115_spill] sm:$0xff]  ;;  %10908 = vst [vmem:[#allocation29_spill] sm:$0xff] %v7401_v33  ;;  %v7405_v47 = vmul.f32 %v7401_v33, %v10841_v3  ;;  %v939_v55 = vadd.f32 %v923_v11, %v902_v40  ;;  %v10909_v14 = vld [vmem:[#allocation89_spill] sm:$0xff]  ;;  %v10910_v6 = vld [vmem:[#allocation162_spill] sm:$0xff] }
 0x1b3   : >> { %v7397_v7 = vmul.f32 %v10907_v2, %v6635_v58  ;;  %v1025_v42 = vmul.f32 %v10909_v14, %v10865_v13  ;;  %v2365_v26 = vadd.f32 %v10910_v6, %v2328_v32  ;;  %v7410_v28 = vld [vmem:[#allocation7] ss:$0 sm:$0xff]  ;;  %v4473_v18 = vld [vmem:[%s5166_s27 + $0x38] sm:$0xff]  ;;  %v7414_v59 = vld [vmem:[#allocation7 + $0x7] ss:$0 sm:$0xff]  ;;  %v1901_v11 = vadd.f32 %v7234_v0, %v1836_v45 }
 0x1b4   : >> { %v1394_v34 = vadd.f32 %v1378_v48, %v1357_v10  ;;  %10911 = vst [vmem:[#allocation26_spill] sm:$0xff] %v7410_v28  ;;  %v460_v58 = vmul.f32 %v4473_v18, %v7410_v28  ;;  %10912 = vst [vmem:[#allocation99_spill] sm:$0xff] %v7414_v59  ;;  %v7417_v56 = vld [vmem:[%s5166_s27 + $0x50] sm:$0xff]  ;;  %v976_v40 = vadd.f32 %v960_v36, %v939_v55  ;;  %v7424_v48 = vld [vmem:[#allocation7 + $0xe] ss:$0 sm:$0xff] }
 0x1b5   : >> { %10913 = vst [vmem:[#allocation135_spill] sm:$0xff] %v7417_v56  ;;  %v481_v3 = vmul.f32 %v7417_v56, %v7414_v59  ;;  %v1062_v13 = vmul.f32 %v7308_v51, %v10772_v62  ;;  %v7427_v32 = vld [vmem:[%s5166_s27 + $0x68] sm:$0xff]  ;;  %v10915_v10 = vld [vmem:[#allocation118_spill] sm:$0xff]  ;;  %v1938_v36 = vadd.f32 %v7244_v44, %v1901_v11 }
 0x1b6   : >> { %10914 = vst [vmem:[#allocation111_spill] sm:$0xff] %v7427_v32  ;;  %v518_v18 = vmul.f32 %v7427_v32, %v7424_v48  ;;  %v2402_v14 = vadd.f32 %v10915_v10, %v2365_v26  ;;  %v1431_v6 = vadd.f32 %v1415_v5, %v1394_v34  ;;  %v7432_v29 = vld [vmem:[#allocation7 + $0x15] ss:$0 sm:$0xff]  ;;  %v7438_v45 = vld [vmem:[%s5166_s27 + $0xc4] sm:$0xff]  ;;  %v1041_v32 = vadd.f32 %v1025_v42, %v976_v40  ;;  %v7452_v34 = vld [vmem:[#allocation7 + $0x1c] ss:$0 sm:$0xff] }
 0x1b7   : >> { %v497_v28 = vadd.f32 %v481_v3, %v460_v58  ;;  %10916 = vst [vmem:[#allocation73_spill] sm:$0xff] %v7432_v29  ;;  %v10917_v56 = vld [vmem:[#allocation114_spill] sm:$0xff]  ;;  %10918 = vst [vmem:[#allocation123_spill] sm:$0xff] %v7438_v45  ;;  %v7442_v55 = vmul.f32 %v7438_v45, %v10842_v49  ;;  %v1099_v5 = vmul.f32 %v7328_v1, %v10779_v9  ;;  %v7449_v58 = vld [vmem:[%s9649_s2] ss:$0 sm:$0xff] }
 0x1b8   : >> { %v555_v0 = vmul.f32 %v7432_v29, %v10917_v56  ;;  %10919 = vst [vmem:[#allocation163_spill] sm:$0xff] %v7449_v58  ;;  %v2425_v3 = vadd.f32 %v7449_v58, %v2402_v14  ;;  %v1468_v44 = vadd.f32 %v1452_v43, %v1431_v6  ;;  %v10920_v56 = vld [vmem:[#allocation129_spill] sm:$0xff]  ;;  %v1975_v42 = vadd.f32 %v7253_v38, %v1938_v36  ;;  %v10921_v40 = vld [vmem:[#allocation108_spill] sm:$0xff] }
 0x1b9   : >> { %v534_v26 = vadd.f32 %v518_v18, %v497_v28  ;;  %v592_v11 = vmul.f32 %v7452_v34, %v10920_v56  ;;  %v7459_v9 = vmul.f32 %v10921_v40, %v10846_v63  ;;  %v1078_v10 = vadd.f32 %v1062_v13, %v1041_v32  ;;  %v7462_v1 = vld [vmem:[%s5166_s27 + $0xda] sm:$0xff]  ;;  %v10924_v18 = vld [vmem:[#allocation113_spill] sm:$0xff]  ;;  %v7471_v36 = vld [vmem:[#allocation7 + $0x23] ss:$0 sm:$0xff] }
 0x1ba   : >> { %10922 = vst [vmem:[#allocation149_spill] sm:$0xff] %v7462_v1  ;;  %v1136_v14 = vmul.f32 %v7462_v1, %v10786_v37  ;;  %2443 = vst [vmem:[%s6239_s19 + $0x18] sm:$0xff] %v2425_v3  ;;  %4027 = vmatmul.mubr.f32.gmra.mrb[2].mxu0 %v2425_v3  ;;  %v1505_v43 = vadd.f32 %v1489_v23, %v1468_v44  ;;  %v10923_v28 = vld [vmem:[#allocation44_spill] sm:$0xff]  ;;  %v7474_v40 = vld [vmem:[%s5166_s27 + $0xb0] sm:$0xff]  ;;  %v2012_v37 = vadd.f32 %v7263_v30, %v1975_v42 }
 0x1bb   : >> { %v7469_v6 = vmul.f32 %v10924_v18, %v10923_v28  ;;  %v571_v38 = vadd.f32 %v555_v0, %v534_v26  ;;  %10925 = vst [vmem:[#allocation137_spill] sm:$0xff] %v7471_v36  ;;  %10926 = vst [vmem:[#allocation112_spill] sm:$0xff] %v7474_v40  ;;  %v629_v13 = vmul.f32 %v7474_v40, %v7471_v36  ;;  %v10927_v32 = vld [vmem:[#allocation122_spill] sm:$0xff]  ;;  %v10928_v1 = vld [vmem:[#allocation171_spill] sm:$0xff] }
 0x1bc   : >> { %v7481_v3 = vmul.f32 %v10928_v1, %v10927_v32  ;;  %v1115_v23 = vadd.f32 %v1099_v5, %v1078_v10  ;;  %v7483_v44 = vld [vmem:[#allocation7 + $0x1e] ss:$0 sm:$0xff]  ;;  %v4486_v18 = vld [vmem:[%s5166_s27 + $0xf2] sm:$0xff]  ;;  %v1542_v26 = vadd.f32 %v7377_v27, %v1505_v43  ;;  %v10930_v51 = vld [vmem:[#allocation173_spill] sm:$0xff]  ;;  %v2049_v10 = vadd.f32 %v7270_v4, %v2012_v37 }
 0x1bd   : >> { %10929 = vst [vmem:[#allocation110_spill] sm:$0xff] %v7483_v44  ;;  %v1173_v0 = vmul.f32 %v4486_v18, %v7483_v44  ;;  %v7490_v28 = vmul.f32 %v10930_v51, %v6691_v60  ;;  %v7493_v36 = vld [vmem:[%s5166_s27 + $0x122] sm:$0xff]  ;;  %v608_v30 = vadd.f32 %v592_v11, %v571_v38  ;;  %v7495_v42 = vld [vmem:[#allocation7 + $0x2a] ss:$0 sm:$0xff]  ;;  %v7504_v18 = vld [vmem:[%s5166_s27 + $0xad] sm:$0xff] }
 0x1be   : >> { %10932 = vst [vmem:[#allocation133_spill] sm:$0xff] %v7493_v36  ;;  %10933 = vst [vmem:[#allocation138_spill] sm:$0xff] %v7495_v42  ;;  %v7498_v1 = vld [vmem:[%s5166_s27 + $0xc8] sm:$0xff]  ;;  %v7508_v27 = vmul.f32 %v7504_v18, %v10859_v61  ;;  %v1152_v43 = vadd.f32 %v1136_v14, %v1115_v23  ;;  %v7510_v60 = vld [vmem:[#allocation7 + $0x25] ss:$0 sm:$0xff]  ;;  %v2086_v23 = vadd.f32 %v7277_v52, %v2049_v10 }
 0x1bf   : >> { %10931 = vst [vmem:[#allocation81_spill] sm:$0xff] %v7490_v28  ;;  %10934 = vst [vmem:[#allocation55_spill] sm:$0xff] %v7498_v1  ;;  %v666_v5 = vmul.f32 %v7498_v1, %v7495_v42  ;;  %v10937_v28 = vld [vmem:[#allocation104_spill] sm:$0xff]  ;;  %v645_v37 = vadd.f32 %v629_v13, %v608_v30  ;;  %v10945_v30 = vld [vmem:[#allocation175_spill] sm:$0xff] }
 0x1c0   : >> { %10935 = vst [vmem:[#allocation74_spill] sm:$0xff] %v7504_v18  ;;  %10936 = vst [vmem:[#allocation148_spill] sm:$0xff] %v7508_v27  ;;  %v1210_v11 = vmul.f32 %v7510_v60, %v10937_v28  ;;  %v10938_v38 = vld [vmem:[#allocation64_spill] sm:$0xff]  ;;  %v10942_v27 = vld [vmem:[#allocation126_spill] sm:$0xff] }
 0x1c1   : >> { %v1607_v44 = vadd.f32 %v10938_v38, %v1542_v26  ;;  %v7516_v32 = vld [vmem:[%s5166_s27 + $0xc5] sm:$0xff]  ;;  %v7522_v42 = vld [vmem:[#allocation7 + $0x1] ss:$0 sm:$0xff]  ;;  %v4493_v61 = vld [vmem:[%s5166_s27 + $0x39] sm:$0xff]  ;;  %v7529_v28 = vmul.f32 %v10942_v27, %v10867_v17  ;;  %v1189_v26 = vadd.f32 %v1173_v0, %v1152_v43  ;;  %v2123_v27 = vadd.f32 %v7284_v15, %v2086_v23 }
 0x1c2   : >> { %10939 = vst [vmem:[#allocation134_spill] sm:$0xff] %v7516_v32  ;;  %v7520_v4 = vmul.f32 %v7516_v32, %v10861_v16  ;;  %10941 = vst [vmem:[#allocation25_spill] sm:$0xff] %v7522_v42  ;;  %v731_v14 = vmul.f32 %v4493_v61, %v7522_v42  ;;  %v7531_v38 = vld [vmem:[#allocation7 + $0x2c] ss:$0 sm:$0xff]  ;;  %v682_v61 = vadd.f32 %v666_v5, %v645_v37  ;;  %v7540_v52 = vld [vmem:[#allocation7 + $0x8] ss:$0 sm:$0xff] }
 0x1c3   : >> { %10943 = vst [vmem:[#allocation101_spill] sm:$0xff] %v7529_v28  ;;  %10944 = vst [vmem:[#allocation30_spill] sm:$0xff] %v7531_v38  ;;  %v1247_v16 = vmul.f32 %v7531_v38, %v7493_v36  ;;  %v1644_v13 = vadd.f32 %v7381_v25, %v1607_v44  ;;  %v7543_v10 = vld [vmem:[%s5166_s27 + $0x51] sm:$0xff]  ;;  %v10948_v43 = vld [vmem:[#allocation177_spill] sm:$0xff]  ;;  %v1226_v25 = vadd.f32 %v1210_v11, %v1189_v26 }
 0x1c4   : >> { %10940 = vst [vmem:[#allocation151_spill] sm:$0xff] %v7520_v4  ;;  %v7538_v4 = vmul.f32 %v10945_v30, %v10869_v41  ;;  %10947 = vst [vmem:[#allocation142_spill] sm:$0xff] %v7543_v10  ;;  %v768_v0 = vmul.f32 %v7543_v10, %v7540_v52  ;;  %v7550_v36 = vmul.f32 %v10948_v43, %v10873_v35  ;;  %v10950_v44 = vld [vmem:[#allocation172_spill] sm:$0xff]  ;;  %v10951_v37 = vld [vmem:[#allocation139_spill] sm:$0xff] }
 0x1c5   : >> { %v1312_v30 = vmul.f32 %v10950_v44, %v10893_v21  ;;  %v1681_v5 = vadd.f32 %v7386_v24, %v1644_v13  ;;  %v747_v28 = vadd.f32 %v731_v14, %v682_v61  ;;  %v7559_v10 = vld [vmem:[#allocation7 + $0xf] ss:$0 sm:$0xff]  ;;  %v2188_v11 = vadd.f32 %v7291_v19, %v2123_v27  ;;  %v7574_v13 = vld [vmem:[#allocation7 + $0xa] ss:$0 sm:$0xff] }
 0x1c6   : >> { %10946 = vst [vmem:[#allocation116_spill] sm:$0xff] %v7538_v4  ;;  %10949 = vst [vmem:[#allocation105_spill] sm:$0xff] %v7550_v36  ;;  %v7557_v4 = vmul.f32 %v10951_v37, %v10877_v31  ;;  %v7562_v15 = vld [vmem:[%s5166_s27 + $0x69] sm:$0xff]  ;;  %v1263_v24 = vadd.f32 %v1247_v16, %v1226_v25  ;;  %v1349_v14 = vmul.f32 %v7574_v13, %v7364_v53  ;;  %v7601_v36 = vld [vmem:[%s5166_s27 + $0xdb] sm:$0xff] }
 0x1c7   : >> { %10953 = vst [vmem:[#allocation83_spill] sm:$0xff] %v7559_v10  ;;  %10954 = vst [vmem:[#allocation157_spill] sm:$0xff] %v7562_v15  ;;  %v805_v23 = vmul.f32 %v7562_v15, %v7559_v10  ;;  %v7568_v26 = vld [vmem:[%s5166_s27 + $0xae] sm:$0xff]  ;;  %v1718_v61 = vadd.f32 %v7393_v54, %v1681_v5  ;;  %v7580_v43 = vld [vmem:[%s5166_s27 + $0xc6] sm:$0xff]  ;;  %v784_v44 = vadd.f32 %v768_v0, %v747_v28 }
 0x1c8   : >> { %10952 = vst [vmem:[#allocation56_spill] sm:$0xff] %v7557_v4  ;;  %10955 = vst [vmem:[#allocation156_spill] sm:$0xff] %v7568_v26  ;;  %v7572_v21 = vmul.f32 %v7568_v26, %v10881_v20  ;;  %v7584_v19 = vmul.f32 %v7580_v43, %v10885_v12  ;;  %v7587_v27 = vld [vmem:[%s5166_s27 + $0x123] sm:$0xff]  ;;  %v7589_v15 = vld [vmem:[#allocation7 + $0x16] ss:$0 sm:$0xff]  ;;  %v1328_v53 = vadd.f32 %v1312_v30, %v1263_v24 }
 0x1c9   : >> { %10957 = vst [vmem:[#allocation102_spill] sm:$0xff] %v7574_v13  ;;  %10958 = vst [vmem:[#allocation143_spill] sm:$0xff] %v7580_v43  ;;  %v10962_v16 = vld [vmem:[#allocation150_spill] sm:$0xff]  ;;  %v7598_v5 = vld [vmem:[#allocation7 + $0x18] ss:$0 sm:$0xff]  ;;  %v1755_v0 = vadd.f32 %v7397_v7, %v1718_v61  ;;  %v821_v30 = vadd.f32 %v805_v23, %v784_v44 }
 0x1ca   : >> { %10956 = vst [vmem:[#allocation169_spill] sm:$0xff] %v7572_v21  ;;  %10959 = vst [vmem:[#allocation63_spill] sm:$0xff] %v7584_v19  ;;  %v842_v25 = vmul.f32 %v7589_v15, %v10962_v16  ;;  %v2225_v21 = vadd.f32 %v7298_v57, %v2188_v11  ;;  %v7594_v4 = vld [vmem:[#allocation7 + $0x11] ss:$0 sm:$0xff]  ;;  %v1423_v28 = vmul.f32 %v7601_v36, %v7598_v5  ;;  %v7606_v19 = vld [vmem:[#allocation7 + $0x1f] ss:$0 sm:$0xff] }
 0x1cb   : >> { %10960 = vst [vmem:[#allocation40_spill] sm:$0xff] %v7587_v27  ;;  %10961 = vst [vmem:[#allocation68_spill] sm:$0xff] %v7589_v15  ;;  %v1386_v54 = vmul.f32 %v7594_v4, %v7373_v8  ;;  %v4507_v16 = vld [vmem:[%s5166_s27 + $0xf3] sm:$0xff]  ;;  %v7610_v11 = vld [vmem:[#allocation7 + $0x1d] ss:$0 sm:$0xff]  ;;  %v1792_v23 = vadd.f32 %v7405_v47, %v1755_v0 }
 0x1cc   : >> { %10963 = vst [vmem:[#allocation43_spill] sm:$0xff] %v7594_v4  ;;  %10964 = vst [vmem:[#allocation94_spill] sm:$0xff] %v7598_v5  ;;  %v1460_v57 = vmul.f32 %v4507_v16, %v7606_v19  ;;  %v10968_v24 = vld [vmem:[#allocation145_spill] sm:$0xff]  ;;  %v2262_v15 = vadd.f32 %v7305_v46, %v2225_v21  ;;  %v1365_v4 = vadd.f32 %v1349_v14, %v1328_v53  ;;  %v10970_v7 = vld [vmem:[#allocation179_spill] sm:$0xff] }
 0x1cd   : >> { %10965 = vst [vmem:[#allocation121_spill] sm:$0xff] %v7601_v36  ;;  %10966 = vst [vmem:[#allocation42_spill] sm:$0xff] %v7606_v19  ;;  %v879_v8 = vmul.f32 %v7610_v11, %v10968_v24  ;;  %v7615_v36 = vld [vmem:[#allocation7 + $0x26] ss:$0 sm:$0xff]  ;;  %v1534_v5 = vmul.f32 %v10824_v50, %v7587_v27  ;;  %v858_v19 = vadd.f32 %v842_v25, %v821_v30  ;;  %v7627_v46 = vld [vmem:[%s5166_s27 + $0xb1] sm:$0xff] }
 0x1ce   : >> { %10967 = vst [vmem:[#allocation48_spill] sm:$0xff] %v7610_v11  ;;  %10969 = vst [vmem:[#allocation100_spill] sm:$0xff] %v7615_v36  ;;  %v1497_v61 = vmul.f32 %v7615_v36, %v10970_v7  ;;  %v10971_v44 = vld [vmem:[#allocation128_spill] sm:$0xff]  ;;  %v10974_v21 = vld [vmem:[#allocation77_spill] sm:$0xff]  ;;  %v1402_v7 = vadd.f32 %v1386_v54, %v1365_v4  ;;  %v7637_v50 = vmul.f32 %v7401_v33, %v6591_v22 }
 0x1cf   : >> { %v1599_v16 = vmul.f32 %v10971_v44, %v10907_v2  ;;  %v7624_v11 = vld [vmem:[#allocation7 + $0x24] ss:$0 sm:$0xff]  ;;  %10973 = vst [vmem:[#allocation22_spill] sm:$0xff] %v7627_v46  ;;  %v2299_v14 = vadd.f32 %v10974_v21, %v2262_v15  ;;  %v7641_v2 = vmul.f32 %v7438_v45, %v10901_v39  ;;  %v1829_v47 = vadd.f32 %v7442_v55, %v1792_v23  ;;  %v7645_v25 = vld [vmem:[%s5166_s27 + $0xdc] sm:$0xff]  ;;  %v7651_v15 = vld [vmem:[#allocation7 + $0x2b] ss:$0 sm:$0xff] }
 0x1d0   : >> { %10972 = vst [vmem:[#allocation37_spill] sm:$0xff] %v7624_v11  ;;  %v916_v53 = vmul.f32 %v7627_v46, %v7624_v11  ;;  %v7633_v36 = vld [vmem:[%s5166_s27 + $0x124] sm:$0xff]  ;;  %10976 = vst [vmem:[#allocation158_spill] sm:$0xff] %v7645_v25  ;;  %v895_v4 = vadd.f32 %v879_v8, %v858_v19  ;;  %v10980_v39 = vld [vmem:[#allocation82_spill] sm:$0xff]  ;;  %v1439_v27 = vadd.f32 %v1423_v28, %v1402_v7 }
 0x1d1   : >> { %10975 = vst [vmem:[#allocation58_spill] sm:$0xff] %v7633_v36  ;;  %v10977_v0 = vld [vmem:[#allocation88_spill] sm:$0xff]  ;;  %10978 = vst [vmem:[#allocation61_spill] sm:$0xff] %v7651_v15  ;;  %v7654_v54 = vld [vmem:[%s5166_s27 + $0xc9] sm:$0xff]  ;;  %v2336_v21 = vadd.f32 %v10980_v39, %v2299_v14 }
 0x1d2   : >> { %v7649_v30 = vmul.f32 %v7645_v25, %v10977_v0  ;;  %10979 = vst [vmem:[#allocation103_spill] sm:$0xff] %v7654_v54  ;;  %v953_v22 = vmul.f32 %v7654_v54, %v7651_v15  ;;  %v4515_v55 = vld [vmem:[%s5166_s27 + $0xf4] sm:$0xff]  ;;  %v10981_v23 = vld [vmem:[#allocation60_spill] sm:$0xff]  ;;  %v10982_v33 = vld [vmem:[#allocation53_spill] sm:$0xff]  ;;  %v7670_v25 = vmul.f32 %v10842_v49, %v7633_v36  ;;  %v932_v44 = vadd.f32 %v916_v53, %v895_v4 }
 0x1d3   : >> { %v7661_v45 = vmul.f32 %v4515_v55, %v10981_v23  ;;  %v10983_v11 = vld [vmem:[#allocation90_spill] sm:$0xff]  ;;  %v10984_v8 = vld [vmem:[#allocation85_spill] sm:$0xff]  ;;  %v7672_v12 = vld [vmem:[#allocation7 + $0x2] ss:$0 sm:$0xff]  ;;  %v1476_v55 = vadd.f32 %v1460_v57, %v1439_v27  ;;  %v489_v4 = vmul.f32 %v7474_v40, %v7414_v59 }
 0x1d4   : >> { %v7665_v0 = vmul.f32 %v10983_v11, %v10982_v33  ;;  %v1894_v19 = vadd.f32 %v10984_v8, %v1829_v47  ;;  %10985 = vst [vmem:[#allocation51_spill] sm:$0xff] %v7672_v12  ;;  %v4517_v14 = vld [vmem:[%s5166_s27 + $0x3a] sm:$0xff]  ;;  %v7678_v23 = vld [vmem:[%s5166_s27 + $0x52] sm:$0xff]  ;;  %v969_v47 = vadd.f32 %v953_v22, %v932_v44  ;;  %v526_v8 = vmul.f32 %v7498_v1, %v7424_v48  ;;  %v11006_v36 = vld [vmem:[#allocation137_spill] sm:$0xff] }
 0x1d5   : >> { %v1018_v28 = vmul.f32 %v4517_v14, %v7672_v12  ;;  %v10986_v7 = vld [vmem:[#allocation23_spill] sm:$0xff]  ;;  %10987 = vst [vmem:[#allocation178_spill] sm:$0xff] %v7678_v23  ;;  %v1055_v33 = vmul.f32 %v7678_v23, %v10772_v62  ;;  %v10988_v11 = vld [vmem:[#allocation26_spill] sm:$0xff]  ;;  %v1513_v57 = vadd.f32 %v1497_v61, %v1476_v55  ;;  %v10990_v14 = vld [vmem:[#allocation140_spill] sm:$0xff]  ;;  %v7710_v55 = vmul.f32 %v7504_v18, %v10846_v63 }
 0x1d6   : >> { %v2373_v39 = vadd.f32 %v10986_v7, %v2336_v21  ;;  %v468_v49 = vmul.f32 %v10988_v11, %v10920_v56  ;;  %v1931_v53 = vadd.f32 %v7459_v9, %v1894_v19  ;;  %v10989_v21 = vld [vmem:[#allocation78_spill] sm:$0xff]  ;;  %v7692_v7 = vmul.f32 %v10990_v14, %v10930_v51  ;;  %v7703_v23 = vld [vmem:[%s5166_s27 + $0xe0] sm:$0xff] }
 0x1d7   : >> { %v7694_v62 = vld [vmem:[#allocation7 + $0x10] ss:$0 sm:$0xff]  ;;  %v1034_v22 = vadd.f32 %v1018_v28, %v969_v47  ;;  %10993 = vst [vmem:[#allocation67_spill] sm:$0xff] %v7703_v23  ;;  %v563_v51 = vmul.f32 %v7703_v23, %v7432_v29  ;;  %v7718_v47 = vld [vmem:[%s5166_s27 + $0xf8] sm:$0xff]  ;;  %v11008_v1 = vld [vmem:[#allocation32_spill] sm:$0xff] }
 0x1d8   : >> { %v2410_v27 = vadd.f32 %v10989_v21, %v2373_v39  ;;  %10991 = vst [vmem:[#allocation167_spill] sm:$0xff] %v7694_v62  ;;  %v7697_v56 = vld [vmem:[%s5166_s27 + $0x6a] sm:$0xff]  ;;  %v1968_v44 = vadd.f32 %v7469_v6, %v1931_v53  ;;  %v505_v19 = vadd.f32 %v489_v4, %v468_v49  ;;  %v1550_v39 = vadd.f32 %v1534_v5, %v1513_v57  ;;  %v7712_v21 = vld [vmem:[#allocation7 + $0x17] ss:$0 sm:$0xff]  ;;  %v10997_v4 = vld [vmem:[#allocation44_spill] sm:$0xff] }
 0x1d9   : >> { %10992 = vst [vmem:[#allocation20_spill] sm:$0xff] %v7697_v56  ;;  %v1092_v9 = vmul.f32 %v7697_v56, %v7694_v62  ;;  %10994 = vst [vmem:[#allocation72_spill] sm:$0xff] %v7712_v21  ;;  %v10995_v56 = vld [vmem:[#allocation144_spill] sm:$0xff]  ;;  %v1071_v49 = vadd.f32 %v1055_v33, %v1034_v22  ;;  %v600_v5 = vmul.f32 %v7718_v47, %v7452_v34  ;;  %v11000_v33 = vld [vmem:[#allocation159_spill] sm:$0xff] }
 0x1da   : >> { %v2433_v61 = vadd.f32 %v7449_v58, %v2410_v27  ;;  %v1129_v6 = vmul.f32 %v7712_v21, %v10995_v56  ;;  %v2005_v28 = vadd.f32 %v7481_v3, %v1968_v44  ;;  %v542_v53 = vadd.f32 %v526_v8, %v505_v19  ;;  %10996 = vst [vmem:[#allocation84_spill] sm:$0xff] %v7718_v47  ;;  %v7728_v57 = vld [vmem:[%s5166_s27 + $0xdd] sm:$0xff]  ;;  %v10999_v56 = vld [vmem:[#allocation122_spill] sm:$0xff]  ;;  %v7737_v22 = vld [vmem:[%s5166_s27 + $0x128] sm:$0xff] }
 0x1db   : >> { %v1615_v63 = vadd.f32 %v1599_v16, %v1550_v39  ;;  %v7725_v27 = vmul.f32 %v7516_v32, %v10997_v4  ;;  %10998 = vst [vmem:[#allocation33_spill] sm:$0xff] %v7728_v57  ;;  %v7732_v3 = vmul.f32 %v7728_v57, %v10999_v56  ;;  %v11001_v8 = vld [vmem:[#allocation110_spill] sm:$0xff]  ;;  %11002 = vst [vmem:[#allocation131_spill] sm:$0xff] %v7737_v22  ;;  %v11003_v19 = vld [vmem:[#allocation81_spill] sm:$0xff] }
 0x1dc   : >> { %2451 = vst [vmem:[%s6239_s19 + $0x58] sm:$0xff] %v2433_v61  ;;  %4039 = vmatmul.mubr.f32.gmra.mrb[2].mxu1 %v2433_v61  ;;  %v1166_v44 = vmul.f32 %v11001_v8, %v11000_v33  ;;  %v2042_v47 = vadd.f32 %v11003_v19, %v2005_v28  ;;  %v7741_v61 = vld [vmem:[%s5166_s27 + $0x125] sm:$0xff]  ;;  %v1108_v16 = vadd.f32 %v1092_v9, %v1071_v49  ;;  %v11005_v4 = vld [vmem:[#allocation147_spill] sm:$0xff]  ;;  %v11013_v19 = vld [vmem:[#allocation174_spill] sm:$0xff] }
 0x1dd   : >> { %11004 = vst [vmem:[#allocation180_spill] sm:$0xff] %v7741_v61  ;;  %v579_v39 = vadd.f32 %v563_v51, %v542_v53  ;;  %v637_v32 = vmul.f32 %v11006_v36, %v11005_v4  ;;  %v1652_v18 = vadd.f32 %v7637_v50, %v1615_v63  ;;  %v4525_v23 = vld [vmem:[%s5166_s27 + $0xf5] sm:$0xff]  ;;  %v11007_v56 = vld [vmem:[#allocation141_spill] sm:$0xff]  ;;  %v11009_v40 = vld [vmem:[#allocation120_spill] sm:$0xff] }
 0x1de   : >> { %v7748_v57 = vmul.f32 %v4525_v23, %v11007_v56  ;;  %v7752_v8 = vmul.f32 %v11009_v40, %v11008_v1  ;;  %v7755_v21 = vld [vmem:[%s5166_s27 + $0xb2] sm:$0xff]  ;;  %v11011_v28 = vld [vmem:[#allocation148_spill] sm:$0xff]  ;;  %v1145_v49 = vadd.f32 %v1129_v6, %v1108_v16  ;;  %v7765_v40 = vmul.f32 %v11013_v19, %v7741_v61  ;;  %v7772_v56 = vld [vmem:[%s5166_s27 + $0xca] sm:$0xff] }
 0x1df   : >> { %11010 = vst [vmem:[#allocation45_spill] sm:$0xff] %v7755_v21  ;;  %v1203_v9 = vmul.f32 %v7755_v21, %v7510_v60  ;;  %v2079_v51 = vadd.f32 %v11011_v28, %v2042_v47  ;;  %v616_v53 = vadd.f32 %v600_v5, %v579_v39  ;;  %v11012_v50 = vld [vmem:[#allocation138_spill] sm:$0xff]  ;;  %v1689_v23 = vadd.f32 %v7641_v2, %v1652_v18  ;;  %v11014_v1 = vld [vmem:[#allocation132_spill] sm:$0xff]  ;;  %v11016_v47 = vld [vmem:[#allocation151_spill] sm:$0xff] }
 0x1e0   : >> { %v674_v63 = vmul.f32 %v11012_v50, %v7737_v22  ;;  %v7769_v4 = vmul.f32 %v11014_v1, %v10951_v37  ;;  %11015 = vst [vmem:[#allocation176_spill] sm:$0xff] %v7772_v56  ;;  %v1240_v6 = vmul.f32 %v7772_v56, %v7531_v38  ;;  %v1182_v16 = vadd.f32 %v1166_v44, %v1145_v49  ;;  %v7788_v19 = vld [vmem:[#allocation7 + $0x3] ss:$0 sm:$0xff]  ;;  %v11018_v44 = vld [vmem:[#allocation106_spill] sm:$0xff] }
 0x1e1   : >> { %v2116_v5 = vadd.f32 %v11016_v47, %v2079_v51  ;;  %v653_v39 = vadd.f32 %v637_v32, %v616_v53  ;;  %v739_v18 = vmul.f32 %v7522_v42, %v10968_v24  ;;  %v1726_v2 = vadd.f32 %v7649_v30, %v1689_v23  ;;  %11017 = vst [vmem:[#allocation75_spill] sm:$0xff] %v7788_v19  ;;  %v4529_v51 = vld [vmem:[%s5166_s27 + $0x3b] sm:$0xff]  ;;  %v7794_v53 = vld [vmem:[%s5166_s27 + $0x126] sm:$0xff] }
 0x1e2   : >> { %v7782_v37 = vmul.f32 %v7568_v26, %v10867_v17  ;;  %v7786_v28 = vmul.f32 %v7580_v43, %v10869_v41  ;;  %v1305_v32 = vmul.f32 %v4529_v51, %v7788_v19  ;;  %11019 = vst [vmem:[#allocation127_spill] sm:$0xff] %v7794_v53  ;;  %v1219_v24 = vadd.f32 %v1203_v9, %v1182_v16  ;;  %v7800_v47 = vld [vmem:[%s5166_s27 + $0xde] sm:$0xff]  ;;  %v4531_v61 = vld [vmem:[%s5166_s27 + $0xf6] sm:$0xff]  ;;  %v7855_v26 = vld [vmem:[#allocation7 + $0x2d] ss:$0 sm:$0xff] }
 0x1e3   : >> { %v2181_v49 = vadd.f32 %v11018_v44, %v2116_v5  ;;  %v690_v30 = vadd.f32 %v674_v63, %v653_v39  ;;  %v776_v17 = vmul.f32 %v7627_v46, %v7540_v52  ;;  %v1763_v23 = vadd.f32 %v7661_v45, %v1726_v2  ;;  %11020 = vst [vmem:[#allocation54_spill] sm:$0xff] %v7800_v47  ;;  %v7811_v51 = vld [vmem:[%s5166_s27 + $0x53] sm:$0xff]  ;;  %v11022_v63 = vld [vmem:[#allocation101_spill] sm:$0xff]  ;;  %v11034_v46 = vld [vmem:[#allocation36_spill] sm:$0xff] }
 0x1e4   : >> { %v7804_v41 = vmul.f32 %v7800_v47, %v10873_v35  ;;  %v7808_v5 = vmul.f32 %v4531_v61, %v10877_v31  ;;  %11021 = vst [vmem:[#allocation35_spill] sm:$0xff] %v7811_v51  ;;  %v1342_v9 = vmul.f32 %v7811_v51, %v7574_v13  ;;  %v1256_v39 = vadd.f32 %v1240_v6, %v1219_v24  ;;  %v11023_v44 = vld [vmem:[#allocation153_spill] sm:$0xff]  ;;  %v11035_v47 = vld [vmem:[#allocation42_spill] sm:$0xff] }
 0x1e5   : >> { %v2218_v16 = vadd.f32 %v11022_v63, %v2181_v49  ;;  %v755_v45 = vadd.f32 %v739_v18, %v690_v30  ;;  %v813_v2 = vmul.f32 %v7654_v54, %v7559_v10  ;;  %v1800_v35 = vadd.f32 %v7665_v0, %v1763_v23  ;;  %v11025_v31 = vld [vmem:[#allocation181_spill] sm:$0xff]  ;;  %v11028_v49 = vld [vmem:[#allocation43_spill] sm:$0xff]  ;;  %v11029_v18 = vld [vmem:[#allocation116_spill] sm:$0xff]  ;;  %11041 = vst [vmem:[#allocation71_spill] sm:$0xff] %v7855_v26 }
 0x1e6   : >> { %v7821_v22 = vmul.f32 %v10881_v20, %v11023_v44  ;;  %v7825_v61 = vmul.f32 %v11025_v31, %v7794_v53  ;;  %v7828_v51 = vld [vmem:[%s5166_s27 + $0x6b] sm:$0xff]  ;;  %v1321_v30 = vadd.f32 %v1305_v32, %v1256_v39  ;;  %v7834_v0 = vld [vmem:[%s5166_s27 + $0xe1] sm:$0xff]  ;;  %v7844_v43 = vld [vmem:[%s5166_s27 + $0xb3] sm:$0xff] }
 0x1e7   : >> { %11027 = vst [vmem:[#allocation160_spill] sm:$0xff] %v7828_v51  ;;  %v1379_v6 = vmul.f32 %v7828_v51, %v11028_v49  ;;  %v2255_v24 = vadd.f32 %v11029_v18, %v2218_v16  ;;  %v792_v63 = vadd.f32 %v776_v17, %v755_v45  ;;  %11030 = vst [vmem:[#allocation119_spill] sm:$0xff] %v7834_v0  ;;  %v11031_v23 = vld [vmem:[#allocation68_spill] sm:$0xff]  ;;  %v11032_v31 = vld [vmem:[#allocation34_spill] sm:$0xff] }
 0x1e8   : >> { %11024 = vst [vmem:[#allocation57_spill] sm:$0xff] %v7821_v22  ;;  %11026 = vst [vmem:[#allocation52_spill] sm:$0xff] %v7825_v61  ;;  %v850_v20 = vmul.f32 %v7834_v0, %v11031_v23  ;;  %v1837_v44 = vadd.f32 %v7670_v25, %v1800_v35  ;;  %v11033_v53 = vld [vmem:[#allocation94_spill] sm:$0xff]  ;;  %v1453_v51 = vmul.f32 %v11035_v47, %v11034_v46  ;;  %v11037_v32 = vld [vmem:[#allocation100_spill] sm:$0xff] }
 0x1e9   : >> { %v1416_v54 = vmul.f32 %v11033_v53, %v11032_v31  ;;  %11036 = vst [vmem:[#allocation62_spill] sm:$0xff] %v7844_v43  ;;  %v1490_v17 = vmul.f32 %v7844_v43, %v11037_v32  ;;  %v11038_v16 = vld [vmem:[#allocation105_spill] sm:$0xff]  ;;  %v1358_v45 = vadd.f32 %v1342_v9, %v1321_v30  ;;  %v829_v18 = vadd.f32 %v813_v2, %v792_v63  ;;  %v7850_v0 = vld [vmem:[%s5166_s27 + $0xf9] sm:$0xff] }
 0x1ea   : >> { %v2292_v39 = vadd.f32 %v11038_v16, %v2255_v24  ;;  %11039 = vst [vmem:[#allocation65_spill] sm:$0xff] %v7850_v0  ;;  %v11040_v25 = vld [vmem:[#allocation48_spill] sm:$0xff]  ;;  %v1902_v31 = vadd.f32 %v7692_v7, %v1837_v44  ;;  %v7858_v42 = vld [vmem:[%s5166_s27 + $0xcb] sm:$0xff]  ;;  %v7869_v2 = vld [vmem:[%s5166_s27 + $0x54] sm:$0xff] }
 0x1eb   : >> { %v887_v35 = vmul.f32 %v7850_v0, %v11040_v25  ;;  %11042 = vst [vmem:[#allocation70_spill] sm:$0xff] %v7858_v42  ;;  %v1527_v61 = vmul.f32 %v7858_v42, %v7855_v26  ;;  %v4539_v22 = vld [vmem:[%s5166_s27 + $0x3c] sm:$0xff]  ;;  %v7866_v9 = vld [vmem:[#allocation7 + $0xb] ss:$0 sm:$0xff]  ;;  %11045 = vst [vmem:[#allocation79_spill] sm:$0xff] %v7869_v2  ;;  %v1395_v16 = vadd.f32 %v1379_v6, %v1358_v45 }
 0x1ec   : >> { %v11043_v32 = vld [vmem:[#allocation128_spill] sm:$0xff]  ;;  %11044 = vst [vmem:[#allocation46_spill] sm:$0xff] %v7866_v9  ;;  %v7873_v30 = vmul.f32 %v7869_v2, %v7866_v9  ;;  %v7876_v7 = vld [vmem:[%s5166_s27 + $0x129] sm:$0xff]  ;;  %v866_v0 = vadd.f32 %v850_v20, %v829_v18  ;;  %v7891_v9 = vld [vmem:[#allocation7 + $0x19] ss:$0 sm:$0xff] }
 0x1ed   : >> { %v7864_v24 = vmul.f32 %v4539_v22, %v11043_v32  ;;  %11046 = vst [vmem:[#allocation80_spill] sm:$0xff] %v7876_v7  ;;  %v11047_v63 = vld [vmem:[#allocation56_spill] sm:$0xff]  ;;  %v11048_v25 = vld [vmem:[#allocation69_spill] sm:$0xff]  ;;  %v1939_v22 = vadd.f32 %v7710_v55, %v1902_v31  ;;  %v7882_v32 = vld [vmem:[#allocation7 + $0x12] ss:$0 sm:$0xff]  ;;  %v1432_v31 = vadd.f32 %v1416_v54, %v1395_v16 }
 0x1ee   : >> { %v2329_v44 = vadd.f32 %v11047_v63, %v2292_v39  ;;  %v11049_v26 = vld [vmem:[#allocation37_spill] sm:$0xff]  ;;  %11050 = vst [vmem:[#allocation95_spill] sm:$0xff] %v7882_v32  ;;  %11052 = vst [vmem:[#allocation50_spill] sm:$0xff] %v7891_v9  ;;  %v11053_v6 = vld [vmem:[#allocation39_spill] sm:$0xff]  ;;  %v903_v63 = vadd.f32 %v887_v35, %v866_v0 }
 0x1ef   : >> { %v924_v23 = vmul.f32 %v11049_v26, %v11048_v25  ;;  %v7885_v47 = vld [vmem:[%s5166_s27 + $0x6c] sm:$0xff]  ;;  %v7895_v20 = vmul.f32 %v7891_v9, %v11053_v6  ;;  %v7897_v39 = vld [vmem:[#allocation7 + $0x20] ss:$0 sm:$0xff]  ;;  %v1976_v26 = vadd.f32 %v7725_v27, %v1939_v22  ;;  %v7910_v6 = vld [vmem:[%s5166_s27 + $0xb4] sm:$0xff]  ;;  %v1469_v16 = vadd.f32 %v1453_v51, %v1432_v31 }
 0x1f0   : >> { %11051 = vst [vmem:[#allocation49_spill] sm:$0xff] %v7885_v47  ;;  %v7889_v2 = vmul.f32 %v7885_v47, %v7882_v32  ;;  %11054 = vst [vmem:[#allocation87_spill] sm:$0xff] %v7897_v39  ;;  %v11055_v45 = vld [vmem:[#allocation24_spill] sm:$0xff]  ;;  %v11056_v18 = vld [vmem:[#allocation169_spill] sm:$0xff]  ;;  %v961_v47 = vmul.f32 %v7651_v15, %v7876_v7 }
 0x1f1   : >> { %v7901_v55 = vmul.f32 %v7897_v39, %v11055_v45  ;;  %v2366_v25 = vadd.f32 %v11056_v18, %v2329_v44  ;;  %v7907_v32 = vld [vmem:[#allocation7 + $0x27] ss:$0 sm:$0xff]  ;;  %11058 = vst [vmem:[#allocation89_spill] sm:$0xff] %v7910_v6  ;;  %v7916_v39 = vld [vmem:[#allocation7 + $0x2e] ss:$0 sm:$0xff]  ;;  %v4550_v0 = vld [vmem:[%s5166_s27 + $0x3d] sm:$0xff]  ;;  %v940_v22 = vadd.f32 %v924_v23, %v903_v63  ;;  %v1026_v18 = vmul.f32 %v7672_v12, %v11000_v33 }
 0x1f2   : >> { %11057 = vst [vmem:[#allocation115_spill] sm:$0xff] %v7907_v32  ;;  %v7914_v9 = vmul.f32 %v7910_v6, %v7907_v32  ;;  %11059 = vst [vmem:[#allocation162_spill] sm:$0xff] %v7916_v39  ;;  %v7919_v45 = vld [vmem:[%s5166_s27 + $0xcc] sm:$0xff]  ;;  %v7927_v27 = vmul.f32 %v4550_v0, %v10990_v14  ;;  %v11061_v35 = vld [vmem:[#allocation63_spill] sm:$0xff]  ;;  %v2013_v7 = vadd.f32 %v7732_v3, %v1976_v26 }
 0x1f3   : >> { %11060 = vst [vmem:[#allocation118_spill] sm:$0xff] %v7919_v45  ;;  %v7923_v54 = vmul.f32 %v7919_v45, %v7916_v39  ;;  %v2403_v44 = vadd.f32 %v11061_v35, %v2366_v25  ;;  %v11062_v32 = vld [vmem:[#allocation59_spill] sm:$0xff]  ;;  %v1506_v51 = vadd.f32 %v1490_v17, %v1469_v16  ;;  %v977_v23 = vadd.f32 %v961_v47, %v940_v22  ;;  %v7940_v31 = vld [vmem:[#allocation7 + $0x9] ss:$0 sm:$0xff]  ;;  %v7945_v33 = vld [vmem:[#allocation7 + $0xc] ss:$0 sm:$0xff] }
 0x1f4   : >> { %v461_v15 = vmul.f32 %v10988_v11, %v11062_v32  ;;  %v11063_v39 = vld [vmem:[#allocation27_spill] sm:$0xff]  ;;  %v1063_v26 = vmul.f32 %v7940_v31, %v7755_v21  ;;  %v2050_v3 = vadd.f32 %v7748_v57, %v2013_v7  ;;  %11064 = vst [vmem:[#allocation114_spill] sm:$0xff] %v7945_v33  ;;  %v4555_v35 = vld [vmem:[%s5166_s27 + $0x90] sm:$0xff] }
 0x1f5   : >> { %v482_v45 = vmul.f32 %v7414_v59, %v11063_v39  ;;  %v4551_v14 = vld [vmem:[%s5166_s27 + $0x78] sm:$0xff]  ;;  %v2426_v25 = vadd.f32 %v7449_v58, %v2403_v44  ;;  %v556_v17 = vmul.f32 %v4555_v35, %v7432_v29  ;;  %v1543_v47 = vadd.f32 %v1527_v61, %v1506_v51  ;;  %v7957_v44 = vld [vmem:[#allocation7 + $0x13] ss:$0 sm:$0xff]  ;;  %v11070_v51 = vld [vmem:[#allocation28_spill] sm:$0xff] }
 0x1f6   : >> { %v519_v0 = vmul.f32 %v4551_v14, %v7424_v48  ;;  %v7948_v32 = vld [vmem:[%s5166_s27 + $0x55] sm:$0xff]  ;;  %11066 = vst [vmem:[#allocation108_spill] sm:$0xff] %v7957_v44  ;;  %v7960_v16 = vld [vmem:[%s5166_s27 + $0x6d] sm:$0xff]  ;;  %v1042_v7 = vadd.f32 %v1026_v18, %v977_v23  ;;  %v593_v35 = vmul.f32 %v7452_v34, %v11070_v51  ;;  %v11072_v18 = vld [vmem:[#allocation76_spill] sm:$0xff] }
 0x1f7   : >> { %11065 = vst [vmem:[#allocation129_spill] sm:$0xff] %v7948_v32  ;;  %v7952_v39 = vmul.f32 %v7948_v32, %v7945_v33  ;;  %v498_v63 = vadd.f32 %v482_v45, %v461_v15  ;;  %2444 = vst [vmem:[%s6239_s19 + $0x20] sm:$0xff] %v2426_v25  ;;  %4029 = vmatprep.mubr.f32.mxu0 %v2426_v25  ;;  %v7964_v57 = vmul.f32 %v7960_v16, %v7957_v44  ;;  %v7969_v22 = vld [vmem:[#allocation7 + $0x1a] ss:$0 sm:$0xff]  ;;  %v11069_v14 = vld [vmem:[#allocation97_spill] sm:$0xff] }
 0x1f8   : >> { %11067 = vst [vmem:[#allocation113_spill] sm:$0xff] %v7960_v16  ;;  %v1100_v15 = vmul.f32 %v7772_v56, %v7694_v62  ;;  %v2087_v45 = vadd.f32 %v7752_v8, %v2050_v3  ;;  %11068 = vst [vmem:[#allocation171_spill] sm:$0xff] %v7969_v22  ;;  %v7973_v61 = vmul.f32 %v7969_v22, %v11069_v14  ;;  %v7978_v32 = vld [vmem:[#allocation7 + $0x21] ss:$0 sm:$0xff]  ;;  %v7985_v3 = vld [vmem:[%s5166_s27 + $0xe2] sm:$0xff] }
 0x1f9   : >> { %v535_v25 = vadd.f32 %v519_v0, %v498_v63  ;;  %v1608_v16 = vadd.f32 %v7864_v24, %v1543_v47  ;;  %11071 = vst [vmem:[#allocation173_spill] sm:$0xff] %v7978_v32  ;;  %v7982_v23 = vmul.f32 %v7978_v32, %v11072_v18  ;;  %v1079_v8 = vadd.f32 %v1063_v26, %v1042_v7  ;;  %v11074_v56 = vld [vmem:[#allocation72_spill] sm:$0xff]  ;;  %v7990_v14 = vld [vmem:[#allocation7 + $0x28] ss:$0 sm:$0xff]  ;;  %v7993_v24 = vld [vmem:[%s5166_s27 + $0xb5] sm:$0xff] }
 0x1fa   : >> { %11073 = vst [vmem:[#allocation104_spill] sm:$0xff] %v7985_v3  ;;  %v1137_v0 = vmul.f32 %v7985_v3, %v11074_v56  ;;  %v2124_v63 = vadd.f32 %v7765_v40, %v2087_v45  ;;  %11075 = vst [vmem:[#allocation64_spill] sm:$0xff] %v7990_v14  ;;  %v7997_v47 = vmul.f32 %v7993_v24, %v7990_v14  ;;  %v11078_v12 = vld [vmem:[#allocation154_spill] sm:$0xff]  ;;  %v8002_v29 = vld [vmem:[#allocation7 + $0x2f] ss:$0 sm:$0xff] }
 0x1fb   : >> { %11076 = vst [vmem:[#allocation126_spill] sm:$0xff] %v7993_v24  ;;  %v572_v21 = vadd.f32 %v556_v17, %v535_v25  ;;  %v630_v26 = vmul.f32 %v11006_v36, %v11078_v12  ;;  %v1645_v7 = vadd.f32 %v7873_v30, %v1608_v16  ;;  %11079 = vst [vmem:[#allocation177_spill] sm:$0xff] %v8002_v29  ;;  %v8005_v3 = vld [vmem:[%s5166_s27 + $0xcd] sm:$0xff]  ;;  %v8012_v56 = vld [vmem:[%s5166_s27 + $0xfa] sm:$0xff] }
 0x1fc   : >> { %11077 = vst [vmem:[#allocation175_spill] sm:$0xff] %v7997_v47  ;;  %11080 = vst [vmem:[#allocation172_spill] sm:$0xff] %v8005_v3  ;;  %v8009_v40 = vmul.f32 %v8005_v3, %v8002_v29  ;;  %v1116_v45 = vadd.f32 %v1100_v15, %v1079_v8  ;;  %v11083_v14 = vld [vmem:[#allocation110_spill] sm:$0xff]  ;;  %v2189_v25 = vadd.f32 %v7769_v4, %v2124_v63  ;;  %v4566_v47 = vld [vmem:[%s5166_s27 + $0x3e] sm:$0xff] }
 0x1fd   : >> { %11082 = vst [vmem:[#allocation150_spill] sm:$0xff] %v8012_v56  ;;  %v1174_v17 = vmul.f32 %v8012_v56, %v11083_v14  ;;  %v8019_v30 = vmul.f32 %v4566_v47, %v11014_v1  ;;  %v8022_v16 = vld [vmem:[%s5166_s27 + $0x12a] sm:$0xff]  ;;  %v609_v36 = vadd.f32 %v593_v35, %v572_v21  ;;  %v1682_v15 = vadd.f32 %v7889_v2, %v1645_v7  ;;  %v8030_v29 = vld [vmem:[%s5166_s27 + $0x56] sm:$0xff]  ;;  %v8039_v35 = vld [vmem:[#allocation7 + $0x14] ss:$0 sm:$0xff] }
 0x1fe   : >> { %11081 = vst [vmem:[#allocation139_spill] sm:$0xff] %v8009_v40  ;;  %11085 = vst [vmem:[#allocation179_spill] sm:$0xff] %v8022_v16  ;;  %v11086_v62 = vld [vmem:[#allocation166_spill] sm:$0xff]  ;;  %v8027_v8 = vld [vmem:[#allocation7 + $0xd] ss:$0 sm:$0xff]  ;;  %v1153_v63 = vadd.f32 %v1137_v0, %v1116_v45  ;;  %v2226_v21 = vadd.f32 %v7782_v37, %v2189_v25 }
 0x1ff   : >> { %11084 = vst [vmem:[#allocation145_spill] sm:$0xff] %v8019_v30  ;;  %v667_v40 = vmul.f32 %v11012_v50, %v11086_v62  ;;  %11087 = vst [vmem:[#allocation77_spill] sm:$0xff] %v8027_v8  ;;  %v8034_v4 = vmul.f32 %v8030_v29, %v8027_v8  ;;  %v11089_v1 = vld [vmem:[#allocation161_spill] sm:$0xff]  ;;  %v8048_v7 = vld [vmem:[#allocation7 + $0x1b] ss:$0 sm:$0xff]  ;;  %v646_v45 = vadd.f32 %v630_v26, %v609_v36 }
 0x200   : >> { %11088 = vst [vmem:[#allocation88_spill] sm:$0xff] %v8030_v29  ;;  %v1211_v47 = vmul.f32 %v7510_v60, %v11089_v1  ;;  %11090 = vst [vmem:[#allocation82_spill] sm:$0xff] %v8039_v35  ;;  %v8042_v56 = vld [vmem:[%s5166_s27 + $0x6e] sm:$0xff]  ;;  %v8051_v30 = vld [vmem:[%s5166_s27 + $0x86] sm:$0xff]  ;;  %v1719_v37 = vadd.f32 %v7895_v20, %v1682_v15  ;;  %v1190_v29 = vadd.f32 %v1174_v17, %v1153_v63 }
 0x201   : >> { %11091 = vst [vmem:[#allocation60_spill] sm:$0xff] %v8042_v56  ;;  %v8046_v2 = vmul.f32 %v8042_v56, %v8039_v35  ;;  %11093 = vst [vmem:[#allocation90_spill] sm:$0xff] %v8048_v7  ;;  %v8055_v0 = vmul.f32 %v8051_v30, %v8048_v7  ;;  %v8058_v25 = vld [vmem:[#allocation7 + $0x22] ss:$0 sm:$0xff]  ;;  %v8073_v36 = vld [vmem:[%s5166_s27 + $0xb6] sm:$0xff]  ;;  %v683_v26 = vadd.f32 %v667_v40, %v646_v45 }
 0x202   : >> { %11094 = vst [vmem:[#allocation85_spill] sm:$0xff] %v8051_v30  ;;  %11096 = vst [vmem:[#allocation78_spill] sm:$0xff] %v8058_v25  ;;  %v8061_v1 = vld [vmem:[%s5166_s27 + $0x9e] sm:$0xff]  ;;  %v2263_v30 = vadd.f32 %v7786_v28, %v2226_v21  ;;  %v1756_v17 = vadd.f32 %v7901_v55, %v1719_v37  ;;  %v8082_v63 = vld [vmem:[#allocation7 + $0x30] ss:$0 sm:$0xff]  ;;  %v1227_v21 = vadd.f32 %v1211_v47, %v1190_v29 }
 0x203   : >> { %11092 = vst [vmem:[#allocation53_spill] sm:$0xff] %v8046_v2  ;;  %11095 = vst [vmem:[#allocation23_spill] sm:$0xff] %v8055_v0  ;;  %v8065_v56 = vmul.f32 %v8061_v1, %v8058_v25  ;;  %v1248_v2 = vmul.f32 %v7531_v38, %v8022_v16  ;;  %v8070_v0 = vld [vmem:[#allocation7 + $0x29] ss:$0 sm:$0xff]  ;;  %v11102_v15 = vld [vmem:[#allocation91_spill] sm:$0xff]  ;;  %v1350_v55 = vmul.f32 %v7844_v43, %v7574_v13 }
 0x204   : >> { %11097 = vst [vmem:[#allocation140_spill] sm:$0xff] %v8061_v1  ;;  %11099 = vst [vmem:[#allocation44_spill] sm:$0xff] %v8070_v0  ;;  %v8077_v20 = vmul.f32 %v8073_v36, %v8070_v0  ;;  %v8085_v16 = vld [vmem:[%s5166_s27 + $0xce] sm:$0xff]  ;;  %v2300_v40 = vadd.f32 %v7804_v41, %v2263_v30  ;;  %v11107_v37 = vld [vmem:[#allocation31_spill] sm:$0xff]  ;;  %v1387_v29 = vmul.f32 %v7858_v42, %v11028_v49 }
 0x205   : >> { %11098 = vst [vmem:[#allocation144_spill] sm:$0xff] %v8065_v56  ;;  %11100 = vst [vmem:[#allocation122_spill] sm:$0xff] %v8073_v36  ;;  %v769_v56 = vmul.f32 %v7540_v52, %v11102_v15  ;;  %v8089_v28 = vmul.f32 %v8085_v16, %v8082_v63  ;;  %v8095_v45 = vld [vmem:[%s5166_s27 + $0x12b] sm:$0xff]  ;;  %v748_v15 = vadd.f32 %v11107_v37, %v683_v26  ;;  %v4579_v38 = vld [vmem:[%s5166_s27 + $0x79] sm:$0xff] }
 0x206   : >> { %11101 = vst [vmem:[#allocation159_spill] sm:$0xff] %v8077_v20  ;;  %11103 = vst [vmem:[#allocation81_spill] sm:$0xff] %v8082_v63  ;;  %v1313_v20 = vmul.f32 %v7788_v19, %v11034_v46  ;;  %v806_v0 = vmul.f32 %v4579_v38, %v7559_v10  ;;  %v1793_v63 = vadd.f32 %v7914_v9, %v1756_v17  ;;  %v8106_v46 = vld [vmem:[%s5166_s27 + $0xe3] sm:$0xff]  ;;  %v8112_v47 = vld [vmem:[%s5166_s27 + $0xfb] sm:$0xff] }
 0x207   : >> { %11104 = vst [vmem:[#allocation147_spill] sm:$0xff] %v8085_v16  ;;  %11105 = vst [vmem:[#allocation141_spill] sm:$0xff] %v8089_v28  ;;  %v1264_v28 = vadd.f32 %v1248_v2, %v1227_v21  ;;  %v1424_v41 = vmul.f32 %v8106_v46, %v11033_v53  ;;  %v2337_v30 = vadd.f32 %v7808_v5, %v2300_v40  ;;  %v11110_v43 = vld [vmem:[#allocation42_spill] sm:$0xff]  ;;  %v11111_v19 = vld [vmem:[#allocation68_spill] sm:$0xff] }
 0x208   : >> { %11106 = vst [vmem:[#allocation32_spill] sm:$0xff] %v8095_v45  ;;  %11108 = vst [vmem:[#allocation120_spill] sm:$0xff] %v8106_v46  ;;  %v1461_v26 = vmul.f32 %v8112_v47, %v11110_v43  ;;  %v785_v37 = vadd.f32 %v769_v56, %v748_v15  ;;  %v4582_v38 = vld [vmem:[%s5166_s27 + $0x91] sm:$0xff]  ;;  %v1830_v2 = vadd.f32 %v7923_v54, %v1793_v63  ;;  %v11112_v21 = vld [vmem:[#allocation152_spill] sm:$0xff] }
 0x209   : >> { %11109 = vst [vmem:[#allocation148_spill] sm:$0xff] %v8112_v47  ;;  %v843_v9 = vmul.f32 %v4582_v38, %v11111_v19  ;;  %v1329_v17 = vadd.f32 %v1313_v20, %v1264_v28  ;;  %v11113_v42 = vld [vmem:[#allocation100_spill] sm:$0xff]  ;;  %v11114_v46 = vld [vmem:[#allocation71_spill] sm:$0xff]  ;;  %v11115_v5 = vld [vmem:[#allocation57_spill] sm:$0xff] }
 0x20a   : >> { %v1498_v49 = vmul.f32 %v11113_v42, %v11112_v21  ;;  %v1535_v53 = vmul.f32 %v11114_v46, %v8095_v45  ;;  %v2374_v40 = vadd.f32 %v11115_v5, %v2337_v30  ;;  %v8124_v13 = vld [vmem:[#allocation7 + $0x4] ss:$0 sm:$0xff]  ;;  %v822_v15 = vadd.f32 %v806_v0, %v785_v37  ;;  %v11120_v28 = vld [vmem:[#allocation46_spill] sm:$0xff]  ;;  %v11121_v45 = vld [vmem:[#allocation95_spill] sm:$0xff] }
 0x20b   : >> { %11116 = vst [vmem:[#allocation174_spill] sm:$0xff] %v8124_v13  ;;  %v11117_v47 = vld [vmem:[#allocation24_spill] sm:$0xff]  ;;  %v1895_v20 = vadd.f32 %v7927_v27, %v1830_v2  ;;  %v1366_v63 = vadd.f32 %v1350_v55, %v1329_v17  ;;  %v8135_v21 = vmul.f32 %v7910_v6, %v11120_v28  ;;  %v11122_v30 = vld [vmem:[#allocation118_spill] sm:$0xff]  ;;  %v11127_v55 = vld [vmem:[#allocation37_spill] sm:$0xff] }
 0x20c   : >> { %v8128_v56 = vmul.f32 %v8124_v13, %v11117_v47  ;;  %v11118_v38 = vld [vmem:[#allocation92_spill] sm:$0xff]  ;;  %v8139_v5 = vmul.f32 %v11122_v30, %v11121_v45  ;;  %v11125_v0 = vld [vmem:[#allocation50_spill] sm:$0xff]  ;;  %v859_v13 = vadd.f32 %v843_v9, %v822_v15  ;;  %v11129_v30 = vld [vmem:[#allocation109_spill] sm:$0xff]  ;;  %v490_v9 = vmul.f32 %v7414_v59, %v11078_v12 }
 0x20d   : >> { %v11119_v19 = vld [vmem:[#allocation48_spill] sm:$0xff]  ;;  %v1932_v17 = vadd.f32 %v7952_v39, %v1895_v20  ;;  %v1403_v6 = vadd.f32 %v1387_v29, %v1366_v63  ;;  %v8153_v28 = vld [vmem:[%s5166_s27 + $0x12c] sm:$0xff]  ;;  %v527_v15 = vmul.f32 %v7424_v48, %v11086_v62  ;;  %v11132_v63 = vld [vmem:[#allocation87_spill] sm:$0xff] }
 0x20e   : >> { %v880_v54 = vmul.f32 %v11119_v19, %v11118_v38  ;;  %v11123_v46 = vld [vmem:[#allocation52_spill] sm:$0xff]  ;;  %11128 = vst [vmem:[#allocation151_spill] sm:$0xff] %v8153_v28  ;;  %v11130_v45 = vld [vmem:[#allocation61_spill] sm:$0xff]  ;;  %v11135_v12 = vld [vmem:[#allocation162_spill] sm:$0xff] }
 0x20f   : >> { %v2411_v42 = vadd.f32 %v11123_v46, %v2374_v40  ;;  %v8143_v47 = vld [vmem:[%s5166_s27 + $0xe4] sm:$0xff]  ;;  %v954_v46 = vmul.f32 %v11130_v45, %v11129_v30  ;;  %v469_v40 = vmul.f32 %v10988_v11, %v11070_v51  ;;  %v1969_v39 = vadd.f32 %v7964_v57, %v1932_v17  ;;  %v8166_v20 = vld [vmem:[%s5166_s27 + $0xfc] sm:$0xff] }
 0x210   : >> { %11124 = vst [vmem:[#allocation132_spill] sm:$0xff] %v8143_v47  ;;  %v8147_v37 = vmul.f32 %v8143_v47, %v11125_v0  ;;  %v11126_v27 = vld [vmem:[#allocation164_spill] sm:$0xff]  ;;  %v896_v47 = vadd.f32 %v880_v54, %v859_v13  ;;  %v1440_v29 = vadd.f32 %v1424_v41, %v1403_v6  ;;  %11131 = vst [vmem:[#allocation106_spill] sm:$0xff] %v8166_v20  ;;  %v11133_v51 = vld [vmem:[#allocation165_spill] sm:$0xff] }
 0x211   : >> { %v917_v2 = vmul.f32 %v11127_v55, %v11126_v27  ;;  %v2434_v19 = vadd.f32 %v7449_v58, %v2411_v42  ;;  %v8170_v45 = vmul.f32 %v8166_v20, %v11132_v63  ;;  %v11134_v42 = vld [vmem:[#allocation115_spill] sm:$0xff]  ;;  %v8179_v62 = vmul.f32 %v11135_v12, %v8153_v28  ;;  %v8181_v57 = vld [vmem:[#allocation7 + $0x5] ss:$0 sm:$0xff]  ;;  %v8197_v20 = vld [vmem:[%s5166_s27 + $0x12d] sm:$0xff] }
 0x212   : >> { %v8174_v13 = vmul.f32 %v11134_v42, %v11133_v51  ;;  %11136 = vst [vmem:[#allocation101_spill] sm:$0xff] %v8181_v57  ;;  %v8185_v6 = vmul.f32 %v8181_v57, %v11072_v18  ;;  %v506_v54 = vadd.f32 %v490_v9, %v469_v40  ;;  %v2006_v17 = vadd.f32 %v7973_v61, %v1969_v39  ;;  %v4587_v57 = vld [vmem:[%s5166_s27 + $0x62] sm:$0xff] }
 0x213   : >> { %2452 = vst [vmem:[%s6239_s19 + $0x60] sm:$0xff] %v2434_v19  ;;  %4041 = vmatprep.mubr.f32.mxu1 %v2434_v19  ;;  %v933_v41 = vadd.f32 %v917_v2, %v896_v47  ;;  %v1477_v51 = vadd.f32 %v1461_v26, %v1440_v29  ;;  %v8190_v19 = vmul.f32 %v7993_v24, %v7945_v33  ;;  %11138 = vst [vmem:[#allocation181_spill] sm:$0xff] %v8197_v20  ;;  %v4588_v40 = vld [vmem:[%s5166_s27 + $0x108] sm:$0xff]  ;;  %v11148_v33 = vld [vmem:[#allocation175_spill] sm:$0xff] }
 0x214   : >> { %v8194_v28 = vmul.f32 %v8005_v3, %v7957_v44  ;;  %v1056_v47 = vmul.f32 %v4587_v57, %v7940_v31  ;;  %v543_v2 = vadd.f32 %v527_v15, %v506_v54  ;;  %v601_v61 = vmul.f32 %v4588_v40, %v7452_v34  ;;  %v8205_v39 = vld [vmem:[%s5166_s27 + $0xe5] sm:$0xff]  ;;  %v8212_v3 = vld [vmem:[%s5166_s27 + $0xfd] sm:$0xff]  ;;  %v11143_v57 = vld [vmem:[#allocation38_spill] sm:$0xff] }
 0x215   : >> { %v970_v18 = vadd.f32 %v954_v46, %v933_v41  ;;  %v2043_v26 = vadd.f32 %v7982_v23, %v2006_v17  ;;  %v1514_v9 = vadd.f32 %v1498_v49, %v1477_v51  ;;  %11139 = vst [vmem:[#allocation116_spill] sm:$0xff] %v8205_v39  ;;  %v8209_v29 = vmul.f32 %v8205_v39, %v7969_v22  ;;  %v448_v15 = vld [vmem:[%s5166_s27 + $0x138] sm:$0xff]  ;;  %v11145_v49 = vld [vmem:[#allocation124_spill] sm:$0xff]  ;;  %v11146_v51 = vld [vmem:[#allocation93_spill] sm:$0xff] }
 0x216   : >> { %11137 = vst [vmem:[#allocation153_spill] sm:$0xff] %v8194_v28  ;;  %11141 = vst [vmem:[#allocation36_spill] sm:$0xff] %v8212_v3  ;;  %v8216_v46 = vmul.f32 %v8212_v3, %v7978_v32  ;;  %v4591_v54 = vld [vmem:[%s5166_s27 + $0x7a] sm:$0xff]  ;;  %v580_v17 = vadd.f32 %v11145_v49, %v543_v2  ;;  %v11147_v24 = vld [vmem:[#allocation137_spill] sm:$0xff]  ;;  %v675_v49 = vmul.f32 %v11012_v50, %v448_v15 }
 0x217   : >> { %11140 = vst [vmem:[#allocation34_spill] sm:$0xff] %v8209_v29  ;;  %v1035_v41 = vadd.f32 %v11143_v57, %v970_v18  ;;  %v11144_v40 = vld [vmem:[#allocation167_spill] sm:$0xff]  ;;  %v638_v44 = vmul.f32 %v11147_v24, %v11146_v51  ;;  %v2080_v39 = vadd.f32 %v11148_v33, %v2043_v26  ;;  %v1551_v22 = vadd.f32 %v1535_v53, %v1514_v9  ;;  %v11149_v29 = vld [vmem:[#allocation168_spill] sm:$0xff]  ;;  %v11151_v3 = vld [vmem:[#allocation177_spill] sm:$0xff] }
 0x218   : >> { %11142 = vst [vmem:[#allocation105_spill] sm:$0xff] %v8216_v46  ;;  %v1093_v23 = vmul.f32 %v4591_v54, %v11144_v40  ;;  %v11150_v12 = vld [vmem:[#allocation64_spill] sm:$0xff]  ;;  %v8232_v46 = vmul.f32 %v11151_v3, %v8197_v20  ;;  %v4592_v57 = vld [vmem:[%s5166_s27 + $0x92] sm:$0xff]  ;;  %v617_v2 = vadd.f32 %v601_v61, %v580_v17 }
 0x219   : >> { %v8228_v28 = vmul.f32 %v11150_v12, %v11149_v29  ;;  %v1072_v18 = vadd.f32 %v1056_v47, %v1035_v41  ;;  %v11152_v32 = vld [vmem:[#allocation72_spill] sm:$0xff]  ;;  %v11153_v51 = vld [vmem:[#allocation139_spill] sm:$0xff]  ;;  %v1616_v53 = vadd.f32 %v8128_v56, %v1551_v22  ;;  %v8247_v47 = vmul.f32 %v8073_v36, %v8027_v8  ;;  %v11156_v41 = vld [vmem:[#allocation117_spill] sm:$0xff] }
 0x21a   : >> { %v1130_v54 = vmul.f32 %v4592_v57, %v11152_v32  ;;  %v2117_v33 = vadd.f32 %v11153_v51, %v2080_v39  ;;  %v8239_v26 = vld [vmem:[#allocation7 + $0x6] ss:$0 sm:$0xff]  ;;  %v1167_v61 = vmul.f32 %v11083_v14, %v11156_v41  ;;  %v654_v15 = vadd.f32 %v638_v44, %v617_v2  ;;  %v11157_v39 = vld [vmem:[#allocation25_spill] sm:$0xff] }
 0x21b   : >> { %11154 = vst [vmem:[#allocation128_spill] sm:$0xff] %v8239_v26  ;;  %v8243_v9 = vmul.f32 %v8239_v26, %v8061_v1  ;;  %11155 = vst [vmem:[#allocation56_spill] sm:$0xff] %v8247_v47  ;;  %v1109_v29 = vadd.f32 %v1093_v23, %v1072_v18  ;;  %v740_v17 = vmul.f32 %v11157_v39, %v11118_v38  ;;  %v11158_v22 = vld [vmem:[#allocation145_spill] sm:$0xff]  ;;  %v11170_v1 = vld [vmem:[#allocation30_spill] sm:$0xff] }
 0x21c   : >> { %v2182_v56 = vadd.f32 %v11158_v22, %v2117_v33  ;;  %v1653_v57 = vadd.f32 %v8135_v21, %v1616_v53  ;;  %v8257_v51 = vmul.f32 %v8085_v16, %v8039_v35  ;;  %v8260_v20 = vld [vmem:[%s5166_s27 + $0xe6] sm:$0xff]  ;;  %v8267_v18 = vld [vmem:[%s5166_s27 + $0x12e] sm:$0xff]  ;;  %v691_v33 = vadd.f32 %v675_v49, %v654_v15  ;;  %v8276_v16 = vld [vmem:[%s5166_s27 + $0xfe] sm:$0xff] }
 0x21d   : >> { %11160 = vst [vmem:[#allocation39_spill] sm:$0xff] %v8260_v20  ;;  %v8264_v23 = vmul.f32 %v8260_v20, %v8048_v7  ;;  %11162 = vst [vmem:[#allocation63_spill] sm:$0xff] %v8267_v18  ;;  %v1146_v44 = vadd.f32 %v1130_v54, %v1109_v29  ;;  %v11163_v2 = vld [vmem:[#allocation21_spill] sm:$0xff]  ;;  %v777_v21 = vmul.f32 %v7540_v52, %v11126_v27  ;;  %v11166_v54 = vld [vmem:[#allocation170_spill] sm:$0xff] }
 0x21e   : >> { %11159 = vst [vmem:[#allocation69_spill] sm:$0xff] %v8257_v51  ;;  %v1204_v38 = vmul.f32 %v7510_v60, %v11163_v2  ;;  %v2219_v53 = vadd.f32 %v8034_v4, %v2182_v56  ;;  %v1690_v22 = vadd.f32 %v8139_v5, %v1653_v57  ;;  %11164 = vst [vmem:[#allocation59_spill] sm:$0xff] %v8276_v16  ;;  %v11167_v29 = vld [vmem:[#allocation44_spill] sm:$0xff]  ;;  %v11169_v15 = vld [vmem:[#allocation149_spill] sm:$0xff] }
 0x21f   : >> { %11161 = vst [vmem:[#allocation169_spill] sm:$0xff] %v8264_v23  ;;  %v8280_v20 = vmul.f32 %v8276_v16, %v8058_v25  ;;  %v8284_v36 = vmul.f32 %v11167_v29, %v11166_v54  ;;  %v1183_v49 = vadd.f32 %v1167_v61, %v1146_v44  ;;  %v1241_v27 = vmul.f32 %v11170_v1, %v11169_v15  ;;  %v11171_v5 = vld [vmem:[#allocation53_spill] sm:$0xff]  ;;  %v11174_v54 = vld [vmem:[#allocation102_spill] sm:$0xff]  ;;  %v4597_v44 = vld [vmem:[%s5166_s27 + $0x7b] sm:$0xff] }
 0x220   : >> { %v756_v26 = vadd.f32 %v740_v17, %v691_v33  ;;  %v814_v4 = vmul.f32 %v7559_v10, %v11129_v30  ;;  %v2256_v56 = vadd.f32 %v11171_v5, %v2219_v53  ;;  %v1727_v57 = vadd.f32 %v8147_v37, %v1690_v22  ;;  %v11172_v32 = vld [vmem:[#allocation81_spill] sm:$0xff]  ;;  %v11175_v23 = vld [vmem:[#allocation43_spill] sm:$0xff]  ;;  %v11176_v51 = vld [vmem:[#allocation94_spill] sm:$0xff] }
 0x221   : >> { %11165 = vst [vmem:[#allocation27_spill] sm:$0xff] %v8280_v20  ;;  %11168 = vst [vmem:[#allocation97_spill] sm:$0xff] %v8284_v36  ;;  %v8294_v16 = vmul.f32 %v11172_v32, %v8267_v18  ;;  %v4596_v20 = vld [vmem:[%s5166_s27 + $0x63] sm:$0xff]  ;;  %v1220_v61 = vadd.f32 %v1204_v38, %v1183_v49  ;;  %v1380_v17 = vmul.f32 %v4597_v44, %v11175_v23  ;;  %v4598_v33 = vld [vmem:[%s5166_s27 + $0x93] sm:$0xff] }
 0x222   : >> { %v1343_v36 = vmul.f32 %v4596_v20, %v11174_v54  ;;  %v1417_v30 = vmul.f32 %v4598_v33, %v11176_v51  ;;  %v793_v53 = vadd.f32 %v777_v21, %v756_v26  ;;  %v11177_v5 = vld [vmem:[#allocation23_spill] sm:$0xff]  ;;  %v1764_v22 = vadd.f32 %v8170_v45, %v1727_v57  ;;  %v11178_v18 = vld [vmem:[#allocation98_spill] sm:$0xff]  ;;  %v11179_v47 = vld [vmem:[#allocation41_spill] sm:$0xff] }
 0x223   : >> { %11173 = vst [vmem:[#allocation28_spill] sm:$0xff] %v8294_v16  ;;  %v2293_v37 = vadd.f32 %v11177_v5, %v2256_v56  ;;  %v1454_v16 = vmul.f32 %v11110_v43, %v11178_v18  ;;  %v11180_v20 = vld [vmem:[#allocation100_spill] sm:$0xff]  ;;  %v1257_v49 = vadd.f32 %v1241_v27, %v1220_v61  ;;  %v11181_v54 = vld [vmem:[#allocation121_spill] sm:$0xff]  ;;  %v11182_v32 = vld [vmem:[#allocation71_spill] sm:$0xff] }
 0x224   : >> { %v1491_v38 = vmul.f32 %v11180_v20, %v11179_v47  ;;  %v8310_v44 = vmul.f32 %v11182_v32, %v11181_v54  ;;  %v830_v23 = vadd.f32 %v814_v4, %v793_v53  ;;  %v4599_v29 = vld [vmem:[%s5166_s27 + $0x109] sm:$0xff]  ;;  %v11183_v33 = vld [vmem:[#allocation48_spill] sm:$0xff]  ;;  %v1801_v45 = vadd.f32 %v8174_v13, %v1764_v22  ;;  %v11186_v27 = vld [vmem:[#allocation95_spill] sm:$0xff] }
 0x225   : >> { %v888_v26 = vmul.f32 %v4599_v29, %v11183_v33  ;;  %v11184_v21 = vld [vmem:[#allocation144_spill] sm:$0xff]  ;;  %v11185_v5 = vld [vmem:[#allocation46_spill] sm:$0xff]  ;;  %v11187_v43 = vld [vmem:[#allocation47_spill] sm:$0xff] }
 0x226   : >> { %v2330_v56 = vadd.f32 %v11184_v21, %v2293_v37  ;;  %v4600_v57 = vld [vmem:[%s5166_s27 + $0x64] sm:$0xff]  ;;  %v4601_v20 = vld [vmem:[%s5166_s27 + $0x7c] sm:$0xff]  ;;  %v1322_v4 = vadd.f32 %v11187_v43, %v1257_v49  ;;  %v4603_v49 = vld [vmem:[%s5166_s27 + $0x94] sm:$0xff] }
 0x227   : >> { %v8318_v51 = vmul.f32 %v4600_v57, %v11185_v5  ;;  %v8322_v61 = vmul.f32 %v4601_v20, %v11186_v27  ;;  %v719_v32 = vld [vmem:[%s5166_s27 + $0x139] sm:$0xff]  ;;  %v11188_v53 = vld [vmem:[#allocation125_spill] sm:$0xff]  ;;  %v1838_v57 = vadd.f32 %v8179_v62, %v1801_v45 }
 0x228   : >> { %v867_v54 = vadd.f32 %v11188_v53, %v830_v23  ;;  %v11189_v47 = vld [vmem:[#allocation96_spill] sm:$0xff]  ;;  %v11190_v13 = vld [vmem:[#allocation135_spill] sm:$0xff]  ;;  %v1359_v43 = vadd.f32 %v1343_v36, %v1322_v4  ;;  %v8339_v23 = vmul.f32 %v4603_v49, %v11125_v0  ;;  %v11194_v18 = vld [vmem:[#allocation141_spill] sm:$0xff] }
 0x229   : >> { %v925_v29 = vmul.f32 %v11127_v55, %v11189_v47  ;;  %v462_v37 = vmul.f32 %v11190_v13, %v10988_v11  ;;  %v11191_v22 = vld [vmem:[#allocation159_spill] sm:$0xff]  ;;  %v4602_v27 = vld [vmem:[%s5166_s27 + $0x80] sm:$0xff]  ;;  %v11193_v47 = vld [vmem:[#allocation61_spill] sm:$0xff] }
 0x22a   : >> { %v2367_v21 = vadd.f32 %v11191_v22, %v2330_v56  ;;  %v11192_v5 = vld [vmem:[#allocation111_spill] sm:$0xff]  ;;  %v520_v33 = vmul.f32 %v4602_v27, %v7424_v48  ;;  %v904_v53 = vadd.f32 %v888_v26, %v867_v54  ;;  %v962_v55 = vmul.f32 %v11193_v47, %v719_v32  ;;  %v11195_v22 = vld [vmem:[#allocation73_spill] sm:$0xff]  ;;  %v11198_v26 = vld [vmem:[#allocation112_spill] sm:$0xff] }
 0x22b   : >> { %v483_v20 = vmul.f32 %v11192_v5, %v7414_v59  ;;  %v1903_v56 = vadd.f32 %v8185_v6, %v1838_v57  ;;  %v4604_v45 = vld [vmem:[%s5166_s27 + $0x98] sm:$0xff]  ;;  %v1396_v59 = vadd.f32 %v1380_v17, %v1359_v43  ;;  %v11196_v11 = vld [vmem:[#allocation29_spill] sm:$0xff] }
 0x22c   : >> { %v2404_v13 = vadd.f32 %v11194_v18, %v2367_v21  ;;  %v557_v5 = vmul.f32 %v4604_v45, %v11195_v22  ;;  %v8348_v36 = vmul.f32 %v11132_v63, %v11196_v11  ;;  %v941_v27 = vadd.f32 %v925_v29, %v904_v53  ;;  %v11197_v4 = vld [vmem:[#allocation51_spill] sm:$0xff] }
 0x22d   : >> { %v499_v62 = vadd.f32 %v483_v20, %v462_v37  ;;  %v1027_v54 = vmul.f32 %v11197_v4, %v11156_v41  ;;  %v1940_v18 = vadd.f32 %v8190_v19, %v1903_v56  ;;  %v594_v37 = vmul.f32 %v11198_v26, %v7452_v34  ;;  %v11199_v57 = vld [vmem:[#allocation123_spill] sm:$0xff]  ;;  %v11200_v41 = vld [vmem:[#allocation153_spill] sm:$0xff]  ;;  %v11201_v19 = vld [vmem:[#allocation158_spill] sm:$0xff] }
 0x22e   : >> { %v2427_v32 = vadd.f32 %v7449_v58, %v2404_v13  ;;  %v1433_v21 = vadd.f32 %v1417_v30, %v1396_v59  ;;  %v8358_v17 = vmul.f32 %v11134_v42, %v11199_v57  ;;  %v978_v20 = vadd.f32 %v962_v55, %v941_v27  ;;  %v11203_v59 = vld [vmem:[#allocation55_spill] sm:$0xff]  ;;  %v4605_v56 = vld [vmem:[%s5166_s27 + $0x65] sm:$0xff]  ;;  %v11205_v27 = vld [vmem:[#allocation34_spill] sm:$0xff] }
 0x22f   : >> { %v536_v6 = vadd.f32 %v520_v33, %v499_v62  ;;  %v1064_v29 = vmul.f32 %v7940_v31, %v11163_v2  ;;  %v1977_v43 = vadd.f32 %v11200_v41, %v1940_v18  ;;  %v11202_v33 = vld [vmem:[#allocation162_spill] sm:$0xff]  ;;  %v631_v30 = vmul.f32 %v11203_v59, %v11147_v24  ;;  %v4606_v18 = vld [vmem:[%s5166_s27 + $0x7d] sm:$0xff] }
 0x230   : >> { %2445 = vst [vmem:[%s6239_s19 + $0x28] sm:$0xff] %v2427_v32  ;;  %4030 = vmatmul.mubr.f32.gmra.mrb[4].mxu0 %v2427_v32  ;;  %v8366_v49 = vmul.f32 %v11202_v33, %v11201_v19  ;;  %v1470_v13 = vadd.f32 %v1454_v16, %v1433_v21  ;;  %v11204_v62 = vld [vmem:[#allocation114_spill] sm:$0xff]  ;;  %v1043_v45 = vadd.f32 %v1027_v54, %v978_v20  ;;  %v11206_v41 = vld [vmem:[#allocation108_spill] sm:$0xff] }
 0x231   : >> { %v573_v53 = vadd.f32 %v557_v5, %v536_v6  ;;  %v8372_v55 = vmul.f32 %v4605_v56, %v11204_v62  ;;  %v1101_v2 = vmul.f32 %v11144_v40, %v11169_v15  ;;  %v2014_v32 = vadd.f32 %v11205_v27, %v1977_v43  ;;  %v11207_v6 = vld [vmem:[#allocation67_spill] sm:$0xff]  ;;  %v11209_v20 = vld [vmem:[#allocation74_spill] sm:$0xff]  ;;  %v11210_v15 = vld [vmem:[#allocation173_spill] sm:$0xff] }
 0x232   : >> { %v8379_v0 = vmul.f32 %v4606_v18, %v11206_v41  ;;  %v668_v24 = vmul.f32 %v11207_v6, %v11012_v50  ;;  %v1507_v16 = vadd.f32 %v1491_v38, %v1470_v13  ;;  %v4607_v21 = vld [vmem:[%s5166_s27 + $0x95] sm:$0xff]  ;;  %v8389_v62 = vmul.f32 %v11210_v15, %v11209_v20  ;;  %v11212_v27 = vld [vmem:[#allocation105_spill] sm:$0xff] }
 0x233   : >> { %v610_v5 = vadd.f32 %v594_v37, %v573_v53  ;;  %v11208_v56 = vld [vmem:[#allocation171_spill] sm:$0xff]  ;;  %v1080_v43 = vadd.f32 %v1064_v29, %v1043_v45  ;;  %v2051_v58 = vadd.f32 %v11212_v27, %v2014_v32  ;;  %v11213_v18 = vld [vmem:[#allocation134_spill] sm:$0xff]  ;;  %v4609_v27 = vld [vmem:[%s5166_s27 + $0x66] sm:$0xff] }
 0x234   : >> { %v8385_v54 = vmul.f32 %v4607_v21, %v11208_v56  ;;  %11211 = vst [vmem:[#allocation76_spill] sm:$0xff] %v8389_v62  ;;  %v8394_v37 = vmul.f32 %v11150_v12, %v11213_v18  ;;  %v11215_v38 = vld [vmem:[#allocation142_spill] sm:$0xff]  ;;  %v1544_v50 = vadd.f32 %v8310_v44, %v1507_v16  ;;  %v11216_v21 = vld [vmem:[#allocation33_spill] sm:$0xff] }
 0x235   : >> { %v647_v53 = vadd.f32 %v631_v30, %v610_v5  ;;  %v733_v13 = vmul.f32 %v11215_v38, %v11157_v39  ;;  %v8401_v56 = vmul.f32 %v11151_v3, %v11216_v21  ;;  %v1117_v62 = vadd.f32 %v1101_v2, %v1080_v43  ;;  %v4608_v29 = vld [vmem:[%s5166_s27 + $0x10a] sm:$0xff]  ;;  %v1006_v5 = vld [vmem:[%s5166_s27 + $0x13a] sm:$0xff] }
 0x236   : >> { %11214 = vst [vmem:[#allocation154_spill] sm:$0xff] %v8394_v37  ;;  %v1175_v45 = vmul.f32 %v4608_v29, %v11083_v14  ;;  %v2088_v32 = vadd.f32 %v8228_v28, %v2051_v58  ;;  %v8408_v30 = vmul.f32 %v4609_v27, %v8027_v8  ;;  %v11219_v44 = vld [vmem:[#allocation157_spill] sm:$0xff]  ;;  %v11220_v37 = vld [vmem:[#allocation66_spill] sm:$0xff] }
 0x237   : >> { %11217 = vst [vmem:[#allocation110_spill] sm:$0xff] %v8401_v56  ;;  %v684_v38 = vadd.f32 %v668_v24, %v647_v53  ;;  %v770_v16 = vmul.f32 %v11219_v44, %v7540_v52  ;;  %v1609_v3 = vadd.f32 %v11220_v37, %v1544_v50  ;;  %v4610_v56 = vld [vmem:[%s5166_s27 + $0x7e] sm:$0xff]  ;;  %v11222_v43 = vld [vmem:[#allocation130_spill] sm:$0xff]  ;;  %v11223_v39 = vld [vmem:[#allocation133_spill] sm:$0xff] }
 0x238   : >> { %11218 = vst [vmem:[#allocation166_spill] sm:$0xff] %v8408_v30  ;;  %v8416_v2 = vmul.f32 %v4610_v56, %v8039_v35  ;;  %v1154_v29 = vadd.f32 %v11222_v43, %v1117_v62  ;;  %v1212_v58 = vmul.f32 %v7510_v60, %v11223_v39  ;;  %v2125_v28 = vadd.f32 %v8232_v46, %v2088_v32  ;;  %v4611_v27 = vld [vmem:[%s5166_s27 + $0x96] sm:$0xff]  ;;  %v4612_v44 = vld [vmem:[%s5166_s27 + $0x81] sm:$0xff] }
 0x239   : >> { %v8424_v24 = vmul.f32 %v4611_v27, %v8048_v7  ;;  %v749_v53 = vadd.f32 %v733_v13, %v684_v38  ;;  %v807_v50 = vmul.f32 %v4612_v44, %v7559_v10  ;;  %v1646_v56 = vadd.f32 %v8318_v51, %v1609_v3  ;;  %v11225_v37 = vld [vmem:[#allocation156_spill] sm:$0xff]  ;;  %v11227_v32 = vld [vmem:[#allocation143_spill] sm:$0xff]  ;;  %v11231_v51 = vld [vmem:[#allocation54_spill] sm:$0xff] }
 0x23a   : >> { %11221 = vst [vmem:[#allocation161_spill] sm:$0xff] %v8416_v2  ;;  %v8431_v2 = vmul.f32 %v8058_v25, %v11225_v37  ;;  %v1191_v62 = vadd.f32 %v1175_v45, %v1154_v29  ;;  %v1249_v39 = vmul.f32 %v11170_v1, %v1006_v5  ;;  %v2190_v46 = vadd.f32 %v8243_v9, %v2125_v28  ;;  %v11228_v43 = vld [vmem:[#allocation44_spill] sm:$0xff]  ;;  %v11234_v29 = vld [vmem:[#allocation98_spill] sm:$0xff]  ;;  %v11235_v5 = vld [vmem:[#allocation75_spill] sm:$0xff] }
 0x23b   : >> { %11224 = vst [vmem:[#allocation91_spill] sm:$0xff] %v8424_v24  ;;  %v8437_v27 = vmul.f32 %v11228_v43, %v11227_v32  ;;  %v786_v13 = vadd.f32 %v770_v16, %v749_v53  ;;  %v4613_v38 = vld [vmem:[%s5166_s27 + $0x99] sm:$0xff]  ;;  %v1683_v3 = vadd.f32 %v8322_v61, %v1646_v56  ;;  %v11232_v24 = vld [vmem:[#allocation81_spill] sm:$0xff]  ;;  %v11240_v35 = vld [vmem:[#allocation22_spill] sm:$0xff] }
 0x23c   : >> { %11226 = vst [vmem:[#allocation31_spill] sm:$0xff] %v8431_v2  ;;  %v11230_v7 = vld [vmem:[#allocation68_spill] sm:$0xff]  ;;  %v8444_v30 = vmul.f32 %v11232_v24, %v11231_v51  ;;  %v1228_v45 = vadd.f32 %v1212_v58, %v1191_v62  ;;  %v1314_v2 = vmul.f32 %v11235_v5, %v11234_v29  ;;  %v11237_v43 = vld [vmem:[#allocation41_spill] sm:$0xff]  ;;  %v11243_v62 = vld [vmem:[#allocation42_spill] sm:$0xff] }
 0x23d   : >> { %11229 = vst [vmem:[#allocation152_spill] sm:$0xff] %v8437_v27  ;;  %v844_v44 = vmul.f32 %v4613_v38, %v11230_v7  ;;  %v11236_v9 = vld [vmem:[#allocation56_spill] sm:$0xff]  ;;  %v11238_v27 = vld [vmem:[#allocation102_spill] sm:$0xff]  ;;  %v823_v16 = vadd.f32 %v807_v50, %v786_v13  ;;  %v1720_v61 = vadd.f32 %v8339_v23, %v1683_v3  ;;  %v11241_v7 = vld [vmem:[#allocation43_spill] sm:$0xff] }
 0x23e   : >> { %11233 = vst [vmem:[#allocation57_spill] sm:$0xff] %v8444_v30  ;;  %v2227_v28 = vadd.f32 %v11236_v9, %v2190_v46  ;;  %v1293_v25 = vld [vmem:[%s5166_s27 + $0x13b] sm:$0xff]  ;;  %v1351_v10 = vmul.f32 %v11238_v27, %v11237_v43  ;;  %v1265_v56 = vadd.f32 %v1249_v39, %v1228_v45  ;;  %v11242_v24 = vld [vmem:[#allocation121_spill] sm:$0xff] }
 0x23f   : >> { %v11239_v53 = vld [vmem:[#allocation48_spill] sm:$0xff]  ;;  %v1388_v30 = vmul.f32 %v11242_v24, %v11241_v7  ;;  %v4614_v58 = vld [vmem:[%s5166_s27 + $0x10b] sm:$0xff]  ;;  %v860_v43 = vadd.f32 %v844_v44, %v823_v16  ;;  %v11248_v13 = vld [vmem:[#allocation103_spill] sm:$0xff] }
 0x240   : >> { %v881_v38 = vmul.f32 %v11240_v35, %v11239_v53  ;;  %v1462_v51 = vmul.f32 %v4614_v58, %v11243_v62  ;;  %v11244_v29 = vld [vmem:[#allocation69_spill] sm:$0xff]  ;;  %v11245_v9 = vld [vmem:[#allocation40_spill] sm:$0xff]  ;;  %v1757_v53 = vadd.f32 %v8348_v36, %v1720_v61  ;;  %v1330_v23 = vadd.f32 %v1314_v2, %v1265_v56  ;;  %v11249_v39 = vld [vmem:[#allocation71_spill] sm:$0xff] }
 0x241   : >> { %v2264_v46 = vadd.f32 %v11244_v29, %v2227_v28  ;;  %v11246_v5 = vld [vmem:[#allocation100_spill] sm:$0xff]  ;;  %v11247_v50 = vld [vmem:[#allocation37_spill] sm:$0xff]  ;;  %v1536_v3 = vmul.f32 %v11249_v39, %v1293_v25  ;;  %v11250_v24 = vld [vmem:[#allocation174_spill] sm:$0xff] }
 0x242   : >> { %v1499_v8 = vmul.f32 %v11246_v5, %v11245_v9  ;;  %v918_v27 = vmul.f32 %v11248_v13, %v11247_v50  ;;  %v8468_v45 = vmul.f32 %v11250_v24, %v11196_v11  ;;  %v11251_v58 = vld [vmem:[#allocation169_spill] sm:$0xff]  ;;  %v11252_v28 = vld [vmem:[#allocation46_spill] sm:$0xff]  ;;  %v897_v44 = vadd.f32 %v881_v38, %v860_v43  ;;  %v11253_v16 = vld [vmem:[#allocation119_spill] sm:$0xff] }
 0x243   : >> { %v2301_v62 = vadd.f32 %v11251_v58, %v2264_v46  ;;  %v8473_v29 = vmul.f32 %v11252_v28, %v11199_v57  ;;  %v955_v9 = vmul.f32 %v11253_v16, %v11193_v47  ;;  %v1794_v36 = vadd.f32 %v8358_v17, %v1757_v53  ;;  %v11254_v25 = vld [vmem:[#allocation95_spill] sm:$0xff]  ;;  %v4615_v11 = vld [vmem:[%s5166_s27 + $0x10c] sm:$0xff] }
 0x244   : >> { %v1367_v2 = vadd.f32 %v1351_v10, %v1330_v23  ;;  %v8480_v61 = vmul.f32 %v11254_v25, %v11201_v19  ;;  %v8484_v56 = vmul.f32 %v4615_v11, %v11132_v63  ;;  %v11255_v46 = vld [vmem:[#allocation27_spill] sm:$0xff]  ;;  %v11256_v24 = vld [vmem:[#allocation58_spill] sm:$0xff]  ;;  %v934_v38 = vadd.f32 %v918_v27, %v897_v44 }
 0x245   : >> { %v2338_v58 = vadd.f32 %v11255_v46, %v2301_v62  ;;  %v8489_v57 = vmul.f32 %v11134_v42, %v11256_v24  ;;  %v11257_v43 = vld [vmem:[#allocation178_spill] sm:$0xff]  ;;  %v1831_v10 = vadd.f32 %v8366_v49, %v1794_v36  ;;  %v1580_v19 = vld [vmem:[%s5166_s27 + $0x13c] sm:$0xff]  ;;  %v11260_v62 = vld [vmem:[#allocation97_spill] sm:$0xff]  ;;  %v528_v44 = vmul.f32 %v11207_v6, %v7424_v48 }
 0x246   : >> { %v1020_v47 = vmul.f32 %v11257_v43, %v11197_v4  ;;  %v1404_v17 = vadd.f32 %v1388_v30, %v1367_v2  ;;  %v11258_v53 = vld [vmem:[#allocation26_spill] sm:$0xff]  ;;  %v11259_v11 = vld [vmem:[#allocation99_spill] sm:$0xff]  ;;  %v971_v24 = vadd.f32 %v955_v9, %v934_v38  ;;  %v11261_v42 = vld [vmem:[#allocation20_spill] sm:$0xff]  ;;  %v8510_v9 = vmul.f32 %v11202_v33, %v1580_v19 }
 0x247   : >> { %v470_v23 = vmul.f32 %v11198_v26, %v11258_v53  ;;  %v491_v63 = vmul.f32 %v11203_v59, %v11259_v11  ;;  %v2375_v46 = vadd.f32 %v11260_v62, %v2338_v58  ;;  %v1057_v27 = vmul.f32 %v7940_v31, %v11261_v42  ;;  %v11262_v49 = vld [vmem:[#allocation86_spill] sm:$0xff]  ;;  %v11263_v30 = vld [vmem:[#allocation19_spill] sm:$0xff]  ;;  %v11264_v26 = vld [vmem:[#allocation84_spill] sm:$0xff] }
 0x248   : >> { %v1896_v36 = vadd.f32 %v11262_v49, %v1831_v10  ;;  %v1441_v2 = vadd.f32 %v11263_v30, %v1404_v17  ;;  %v565_v53 = vmul.f32 %v11264_v26, %v11195_v22  ;;  %v11265_v59 = vld [vmem:[#allocation28_spill] sm:$0xff]  ;;  %v1036_v58 = vadd.f32 %v1020_v47, %v971_v24  ;;  %v11266_v22 = vld [vmem:[#allocation163_spill] sm:$0xff] }
 0x249   : >> { %v507_v43 = vadd.f32 %v491_v63, %v470_v23  ;;  %v2412_v11 = vadd.f32 %v11265_v59, %v2375_v46  ;;  %v4616_v42 = vld [vmem:[%s5166_s27 + $0x82] sm:$0xff]  ;;  %v4617_v63 = vld [vmem:[%s5166_s27 + $0x110] sm:$0xff]  ;;  %v8517_v23 = vpop.f32.mrb[0].mxu0  ;;  %v4618_v24 = vld [vmem:[%s5166_s27 + $0x9a] sm:$0xff]  ;;  %v8539_v26 = vmul.f32 %v11206_v41, %v11216_v21 }
 0x24a   : >> { %v1094_v38 = vmul.f32 %v4616_v42, %v11144_v40  ;;  %v1933_v48 = vadd.f32 %v8372_v55, %v1896_v36  ;;  %v1478_v6 = vadd.f32 %v1462_v51, %v1441_v2  ;;  %v602_v17 = vmul.f32 %v4617_v63, %v7452_v34  ;;  %v11267_v46 = vld [vmem:[#allocation101_spill] sm:$0xff]  ;;  %v11268_v49 = vld [vmem:[#allocation72_spill] sm:$0xff]  ;;  %v8527_v51 = vpop.f32.mrb[1].mxu0  ;;  %v11269_v30 = vld [vmem:[#allocation131_spill] sm:$0xff] }
 0x24b   : >> { %v544_v10 = vadd.f32 %v528_v44, %v507_v43  ;;  %v2435_v62 = vadd.f32 %v11266_v22, %v2412_v11  ;;  %v8522_v19 = vmul.f32 %v11267_v46, %v11209_v20  ;;  %v1073_v47 = vadd.f32 %v1057_v27, %v1036_v58  ;;  %v449_v55 = vld [vmem:[%s5166_s27 + $0x140] sm:$0xff]  ;;  %v11270_v2 = vld [vmem:[#allocation137_spill] sm:$0xff]  ;;  %v11271_v20 = vld [vmem:[#allocation114_spill] sm:$0xff] }
 0x24c   : >> { %v1131_v40 = vmul.f32 %v4618_v24, %v11268_v49  ;;  %v1970_v44 = vadd.f32 %v8379_v0, %v1933_v48  ;;  %v1515_v34 = vadd.f32 %v1499_v8, %v1478_v6  ;;  %v639_v43 = vmul.f32 %v11270_v2, %v11269_v30  ;;  %v11272_v11 = vld [vmem:[#allocation45_spill] sm:$0xff]  ;;  %v11273_v48 = vld [vmem:[#allocation138_spill] sm:$0xff] }
 0x24d   : >> { %v581_v36 = vadd.f32 %v565_v53, %v544_v10  ;;  %2453 = vst [vmem:[%s6239_s19 + $0x68] sm:$0xff] %v2435_v62  ;;  %4042 = vmatmul.mubr.f32.gmra.mrb[4].mxu1 %v2435_v62  ;;  %v8535_v27 = vmul.f32 %v11271_v20, %v11213_v18  ;;  %v1110_v59 = vadd.f32 %v1094_v38, %v1073_v47  ;;  %v1867_v53 = vld [vmem:[%s5166_s27 + $0x13d] sm:$0xff]  ;;  %v4619_v10 = vld [vmem:[%s5166_s27 + $0x10d] sm:$0xff] }
 0x24e   : >> { %v1168_v58 = vmul.f32 %v11272_v11, %v11083_v14  ;;  %v2007_v8 = vadd.f32 %v8385_v54, %v1970_v44  ;;  %v1552_v0 = vadd.f32 %v1536_v3, %v1515_v34  ;;  %v676_v6 = vmul.f32 %v11273_v48, %v449_v55  ;;  %v11274_v18 = vld [vmem:[#allocation180_spill] sm:$0xff]  ;;  %v11278_v49 = vld [vmem:[#allocation177_spill] sm:$0xff]  ;;  %v11281_v30 = vld [vmem:[#allocation154_spill] sm:$0xff] }
 0x24f   : >> { %v618_v42 = vadd.f32 %v602_v17, %v581_v36  ;;  %v8548_v63 = vmul.f32 %v4619_v10, %v11210_v15  ;;  %v8552_v22 = vmul.f32 %v11150_v12, %v11274_v18  ;;  %v1147_v21 = vadd.f32 %v1131_v40, %v1110_v59  ;;  %v11275_v38 = vld [vmem:[#allocation176_spill] sm:$0xff]  ;;  %v11277_v17 = vld [vmem:[#allocation25_spill] sm:$0xff]  ;;  %v11286_v48 = vld [vmem:[#allocation35_spill] sm:$0xff] }
 0x250   : >> { %v1205_v62 = vmul.f32 %v11275_v38, %v7510_v60  ;;  %v11276_v14 = vld [vmem:[#allocation76_spill] sm:$0xff]  ;;  %v1617_v54 = vadd.f32 %v8468_v45, %v1552_v0  ;;  %v741_v24 = vmul.f32 %v11240_v35, %v11277_v17  ;;  %v8561_v55 = vmul.f32 %v11278_v49, %v1867_v53  ;;  %v11282_v59 = vld [vmem:[#allocation77_spill] sm:$0xff]  ;;  %v11283_v0 = vld [vmem:[#allocation54_spill] sm:$0xff] }
 0x251   : >> { %v2044_v47 = vadd.f32 %v11276_v14, %v2007_v8  ;;  %v655_v3 = vadd.f32 %v639_v43, %v618_v42  ;;  %v11279_v44 = vld [vmem:[#allocation128_spill] sm:$0xff]  ;;  %v1184_v40 = vadd.f32 %v1168_v58, %v1147_v21  ;;  %v778_v35 = vmul.f32 %v11248_v13, %v7540_v52  ;;  %v11285_v42 = vld [vmem:[#allocation75_spill] sm:$0xff]  ;;  %v11287_v10 = vld [vmem:[#allocation110_spill] sm:$0xff] }
 0x252   : >> { %v8565_v34 = vmul.f32 %v11279_v44, %v11225_v37  ;;  %v11280_v60 = vld [vmem:[#allocation104_spill] sm:$0xff]  ;;  %v1654_v45 = vadd.f32 %v8473_v29, %v1617_v54  ;;  %v8575_v8 = vmul.f32 %v11282_v59, %v11227_v32  ;;  %v11284_v37 = vld [vmem:[#allocation82_spill] sm:$0xff]  ;;  %v11288_v13 = vld [vmem:[#allocation83_spill] sm:$0xff] }
 0x253   : >> { %v1242_v36 = vmul.f32 %v11280_v60, %v11170_v1  ;;  %v2081_v2 = vadd.f32 %v11281_v30, %v2044_v47  ;;  %v692_v43 = vadd.f32 %v676_v6, %v655_v3  ;;  %v8579_v53 = vmul.f32 %v11284_v37, %v11283_v0  ;;  %v2154_v6 = vld [vmem:[%s5166_s27 + $0x13e] sm:$0xff]  ;;  %v4620_v21 = vld [vmem:[%s5166_s27 + $0x10e] sm:$0xff] }
 0x254   : >> { %v1221_v58 = vadd.f32 %v1205_v62, %v1184_v40  ;;  %v1307_v1 = vmul.f32 %v11286_v48, %v11285_v42  ;;  %v1691_v29 = vadd.f32 %v8480_v61, %v1654_v45  ;;  %v815_v32 = vmul.f32 %v11253_v16, %v11288_v13  ;;  %v11289_v14 = vld [vmem:[#allocation78_spill] sm:$0xff]  ;;  %v11291_v54 = vld [vmem:[#allocation127_spill] sm:$0xff]  ;;  %v11292_v62 = vld [vmem:[#allocation44_spill] sm:$0xff] }
 0x255   : >> { %v2118_v18 = vadd.f32 %v11287_v10, %v2081_v2  ;;  %v757_v52 = vadd.f32 %v741_v24, %v692_v43  ;;  %v8590_v47 = vmul.f32 %v4620_v21, %v11289_v14  ;;  %v8594_v3 = vmul.f32 %v11292_v62, %v11291_v54  ;;  %v11294_v40 = vld [vmem:[#allocation102_spill] sm:$0xff]  ;;  %v11295_v30 = vld [vmem:[#allocation160_spill] sm:$0xff]  ;;  %v11296_v61 = vld [vmem:[#allocation107_spill] sm:$0xff] }
 0x256   : >> { %v1258_v17 = vadd.f32 %v1242_v36, %v1221_v58  ;;  %v1344_v2 = vmul.f32 %v11295_v30, %v11294_v40  ;;  %v11297_v0 = vld [vmem:[#allocation136_spill] sm:$0xff]  ;;  %v11299_v16 = vld [vmem:[#allocation65_spill] sm:$0xff]  ;;  %v11302_v58 = vld [vmem:[#allocation94_spill] sm:$0xff] }
 0x257   : >> { %11290 = vst [vmem:[#allocation24_spill] sm:$0xff] %v8590_v47  ;;  %11293 = vst [vmem:[#allocation92_spill] sm:$0xff] %v8594_v3  ;;  %v2183_v45 = vadd.f32 %v11296_v61, %v2118_v18  ;;  %v1728_v24 = vadd.f32 %v11297_v0, %v1691_v29  ;;  %v794_v43 = vadd.f32 %v778_v35, %v757_v52  ;;  %v11298_v48 = vld [vmem:[#allocation68_spill] sm:$0xff]  ;;  %v11300_v13 = vld [vmem:[#allocation81_spill] sm:$0xff] }
 0x258   : >> { %v852_v10 = vmul.f32 %v11299_v16, %v11298_v48  ;;  %v8603_v21 = vmul.f32 %v11300_v13, %v2154_v6  ;;  %v1323_v47 = vadd.f32 %v1307_v1, %v1258_v17  ;;  %v4621_v54 = vld [vmem:[%s5166_s27 + $0x83] sm:$0xff]  ;;  %v4622_v36 = vld [vmem:[%s5166_s27 + $0x9b] sm:$0xff]  ;;  %v11303_v40 = vld [vmem:[#allocation166_spill] sm:$0xff] }
 0x259   : >> { %v1381_v3 = vmul.f32 %v4621_v54, %v11241_v7  ;;  %v1418_v62 = vmul.f32 %v4622_v36, %v11302_v58  ;;  %v2220_v30 = vadd.f32 %v11303_v40, %v2183_v45  ;;  %v1765_v18 = vadd.f32 %v8484_v56, %v1728_v24  ;;  %v4623_v29 = vld [vmem:[%s5166_s27 + $0x111] sm:$0xff]  ;;  %v11304_v52 = vld [vmem:[#allocation48_spill] sm:$0xff]  ;;  %v11309_v58 = vld [vmem:[#allocation161_spill] sm:$0xff] }
 0x25a   : >> { %11301 = vst [vmem:[#allocation52_spill] sm:$0xff] %v8603_v21  ;;  %v831_v35 = vadd.f32 %v815_v32, %v794_v43  ;;  %v889_v61 = vmul.f32 %v4623_v29, %v11304_v52  ;;  %v1360_v0 = vadd.f32 %v1344_v2, %v1323_v47  ;;  %v11305_v48 = vld [vmem:[#allocation42_spill] sm:$0xff]  ;;  %v11308_v7 = vld [vmem:[#allocation120_spill] sm:$0xff]  ;;  %v11311_v2 = vld [vmem:[#allocation79_spill] sm:$0xff] }
 0x25b   : >> { %v11306_v6 = vld [vmem:[#allocation62_spill] sm:$0xff]  ;;  %v1529_v54 = vmul.f32 %v11308_v7, %v11249_v39  ;;  %v720_v36 = vld [vmem:[%s5166_s27 + $0x141] sm:$0xff]  ;;  %v2257_v45 = vadd.f32 %v11309_v58, %v2220_v30  ;;  %v1802_v56 = vadd.f32 %v8489_v57, %v1765_v18  ;;  %v11314_v21 = vld [vmem:[#allocation91_spill] sm:$0xff] }
 0x25c   : >> { %v1455_v16 = vmul.f32 %v11306_v6, %v11305_v48  ;;  %v11307_v1 = vld [vmem:[#allocation70_spill] sm:$0xff]  ;;  %v868_v32 = vadd.f32 %v852_v10, %v831_v35  ;;  %v11310_v24 = vld [vmem:[#allocation80_spill] sm:$0xff]  ;;  %v1397_v47 = vadd.f32 %v1381_v3, %v1360_v0  ;;  %v11313_v52 = vld [vmem:[#allocation49_spill] sm:$0xff] }
 0x25d   : >> { %v1492_v17 = vmul.f32 %v11307_v1, %v11246_v5  ;;  %v926_v43 = vmul.f32 %v11247_v50, %v11310_v24  ;;  %v11312_v40 = vld [vmem:[#allocation174_spill] sm:$0xff]  ;;  %v1631_v5 = vmul.f32 %v11313_v52, %v11252_v28  ;;  %v4624_v48 = vld [vmem:[%s5166_s27 + $0x84] sm:$0xff]  ;;  %v2294_v13 = vadd.f32 %v11314_v21, %v2257_v45  ;;  %v8638_v50 = vld [vmem:[%s9651_s4] ss:$0 sm:$0xff] }
 0x25e   : >> { %v1594_v29 = vmul.f32 %v11312_v40, %v11311_v2  ;;  %v8630_v39 = vmul.f32 %v4624_v48, %v11254_v25  ;;  %v1839_v30 = vadd.f32 %v8510_v9, %v1802_v56  ;;  %v905_v57 = vadd.f32 %v889_v61, %v868_v32  ;;  %v11315_v10 = vld [vmem:[#allocation61_spill] sm:$0xff]  ;;  %v4625_v35 = vld [vmem:[%s5166_s27 + $0x9c] sm:$0xff]  ;;  %v11316_v0 = vld [vmem:[#allocation50_spill] sm:$0xff]  ;;  %v4037_v61 = vpop.f32.mrb[0].mxu1 }
 0x25f   : >> { %v963_v18 = vmul.f32 %v11315_v10, %v720_v36  ;;  %v1434_v3 = vadd.f32 %v1418_v62, %v1397_v47  ;;  %v8642_v28 = vmul.f32 %v4625_v35, %v11316_v0  ;;  %v11317_v58 = vld [vmem:[#allocation87_spill] sm:$0xff]  ;;  %v11318_v25 = vld [vmem:[#allocation89_spill] sm:$0xff]  ;;  %v11320_v45 = vld [vmem:[#allocation118_spill] sm:$0xff]  ;;  %v1028_v62 = vmul.f32 %v11272_v11, %v11197_v4  ;;  %v8656_v47 = vpop.f32.mrb[1].mxu1 }
 0x260   : >> { %v8646_v24 = vmul.f32 %v11318_v25, %v11317_v58  ;;  %v11319_v21 = vld [vmem:[#allocation115_spill] sm:$0xff]  ;;  %v1904_v32 = vadd.f32 %v8522_v19, %v1839_v30  ;;  %v942_v2 = vadd.f32 %v926_v43, %v905_v57  ;;  %v11322_v48 = vld [vmem:[#allocation132_spill] sm:$0xff]  ;;  %v11323_v35 = vld [vmem:[#allocation129_spill] sm:$0xff]  ;;  %v8682_v58 = vadd.f32 %v4037_v61, %v8638_v50 }
 0x261   : >> { %v8650_v9 = vmul.f32 %v11320_v45, %v11319_v21  ;;  %v11321_v36 = vld [vmem:[#allocation31_spill] sm:$0xff]  ;;  %v1471_v52 = vadd.f32 %v1455_v16, %v1434_v3  ;;  %v8660_v10 = vmul.f32 %v11322_v48, %v11202_v33  ;;  %v8664_v0 = vmul.f32 %v11267_v46, %v11323_v35  ;;  %v11324_v19 = vld [vmem:[#allocation152_spill] sm:$0xff]  ;;  %v11325_v33 = vld [vmem:[#allocation113_spill] sm:$0xff] }
 0x262   : >> { %v2331_v56 = vadd.f32 %v11321_v36, %v2294_v13  ;;  %v8668_v13 = vadd.f32 %v8517_v23, %v8638_v50  ;;  %v1941_v4 = vadd.f32 %v8535_v27, %v1904_v32  ;;  %v979_v11 = vadd.f32 %v963_v18, %v942_v2  ;;  %v11326_v23 = vld [vmem:[#allocation57_spill] sm:$0xff]  ;;  %v4626_v18 = vld [vmem:[#allocation7 + $0x10] ss:$0 sm:$0xff]  ;;  %v4630_v35 = vld [vmem:[%s5166_s27 + $0x9d] sm:$0xff] }
 0x263   : >> { %v1065_v16 = vmul.f32 %v7940_v31, %v11275_v38  ;;  %v1508_v30 = vadd.f32 %v1492_v17, %v1471_v52  ;;  %v8676_v57 = vmul.f32 %v11325_v33, %v11271_v20  ;;  %v1102_v31 = vmul.f32 %v4626_v18, %v11280_v60  ;;  %v4627_v17 = vld [vmem:[%s5166_s27 + $0x85] sm:$0xff]  ;;  %v11328_v2 = vld [vmem:[#allocation150_spill] sm:$0xff] }
 0x264   : >> { %v2368_v43 = vadd.f32 %v11324_v19, %v2331_v56  ;;  %v8679_v3 = vmul.f32 0.70710677, %v8668_v13  ;;  %v1978_v45 = vadd.f32 %v8539_v26, %v1941_v4  ;;  %v1044_v27 = vadd.f32 %v1028_v62, %v979_v11  ;;  %v8701_v26 = vld [vmem:[%s9649_s2] ss:$0 sm:$0xff]  ;;  %v11329_v19 = vld [vmem:[#allocation171_spill] sm:$0xff] }
 0x265   : >> { %v1545_v38 = vadd.f32 %v1529_v54, %v1508_v30  ;;  %v8689_v20 = vmul.f32 %v4627_v17, %v11206_v41  ;;  %v8696_v61 = vadd.f32 %v8638_v50, %v8527_v51  ;;  %v11327_v54 = vld [vmem:[#allocation146_spill] sm:$0xff]  ;;  %v8708_v51 = vmul.f32 %v4630_v35, %v11329_v19  ;;  %v4634_v35 = vld [vmem:[#allocation7 + $0x2c] ss:$0 sm:$0xff] }
 0x266   : >> { %v2405_v21 = vadd.f32 %v11326_v23, %v2368_v43  ;;  %v8692_v36 = vand.u32 2147483647, %v8679_v3  ;;  %v2015_v56 = vadd.f32 %v11327_v54, %v1978_v45  ;;  %v1081_v32 = vadd.f32 %v1065_v16, %v1044_v27  ;;  %v4629_v41 = vld [vmem:[#allocation7 + $0x17] ss:$0 sm:$0xff]  ;;  %v4631_v23 = vld [vmem:[#allocation7 + $0x1e] ss:$0 sm:$0xff] }
 0x267   : >> { %v1139_v62 = vmul.f32 %v4629_v41, %v11328_v2  ;;  %v1610_v52 = vadd.f32 %v1594_v29, %v1545_v38  ;;  %v8712_v4 = vmul.f32 0.70710677, %v8682_v58  ;;  %v11330_v16 = vld [vmem:[#allocation126_spill] sm:$0xff]  ;;  %v11331_v27 = vld [vmem:[#allocation172_spill] sm:$0xff]  ;;  %v8727_v54 = vmul.f32 0.70710677, %v8696_v61 }
 0x268   : >> { %v2428_v60 = vadd.f32 %v8701_v26, %v2405_v21  ;;  %v2705_v43 = vmul.f32 0.3275911, %v8692_v36  ;;  %v2052_v11 = vadd.f32 %v8548_v63, %v2015_v56  ;;  %v8718_v30 = vmul.f32 %v11330_v16, %v11210_v15  ;;  %v4632_v29 = vld [vmem:[%s5166_s27 + $0x112] sm:$0xff]  ;;  %v1007_v38 = vld [vmem:[%s5166_s27 + $0x142] sm:$0xff] }
 0x269   : >> { %v1118_v33 = vadd.f32 %v1102_v31, %v1081_v32  ;;  %v1176_v21 = vmul.f32 %v4632_v29, %v4631_v23  ;;  %v1647_v45 = vadd.f32 %v1631_v5, %v1610_v52  ;;  %v8723_v18 = vmul.f32 %v11331_v27, %v11150_v12  ;;  %v4633_v56 = vld [vmem:[#allocation7 + $0x25] ss:$0 sm:$0xff]  ;;  %v11332_v15 = vld [vmem:[#allocation179_spill] sm:$0xff]  ;;  %v11337_v27 = vld [vmem:[#allocation90_spill] sm:$0xff] }
 0x26a   : >> { %2446 = vst [vmem:[%s6239_s19 + $0x30] sm:$0xff] %v2428_v60  ;;  %4032 = vmatprep.mubr.f32.mxu0 %v2428_v60  ;;  %v2721_v17 = vadd.f32 1.0, %v2705_v43  ;;  %v2089_v63 = vadd.f32 %v8552_v22, %v2052_v11  ;;  %v1213_v41 = vmul.f32 %v4633_v56, %v11332_v15  ;;  %v8732_v31 = vand.u32 2147483647, %v8712_v4  ;;  %v11333_v32 = vld [vmem:[#allocation116_spill] sm:$0xff] }
 0x26b   : >> { %v1155_v60 = vadd.f32 %v1139_v62, %v1118_v33  ;;  %v1684_v5 = vadd.f32 %v8630_v39, %v1647_v45  ;;  %v8737_v12 = vmul.f32 %v11333_v32, %v11278_v49  ;;  %v11334_v2 = vld [vmem:[#allocation88_spill] sm:$0xff]  ;;  %v1250_v19 = vmul.f32 %v4634_v35, %v1007_v38  ;;  %v11336_v49 = vld [vmem:[#allocation85_spill] sm:$0xff] }
 0x26c   : >> { %v8741_v52 = vmul.f32 %v11279_v44, %v11334_v2  ;;  %4301 = vrcp.f32 %v2721_v17  ;;  %v2126_v22 = vadd.f32 %v8561_v55, %v2089_v63  ;;  %v2713_v43 = vmul.f32 0.3275911, %v8732_v31  ;;  %v11335_v39 = vld [vmem:[#allocation60_spill] sm:$0xff]  ;;  %v4636_v2 = vld [vmem:[#allocation7 + $0x11] ss:$0 sm:$0xff] }
 0x26d   : >> { %v1192_v62 = vadd.f32 %v1176_v21, %v1155_v60  ;;  %v1721_v11 = vadd.f32 %v8642_v28, %v1684_v5  ;;  %v8748_v16 = vmul.f32 %v11335_v39, %v11282_v59  ;;  %v8752_v33 = vmul.f32 %v11336_v49, %v11284_v37  ;;  %v11338_v38 = vld [vmem:[#allocation140_spill] sm:$0xff]  ;;  %v4635_v60 = vld [vmem:[#allocation7 + $0xa] ss:$0 sm:$0xff] }
 0x26e   : >> { %v8755_v23 = vand.u32 2147483647, %v8727_v54  ;;  %v2191_v55 = vadd.f32 %v8565_v34, %v2126_v22  ;;  %v1315_v21 = vmul.f32 %v11306_v6, %v11285_v42  ;;  %v2729_v45 = vadd.f32 1.0, %v2713_v43  ;;  %v11339_v6 = vld [vmem:[#allocation122_spill] sm:$0xff]  ;;  %v1294_v39 = vld [vmem:[%s5166_s27 + $0x143] sm:$0xff] }
 0x26f   : >> { %v1229_v29 = vadd.f32 %v1213_v41, %v1192_v62  ;;  %v1758_v28 = vadd.f32 %v8646_v24, %v1721_v11  ;;  %v8763_v59 = vmul.f32 %v11338_v38, %v11337_v27  ;;  %v8768_v37 = vadd.f32 %v8638_v50, %v8656_v47  ;;  %v11341_v62 = vld [vmem:[#allocation147_spill] sm:$0xff] }
 0x270   : >> { %v2704_v17 = vmul.f32 0.3275911, %v8755_v23  ;;  %v2228_v63 = vadd.f32 %v8575_v8, %v2191_v55  ;;  %v1352_v56 = vmul.f32 %v4635_v60, %v11307_v1  ;;  %4303 = vrcp.f32 %v2729_v45  ;;  %v4637_v55 = vld [vmem:[#allocation7 + $0x18] ss:$0 sm:$0xff] }
 0x271   : >> { %v1266_v34 = vadd.f32 %v1250_v19, %v1229_v29  ;;  %v1795_v42 = vadd.f32 %v8650_v9, %v1758_v28  ;;  %v8775_v24 = vmul.f32 %v11339_v6, %v11289_v14  ;;  %v2913_v15 = vsub.f32 0.0, %v8692_v36  ;;  %v11340_v9 = vld [vmem:[#allocation44_spill] sm:$0xff]  ;;  %v11342_v14 = vld [vmem:[#allocation81_spill] sm:$0xff]  ;;  %v11343_v19 = vld [vmem:[#allocation39_spill] sm:$0xff] }
 0x272   : >> { %v2720_v41 = vadd.f32 1.0, %v2704_v17  ;;  %v2265_v47 = vadd.f32 %v8579_v53, %v2228_v63  ;;  %v1389_v8 = vmul.f32 %v4636_v2, %v11308_v7  ;;  %v8781_v1 = vmul.f32 0.70710677, %v8768_v37  ;;  %v11344_v53 = vld [vmem:[#allocation155_spill] sm:$0xff]  ;;  %v11345_v7 = vld [vmem:[#allocation148_spill] sm:$0xff] }
 0x273   : >> { %v1331_v5 = vadd.f32 %v1315_v21, %v1266_v34  ;;  %v1832_v22 = vadd.f32 %v8660_v10, %v1795_v42  ;;  %v8786_v35 = vmul.f32 %v11341_v62, %v11340_v9  ;;  %v8790_v43 = vmul.f32 %v11343_v19, %v11342_v14  ;;  %v4638_v28 = vld [vmem:[#allocation7 + $0x1f] ss:$0 sm:$0xff]  ;;  %v4639_v27 = vld [vmem:[%s5166_s27 + $0x113] sm:$0xff]  ;;  %v11346_v34 = vld [vmem:[#allocation24_spill] sm:$0xff] }
 0x274   : >> { %4305 = vrcp.f32 %v2720_v41  ;;  %v2302_v11 = vadd.f32 %v11344_v53, %v2265_v47  ;;  %v1426_v29 = vmul.f32 %v4637_v55, %v11345_v7  ;;  %v8796_v21 = vand.u32 2147483647, %v8781_v1  ;;  %v4640_v47 = vld [vmem:[#allocation7 + $0x26] ss:$0 sm:$0xff] }
 0x275   : >> { %v1368_v49 = vadd.f32 %v1352_v56, %v1331_v5  ;;  %v1897_v45 = vadd.f32 %v8664_v0, %v1832_v22  ;;  %v1463_v38 = vmul.f32 %v4639_v27, %v4638_v28  ;;  %v2929_v17 = vmul.f32 %v2913_v15, %v8692_v36  ;;  %v11347_v5 = vld [vmem:[#allocation32_spill] sm:$0xff]  ;;  %v4641_v0 = vld [vmem:[#allocation7 + $0x2d] ss:$0 sm:$0xff] }
 0x276   : >> { %v8798_v10 = vpop.eup %4301  ;;  %v2921_v63 = vsub.f32 0.0, %v8732_v31  ;;  %v2339_v60 = vadd.f32 %v11346_v34, %v2302_v11  ;;  %v2712_v6 = vmul.f32 0.3275911, %v8796_v21  ;;  %v1500_v2 = vmul.f32 %v4640_v47, %v11347_v5  ;;  %v11348_v36 = vld [vmem:[#allocation92_spill] sm:$0xff]  ;;  %v4643_v28 = vld [vmem:[%s5166_s27 + $0xcc] sm:$0xff] }
 0x277   : >> { %v1405_v56 = vadd.f32 %v1389_v8, %v1368_v49  ;;  %v2769_v42 = vmul.f32 1.0614054, %v8798_v10  ;;  %v1934_v41 = vadd.f32 %v8676_v57, %v1897_v45  ;;  %v1537_v22 = vmul.f32 %v4641_v0, %v1294_v39  ;;  %v11349_v7 = vld [vmem:[#allocation52_spill] sm:$0xff] }
 0x278   : >> { %v1602_v9 = vmul.f32 %v11312_v40, %v11318_v25  ;;  %v2376_v15 = vadd.f32 %v11348_v36, %v2339_v60  ;;  %v2728_v8 = vadd.f32 1.0, %v2712_v6  ;;  %v2946_v11 = vmul.f32 1.442695, %v2929_v17  ;;  %v4645_v60 = vld [vmem:[#allocation7 + $0x19] ss:$0 sm:$0xff]  ;;  %v1581_v5 = vld [vmem:[%s5166_s27 + $0x144] sm:$0xff] }
 0x279   : >> { %v1442_v62 = vadd.f32 %v1426_v29, %v1405_v56  ;;  %v2785_v14 = vadd.f32 -1.4531521, %v2769_v42  ;;  %v1971_v53 = vadd.f32 %v8689_v20, %v1934_v41  ;;  %v2937_v49 = vmul.f32 %v2921_v63, %v8732_v31  ;;  %v4642_v29 = vld [vmem:[#allocation7 + $0xb] ss:$0 sm:$0xff]  ;;  %v4644_v20 = vld [vmem:[#allocation7 + $0x12] ss:$0 sm:$0xff] }
 0x27a   : >> { %v2912_v57 = vsub.f32 0.0, %v8755_v23  ;;  %v8815_v55 = vpop.eup %4303  ;;  %v2413_v39 = vadd.f32 %v11349_v7, %v2376_v15  ;;  %4307 = vrcp.f32 %v2728_v8  ;;  %v1639_v27 = vmul.f32 %v4643_v28, %v4642_v29 }
 0x27b   : >> { %v1479_v45 = vadd.f32 %v1463_v38, %v1442_v62  ;;  %v2801_v40 = vmul.f32 %v8798_v10, %v2785_v14  ;;  %v2008_v25 = vadd.f32 %v8708_v51, %v1971_v53  ;;  %v1676_v31 = vmul.f32 %v4644_v20, %v11322_v48  ;;  %v11350_v38 = vld [vmem:[#allocation106_spill] sm:$0xff]  ;;  %v4646_v62 = vld [vmem:[#allocation7 + $0x20] ss:$0 sm:$0xff]  ;;  %v4648_v53 = vld [vmem:[#allocation7 + $0x27] ss:$0 sm:$0xff] }
 0x27c   : >> { %v2777_v17 = vmul.f32 1.0614054, %v8815_v55  ;;  %v2436_v63 = vadd.f32 %v8701_v26, %v2413_v39  ;;  %v1713_v56 = vmul.f32 %v4645_v60, %v11350_v38  ;;  %4309 = vpow2.f32 %v2946_v11  ;;  %v4647_v14 = vld [vmem:[%s5166_s27 + $0x114] sm:$0xff] }
 0x27d   : >> { %v1516_v34 = vadd.f32 %v1500_v2, %v1479_v45  ;;  %v2817_v42 = vadd.f32 1.4214138, %v2801_v40  ;;  %v2045_v51 = vadd.f32 %v8718_v30, %v2008_v25  ;;  %v2928_v47 = vmul.f32 %v2912_v57, %v8755_v23  ;;  %v11351_v30 = vld [vmem:[#allocation151_spill] sm:$0xff]  ;;  %v4649_v45 = vld [vmem:[#allocation7 + $0x2e] ss:$0 sm:$0xff] }
 0x27e   : >> { %v8825_v6 = vpop.eup %4305  ;;  %v2793_v41 = vadd.f32 -1.4531521, %v2777_v17  ;;  %2454 = vst [vmem:[%s6239_s19 + $0x70] sm:$0xff] %v2436_v63  ;;  %4044 = vmatprep.mubr.f32.mxu1 %v2436_v63  ;;  %v2962_v2 = vmul.f32 1.442695, %v2937_v49  ;;  %v1750_v8 = vmul.f32 %v4647_v14, %v4646_v62  ;;  %v1787_v11 = vmul.f32 %v4648_v53, %v11351_v30  ;;  %v4652_v60 = vld [vmem:[%s5166_s27 + $0xcd] sm:$0xff] }
 0x27f   : >> { %v1553_v48 = vadd.f32 %v1537_v22, %v1516_v34  ;;  %v2833_v0 = vmul.f32 %v8798_v10, %v2817_v42  ;;  %v2768_v36 = vmul.f32 1.0614054, %v8825_v6  ;;  %v2082_v15 = vadd.f32 %v8723_v18, %v2045_v51  ;;  %v4651_v34 = vld [vmem:[#allocation7 + $0xc] ss:$0 sm:$0xff] }
 0x280   : >> { %v2809_v23 = vmul.f32 %v8815_v55, %v2793_v41  ;;  %v2920_v39 = vsub.f32 0.0, %v8796_v21  ;;  %v1824_v40 = vmul.f32 %v4649_v45, %v1581_v5  ;;  %v2944_v25 = vmul.f32 1.442695, %v2928_v47 }
 0x281   : >> { %v1618_v57 = vadd.f32 %v1602_v9, %v1553_v48  ;;  %v2849_v7 = vadd.f32 -0.28449672, %v2833_v0  ;;  %v2784_v22 = vadd.f32 -1.4531521, %v2768_v36  ;;  %v2119_v49 = vadd.f32 %v8737_v12, %v2082_v15  ;;  %v4650_v9 = vld [vmem:[%s5166_s27 + $0xb5] sm:$0xff] }
 0x282   : >> { %v2825_v18 = vadd.f32 1.4214138, %v2809_v23  ;;  %4311 = vpow2.f32 %v2962_v2  ;;  %v1889_v63 = vmul.f32 %v4650_v9, %v11267_v46  ;;  %v1926_v38 = vmul.f32 %v4652_v60, %v4651_v34  ;;  %v4653_v23 = vld [vmem:[#allocation7 + $0x13] ss:$0 sm:$0xff] }
 0x283   : >> { %v1655_v29 = vadd.f32 %v1639_v27, %v1618_v57  ;;  %v2865_v28 = vmul.f32 %v8798_v10, %v2849_v7  ;;  %v2800_v20 = vmul.f32 %v8825_v6, %v2784_v22  ;;  %v2184_v17 = vadd.f32 %v8741_v52, %v2119_v49 }
 0x284   : >> { %v2841_v12 = vmul.f32 %v8815_v55, %v2825_v18  ;;  %v8846_v42 = vpop.eup %4307  ;;  %v2936_v47 = vmul.f32 %v2920_v39, %v8796_v21  ;;  %4313 = vpow2.f32 %v2944_v25  ;;  %vm2657_vm0 = vcmp.ge.f32.partialorder %v8679_v3, 0.0 }
 0x285   : >> { %v1692_v51 = vadd.f32 %v1676_v31, %v1655_v29  ;;  %v2881_v41 = vadd.f32 0.2548296, %v2865_v28  ;;  %v2816_v27 = vadd.f32 1.4214138, %v2800_v20  ;;  %v2221_v48 = vadd.f32 %v8748_v16, %v2184_v17  ;;  %v4654_v29 = vld [vmem:[#allocation7 + $0x1a] ss:$0 sm:$0xff] }
 0x286   : >> { %v2857_v5 = vadd.f32 -0.28449672, %v2841_v12  ;;  %v2776_v52 = vmul.f32 1.0614054, %v8846_v42  ;;  %v4310_v36 = vpop.eup %4309  ;;  %v2960_v53 = vmul.f32 1.442695, %v2936_v47 }
 0x287   : >> { %v1729_v0 = vadd.f32 %v1713_v56, %v1692_v51  ;;  %v2897_v46 = vmul.f32 %v8798_v10, %v2881_v41  ;;  %v2832_v2 = vmul.f32 %v8825_v6, %v2816_v27  ;;  %v2258_v15 = vadd.f32 %v8752_v33, %v2221_v48  ;;  %v11352_v28 = vld [vmem:[#allocation36_spill] sm:$0xff] }
 0x288   : >> { %v2873_v31 = vmul.f32 %v8815_v55, %v2857_v5  ;;  %v2792_v62 = vadd.f32 -1.4531521, %v2776_v52  ;;  %v1963_v10 = vmul.f32 %v4653_v23, %v11333_v32  ;;  %v4882_v33 = vmov -1.0   ;;  %v4656_v52 = vld [vmem:[%s5166_s27 + $0x115] sm:$0xff] }
 0x289   : >> { %v1766_v21 = vadd.f32 %v1750_v8, %v1729_v0  ;;  %v2977_v14 = vmul.f32 %v4310_v36, %v2897_v46  ;;  %v2848_v16 = vadd.f32 -0.28449672, %v2832_v2  ;;  %v2295_v30 = vadd.f32 %v8763_v59, %v2258_v15 }
 0x28a   : >> { %v2889_v56 = vadd.f32 0.2548296, %v2873_v31  ;;  %v2808_v57 = vmul.f32 %v8846_v42, %v2792_v62  ;;  %v2673_v3 = vsel %vm2657_vm0, 1.0, %v4882_v33  ;;  %vm2665_vm1 = vcmp.ge.f32.partialorder %v8712_v4, 0.0  ;;  %v4657_v62 = vld [vmem:[#allocation7 + $0x28] ss:$0 sm:$0xff] }
 0x28b   : >> { %v1803_v7 = vadd.f32 %v1787_v11, %v1766_v21  ;;  %v2993_v22 = vsub.f32 1.0, %v2977_v14  ;;  %v2864_v39 = vmul.f32 %v8825_v6, %v2848_v16  ;;  %v2332_v8 = vadd.f32 %v8775_v24, %v2295_v30  ;;  %v11353_v21 = vld [vmem:[#allocation181_spill] sm:$0xff] }
 0x28c   : >> { %v2905_v59 = vmul.f32 %v8815_v55, %v2889_v56  ;;  %v2824_v49 = vadd.f32 1.4214138, %v2808_v57  ;;  %v4312_v45 = vpop.eup %4311  ;;  %4315 = vpow2.f32 %v2960_v53  ;;  %v2000_v20 = vmul.f32 %v4654_v29, %v11352_v28 }
 0x28d   : >> { %v1840_v18 = vadd.f32 %v1824_v40, %v1803_v7  ;;  %v3009_v32 = vmul.f32 %v2993_v22, %v2673_v3  ;;  %v2880_v25 = vadd.f32 0.2548296, %v2864_v39  ;;  %v2369_v11 = vadd.f32 %v8786_v35, %v2332_v8  ;;  %v4659_v22 = vld [vmem:[%s5166_s27 + $0xb6] sm:$0xff] }
 0x28e   : >> { %v2985_v17 = vmul.f32 %v4312_v45, %v2905_v59  ;;  %v2840_v9 = vmul.f32 %v8846_v42, %v2824_v49  ;;  %v2625_v34 = vmul.f32 0.5, %v8668_v13  ;;  %v4314_v40 = vpop.eup %4313  ;;  %v2681_v35 = vsel %vm2665_vm1, 1.0, %v4882_v33  ;;  %v4660_v49 = vld [vmem:[#allocation7 + $0xd] ss:$0 sm:$0xff]  ;;  %v4661_v45 = vld [vmem:[%s5166_s27 + $0xce] sm:$0xff] }
 0x28f   : >> { %v1905_v24 = vadd.f32 %v1889_v63, %v1840_v18  ;;  %v3025_v60 = vadd.f32 1.0, %v3009_v32  ;;  %v2896_v55 = vmul.f32 %v8825_v6, %v2880_v25  ;;  %v2406_v12 = vadd.f32 %v8790_v43, %v2369_v11  ;;  %v4655_v43 = vld [vmem:[#allocation7 + $0x21] ss:$0 sm:$0xff] }
 0x290   : >> { %v3001_v51 = vsub.f32 1.0, %v2985_v17  ;;  %v2856_v41 = vadd.f32 -0.28449672, %v2840_v9  ;;  %vm2656_vm2 = vcmp.ge.f32.partialorder %v8727_v54, 0.0  ;;  %v2037_v0 = vmul.f32 %v4656_v52, %v4655_v43  ;;  %v11354_v17 = vld [vmem:[#allocation59_spill] sm:$0xff] }
 0x291   : >> { %v1942_v27 = vadd.f32 %v1926_v38, %v1905_v24  ;;  %v3041_v47 = vmul.f32 %v3025_v60, %v2625_v34  ;;  %v2976_v13 = vmul.f32 %v4314_v40, %v2896_v55  ;;  %v2429_v63 = vadd.f32 %v8701_v26, %v2406_v12  ;;  %v1868_v38 = vld [vmem:[%s5166_s27 + $0x145] sm:$0xff]  ;;  %v4664_v60 = vld [vmem:[#allocation7 + $0x22] ss:$0 sm:$0xff]  ;;  %v4665_v55 = vld [vmem:[%s5166_s27 + $0x116] sm:$0xff] }
 0x292   : >> { %v3017_v48 = vmul.f32 %v3001_v51, %v2681_v35  ;;  %v2872_v6 = vmul.f32 %v8846_v42, %v2856_v41  ;;  %v2633_v46 = vmul.f32 0.5, %v8682_v58  ;;  %v2672_v36 = vsel %vm2656_vm2, 1.0, %v4882_v33  ;;  %v4658_v58 = vld [vmem:[#allocation7 + $0x2f] ss:$0 sm:$0xff]  ;;  %v2155_v12 = vld [vmem:[%s5166_s27 + $0x146] sm:$0xff]  ;;  %v11355_v41 = vld [vmem:[#allocation63_spill] sm:$0xff] }
 0x293   : >> { %v1979_v5 = vadd.f32 %v1963_v10, %v1942_v27  ;;  %3889 = vst [vmem:[%s8878_s20 + $0x30] sm:$0xff] %v3041_v47  ;;  %v2992_v4 = vsub.f32 1.0, %v2976_v13  ;;  %2447 = vst [vmem:[%s6239_s19 + $0x38] sm:$0xff] %v2429_v63  ;;  %4033 = vmatmul.mubr.f32.gmra.mrb[6].mxu0 %v2429_v63  ;;  %v2074_v14 = vmul.f32 %v4657_v62, %v11353_v21  ;;  %v2624_v57 = vmul.f32 0.5, %v8696_v61  ;;  %v4666_v51 = vld [vmem:[#allocation7 + $0x29] ss:$0 sm:$0xff] }
 0x294   : >> { %v3033_v2 = vadd.f32 1.0, %v3017_v48  ;;  %v2888_v15 = vadd.f32 0.2548296, %v2872_v6  ;;  %v2111_v56 = vmul.f32 %v4658_v58, %v1868_v38  ;;  %vm2664_vm3 = vcmp.ge.f32.partialorder %v8781_v1, 0.0  ;;  %v4662_v1 = vld [vmem:[#allocation7 + $0x14] ss:$0 sm:$0xff] }
 0x295   : >> { %v2016_v31 = vadd.f32 %v2000_v20, %v1979_v5  ;;  %v3008_v16 = vmul.f32 %v2992_v4, %v2672_v36  ;;  %v2176_v39 = vmul.f32 %v4659_v22, %v11279_v44  ;;  %v2213_v18 = vmul.f32 %v4661_v45, %v4660_v49  ;;  %v4663_v20 = vld [vmem:[#allocation7 + $0x1b] ss:$0 sm:$0xff]  ;;  %v4667_v47 = vld [vmem:[#allocation7 + $0x30] ss:$0 sm:$0xff]  ;;  %v4028_v6 = vpop.f32.mrb[2].mxu0 }
 0x296   : >> { %v3049_v53 = vmul.f32 %v3033_v2, %v2633_v46  ;;  %v2904_v30 = vmul.f32 %v8846_v42, %v2888_v15  ;;  %v4316_v23 = vpop.eup %4315  ;;  %v2680_v61 = vsel %vm2664_vm3, 1.0, %v4882_v33  ;;  %v2250_v11 = vmul.f32 %v4662_v1, %v11343_v19  ;;  %v2555_v43 = vpop.f32.mrb[3].mxu0 }
 0x297   : >> { %v2053_v10 = vadd.f32 %v2037_v0, %v2016_v31  ;;  %v3024_v54 = vadd.f32 1.0, %v3008_v16  ;;  %v2632_v29 = vmul.f32 0.5, %v8768_v37  ;;  %v2287_v9 = vmul.f32 %v4663_v20, %v11354_v17 }
 0x298   : >> { %3897 = vst [vmem:[%s8878_s20 + $0xb0] sm:$0xff] %v3049_v53  ;;  %v2984_v7 = vmul.f32 %v4316_v23, %v2904_v30  ;;  %v2324_v40 = vmul.f32 %v4665_v55, %v4664_v60  ;;  %v2361_v27 = vmul.f32 %v4666_v51, %v11355_v41  ;;  %v2398_v37 = vmul.f32 %v4667_v47, %v2155_v12 }
 0x299   : >> { %v2090_v3 = vadd.f32 %v2074_v14, %v2053_v10  ;;  %v3040_v8 = vmul.f32 %v3024_v54, %v2624_v57  ;;  %v8906_v5 = vadd.f32 %v4028_v6, %v8638_v50  ;;  %v8910_v52 = vadd.f32 %v8638_v50, %v2555_v43 }
 0x29a   : >> { %v3000_v59 = vsub.f32 1.0, %v2984_v7 }
 0x29b   : >> { %v2127_v42 = vadd.f32 %v2111_v56, %v2090_v3  ;;  %3888 = vst [vmem:[%s8878_s20 + $0x28] sm:$0xff] %v3040_v8  ;;  %v2643_v0 = vmul.f32 0.70710677, %v8906_v5  ;;  %v8914_v4 = vmul.f32 0.70710677, %v8910_v52  ;;  %v2627_v43 = vmul.f32 0.5, %v8906_v5 }
 0x29c   : >> { %v3016_v32 = vmul.f32 %v3000_v59, %v2680_v61 }
 0x29d   : >> { %v2192_v25 = vadd.f32 %v2176_v39, %v2127_v42  ;;  %v2691_v38 = vand.u32 2147483647, %v2643_v0  ;;  %v2690_v46 = vand.u32 2147483647, %v8914_v4  ;;  %vm2659_vm4 = vcmp.ge.f32.partialorder %v2643_v0, 0.0 }
 0x29e   : >> { %v3032_v44 = vadd.f32 1.0, %v3016_v32  ;;  %vm2658_vm5 = vcmp.ge.f32.partialorder %v8914_v4, 0.0 }
 0x29f   : >> { %v2229_v28 = vadd.f32 %v2213_v18, %v2192_v25  ;;  %v2707_v2 = vmul.f32 0.3275911, %v2691_v38  ;;  %v2915_v31 = vsub.f32 0.0, %v2691_v38  ;;  %v2914_v62 = vsub.f32 0.0, %v2690_v46 }
 0x2a0   : >> { %v3048_v24 = vmul.f32 %v3032_v44, %v2632_v29 }
 0x2a1   : >> { %v2266_v34 = vadd.f32 %v2250_v11, %v2229_v28  ;;  %v2723_v36 = vadd.f32 1.0, %v2707_v2  ;;  %v2931_v14 = vmul.f32 %v2915_v31, %v2691_v38  ;;  %v2930_v30 = vmul.f32 %v2914_v62, %v2690_v46 }
 0x2a2   : >> { %3896 = vst [vmem:[%s8878_s20 + $0xa8] sm:$0xff] %v3048_v24  ;;  %v2626_v2 = vmul.f32 0.5, %v8910_v52 }
 0x2a3   : >> { %v2303_v35 = vadd.f32 %v2287_v9, %v2266_v34  ;;  %4317 = vrcp.f32 %v2723_v36  ;;  %v2950_v58 = vmul.f32 1.442695, %v2931_v14  ;;  %v2948_v3 = vmul.f32 1.442695, %v2930_v30 }
 0x2a5   : >> { %v2340_v19 = vadd.f32 %v2324_v40, %v2303_v35 }
 0x2a7   : >> { %v2377_v13 = vadd.f32 %v2361_v27, %v2340_v19  ;;  %v2675_v19 = vsel %vm2659_vm4, 1.0, %v4882_v33 }
 0x2a9   : >> { %v2414_v63 = vadd.f32 %v2398_v37, %v2377_v13 }
 0x2ab   : >> { %v2437_v48 = vadd.f32 %v8701_v26, %v2414_v63  ;;  %v2706_v26 = vmul.f32 0.3275911, %v2690_v46  ;;  %v2674_v63 = vsel %vm2658_vm5, 1.0, %v4882_v33 }
 0x2ad   : >> { %2455 = vst [vmem:[%s6239_s19 + $0x78] sm:$0xff] %v2437_v48  ;;  %4045 = vmatmul.mubr.f32.gmra.mrb[6].mxu1 %v2437_v48  ;;  %v2722_v15 = vadd.f32 1.0, %v2706_v26  ;;  %v4318_v21 = vpop.eup %4317  ;;  %s9028_s19 = smov (%p415_p10), 0  }
 0x2ae   : >> { %v2771_v53 = vmul.f32 1.0614054, %v4318_v21 }
 0x2af   : >> { %4319 = vrcp.f32 %v2722_v15  ;;  %v4040_v56 = vpop.f32.mrb[2].mxu1 }
 0x2b0   : >> { %v2787_v10 = vadd.f32 -1.4531521, %v2771_v53  ;;  %v8918_v7 = vadd.f32 %v4040_v56, %v8638_v50  ;;  %v2595_v22 = vpop.f32.mrb[3].mxu1  ;;  %4321 = vpow2.f32 %v2950_v58 }
 0x2b1   : >> { %v8921_v8 = vadd.f32 %v8638_v50, %v2595_v22  ;;  %4323 = vpow2.f32 %v2948_v3 }
 0x2b2   : >> { %v2803_v54 = vmul.f32 %v4318_v21, %v2787_v10  ;;  %v8924_v42 = vmul.f32 0.70710677, %v8918_v7 }
 0x2b3   : >> { %v8927_v45 = vmul.f32 0.70710677, %v8921_v8 }
 0x2b4   : >> { %v2819_v59 = vadd.f32 1.4214138, %v2803_v54  ;;  %v2699_v61 = vand.u32 2147483647, %v8924_v42  ;;  %vm2667_vm6 = vcmp.ge.f32.partialorder %v8924_v42, 0.0 }
 0x2b5   : >> { %v2698_v25 = vand.u32 2147483647, %v8927_v45  ;;  %vm2666_vm7 = vcmp.ge.f32.partialorder %v8927_v45, 0.0 }
 0x2b6   : >> { %v2835_v18 = vmul.f32 %v4318_v21, %v2819_v59  ;;  %v2715_v11 = vmul.f32 0.3275911, %v2699_v61  ;;  %v2923_v27 = vsub.f32 0.0, %v2699_v61 }
 0x2b7   : >> { %v2714_v44 = vmul.f32 0.3275911, %v2698_v25  ;;  %v2922_v37 = vsub.f32 0.0, %v2698_v25 }
 0x2b8   : >> { %v2851_v1 = vadd.f32 -0.28449672, %v2835_v18  ;;  %v2731_v20 = vadd.f32 1.0, %v2715_v11  ;;  %v2939_v38 = vmul.f32 %v2923_v27, %v2699_v61  ;;  %v2683_v11 = vsel %vm2667_vm6, 1.0, %v4882_v33 }
 0x2b9   : >> { %v4320_v16 = vpop.eup %4319  ;;  %v2730_v9 = vadd.f32 1.0, %v2714_v44  ;;  %v2938_v36 = vmul.f32 %v2922_v37, %v2698_v25 }
 0x2ba   : >> { %v2770_v23 = vmul.f32 1.0614054, %v4320_v16  ;;  %v2867_v28 = vmul.f32 %v4318_v21, %v2851_v1  ;;  %4325 = vrcp.f32 %v2731_v20  ;;  %v4322_v55 = vpop.eup %4321  ;;  %v2966_v14 = vmul.f32 1.442695, %v2939_v38 }
 0x2bb   : >> { %4327 = vrcp.f32 %v2730_v9  ;;  %v4324_v12 = vpop.eup %4323  ;;  %v2964_v30 = vmul.f32 1.442695, %v2938_v36 }
 0x2bc   : >> { %v2786_v57 = vadd.f32 -1.4531521, %v2770_v23  ;;  %v2883_v24 = vadd.f32 0.2548296, %v2867_v28  ;;  %4329 = vpow2.f32 %v2966_v14  ;;  %v2682_v28 = vsel %vm2666_vm7, 1.0, %v4882_v33 }
 0x2bd   : >> { %4331 = vpow2.f32 %v2964_v30 }
 0x2be   : >> { %v2802_v39 = vmul.f32 %v4320_v16, %v2786_v57  ;;  %v2899_v60 = vmul.f32 %v4318_v21, %v2883_v24  ;;  %v2634_v24 = vmul.f32 0.5, %v8921_v8 }
 0x2c0   : >> { %v2818_v49 = vadd.f32 1.4214138, %v2802_v39  ;;  %v2979_v35 = vmul.f32 %v4322_v55, %v2899_v60 }
 0x2c2   : >> { %v2834_v32 = vmul.f32 %v4320_v16, %v2818_v49  ;;  %v2995_v41 = vsub.f32 1.0, %v2979_v35 }
 0x2c4   : >> { %v2850_v29 = vadd.f32 -0.28449672, %v2834_v32  ;;  %v3011_v13 = vmul.f32 %v2995_v41, %v2675_v19  ;;  %v4326_v6 = vpop.eup %4325 }
 0x2c5   : >> { %v4328_v46 = vpop.eup %4327  ;;  %v2779_v4 = vmul.f32 1.0614054, %v4326_v6 }
 0x2c6   : >> { %v2866_v17 = vmul.f32 %v4320_v16, %v2850_v29  ;;  %v3027_v0 = vadd.f32 1.0, %v3011_v13  ;;  %v2778_v31 = vmul.f32 1.0614054, %v4328_v46  ;;  %v4330_v49 = vpop.eup %4329 }
 0x2c7   : >> { %v2795_v62 = vadd.f32 -1.4531521, %v2779_v4  ;;  %v4332_v61 = vpop.eup %4331 }
 0x2c8   : >> { %v2882_v34 = vadd.f32 0.2548296, %v2866_v17  ;;  %v3043_v15 = vmul.f32 %v3027_v0, %v2627_v43  ;;  %v2635_v17 = vmul.f32 0.5, %v8918_v7 }
 0x2c9   : >> { %v2811_v53 = vmul.f32 %v4326_v6, %v2795_v62 }
 0x2ca   : >> { %v2898_v40 = vmul.f32 %v4320_v16, %v2882_v34  ;;  %3891 = vst [vmem:[%s8878_s20 + $0x50] sm:$0xff] %v3043_v15  ;;  %v2794_v16 = vadd.f32 -1.4531521, %v2778_v31 }
 0x2cb   : >> { %v2827_v23 = vadd.f32 1.4214138, %v2811_v53 }
 0x2cc   : >> { %v2978_v51 = vmul.f32 %v4324_v12, %v2898_v40  ;;  %v2810_v5 = vmul.f32 %v4328_v46, %v2794_v16 }
 0x2cd   : >> { %v2843_v58 = vmul.f32 %v4326_v6, %v2827_v23 }
 0x2ce   : >> { %v2994_v47 = vsub.f32 1.0, %v2978_v51  ;;  %v2826_v10 = vadd.f32 1.4214138, %v2810_v5 }
 0x2cf   : >> { %v2859_v52 = vadd.f32 -0.28449672, %v2843_v58 }
 0x2d0   : >> { %v3010_v48 = vmul.f32 %v2994_v47, %v2674_v63  ;;  %v2842_v56 = vmul.f32 %v4328_v46, %v2826_v10 }
 0x2d1   : >> { %v2875_v54 = vmul.f32 %v4326_v6, %v2859_v52 }
 0x2d2   : >> { %v3026_v26 = vadd.f32 1.0, %v3010_v48  ;;  %v2858_v57 = vadd.f32 -0.28449672, %v2842_v56 }
 0x2d3   : >> { %v2891_v22 = vadd.f32 0.2548296, %v2875_v54 }
 0x2d4   : >> { %v3042_v21 = vmul.f32 %v3026_v26, %v2626_v2  ;;  %v2874_v3 = vmul.f32 %v4328_v46, %v2858_v57 }
 0x2d5   : >> { %v2907_v59 = vmul.f32 %v4326_v6, %v2891_v22 }
 0x2d6   : >> { %3890 = vst [vmem:[%s8878_s20 + $0x48] sm:$0xff] %v3042_v21  ;;  %v2890_v39 = vadd.f32 0.2548296, %v2874_v3 }
 0x2d7   : >> { %v2987_v32 = vmul.f32 %v4330_v49, %v2907_v59 }
 0x2d8   : >> { %v2906_v18 = vmul.f32 %v4328_v46, %v2890_v39 }
 0x2d9   : >> { %v3003_v1 = vsub.f32 1.0, %v2987_v32 }
 0x2da   : >> { %v2986_v25 = vmul.f32 %v4332_v61, %v2906_v18 }
 0x2db   : >> { %v3019_v44 = vmul.f32 %v3003_v1, %v2683_v11 }
 0x2dc   : >> { %v3002_v29 = vsub.f32 1.0, %v2986_v25 }
 0x2dd   : >> { %v3035_v9 = vadd.f32 1.0, %v3019_v44 }
 0x2de   : >> { %v3018_v20 = vmul.f32 %v3002_v29, %v2682_v28 }
 0x2df   : >> { %v3051_v34 = vmul.f32 %v3035_v9, %v2635_v17 }
 0x2e0   : >> { %v3034_v42 = vadd.f32 1.0, %v3018_v20 }
 0x2e1   : >> { %3899 = vst [vmem:[%s8878_s20 + $0xd0] sm:$0xff] %v3051_v34 }
 0x2e2   : >> { %v3050_v60 = vmul.f32 %v3034_v42, %v2634_v24 }
 0x2e4   : >> { %3898 = vst [vmem:[%s8878_s20 + $0xc8] sm:$0xff] %v3050_v60 }
 0x303   : >> { %v4031_v45 = vpop.f32.mrb[4].mxu0 }
 0x304   : >> { %v8947_v55 = vadd.f32 %v4031_v45, %v8638_v50  ;;  %v2565_v40 = vpop.f32.mrb[5].mxu0 }
 0x305   : >> { %v8950_v12 = vadd.f32 %v8638_v50, %v2565_v40 }
 0x306   : >> { %v2645_v35 = vmul.f32 0.70710677, %v8947_v55  ;;  %v2629_v60 = vmul.f32 0.5, %v8947_v55 }
 0x307   : >> { %v8954_v7 = vmul.f32 0.70710677, %v8950_v12 }
 0x308   : >> { %v2693_v51 = vand.u32 2147483647, %v2645_v35  ;;  %vm2661_vm8 = vcmp.ge.f32.partialorder %v2645_v35, 0.0 }
 0x309   : >> { %v2692_v8 = vand.u32 2147483647, %v8954_v7  ;;  %vm2660_vm9 = vcmp.ge.f32.partialorder %v8954_v7, 0.0  ;;  %v2677_v28 = vsel %vm2661_vm8, 1.0, %v4882_v33  ;;  %v2628_v7 = vmul.f32 0.5, %v8950_v12 }
 0x30a   : >> { %v2709_v41 = vmul.f32 0.3275911, %v2693_v51  ;;  %v2917_v37 = vsub.f32 0.0, %v2693_v51  ;;  %v2676_v24 = vsel %vm2660_vm9, 1.0, %v4882_v33 }
 0x30b   : >> { %v2708_v27 = vmul.f32 0.3275911, %v2692_v8  ;;  %v2916_v13 = vsub.f32 0.0, %v2692_v8 }
 0x30c   : >> { %v2725_v19 = vadd.f32 1.0, %v2709_v41  ;;  %v2933_v48 = vmul.f32 %v2917_v37, %v2693_v51 }
 0x30d   : >> { %v2724_v47 = vadd.f32 1.0, %v2708_v27  ;;  %v2932_v0 = vmul.f32 %v2916_v13, %v2692_v8 }
 0x30e   : >> { %4333 = vrcp.f32 %v2725_v19  ;;  %v2954_v4 = vmul.f32 1.442695, %v2933_v48 }
 0x30f   : >> { %4335 = vrcp.f32 %v2724_v47  ;;  %v2952_v15 = vmul.f32 1.442695, %v2932_v0 }
 0x310   : >> { %4337 = vpow2.f32 %v2954_v4 }
 0x311   : >> { %4339 = vpow2.f32 %v2952_v15 }
 0x318   : >> { %v4334_v63 = vpop.eup %4333 }
 0x319   : >> { %v4336_v6 = vpop.eup %4335  ;;  %v2773_v43 = vmul.f32 1.0614054, %v4334_v63 }
 0x31a   : >> { %v2772_v38 = vmul.f32 1.0614054, %v4336_v6  ;;  %v4338_v32 = vpop.eup %4337 }
 0x31b   : >> { %v2789_v46 = vadd.f32 -1.4531521, %v2773_v43  ;;  %v4340_v1 = vpop.eup %4339 }
 0x31c   : >> { %v2788_v2 = vadd.f32 -1.4531521, %v2772_v38 }
 0x31d   : >> { %v2805_v26 = vmul.f32 %v4334_v63, %v2789_v46 }
 0x31e   : >> { %v2804_v62 = vmul.f32 %v4336_v6, %v2788_v2 }
 0x31f   : >> { %v2821_v14 = vadd.f32 1.4214138, %v2805_v26 }
 0x320   : >> { %v4043_v36 = vpop.f32.mrb[4].mxu1  ;;  %v2820_v30 = vadd.f32 1.4214138, %v2804_v62 }
 0x321   : >> { %v8958_v31 = vadd.f32 %v4043_v36, %v8638_v50  ;;  %v2605_v21 = vpop.f32.mrb[5].mxu1  ;;  %v2837_v5 = vmul.f32 %v4334_v63, %v2821_v14 }
 0x322   : >> { %v8961_v16 = vadd.f32 %v8638_v50, %v2605_v21  ;;  %v2836_v58 = vmul.f32 %v4336_v6, %v2820_v30 }
 0x323   : >> { %v8964_v53 = vmul.f32 0.70710677, %v8958_v31  ;;  %v2853_v56 = vadd.f32 -0.28449672, %v2837_v5 }
 0x324   : >> { %v8967_v23 = vmul.f32 0.70710677, %v8961_v16  ;;  %v2852_v54 = vadd.f32 -0.28449672, %v2836_v58 }
 0x325   : >> { %v2701_v10 = vand.u32 2147483647, %v8964_v53  ;;  %v2869_v50 = vmul.f32 %v4334_v63, %v2853_v56  ;;  %vm2669_vm10 = vcmp.ge.f32.partialorder %v8964_v53, 0.0 }
 0x326   : >> { %v2700_v52 = vand.u32 2147483647, %v8967_v23  ;;  %v2868_v39 = vmul.f32 %v4336_v6, %v2852_v54  ;;  %vm2668_vm11 = vcmp.ge.f32.partialorder %v8967_v23, 0.0 }
 0x327   : >> { %v2717_v57 = vmul.f32 0.3275911, %v2701_v10  ;;  %v2885_v59 = vadd.f32 0.2548296, %v2869_v50  ;;  %v2925_v20 = vsub.f32 0.0, %v2701_v10  ;;  %v2684_v50 = vsel %vm2668_vm11, 1.0, %v4882_v33 }
 0x328   : >> { %v2716_v3 = vmul.f32 0.3275911, %v2700_v52  ;;  %v2884_v18 = vadd.f32 0.2548296, %v2868_v39  ;;  %v2924_v42 = vsub.f32 0.0, %v2700_v52 }
 0x329   : >> { %v2733_v22 = vadd.f32 1.0, %v2717_v57  ;;  %v2901_v61 = vmul.f32 %v4334_v63, %v2885_v59  ;;  %v2941_v35 = vmul.f32 %v2925_v20, %v2701_v10  ;;  %v2636_v59 = vmul.f32 0.5, %v8961_v16 }
 0x32a   : >> { %v2732_v49 = vadd.f32 1.0, %v2716_v3  ;;  %v2900_v25 = vmul.f32 %v4336_v6, %v2884_v18  ;;  %v2940_v19 = vmul.f32 %v2924_v42, %v2700_v52  ;;  %v2685_v52 = vsel %vm2669_vm10, 1.0, %v4882_v33 }
 0x32b   : >> { %4341 = vrcp.f32 %v2733_v22  ;;  %v2981_v11 = vmul.f32 %v4338_v32, %v2901_v61  ;;  %v2970_v63 = vmul.f32 1.442695, %v2941_v35  ;;  %v2637_v22 = vmul.f32 0.5, %v8958_v31  ;;  %v4668_v61 = vld [vmem:[%s9651_s4] ss:$0 sm:$0xff] }
 0x32c   : >> { %4343 = vrcp.f32 %v2732_v49  ;;  %v2980_v29 = vmul.f32 %v4340_v1, %v2900_v25  ;;  %v2968_v43 = vmul.f32 1.442695, %v2940_v19 }
 0x32d   : >> { %v2997_v44 = vsub.f32 1.0, %v2981_v11  ;;  %4345 = vpow2.f32 %v2970_v63 }
 0x32e   : >> { %v2996_v17 = vsub.f32 1.0, %v2980_v29  ;;  %4347 = vpow2.f32 %v2968_v43 }
 0x32f   : >> { %v3013_v9 = vmul.f32 %v2997_v44, %v2677_v28 }
 0x330   : >> { %v3012_v34 = vmul.f32 %v2996_v17, %v2676_v24 }
 0x331   : >> { %v3029_v45 = vadd.f32 1.0, %v3013_v9 }
 0x332   : >> { %v3028_v51 = vadd.f32 1.0, %v3012_v34 }
 0x333   : >> { %v3045_v41 = vmul.f32 %v3029_v45, %v2629_v60 }
 0x334   : >> { %v3044_v47 = vmul.f32 %v3028_v51, %v2628_v7 }
 0x335   : >> { %v4342_v40 = vpop.eup %4341  ;;  %3893 = vst [vmem:[%s8878_s20 + $0x70] sm:$0xff] %v3045_v41 }
 0x336   : >> { %v4344_v8 = vpop.eup %4343  ;;  %v2781_v27 = vmul.f32 1.0614054, %v4342_v40  ;;  %3892 = vst [vmem:[%s8878_s20 + $0x68] sm:$0xff] %v3044_v47 }
 0x337   : >> { %v2780_v37 = vmul.f32 1.0614054, %v4344_v8  ;;  %v4346_v14 = vpop.eup %4345 }
 0x338   : >> { %v2797_v13 = vadd.f32 -1.4531521, %v2781_v27  ;;  %v4348_v5 = vpop.eup %4347 }
 0x339   : >> { %v2796_v48 = vadd.f32 -1.4531521, %v2780_v37 }
 0x33a   : >> { %v2813_v6 = vmul.f32 %v4342_v40, %v2797_v13 }
 0x33b   : >> { %v2812_v55 = vmul.f32 %v4344_v8, %v2796_v48 }
 0x33c   : >> { %v2829_v0 = vadd.f32 1.4214138, %v2813_v6 }
 0x33d   : >> { %v2828_v38 = vadd.f32 1.4214138, %v2812_v55 }
 0x33e   : >> { %v2845_v46 = vmul.f32 %v4342_v40, %v2829_v0 }
 0x33f   : >> { %v2844_v12 = vmul.f32 %v4344_v8, %v2828_v38 }
 0x340   : >> { %v2861_v4 = vadd.f32 -0.28449672, %v2845_v46 }
 0x341   : >> { %v2860_v2 = vadd.f32 -0.28449672, %v2844_v12 }
 0x342   : >> { %v2877_v26 = vmul.f32 %v4342_v40, %v2861_v4 }
 0x343   : >> { %v2876_v36 = vmul.f32 %v4344_v8, %v2860_v2 }
 0x344   : >> { %v2893_v15 = vadd.f32 0.2548296, %v2877_v26 }
 0x345   : >> { %v2892_v62 = vadd.f32 0.2548296, %v2876_v36 }
 0x346   : >> { %v2909_v21 = vmul.f32 %v4342_v40, %v2893_v15 }
 0x347   : >> { %v2908_v30 = vmul.f32 %v4344_v8, %v2892_v62 }
 0x348   : >> { %v2989_v10 = vmul.f32 %v4346_v14, %v2909_v21 }
 0x349   : >> { %v2988_v58 = vmul.f32 %v4348_v5, %v2908_v30 }
 0x34a   : >> { %v3005_v56 = vsub.f32 1.0, %v2989_v10 }
 0x34b   : >> { %v3004_v57 = vsub.f32 1.0, %v2988_v58 }
 0x34c   : >> { %v3021_v54 = vmul.f32 %v3005_v56, %v2685_v52 }
 0x34d   : >> { %v3020_v3 = vmul.f32 %v3004_v57, %v2684_v50 }
 0x34e   : >> { %v3037_v39 = vadd.f32 1.0, %v3021_v54 }
 0x34f   : >> { %v3036_v53 = vadd.f32 1.0, %v3020_v3 }
 0x350   : >> { %v3053_v49 = vmul.f32 %v3037_v39, %v2637_v22 }
 0x351   : >> { %v3052_v18 = vmul.f32 %v3036_v53, %v2636_v59 }
 0x352   : >> { %3901 = vst [vmem:[%s8878_s20 + $0xf0] sm:$0xff] %v3053_v49 }
 0x353   : >> { %3900 = vst [vmem:[%s8878_s20 + $0xe8] sm:$0xff] %v3052_v18 }
 0x366   : >> { %v4034_v23 = vpop.f32.mrb[6].mxu0 }
 0x367   : >> { %v8989_v32 = vadd.f32 %v4668_v61, %v4034_v23  ;;  %v2575_v25 = vpop.f32.mrb[7].mxu0 }
 0x368   : >> { %v8991_v1 = vadd.f32 %v4668_v61, %v2575_v25 }
 0x369   : >> { %v2647_v31 = vmul.f32 0.70710677, %v8989_v32 }
 0x36a   : >> { %v8995_v11 = vmul.f32 0.70710677, %v8991_v1 }
 0x36b   : >> { %v2695_v16 = vand.u32 2147483647, %v2647_v31  ;;  %vm2663_vm12 = vcmp.ge.f32.partialorder %v2647_v31, 0.0 }
 0x36c   : >> { %v2694_v29 = vand.u32 2147483647, %v8995_v11  ;;  %vm2662_vm13 = vcmp.ge.f32.partialorder %v8995_v11, 0.0  ;;  %v2679_v22 = vsel %vm2663_vm12, 1.0, %v4882_v33 }
 0x36d   : >> { %v2711_v44 = vmul.f32 0.3275911, %v2695_v16  ;;  %v2919_v9 = vsub.f32 0.0, %v2695_v16  ;;  %v2678_v49 = vsel %vm2662_vm13, 1.0, %v4882_v33 }
 0x36e   : >> { %v2710_v28 = vmul.f32 0.3275911, %v2694_v29  ;;  %v2918_v24 = vsub.f32 0.0, %v2694_v29 }
 0x36f   : >> { %v2727_v20 = vadd.f32 1.0, %v2711_v44  ;;  %v2935_v34 = vmul.f32 %v2919_v9, %v2695_v16 }
 0x370   : >> { %v2726_v17 = vadd.f32 1.0, %v2710_v28  ;;  %v2934_v40 = vmul.f32 %v2918_v24, %v2694_v29  ;;  %v2630_v29 = vmul.f32 0.5, %v8991_v1 }
 0x371   : >> { %4349 = vrcp.f32 %v2727_v20  ;;  %v2958_v51 = vmul.f32 1.442695, %v2935_v34 }
 0x372   : >> { %4351 = vrcp.f32 %v2726_v17  ;;  %v2956_v47 = vmul.f32 1.442695, %v2934_v40 }
 0x373   : >> { %4353 = vpow2.f32 %v2958_v51 }
 0x374   : >> { %4355 = vpow2.f32 %v2956_v47 }
 0x37b   : >> { %v4350_v42 = vpop.eup %4349 }
 0x37c   : >> { %v4352_v60 = vpop.eup %4351  ;;  %v2775_v45 = vmul.f32 1.0614054, %v4350_v42 }
 0x37d   : >> { %v2774_v35 = vmul.f32 1.0614054, %v4352_v60  ;;  %v4354_v58 = vpop.eup %4353 }
 0x37e   : >> { %v2791_v7 = vadd.f32 -1.4531521, %v2775_v45  ;;  %v4356_v52 = vpop.eup %4355 }
 0x37f   : >> { %v2790_v41 = vadd.f32 -1.4531521, %v2774_v35 }
 0x380   : >> { %v4046_v8 = vpop.f32.mrb[6].mxu1  ;;  %v2807_v27 = vmul.f32 %v4350_v42, %v2791_v7 }
 0x381   : >> { %v8998_v19 = vadd.f32 %v4668_v61, %v4046_v8  ;;  %v2615_v37 = vpop.f32.mrb[7].mxu1  ;;  %v2806_v13 = vmul.f32 %v4352_v60, %v2790_v41 }
 0x382   : >> { %v9000_v63 = vadd.f32 %v4668_v61, %v2615_v37  ;;  %v2823_v48 = vadd.f32 1.4214138, %v2807_v27  ;;  %v2631_v61 = vmul.f32 0.5, %v8989_v32 }
 0x383   : >> { %v9003_v6 = vmul.f32 0.70710677, %v8998_v19  ;;  %v2822_v43 = vadd.f32 1.4214138, %v2806_v13 }
 0x384   : >> { %v9006_v55 = vmul.f32 0.70710677, %v9000_v63  ;;  %v2839_v0 = vmul.f32 %v4350_v42, %v2823_v48 }
 0x385   : >> { %v2703_v38 = vand.u32 2147483647, %v9003_v6  ;;  %v2838_v46 = vmul.f32 %v4352_v60, %v2822_v43  ;;  %vm2671_vm14 = vcmp.ge.f32.partialorder %v9003_v6, 0.0 }
 0x386   : >> { %v2702_v12 = vand.u32 2147483647, %v9006_v55  ;;  %v2855_v4 = vadd.f32 -0.28449672, %v2839_v0  ;;  %vm2670_vm15 = vcmp.ge.f32.partialorder %v9006_v55, 0.0 }
 0x387   : >> { %v2719_v2 = vmul.f32 0.3275911, %v2703_v38  ;;  %v2854_v26 = vadd.f32 -0.28449672, %v2838_v46  ;;  %v2927_v3 = vsub.f32 0.0, %v2703_v38 }
 0x388   : >> { %v2718_v36 = vmul.f32 0.3275911, %v2702_v12  ;;  %v2871_v15 = vmul.f32 %v4350_v42, %v2855_v4  ;;  %v2926_v59 = vsub.f32 0.0, %v2702_v12  ;;  %v2687_v4 = vsel %vm2671_vm14, 1.0, %v4882_v33 }
 0x389   : >> { %v2735_v62 = vadd.f32 1.0, %v2719_v2  ;;  %v2870_v21 = vmul.f32 %v4352_v60, %v2854_v26  ;;  %v2943_v31 = vmul.f32 %v2927_v3, %v2703_v38 }
 0x38a   : >> { %v2734_v14 = vadd.f32 1.0, %v2718_v36  ;;  %v2887_v30 = vadd.f32 0.2548296, %v2871_v15  ;;  %v2942_v28 = vmul.f32 %v2926_v59, %v2702_v12  ;;  %v2686_v36 = vsel %vm2670_vm15, 1.0, %v4882_v33 }
 0x38b   : >> { %4357 = vrcp.f32 %v2735_v62  ;;  %v2886_v5 = vadd.f32 0.2548296, %v2870_v21  ;;  %v2639_v62 = vmul.f32 0.5, %v8998_v19 }
 0x38c   : >> { %4359 = vrcp.f32 %v2734_v14  ;;  %v2903_v10 = vmul.f32 %v4350_v42, %v2887_v30  ;;  %v2974_v42 = vmul.f32 1.442695, %v2943_v31  ;;  %v2972_v45 = vmul.f32 1.442695, %v2942_v28 }
 0x38d   : >> { %v2902_v56 = vmul.f32 %v4352_v60, %v2886_v5  ;;  %v2638_v14 = vmul.f32 0.5, %v9000_v63 }
 0x38e   : >> { %v2983_v57 = vmul.f32 %v4354_v58, %v2903_v10  ;;  %4361 = vpow2.f32 %v2974_v42 }
 0x38f   : >> { %v2982_v54 = vmul.f32 %v4356_v52, %v2902_v56  ;;  %4363 = vpow2.f32 %v2972_v45 }
 0x390   : >> { %v2999_v50 = vsub.f32 1.0, %v2983_v57 }
 0x391   : >> { %v2998_v39 = vsub.f32 1.0, %v2982_v54 }
 0x392   : >> { %v3015_v53 = vmul.f32 %v2999_v50, %v2679_v22 }
 0x393   : >> { %v3014_v18 = vmul.f32 %v2998_v39, %v2678_v49 }
 0x394   : >> { %v3031_v25 = vadd.f32 1.0, %v3015_v53 }
 0x395   : >> { %v4358_v23 = vpop.eup %4357  ;;  %v3030_v44 = vadd.f32 1.0, %v3014_v18 }
 0x396   : >> { %v4360_v16 = vpop.eup %4359  ;;  %v2783_v11 = vmul.f32 1.0614054, %v4358_v23  ;;  %v3047_v20 = vmul.f32 %v3031_v25, %v2631_v61 }
 0x397   : >> { %v2782_v17 = vmul.f32 1.0614054, %v4360_v16  ;;  %v3046_v24 = vmul.f32 %v3030_v44, %v2630_v29 }
 0x398   : >> { %v2799_v9 = vadd.f32 -1.4531521, %v2783_v11  ;;  %3895 = vst [vmem:[%s8878_s20 + $0x90] sm:$0xff] %v3047_v20  ;;  %v4362_v48 = vpop.eup %4361 }
 0x399   : >> { %v2798_v34 = vadd.f32 -1.4531521, %v2782_v17  ;;  %3894 = vst [vmem:[%s8878_s20 + $0x88] sm:$0xff] %v3046_v24  ;;  %v4364_v0 = vpop.eup %4363 }
 0x39a   : >> { %v2815_v60 = vmul.f32 %v4358_v23, %v2799_v9 }
 0x39b   : >> { %v2814_v32 = vmul.f32 %v4360_v16, %v2798_v34 }
 0x39c   : >> { %v2831_v40 = vadd.f32 1.4214138, %v2815_v60 }
 0x39d   : >> { %v2830_v35 = vadd.f32 1.4214138, %v2814_v32 }
 0x39e   : >> { %v2847_v7 = vmul.f32 %v4358_v23, %v2831_v40 }
 0x39f   : >> { %v2846_v51 = vmul.f32 %v4360_v16, %v2830_v35 }
 0x3a0   : >> { %v2863_v1 = vadd.f32 -0.28449672, %v2847_v7 }
 0x3a1   : >> { %v2862_v8 = vadd.f32 -0.28449672, %v2846_v51 }
 0x3a2   : >> { %v2879_v41 = vmul.f32 %v4358_v23, %v2863_v1 }
 0x3a3   : >> { %v2878_v27 = vmul.f32 %v4360_v16, %v2862_v8 }
 0x3a4   : >> { %v2895_v47 = vadd.f32 0.2548296, %v2879_v41 }
 0x3a5   : >> { %v2894_v37 = vadd.f32 0.2548296, %v2878_v27 }
 0x3a6   : >> { %v2911_v13 = vmul.f32 %v4358_v23, %v2895_v47 }
 0x3a7   : >> { %v2910_v43 = vmul.f32 %v4360_v16, %v2894_v37 }
 0x3a8   : >> { %v2991_v38 = vmul.f32 %v4362_v48, %v2911_v13 }
 0x3a9   : >> { %v2990_v46 = vmul.f32 %v4364_v0, %v2910_v43 }
 0x3aa   : >> { %v3007_v12 = vsub.f32 1.0, %v2991_v38 }
 0x3ab   : >> { %v3006_v2 = vsub.f32 1.0, %v2990_v46 }
 0x3ac   : >> { %v3023_v26 = vmul.f32 %v3007_v12, %v2687_v4 }
 0x3ad   : >> { %v3022_v15 = vmul.f32 %v3006_v2, %v2686_v36  ;;  %417 = sbr.rel (!%p415_p10) target bundleno = 155 (0x9b), region = 130 }
 0x3ae   : >> { %v3039_v21 = vadd.f32 1.0, %v3023_v26 }
 0x3af   : >> { %v3038_v6 = vadd.f32 1.0, %v3022_v15 }
 0x3b0   : >> { %v3055_v30 = vmul.f32 %v3039_v21, %v2639_v62 }
 0x3b1   : >> { %v3054_v5 = vmul.f32 %v3038_v6, %v2638_v14 }
 0x3b2   : >> { %3903 = vst [vmem:[%s8878_s20 + $0x110] sm:$0xff] %v3055_v30 }
 0x3b3   : >> { %3902 = vst [vmem:[%s8878_s20 + $0x108] sm:$0xff] %v3054_v5 }
 0x3b4 LB: >> { %v3495_v33 = vld [vmem:[#allocation10] sm:$0xff]  ;;  %v3496_v19 = vld [vmem:[#allocation10 + $0x8] sm:$0xff]  ;;  %v3497_v63 = vld [vmem:[#allocation10 + $0x10] sm:$0xff]  ;;  %s3924_s10 = sshll.u32 %s4873_s19, 8  ;;  %s3925_s20 = sshll.u32 %s4873_s19, 7  ;;  %s4873_s19 = sphi %s9028_s19, %s3080_s19  }
 0x3b5   : >> { %v4135_v55 = vpack.c.bf16 %v3496_v19, %v3495_v33  ;;  %v3498_v10 = vld [vmem:[#allocation10 + $0x18] sm:$0xff]  ;;  %v3499_v58 = vld [vmem:[#allocation10 + $0x20] sm:$0xff]  ;;  %v3500_v52 = vld [vmem:[#allocation10 + $0x28] sm:$0xff]  ;;  %s9034_s24 = scalar_lea.vmem [#allocation2], %s3924_s10  ;;  %s9224_s27 = scalar_lea.vmem [#allocation3], %s3925_s20 }
 0x3b6   : >> { %v4139_v56 = vpack.c.bf16 %v3498_v10, %v3497_v63  ;;  %v3501_v57 = vld [vmem:[#allocation10 + $0x30] sm:$0xff]  ;;  %v3502_v54 = vld [vmem:[#allocation10 + $0x38] sm:$0xff]  ;;  %v3503_v50 = vld [vmem:[#allocation10 + $0x40] sm:$0xff]  ;;  %v4143_v49 = vpack.c.bf16 %v3500_v52, %v3499_v58  ;;  %s9575_s10 = scalar_lea.vmem %s5157_s11, %s3925_s20 [#allocation12]  ;;  %s3080_s19 = sadd.s32 1, %s4873_s19  }
 0x3b7   : >> { %4136 = vmatprep.subr.bf16.mxu0 %v4135_v55  ;;  %4183 = vmatprep.subr.bf16.mxu1 %v4135_v55  ;;  %v3504_v3 = vld [vmem:[#allocation10 + $0x48] sm:$0xff]  ;;  %v3505_v22 = vld [vmem:[#allocation10 + $0x50] sm:$0xff]  ;;  %v3506_v39 = vld [vmem:[#allocation10 + $0x58] sm:$0xff]  ;;  %v4147_v11 = vpack.c.bf16 %v3502_v54, %v3501_v57  ;;  %p3077_p3 = scmp.ge.s32.totalorder %s3080_s19, 2  }
 0x3b8   : >> { %4138 = vmatpush3.bf16.msra.mxu0 %v4135_v55  ;;  %4191 = vmatpush3.bf16.msra.mxu1 %v4135_v55  ;;  %v3507_v59 = vld [vmem:[#allocation10 + $0x60] sm:$0xff]  ;;  %v3508_v53 = vld [vmem:[#allocation10 + $0x68] sm:$0xff]  ;;  %v3509_v18 = vld [vmem:[#allocation10 + $0x70] sm:$0xff]  ;;  %v9057_v9 = vpack.c.bf16 %v3504_v3, %v3503_v50  ;;  %v9059_v24 = vpack.c.bf16 %v3506_v39, %v3505_v22  ;;  %s3926_s21 = sshll.u32 (%p3077_p3), %s4952_s9, 12  ;;  %s3694_s13 = sshll.u32 (%p3077_p3), %s5157_s11, 4  ;;  %s9603_s13 = int_to_ptr.vmem [resolvable:$true] %s3694_s13 }
 0x3b9   : >> { %4140 = vmatprep.subr.bf16.mxu0 %v4139_v56  ;;  %4184 = vmatprep.subr.bf16.mxu1 %v4139_v56  ;;  %v9042_v31 = vld [vmem:[%s9652_s5] ss:$0 sm:$0xff]  ;;  %v9047_v16 = vld [vmem:[%s9652_s5 + $0x3] ss:$0 sm:$0xff]  ;;  %v3510_v29 = vld [vmem:[#allocation10 + $0x78] sm:$0xff]  ;;  %v9073_v32 = vpack.c.bf16 %v3508_v53, %v3507_v59  ;;  %s9600_s17 = scalar_lea.hbm (%p3077_p3), %s9655_s8, %s3926_s21  ;;  %s3681_s15 = scalar_lea.sflag (%p3077_p3), [#allocation6], %s5136_s25 }
 0x3ba   : >> { %v3084_v23 = vld [vmem:[%s9034_s24 + $0x7] sm:$0xff]  ;;  %v9054_v20 = vld [vmem:[%s9652_s5 + $0x6] ss:$0 sm:$0xff]  ;;  %v9066_v60 = vld [vmem:[%s9652_s5 + $0x1] ss:$0 sm:$0xff]  ;;  %v9083_v8 = vpack.c.bf16 %v3510_v29, %v3509_v18  ;;  %s4783_s16 = scalar_lea.vmem (%p3077_p3), %s9603_s13, 4096 }
 0x3bb   : >> { %v3086_v61 = vld [vmem:[%s9034_s24 + $0x27] sm:$0xff]  ;;  %v3109_v44 = vmul.f32 %v9042_v31, %v3084_v23  ;;  %v9071_v45 = vld [vmem:[%s9652_s5 + $0x4] ss:$0 sm:$0xff]  ;;  %v9098_v13 = vld [vmem:[%s9652_s5 + $0x2] ss:$0 sm:$0xff]  ;;  %p4784_p7 = scmp.ne.s32.totalorder (%p3077_p3), %s9603_s13, %s4783_s16  ;;  %s4883_s19 = smov (%p3077_p3), [#allocation12]  }
 0x3bc   : >> { %v3088_v25 = vld [vmem:[%s9034_s24 + $0x47] sm:$0xff]  ;;  %v3130_v28 = vmul.f32 %v9047_v16, %v3086_v61  ;;  %4142 = vmatpush3.bf16.msra.mxu0 %v4139_v56  ;;  %4192 = vmatpush3.bf16.msra.mxu1 %v4139_v56  ;;  %v9086_v41 = vmul.f32 %v9042_v31, %v3086_v61  ;;  %v9111_v12 = vld [vmem:[%s9652_s5 + $0x5] ss:$0 sm:$0xff]  ;;  %v3085_v59 = vld [vmem:[%s9034_s24 + $0xf] sm:$0xff]  ;;  %s4787_s20 = sshll.u32 (%p3077_p3), %s4883_s19, 4  ;;  %s4788_s20 = int_to_ptr.vmem [resolvable:$false] %s4787_s20 }
 0x3bd   : >> { %v3199_v17 = vld [vmem:[%s9034_s24 + $0x8] sm:$0xff]  ;;  %v3167_v42 = vmul.f32 %v9054_v20, %v3088_v25  ;;  %4144 = vmatprep.subr.bf16.mxu0 %v4143_v49  ;;  %4185 = vmatprep.subr.bf16.mxu1 %v4143_v49  ;;  %v9080_v51 = vld [vmem:[%s9652_s5 + $0x7] ss:$0 sm:$0xff]  ;;  %v9089_v27 = vmul.f32 %v9042_v31, %v3088_v25  ;;  %v9092_v47 = vmul.f32 %v9047_v16, %v3088_v25  ;;  %p4785_p12 = pnand (%p3077_p3), %p4784_p7, %p5085_p5  ;;  %s4789_s9 = scalar_lea.vmem (%p3077_p3), %s4788_s20, 8192 }
 0x3be   : >> { %v3201_v34 = vld [vmem:[%s9034_s24 + $0x28] sm:$0xff]  ;;  %v3146_v40 = vadd.f32 %v3130_v28, %v3109_v44  ;;  %v3224_v7 = vmul.f32 %v9066_v60, %v3199_v17  ;;  %v3200_v28 = vld [vmem:[%s9034_s24 + $0x10] sm:$0xff]  ;;  %p4790_p2 = scmp.lt.s32.totalorder (%p3077_p3), %s9603_s13, %s4788_s20  ;;  %p4791_p4 = scmp.lt.s32.totalorder (%p3077_p3), %s4789_s9, %s4783_s16 }
 0x3bf   : >> { %v3203_v35 = vld [vmem:[%s9034_s24 + $0x48] sm:$0xff]  ;;  %v9101_v43 = vmul.f32 %v9066_v60, %v3201_v34  ;;  %v3261_v38 = vmul.f32 %v9071_v45, %v3201_v34  ;;  %p4786_p1 = pneg (%p3077_p3), %p4785_p12 }
 0x3c0   : >> { %v3330_v1 = vld [vmem:[%s9034_s24 + $0x9] sm:$0xff]  ;;  %v3183_v48 = vadd.f32 %v3167_v42, %v3146_v40  ;;  %v9104_v0 = vmul.f32 %v9066_v60, %v3203_v35  ;;  %4146 = vmatpush3.bf16.msra.mxu0 %v4143_v49  ;;  %4193 = vmatpush3.bf16.msra.mxu1 %v4143_v49  ;;  %v9117_v2 = vmul.f32 %v9071_v45, %v3203_v35  ;;  %v9124_v15 = vld [vmem:[%s9652_s5 + $0x8] ss:$0 sm:$0xff]  ;;  %p4792_p9 = por (%p3077_p3), %p4791_p4, %p4790_p2 }
 0x3c1   : >> { %v3332_v37 = vld [vmem:[%s9034_s24 + $0x29] sm:$0xff]  ;;  %v3298_v26 = vmul.f32 %v9080_v51, %v3203_v35  ;;  %v3355_v36 = vmul.f32 %v9098_v13, %v3330_v1  ;;  %4148 = vmatprep.subr.bf16.mxu0 %v4147_v11  ;;  %4186 = vmatprep.subr.bf16.mxu1 %v4147_v11  ;;  %v3110_v35 = vmul.f32 %v9042_v31, %v3085_v59 }
 0x3c2   : >> { %v3334_v46 = vld [vmem:[%s9034_s24 + $0x49] sm:$0xff]  ;;  %v3240_v14 = vadd.f32 %v3224_v7, %v3183_v48  ;;  %v9131_v6 = vmul.f32 %v9098_v13, %v3332_v37  ;;  %v3392_v19 = vmul.f32 %v9111_v12, %v3332_v37  ;;  %p4793_p0 = pnand (%p3077_p3), %p4792_p9, %p4786_p1 }
 0x3c3   : >> { %v9114_v4 = vld [vmem:[%s9034_s24 + $0x87] sm:$0xff]  ;;  %v9139_v33 = vmul.f32 %v9098_v13, %v3334_v46  ;;  %v9146_v58 = vmul.f32 %v9111_v12, %v3334_v46  ;;  %v3429_v56 = vmul.f32 %v9124_v15, %v3334_v46  ;;  %v9167_v53 = vld [vmem:[%s9034_s24 + $0x2f] sm:$0xff] }
 0x3c4   : >> { %v9127_v62 = vld [vmem:[%s9034_s24 + $0xa7] sm:$0xff]  ;;  %v3117_v30 = vmul.f32 %v9042_v31, %v9114_v4  ;;  %v3277_v10 = vadd.f32 %v3261_v38, %v3240_v14  ;;  %4150 = vmatpush3.bf16.msra.mxu0 %v4147_v11  ;;  %4194 = vmatpush3.bf16.msra.mxu1 %v4147_v11  ;;  %v9179_v61 = vld [vmem:[%s9034_s24 + $0x4f] sm:$0xff]  ;;  %v3131_v7 = vmul.f32 %v9047_v16, %v9167_v53 }
 0x3c5   : >> { %11356 = vst [vmem:[#allocation182_spill] sm:$0xff] %v9127_v62  ;;  %v3096_v21 = vld [vmem:[%s9034_s24 + $0xc7] sm:$0xff]  ;;  %11357 = vst [vmem:[#allocation183_spill] sm:$0xff] %v9139_v33  ;;  %v3138_v63 = vmul.f32 %v9047_v16, %v9127_v62  ;;  %4152 = vmatprep.subr.bf16.mxu0 %v9057_v9  ;;  %4187 = vmatprep.subr.bf16.mxu1 %v9057_v9  ;;  %v3168_v48 = vmul.f32 %v9054_v20, %v9179_v61  ;;  %v9208_v38 = vld [vmem:[%s9034_s24 + $0x30] sm:$0xff] }
 0x3c6   : >> { %v9136_v5 = vld [vmem:[%s9034_s24 + $0x88] sm:$0xff]  ;;  %v3175_v55 = vmul.f32 %v9054_v20, %v3096_v21  ;;  %v9150_v52 = vmul.f32 %v9042_v31, %v3096_v21  ;;  %v9158_v50 = vmul.f32 %v9047_v16, %v3096_v21  ;;  %v3314_v49 = vadd.f32 %v3298_v26, %v3277_v10 }
 0x3c7   : >> { %v9153_v57 = vld [vmem:[%s9034_s24 + $0xa8] sm:$0xff]  ;;  %v3154_v3 = vadd.f32 %v3138_v63, %v3117_v30  ;;  %v3232_v22 = vmul.f32 %v9066_v60, %v9136_v5  ;;  %v3463_v30 = vld [vmem:[%s9224_s27] sm:$0xff]  ;;  %v3262_v59 = vmul.f32 %v9071_v45, %v9208_v38 }
 0x3c8   : >> { %11358 = vst [vmem:[#allocation184_spill] sm:$0xff] %v9153_v57  ;;  %v3211_v54 = vld [vmem:[%s9034_s24 + $0xc8] sm:$0xff]  ;;  %v9173_v18 = vmul.f32 %v9066_v60, %v9153_v57  ;;  %v3269_v11 = vmul.f32 %v9071_v45, %v9153_v57  ;;  %v3371_v17 = vadd.f32 %v3355_v36, %v3314_v49  ;;  %4154 = vmatpush3.bf16.msra.mxu0 %v9057_v9  ;;  %v3331_v49 = vld [vmem:[%s9034_s24 + $0x11] sm:$0xff] }
 0x3c9   : >> { %v9163_v39 = vld [vmem:[%s9034_s24 + $0x89] sm:$0xff]  ;;  %v9176_v23 = vmul.f32 %v9066_v60, %v3211_v54  ;;  %v3191_v25 = vadd.f32 %v3175_v55, %v3154_v3  ;;  %v9184_v29 = vmul.f32 %v9071_v45, %v3211_v54  ;;  %v3306_v44 = vmul.f32 %v9080_v51, %v3211_v54  ;;  %4195 = vmatpush3.bf16.msra.mxu1 %v9057_v9 }
 0x3ca   : >> { %v9189_v42 = vld [vmem:[%s9034_s24 + $0xa9] sm:$0xff]  ;;  %v3363_v40 = vmul.f32 %v9098_v13, %v9163_v39  ;;  %4156 = vmatprep.subr.bf16.mxu0 %v9059_v24  ;;  %4188 = vmatprep.subr.bf16.mxu1 %v9059_v24  ;;  %v3408_v26 = vadd.f32 %v3392_v19, %v3371_v17  ;;  %v3147_v9 = vadd.f32 %v3131_v7, %v3110_v35  ;;  %v9249_v17 = vld [vmem:[%s9034_s24 + $0x31] sm:$0xff] }
 0x3cb   : >> { %11359 = vst [vmem:[#allocation185_spill] sm:$0xff] %v9189_v42  ;;  %v9192_v34 = vld [vmem:[%s9034_s24 + $0xc9] sm:$0xff]  ;;  %v3248_v1 = vadd.f32 %v3232_v22, %v3191_v25  ;;  %v9203_v37 = vmul.f32 %v9098_v13, %v9189_v42  ;;  %v3225_v36 = vmul.f32 %v9066_v60, %v3200_v28  ;;  %v3400_v19 = vmul.f32 %v9111_v12, %v9189_v42 }
 0x3cc   : >> { %v9211_v46 = vld [vmem:[%s9034_s24 + $0x8f] sm:$0xff]  ;;  %v9229_v55 = vmul.f32 %v9098_v13, %v9192_v34  ;;  %v3437_v10 = vmul.f32 %v9124_v15, %v9192_v34  ;;  %v3445_v3 = vadd.f32 %v3429_v56, %v3408_v26  ;;  %v3184_v22 = vadd.f32 %v3168_v48, %v3147_v9  ;;  %4158 = vmatpush3.bf16.msra.mxu0 %v9059_v24 }
 0x3cd   : >> { %v9217_v21 = vld [vmem:[%s9034_s24 + $0xaf] sm:$0xff]  ;;  %v3285_v63 = vadd.f32 %v3269_v11, %v3248_v1  ;;  %v3118_v25 = vmul.f32 %v9042_v31, %v9211_v46  ;;  %4196 = vmatpush3.bf16.msra.mxu1 %v9059_v24  ;;  %4160 = vmatprep.subr.bf16.mxu0 %v9073_v32  ;;  %v3356_v9 = vmul.f32 %v9098_v13, %v3331_v49 }
 0x3ce   : >> { %v9220_v14 = vld [vmem:[%s9034_s24 + $0xcf] sm:$0xff]  ;;  %11360 = vst [vmem:[#allocation186_spill] sm:$0xff] %v9229_v55  ;;  %v3139_v35 = vmul.f32 %v9047_v16, %v9217_v21  ;;  %4189 = vmatprep.subr.bf16.mxu1 %v9073_v32  ;;  %v3479_v24 = vadd.f32 %v3463_v30, %v3445_v3  ;;  %v9272_v55 = vld [vmem:[%s9034_s24 + $0x67] sm:$0xff] }
 0x3cf   : >> { %v9236_v54 = vld [vmem:[%s9034_s24 + $0x50] sm:$0xff]  ;;  %v3322_v28 = vadd.f32 %v3306_v44, %v3285_v63  ;;  %v3176_v7 = vmul.f32 %v9054_v20, %v9220_v14  ;;  %v3241_v44 = vadd.f32 %v3225_v36, %v3184_v22  ;;  %v3393_v36 = vmul.f32 %v9111_v12, %v9249_v17 }
 0x3d0   : >> { %v9244_v11 = vld [vmem:[%s9034_s24 + $0x90] sm:$0xff]  ;;  %v3299_v48 = vmul.f32 %v9080_v51, %v9236_v54  ;;  %v3155_v63 = vadd.f32 %v3139_v35, %v3118_v25  ;;  %4079 = vmatprep.mubr.f32.mxu0 %v3479_v24  ;;  %4162 = vmatpush3.bf16.msra.mxu0 %v9073_v32  ;;  %v9291_v35 = vld [vmem:[%s9034_s24 + $0xe7] sm:$0xff] }
 0x3d1   : >> { %11361 = vst [vmem:[#allocation187_spill] sm:$0xff] %v9244_v11  ;;  %v9252_v56 = vld [vmem:[%s9034_s24 + $0x51] sm:$0xff]  ;;  %v3379_v26 = vadd.f32 %v3363_v40, %v3322_v28  ;;  %v3233_v57 = vmul.f32 %v9066_v60, %v9244_v11  ;;  %v3278_v30 = vadd.f32 %v3262_v59, %v3241_v44  ;;  %4197 = vmatpush3.bf16.msra.mxu1 %v9073_v32  ;;  %v3471_v24 = vld [vmem:[%s9224_s27 + $0x40] sm:$0xff] }
 0x3d2   : >> { %v9259_v1 = vld [vmem:[%s9034_s24 + $0xb0] sm:$0xff]  ;;  %v3430_v40 = vmul.f32 %v9124_v15, %v9252_v56  ;;  %v3192_v25 = vadd.f32 %v3176_v7, %v3155_v63  ;;  %v3148_v59 = vadd.f32 %v9092_v47, %v9086_v41  ;;  %4164 = vmatprep.subr.bf16.mxu0 %v9083_v8  ;;  %4190 = vmatprep.subr.bf16.mxu1 %v9083_v8  ;;  %v9303_v47 = vld [vmem:[%s9034_s24 + $0x68] sm:$0xff] }
 0x3d3   : >> { %v9267_v42 = vld [vmem:[%s9034_s24 + $0xd0] sm:$0xff]  ;;  %v3270_v3 = vmul.f32 %v9071_v45, %v9259_v1  ;;  %v3416_v49 = vadd.f32 %v3400_v19, %v3379_v26  ;;  %v3315_v44 = vadd.f32 %v3299_v48, %v3278_v30  ;;  %v3169_v32 = vmul.f32 %v9054_v20, %v9272_v55 }
 0x3d4   : >> { %v9281_v22 = vld [vmem:[%s9034_s24 + $0x91] sm:$0xff]  ;;  %v3307_v11 = vmul.f32 %v9080_v51, %v9267_v42  ;;  %v3249_v7 = vadd.f32 %v3233_v57, %v3192_v25  ;;  %v3119_v26 = vmul.f32 %v9042_v31, %v9127_v62  ;;  %v3177_v33 = vmul.f32 %v9054_v20, %v9291_v35  ;;  %4166 = vmatpush3.bf16.msra.mxu0 %v9083_v8 }
 0x3d5   : >> { %11362 = vst [vmem:[#allocation188_spill] sm:$0xff] %v9281_v22  ;;  %v9286_v28 = vld [vmem:[%s9034_s24 + $0xb1] sm:$0xff]  ;;  %v3453_v19 = vadd.f32 %v3437_v10, %v3416_v49  ;;  %v3364_v41 = vmul.f32 %v9098_v13, %v9281_v22  ;;  %v3372_v63 = vadd.f32 %v3356_v9, %v3315_v44  ;;  %v3185_v30 = vadd.f32 %v3169_v32, %v3148_v59  ;;  %v9321_v44 = vld [vmem:[%s9034_s24 + $0xe8] sm:$0xff] }
 0x3d6   : >> { %v3401_v48 = vmul.f32 %v9111_v12, %v9286_v28  ;;  %v9312_v10 = vld [vmem:[%s9034_s24 + $0x6f] sm:$0xff]  ;;  %4198 = vmatpush3.bf16.msra.mxu1 %v9083_v8  ;;  %v3286_v49 = vadd.f32 %v3270_v3, %v3249_v7  ;;  %v3156_v9 = vadd.f32 %v9158_v50, %v3119_v26  ;;  %v3300_v32 = vmul.f32 %v9080_v51, %v9303_v47 }
 0x3d7   : >> { %v3487_v57 = vadd.f32 %v3471_v24, %v3453_v19  ;;  %v9317_v25 = vld [vmem:[%s9034_s24 + $0xd1] sm:$0xff]  ;;  %v3409_v22 = vadd.f32 %v3393_v36, %v3372_v63  ;;  %v3242_v59 = vadd.f32 %v9101_v43, %v3185_v30  ;;  %v3112_v62 = vmul.f32 %v9042_v31, %v9167_v53  ;;  %v3464_v8 = vld [vmem:[%s9224_s27 + $0x8] sm:$0xff] }
 0x3d8   : >> { %v3323_v24 = vadd.f32 %v3307_v11, %v3286_v49  ;;  %v9330_v3 = vld [vmem:[%s9034_s24 + $0x69] sm:$0xff]  ;;  %v3193_v19 = vadd.f32 %v3177_v33, %v3156_v9  ;;  %v3133_v50 = vmul.f32 %v9047_v16, %v9179_v61  ;;  %v3170_v43 = vmul.f32 %v9054_v20, %v9312_v10 }
 0x3d9   : >> { %4091 = vmatprep.mubr.f32.mxu1 %v3487_v57  ;;  %v3446_v36 = vadd.f32 %v3430_v40, %v3409_v22  ;;  %v3438_v7 = vmul.f32 %v9124_v15, %v9317_v25  ;;  %v3279_v53 = vadd.f32 %v9117_v2, %v3242_v59  ;;  %v3308_v11 = vmul.f32 %v9080_v51, %v9321_v44  ;;  %v9345_v57 = vld [vmem:[%s9034_s24 + $0xef] sm:$0xff] }
 0x3da   : >> { %v3380_v26 = vadd.f32 %v3364_v41, %v3323_v24  ;;  %v3250_v33 = vadd.f32 %v9173_v18, %v3193_v19  ;;  %v3149_v63 = vadd.f32 %v3133_v50, %v3112_v62  ;;  %v3227_v30 = vmul.f32 %v9066_v60, %v9208_v38  ;;  %v9352_v9 = vld [vmem:[%s9034_s24 + $0x70] sm:$0xff]  ;;  %v3472_v24 = vld [vmem:[%s9224_s27 + $0x48] sm:$0xff] }
 0x3db   : >> { %v3402_v40 = vmul.f32 %v9111_v12, %v9192_v34  ;;  %v3480_v22 = vadd.f32 %v3464_v8, %v3446_v36  ;;  %v3316_v49 = vadd.f32 %v3300_v32, %v3279_v53  ;;  %v3431_v2 = vmul.f32 %v9124_v15, %v9330_v3  ;;  %v9356_v18 = vld [vmem:[%s9034_s24 + $0xe9] sm:$0xff] }
 0x3dc   : >> { %v3417_v41 = vadd.f32 %v3401_v48, %v3380_v26  ;;  %v3287_v59 = vadd.f32 %v9184_v29, %v3250_v33  ;;  %v3186_v62 = vadd.f32 %v3170_v43, %v3149_v63  ;;  %v3264_v38 = vmul.f32 %v9071_v45, %v9236_v54  ;;  %v3465_v63 = vld [vmem:[%s9224_s27 + $0x10] sm:$0xff] }
 0x3dd   : >> { %4080 = vmatmul.mubr.f32.vlgmr.msra.gmra.mrb[0].mxu0 %v3480_v22  ;;  %v3373_v34 = vadd.f32 %v9131_v6, %v3316_v49  ;;  %v3120_v32 = vmul.f32 %v9042_v31, %v9217_v21  ;;  %v3141_v48 = vmul.f32 %v9047_v16, %v9220_v14  ;;  %v3178_v29 = vmul.f32 %v9054_v20, %v9345_v57 }
 0x3de   : >> { %v3454_v8 = vadd.f32 %v3438_v7, %v3417_v41  ;;  %v3324_v19 = vadd.f32 %v3308_v11, %v3287_v59  ;;  %v3243_v50 = vadd.f32 %v3227_v30, %v3186_v62  ;;  %v3301_v43 = vmul.f32 %v9080_v51, %v9352_v9  ;;  %v9378_v11 = vld [vmem:[%s9034_s24 + $0x71] sm:$0xff] }
 0x3df   : >> { %v3410_v36 = vadd.f32 %v9146_v58, %v3373_v34  ;;  %v3439_v6 = vmul.f32 %v9124_v15, %v9356_v18  ;;  %v3157_v53 = vadd.f32 %v3141_v48, %v3120_v32  ;;  %v3235_v26 = vmul.f32 %v9066_v60, %v9259_v1  ;;  %v9383_v58 = vld [vmem:[%s9034_s24 + $0xf0] sm:$0xff]  ;;  %v9394_v34 = vld [vmem:[%s9034_s24 + $0x107] sm:$0xff] }
 0x3e0   : >> { %v3488_v33 = vadd.f32 %v3472_v24, %v3454_v8  ;;  %v3381_v22 = vadd.f32 %v9203_v37, %v3324_v19  ;;  %v3280_v7 = vadd.f32 %v3264_v38, %v3243_v50  ;;  %v3358_v30 = vmul.f32 %v9098_v13, %v9249_v17  ;;  %v3473_v32 = vld [vmem:[%s9224_s27 + $0x50] sm:$0xff] }
 0x3e1   : >> { %v3447_v49 = vadd.f32 %v3431_v2, %v3410_v36  ;;  %v3395_v41 = vmul.f32 %v9111_v12, %v9252_v56  ;;  %v3194_v59 = vadd.f32 %v3178_v29, %v3157_v53  ;;  %v3272_v62 = vmul.f32 %v9071_v45, %v9267_v42  ;;  %v9402_v50 = vld [vmem:[%s9034_s24 + $0xf1] sm:$0xff] }
 0x3e2   : >> { %4092 = vmatmul.mubr.f32.vlgmr.msra.gmra.mrb[0].mxu1 %v3488_v33  ;;  %v3418_v37 = vadd.f32 %v3402_v40, %v3381_v22  ;;  %v3317_v24 = vadd.f32 %v3301_v43, %v3280_v7  ;;  %v3134_v38 = vmul.f32 %v9047_v16, %v9272_v55  ;;  %v3171_v17 = vmul.f32 %v9054_v20, %v9114_v4 }
 0x3e3   : >> { %v3481_v2 = vadd.f32 %v3465_v63, %v3447_v49  ;;  %v3432_v48 = vmul.f32 %v9124_v15, %v9378_v11  ;;  %v3251_v29 = vadd.f32 %v3235_v26, %v3194_v59  ;;  %v3309_v8 = vmul.f32 %v9080_v51, %v9383_v58  ;;  %v3466_v49 = vld [vmem:[%s9224_s27 + $0x18] sm:$0xff] }
 0x3e4   : >> { %v3455_v40 = vadd.f32 %v3439_v6, %v3418_v37  ;;  %v3374_v19 = vadd.f32 %v3358_v30, %v3317_v24  ;;  %v3366_v43 = vmul.f32 %v9098_v13, %v9286_v28  ;;  %v3150_v36 = vadd.f32 %v3134_v38, %v9089_v27  ;;  %v9422_v24 = vld [vmem:[%s9034_s24 + $0x108] sm:$0xff] }
 0x3e5   : >> { %4082 = vmatprep.mubr.f32.mxu0 %v3481_v2  ;;  %v3288_v53 = vadd.f32 %v3272_v62, %v3251_v29  ;;  %v3403_v33 = vmul.f32 %v9111_v12, %v9317_v25  ;;  %v3142_v26 = vmul.f32 %v9047_v16, %v9291_v35  ;;  %v3179_v6 = vmul.f32 %v9054_v20, %v9394_v34 }
 0x3e6   : >> { %v3489_v63 = vadd.f32 %v3473_v32, %v3455_v40  ;;  %v3411_v22 = vadd.f32 %v3395_v41, %v3374_v19  ;;  %v3187_v7 = vadd.f32 %v3171_v17, %v3150_v36  ;;  %v3265_v30 = vmul.f32 %v9071_v45, %v9303_v47 }
 0x3e7   : >> { %v3325_v59 = vadd.f32 %v3309_v8, %v3288_v53  ;;  %v3440_v27 = vmul.f32 %v9124_v15, %v9402_v50  ;;  %v3302_v62 = vmul.f32 %v9080_v51, %v9136_v5  ;;  %v3158_v37 = vadd.f32 %v3142_v26, %v9150_v52  ;;  %v9439_v53 = vld [vmem:[%s9034_s24 + $0x109] sm:$0xff] }
 0x3e8   : >> { %4094 = vmatprep.mubr.f32.mxu1 %v3489_v63  ;;  %v3448_v38 = vadd.f32 %v3432_v48, %v3411_v22  ;;  %v3244_v41 = vadd.f32 %v9104_v0, %v3187_v7  ;;  %v3273_v17 = vmul.f32 %v9071_v45, %v9321_v44  ;;  %v3114_v2 = vmul.f32 %v9042_v31, %v9179_v61  ;;  %v3474_v63 = vld [vmem:[%s9224_s27 + $0x58] sm:$0xff] }
 0x3e9   : >> { %v3382_v32 = vadd.f32 %v3366_v43, %v3325_v59  ;;  %v3195_v29 = vadd.f32 %v3179_v6, %v3158_v37  ;;  %v3135_v52 = vmul.f32 %v9047_v16, %v9312_v10  ;;  %v3172_v8 = vmul.f32 %v9054_v20, %v9211_v46  ;;  %v9444_v6 = vld [vmem:[%s9034_s24 + $0x10f] sm:$0xff]  ;;  %v11363_v37 = vld [vmem:[#allocation183_spill] sm:$0xff] }
 0x3ea   : >> { %v3482_v40 = vadd.f32 %v3466_v49, %v3448_v38  ;;  %v3281_v48 = vadd.f32 %v3265_v30, %v3244_v41  ;;  %v3396_v0 = vmul.f32 %v9111_v12, %v9330_v3  ;;  %v3310_v19 = vmul.f32 %v9080_v51, %v9422_v24 }
 0x3eb   : >> { %v3419_v36 = vadd.f32 %v3403_v33, %v3382_v32  ;;  %v3252_v61 = vadd.f32 %v9176_v23, %v3195_v29  ;;  %v3151_v43 = vadd.f32 %v3135_v52, %v3114_v2  ;;  %v3229_v26 = vmul.f32 %v9066_v60, %v9236_v54 }
 0x3ec   : >> { %4083 = vmatmul.mubr.f32.gmra.mrb[2].mxu0 %v3482_v40  ;;  %v3318_v22 = vadd.f32 %v3302_v62, %v3281_v48  ;;  %v3433_v7 = vmul.f32 %v9124_v15, %v9163_v39  ;;  %v3404_v30 = vmul.f32 %v9111_v12, %v9356_v18  ;;  %v3266_v23 = vmul.f32 %v9071_v45, %v9352_v9  ;;  %v9467_v48 = vld [vmem:[%s9034_s24 + $0x110] sm:$0xff] }
 0x3ed   : >> { %v3456_v33 = vadd.f32 %v3440_v27, %v3419_v36  ;;  %v3289_v49 = vadd.f32 %v3273_v17, %v3252_v61  ;;  %v3188_v59 = vadd.f32 %v3172_v8, %v3151_v43  ;;  %v3122_v54 = vmul.f32 %v9042_v31, %v9220_v14  ;;  %v11364_v17 = vld [vmem:[#allocation187_spill] sm:$0xff]  ;;  %v11365_v43 = vld [vmem:[#allocation186_spill] sm:$0xff] }
 0x3ee   : >> { %v3375_v38 = vadd.f32 %v11363_v37, %v3318_v22  ;;  %v3441_v62 = vmul.f32 %v9124_v15, %v9439_v53  ;;  %v3143_v41 = vmul.f32 %v9047_v16, %v9345_v57  ;;  %v3180_v2 = vmul.f32 %v9054_v20, %v9444_v6  ;;  %v3467_v61 = vld [vmem:[%s9224_s27 + $0x20] sm:$0xff] }
 0x3ef   : >> { %v3490_v32 = vadd.f32 %v3474_v63, %v3456_v33  ;;  %v3326_v29 = vadd.f32 %v3310_v19, %v3289_v49  ;;  %v3245_v27 = vadd.f32 %v3229_v26, %v3188_v59  ;;  %v3303_v52 = vmul.f32 %v9080_v51, %v11364_v17 }
 0x3f0   : >> { %v3412_v8 = vadd.f32 %v3396_v0, %v3375_v38  ;;  %v3360_v14 = vmul.f32 %v9098_v13, %v9252_v56  ;;  %v3159_v40 = vadd.f32 %v3143_v41, %v3122_v54  ;;  %v3237_v36 = vmul.f32 %v9066_v60, %v9267_v42  ;;  %v11366_v54 = vld [vmem:[#allocation182_spill] sm:$0xff]  ;;  %v3475_v41 = vld [vmem:[%s9224_s27 + $0x60] sm:$0xff] }
 0x3f1   : >> { %4095 = vmatmul.mubr.f32.gmra.mrb[2].mxu1 %v3490_v32  ;;  %v3383_v63 = vadd.f32 %v11365_v43, %v3326_v29  ;;  %v3282_v19 = vadd.f32 %v3266_v23, %v3245_v27  ;;  %v3397_v26 = vmul.f32 %v9111_v12, %v9378_v11  ;;  %v3274_v0 = vmul.f32 %v9071_v45, %v9383_v58 }
 0x3f2   : >> { %v3449_v22 = vadd.f32 %v3433_v7, %v3412_v8  ;;  %v3196_v56 = vadd.f32 %v3180_v2, %v3159_v40  ;;  %v3115_v33 = vmul.f32 %v9042_v31, %v9272_v55  ;;  %v3136_v42 = vmul.f32 %v9047_v16, %v9114_v4  ;;  %v11367_v4 = vld [vmem:[#allocation188_spill] sm:$0xff]  ;;  %v9494_v40 = vld [vmem:[%s9034_s24 + $0x111] sm:$0xff] }
 0x3f3   : >> { %v3420_v49 = vadd.f32 %v3404_v30, %v3383_v63  ;;  %v3319_v59 = vadd.f32 %v3303_v52, %v3282_v19  ;;  %v3311_v23 = vmul.f32 %v9080_v51, %v9467_v48  ;;  %v3173_v37 = vmul.f32 %v9054_v20, %v11366_v54  ;;  %v3102_v52 = vld [vmem:[%s9034_s24 + $0x127] sm:$0xff] }
 0x3f4   : >> { %v3483_v38 = vadd.f32 %v3467_v61, %v3449_v22  ;;  %v3253_v7 = vadd.f32 %v3237_v36, %v3196_v56  ;;  %v3152_v2 = vadd.f32 %v3136_v42, %v3115_v33  ;;  %v3230_v32 = vmul.f32 %v9066_v60, %v9303_v47  ;;  %v3468_v63 = vld [vmem:[%s9224_s27 + $0x28] sm:$0xff] }
 0x3f5   : >> { %v3457_v55 = vadd.f32 %v3441_v62, %v3420_v49  ;;  %v3376_v29 = vadd.f32 %v3360_v14, %v3319_v59  ;;  %v3434_v30 = vmul.f32 %v9124_v15, %v11367_v4  ;;  %v3368_v27 = vmul.f32 %v9098_v13, %v9317_v25  ;;  %v11368_v22 = vld [vmem:[#allocation184_spill] sm:$0xff] }
 0x3f6   : >> { %4085 = vmatprep.mubr.f32.mxu0 %v3483_v38  ;;  %v3290_v8 = vadd.f32 %v3274_v0, %v3253_v7  ;;  %v3405_v36 = vmul.f32 %v9111_v12, %v9402_v50  ;;  %v3189_v61 = vadd.f32 %v3173_v37, %v3152_v2  ;;  %v3267_v47 = vmul.f32 %v9071_v45, %v9136_v5  ;;  %v3217_v54 = vld [vmem:[%s9034_s24 + $0x128] sm:$0xff] }
 0x3f7   : >> { %v3491_v62 = vadd.f32 %v3475_v41, %v3457_v55  ;;  %v3413_v14 = vadd.f32 %v3397_v26, %v3376_v29  ;;  %v3123_v43 = vmul.f32 %v9042_v31, %v9291_v35  ;;  %v3144_v25 = vmul.f32 %v9047_v16, %v9394_v34  ;;  %v11369_v55 = vld [vmem:[#allocation185_spill] sm:$0xff] }
 0x3f8   : >> { %v3327_v19 = vadd.f32 %v3311_v23, %v3290_v8  ;;  %v3246_v0 = vadd.f32 %v3230_v32, %v3189_v61  ;;  %v3304_v56 = vmul.f32 %v9080_v51, %v11368_v22  ;;  %v3181_v33 = vmul.f32 %v9054_v20, %v3102_v52 }
 0x3f9   : >> { %4097 = vmatprep.mubr.f32.mxu1 %v3491_v62  ;;  %v3450_v42 = vadd.f32 %v3434_v30, %v3413_v14  ;;  %v3442_v5 = vmul.f32 %v9124_v15, %v9494_v40  ;;  %v3160_v26 = vadd.f32 %v3144_v25, %v3123_v43  ;;  %v3238_v35 = vmul.f32 %v9066_v60, %v9321_v44  ;;  %v3348_v43 = vld [vmem:[%s9034_s24 + $0x129] sm:$0xff] }
 0x3fa   : >> { %v3384_v49 = vadd.f32 %v3368_v27, %v3327_v19  ;;  %v3283_v34 = vadd.f32 %v3267_v47, %v3246_v0  ;;  %v3361_v59 = vmul.f32 %v9098_v13, %v9330_v3  ;;  %v3398_v23 = vmul.f32 %v9111_v12, %v9163_v39  ;;  %v3476_v39 = vld [vmem:[%s9224_s27 + $0x68] sm:$0xff] }
 0x3fb   : >> { %v3484_v37 = vadd.f32 %v3468_v63, %v3450_v42  ;;  %v3197_v38 = vadd.f32 %v3181_v33, %v3160_v26  ;;  %v3275_v41 = vmul.f32 %v9071_v45, %v9422_v24  ;;  %v3116_v7 = vmul.f32 %v9042_v31, %v9312_v10 }
 0x3fc   : >> { %v3421_v2 = vadd.f32 %v3405_v36, %v3384_v49  ;;  %v3320_v44 = vadd.f32 %v3304_v56, %v3283_v34  ;;  %v3137_v32 = vmul.f32 %v9047_v16, %v9211_v46  ;;  %v3174_v3 = vmul.f32 %v9054_v20, %v9217_v21  ;;  %v3103_v46 = vld [vmem:[%s9034_s24 + $0x12f] sm:$0xff] }
 0x3fd   : >> { %4086 = vmatmul.mubr.f32.gmra.mrb[4].mxu0 %v3484_v37  ;;  %v3435_v29 = vmul.f32 %v9124_v15, %v11369_v55  ;;  %v3254_v30 = vadd.f32 %v3238_v35, %v3197_v38  ;;  %v3312_v24 = vmul.f32 %v9080_v51, %v3217_v54  ;;  %v3231_v8 = vmul.f32 %v9066_v60, %v9352_v9  ;;  %v3469_v9 = vld [vmem:[%s9224_s27 + $0x30] sm:$0xff] }
 0x3fe   : >> { %v3458_v27 = vadd.f32 %v3442_v5, %v3421_v2  ;;  %v3377_v10 = vadd.f32 %v3361_v59, %v3320_v44  ;;  %v3153_v52 = vadd.f32 %v3137_v32, %v3116_v7  ;;  %v3369_v21 = vmul.f32 %v9098_v13, %v9356_v18  ;;  %v3477_v35 = vld [vmem:[%s9224_s27 + $0x70] sm:$0xff] }
 0x3ff   : >> { %v3291_v36 = vadd.f32 %v3275_v41, %v3254_v30  ;;  %v3268_v61 = vmul.f32 %v9071_v45, %v11364_v17  ;;  %v3124_v47 = vmul.f32 %v9042_v31, %v9345_v57  ;;  %v3145_v63 = vmul.f32 %v9047_v16, %v9444_v6  ;;  %v3349_v37 = vld [vmem:[%s9034_s24 + $0x131] sm:$0xff] }
 0x400   : >> { %v3492_v62 = vadd.f32 %v3476_v39, %v3458_v27  ;;  %v3414_v14 = vadd.f32 %v3398_v23, %v3377_v10  ;;  %v3190_v25 = vadd.f32 %v3174_v3, %v3153_v52  ;;  %v3406_v0 = vmul.f32 %v9111_v12, %v9439_v53  ;;  %v3218_v53 = vld [vmem:[%s9034_s24 + $0x130] sm:$0xff]  ;;  %v3478_v3 = vld [vmem:[%s9224_s27 + $0x78] sm:$0xff]  ;;  %v3916_v39 = vld [vmem:[%s9654_s7] ss:$0 sm:$0xff] }
 0x401   : >> { %v3328_v19 = vadd.f32 %v3312_v24, %v3291_v36  ;;  %v3305_v18 = vmul.f32 %v9080_v51, %v9259_v1  ;;  %v3182_v17 = vmul.f32 %v9054_v20, %v3103_v46  ;;  %v3161_v22 = vadd.f32 %v3145_v63, %v3124_v47 }
 0x402   : >> { %4098 = vmatmul.mubr.f32.gmra.mrb[4].mxu1 %v3492_v62  ;;  %v3451_v31 = vadd.f32 %v3435_v29, %v3414_v14  ;;  %v3247_v57 = vadd.f32 %v3231_v8, %v3190_v25  ;;  %v3239_v56 = vmul.f32 %v9066_v60, %v9383_v58  ;;  %v3443_v16 = vmul.f32 %v9124_v15, %v3348_v43 }
 0x403   : >> { %v3385_v33 = vadd.f32 %v3369_v21, %v3328_v19  ;;  %v3362_v6 = vmul.f32 %v9098_v13, %v9378_v11  ;;  %v3198_v1 = vadd.f32 %v3182_v17, %v3161_v22  ;;  %v3276_v20 = vmul.f32 %v9071_v45, %v9467_v48 }
 0x404   : >> { %v3485_v42 = vadd.f32 %v3469_v9, %v3451_v31  ;;  %v3284_v5 = vadd.f32 %v3268_v61, %v3247_v57  ;;  %v3399_v60 = vmul.f32 %v9111_v12, %v11367_v4  ;;  %v3313_v34 = vmul.f32 %v9080_v51, %v3218_v53  ;;  %v3470_v51 = vld [vmem:[%s9224_s27 + $0x38] sm:$0xff] }
 0x405   : >> { %v3422_v26 = vadd.f32 %v3406_v0, %v3385_v33  ;;  %v3255_v58 = vadd.f32 %v3239_v56, %v3198_v1  ;;  %v3436_v23 = vmul.f32 %v9124_v15, %v9286_v28  ;;  %v3370_v45 = vmul.f32 %v9098_v13, %v9402_v50 }
 0x406   : >> { %4088 = vmatprep.mubr.f32.mxu0 %v3485_v42  ;;  %v3321_v49 = vadd.f32 %v3305_v18, %v3284_v5  ;;  %v3407_v4 = vmul.f32 %v9111_v12, %v9494_v40  ;;  %v3444_v44 = vmul.f32 %v9124_v15, %v3349_v37 }
 0x407   : >> { %v3459_v11 = vadd.f32 %v3443_v16, %v3422_v26  ;;  %v3292_v54 = vadd.f32 %v3276_v20, %v3255_v58 }
 0x408   : >> { %v3378_v59 = vadd.f32 %v3362_v6, %v3321_v49 }
 0x409   : >> { %v3493_v48 = vadd.f32 %v3477_v35, %v3459_v11  ;;  %v3329_v41 = vadd.f32 %v3313_v34, %v3292_v54 }
 0x40a   : >> { %v3415_v38 = vadd.f32 %v3399_v60, %v3378_v59 }
 0x40b   : >> { %4100 = vmatprep.mubr.f32.mxu1 %v3493_v48  ;;  %v3386_v2 = vadd.f32 %v3370_v45, %v3329_v41 }
 0x40c   : >> { %v3452_v7 = vadd.f32 %v3436_v23, %v3415_v38 }
 0x40d   : >> { %v3423_v32 = vadd.f32 %v3407_v4, %v3386_v2 }
 0x40e   : >> { %v3486_v28 = vadd.f32 %v3470_v51, %v3452_v7 }
 0x40f   : >> { %v3460_v13 = vadd.f32 %v3444_v44, %v3423_v32 }
 0x410   : >> { %4089 = vmatmul.mubr.f32.gmra.mrb[6].mxu0 %v3486_v28 }
 0x411   : >> { %v3494_v50 = vadd.f32 %v3478_v3, %v3460_v13 }
 0x413   : >> { %4101 = vmatmul.mubr.f32.gmra.mrb[6].mxu1 %v3494_v50 }
 0x4b0   : >> { %v4081_v55 = vpop.f32.mrb[0].mxu0 }
 0x4b1   : >> { %v3590_v12 = vadd.f32 %v4081_v55, %v3916_v39  ;;  %v3584_v15 = vpop.f32.mrb[1].mxu0 }
 0x4b2   : >> { %v3585_v40 = vadd.f32 %v3916_v39, %v3584_v15 }
 0x4b3   : >> { %3665 = vst [vmem:[%s9575_s10 + $0x8] sm:$0xff] %v3590_v12 }
 0x4b4   : >> { %3664 = vst [vmem:[%s9575_s10] sm:$0xff] %v3585_v40 }
 0x4b5   : >> { %v4093_v29 = vpop.f32.mrb[0].mxu1 }
 0x4b6   : >> { %v3630_v30 = vadd.f32 %v4093_v29, %v3916_v39  ;;  %v3624_v24 = vpop.f32.mrb[1].mxu1 }
 0x4b7   : >> { %v3625_v27 = vadd.f32 %v3916_v39, %v3624_v24 }
 0x4b8   : >> { %3673 = vst [vmem:[%s9575_s10 + $0x48] sm:$0xff] %v3630_v30 }
 0x4b9   : >> { %3672 = vst [vmem:[%s9575_s10 + $0x40] sm:$0xff] %v3625_v27 }
 0x4bf   : >> { %v4084_v10 = vpop.f32.mrb[2].mxu0 }
 0x4c0   : >> { %v3600_v52 = vadd.f32 %v4084_v10, %v3916_v39  ;;  %v3594_v8 = vpop.f32.mrb[3].mxu0 }
 0x4c1   : >> { %v3595_v46 = vadd.f32 %v3916_v39, %v3594_v8 }
 0x4c2   : >> { %3667 = vst [vmem:[%s9575_s10 + $0x18] sm:$0xff] %v3600_v52 }
 0x4c3   : >> { %3666 = vst [vmem:[%s9575_s10 + $0x10] sm:$0xff] %v3595_v46 }
 0x4c4   : >> { %v4096_v36 = vpop.f32.mrb[2].mxu1 }
 0x4c5   : >> { %v3640_v21 = vadd.f32 %v4096_v36, %v3916_v39  ;;  %v3634_v61 = vpop.f32.mrb[3].mxu1 }
 0x4c6   : >> { %v3635_v47 = vadd.f32 %v3916_v39, %v3634_v61 }
 0x4c7   : >> { %3675 = vst [vmem:[%s9575_s10 + $0x58] sm:$0xff] %v3640_v21 }
 0x4c8   : >> { %3674 = vst [vmem:[%s9575_s10 + $0x50] sm:$0xff] %v3635_v47 }
 0x4d0   : >> { %v4087_v62 = vpop.f32.mrb[4].mxu0 }
 0x4d1   : >> { %v3610_v14 = vadd.f32 %v4087_v62, %v3916_v39  ;;  %v3604_v43 = vpop.f32.mrb[5].mxu0 }
 0x4d2   : >> { %v3605_v25 = vadd.f32 %v3916_v39, %v3604_v43 }
 0x4d3   : >> { %3669 = vst [vmem:[%s9575_s10 + $0x28] sm:$0xff] %v3610_v14 }
 0x4d4   : >> { %3668 = vst [vmem:[%s9575_s10 + $0x20] sm:$0xff] %v3605_v25 }
 0x4d5   : >> { %v4099_v63 = vpop.f32.mrb[4].mxu1 }
 0x4d6   : >> { %v3650_v9 = vadd.f32 %v4099_v63, %v3916_v39  ;;  %v3644_v19 = vpop.f32.mrb[5].mxu1 }
 0x4d7   : >> { %v3645_v0 = vadd.f32 %v3916_v39, %v3644_v19 }
 0x4d8   : >> { %3677 = vst [vmem:[%s9575_s10 + $0x68] sm:$0xff] %v3650_v9 }
 0x4d9   : >> { %3676 = vst [vmem:[%s9575_s10 + $0x60] sm:$0xff] %v3645_v0 }
 0x4e3   : >> { %v4090_v18 = vpop.f32.mrb[6].mxu0 }
 0x4e4   : >> { %v3620_v17 = vadd.f32 %v4090_v18, %v3916_v39  ;;  %v3614_v31 = vpop.f32.mrb[7].mxu0  ;;  %3079 = sbr.rel (!%p3077_p3) target bundleno = 948 (0x3b4), region = 141 }
 0x4e5   : >> { %v3615_v57 = vadd.f32 %v3916_v39, %v3614_v31 }
 0x4e6   : >> { %3671 = vst [vmem:[%s9575_s10 + $0x38] sm:$0xff] %v3620_v17  ;;  %v4102_v22 = vpop.f32.mrb[6].mxu1 }
 0x4e7   : >> { %3670 = vst [vmem:[%s9575_s10 + $0x30] sm:$0xff] %v3615_v57  ;;  %v3660_v56 = vadd.f32 %v4102_v22, %v3916_v39  ;;  %v3654_v33 = vpop.f32.mrb[7].mxu1 }
 0x4e8   : >> { %v3655_v16 = vadd.f32 %v3916_v39, %v3654_v33 }
 0x4e9   : >> { %3679 = vst [vmem:[%s9575_s10 + $0x78] sm:$0xff] %v3660_v56 }
 0x4ea   : >> { %3678 = vst [vmem:[%s9575_s10 + $0x70] sm:$0xff] %v3655_v16 }
 0x4eb   : > { %4796 = shalt.err (!%p4793_p0)
}
 0x4ec   : > { %s4797_s11 = scalar_lea.hbm %s9600_s17, 4096  ;;  %s4801_s18 = scalar_lea.hbm %s9655_s8, 8192 }
 0x4ed   : > { %p4798_p11 = scmp.ne.s32.totalorder %s9600_s17, %s4797_s11  ;;  %p4802_p6 = scmp.lt.u32.totalorder %s9600_s17, %s9655_s8 }
 0x4ee   : > { %p4803_p10 = scmp.lt.u32.totalorder %s4801_s18, %s4797_s11  ;;  %p4805_p7 = scmp.lt.u32.totalorder %s4797_s11, %s9600_s17 }
 0x4ef   : > { %p4799_p8 = pnand %p4798_p11, %p5085_p5 }
 0x4f0   : > { %p4804_p3 = por %p4803_p10, %p4802_p6 }
 0x4f1   : > { %p4800_p13 = pneg %p4799_p8 }
 0x4f2   : > { %p4806_p12 = por %p4805_p7, %p4804_p3 }
 0x4f4   : > { %p4807_p1 = pnand %p4806_p12, %p4800_p13 }
 0x4f6   : > { %4810 = shalt.err (!%p4807_p1)
}
 0x4f7   : > { %s4884_s12 = smov 128   ;;  %s4885_s14 = smov 8  }
 0x4f8   : > { %4216 = dma.vmem_to_hbm [thread:$0]  (%p5085_p5), %s9603_s13, 4096, %s9600_s17, %s3681_s15, %s4884_s12, %s4884_s12, %s4885_s14  }
 0x4f9 PF: > { %s11370_s16 = sld [smem:[#allocation17_spill]]  ;;  %s11371_s19 = sld [smem:[#allocation18_spill]] }
 0x4fa   : > { %p11373_p4 = scmp.ge.s32.totalorder %s4865_s30, 2 }
 0x4ff   : > { %s3709_s20 = sand.u32 1, %s11370_s16   ;;  %p11372_p2 = scmp.ne.s32.totalorder %s11371_s19, 0 }
 0x500   : > { %s3710_s9 = scalar_lea.sflag [#allocation6], %s3709_s20 }
 0x501   : > { %p4233_p9 = pnand %p11373_p4, %p11372_p2 }
 0x503   : > { %4848 = dma.done.wait (!%p4233_p9), %s3710_s9, 4096  }
 0x504   : > { %4850 = vsyncadd (!%p4233_p9), %s3710_s9, 4294963200  ;;  %p23_p0 = scmp.ge.s32.totalorder %s5071_s26, 4   ;;  %s11374_s27 = smov %s4857_s28 }
 0x505   : > { %s11375_s28 = smov %s4861_s29  ;;  %s11376_s29 = smov %s5081_s22 }
 0x506   : > { %s11377_s30 = smov %s5071_s26  ;;  %25 = sbr.rel (!%p23_p0) target bundleno = 7 (0x7), region = 152 }
 0x50d   :  { %3715 = vsyncpa [#allocation5], 1 }
 0x50e   :  { %3717 = vsyncpa [#allocation5 + $0x1], 1 }
 0x50f   :  { %3718 = vsyncpa [#allocation8], 1 }
 0x510   :  { %3719 = vsyncpa [#allocation11], 1 }
 0x511   :  { %3720 = vsyncpa [#allocation6], 1 }
 0x512   :  { %3722 = vsyncpa [#allocation6 + $0x1], 1 }

</bundles_post_ra>
